<compile_context>
chip_gen: v6e
topology: v6e:2x2x1
jax: 0.10.0
libtpu: 0.0.40
codegen_flags: <defaults>
</compile_context>

<pallas_src>
import jax
import jax.numpy as jnp
from jax.experimental import pallas as pl
from jax.experimental.pallas import tpu as pltpu

_LANE = 128
_MIB = 1024 * 1024


# ---------------------------------------------------------------------------
# helpers
# ---------------------------------------------------------------------------
def _round_up(x, m):
    return ((x + m - 1) // m) * m


def _vmem_limit_bytes():
    """Per-chip scoped-VMEM budget: physical capacity minus headroom for compiler scratch."""
    try:
        cap = int(pltpu.get_tpu_info().vmem_capacity_bytes)  # 128 MiB v5e/v6e, 64 MiB v7x
    except Exception:
        cap = 64 * _MIB  # conservative fallback
    return max(32 * _MIB, min(cap - 12 * _MIB, 100 * _MIB))


def _pick_tile_m(n_p, agg_bytes, vmem_limit):
    # A row-block is (tile_m, Np) and BlockSpec double-buffers it; give it ~1/3 of VMEM.
    budget = vmem_limit // 3
    for tm in (1024, 512, 256, 128):
        if n_p % tm == 0 and 2 * tm * n_p * agg_bytes <= budget:
            return tm
    return 128  # n_p is always a multiple of 128


# ---------------------------------------------------------------------------
# Monolithic (fully VMEM-resident) fused kernel: both layers, one pass over A.
# ---------------------------------------------------------------------------
def _make_fused_kernel(project_first_1, project_first_2, agg_dtype):
    """Whole-graph fused kernel. Per layer the dense weight is applied on the side that
    narrows the O(N^2 * width) aggregation matmul. Aggregation dots run in `agg_dtype`
    on the MXU with f32 accumulation; all VPU work stays f32."""

    def kernel(adj_ref, d_ref, x_ref, w1_ref, b1_ref, w2_ref, b2_ref, out_ref):
        adj = adj_ref[...]            # (Np, Np) agg_dtype
        d = d_ref[...]                # (Np, 1) f32

        # ---- layer 1: h = relu(A_norm @ X @ W1^T + b1) ----
        if project_first_1:
            p1 = d * jnp.dot(x_ref[...], w1_ref[...], preferred_element_type=jnp.float32)
            agg1 = jnp.dot(adj, p1.astype(agg_dtype), preferred_element_type=jnp.float32)
            h = jnp.maximum(d * agg1 + b1_ref[...], 0.0)
        else:
            p1 = (d * x_ref[...]).astype(agg_dtype)
            agg1 = jnp.dot(adj, p1, preferred_element_type=jnp.float32)
            h = jnp.maximum(
                jnp.dot(d * agg1, w1_ref[...], preferred_element_type=jnp.float32)
                + b1_ref[...], 0.0)

        # ---- layer 2: out = relu(A_norm @ h @ W2^T + b2) ----
        if project_first_2:
            p2 = d * jnp.dot(h, w2_ref[...], preferred_element_type=jnp.float32)
            agg2 = jnp.dot(adj, p2.astype(agg_dtype), preferred_element_type=jnp.float32)
            out = d * agg2 + b2_ref[...]
        else:
            p2 = (d * h).astype(agg_dtype)
            agg2 = jnp.dot(adj, p2, preferred_element_type=jnp.float32)
            out = jnp.dot(d * agg2, w2_ref[...], preferred_element_type=jnp.float32) + b2_ref[...]

        out_ref[...] = jnp.maximum(out, 0.0).astype(out_ref.dtype)

    return kernel


# ---------------------------------------------------------------------------
# Tiled / streamed kernels (A streamed in row blocks, small operands resident).
# ---------------------------------------------------------------------------
def _proj_kernel(x_ref, w_ref, d_ref, p_ref):
    # P_block = d_block * (X_block @ W)
    p = jnp.dot(x_ref[...], w_ref[...], preferred_element_type=jnp.float32)
    p_ref[...] = (d_ref[...] * p).astype(p_ref.dtype)


def _agg_scale_kernel(a_ref, p_ref, d_ref, b_ref, out_ref):
    # out_block = relu(d_block * (A_block @ P) + b)      (weight already folded into P)
    agg = jnp.dot(a_ref[...], p_ref[...], preferred_element_type=jnp.float32)
    out_ref[...] = jnp.maximum(d_ref[...] * agg + b_ref[...], 0.0).astype(out_ref.dtype)


def _agg_weight_kernel(a_ref, p_ref, d_ref, w_ref, b_ref, out_ref):
    # out_block = relu((d_block * (A_block @ P)) @ W + b)  (weight applied after aggregation)
    agg = jnp.dot(a_ref[...], p_ref[...], preferred_element_type=jnp.float32)
    h = jnp.dot(d_ref[...] * agg, w_ref[...], preferred_element_type=jnp.float32)
    out_ref[...] = jnp.maximum(h + b_ref[...], 0.0).astype(out_ref.dtype)


def _tiled_project(x, w, d, tile_m, out_dtype, vmem_limit):
    n_p, in_w = x.shape
    out_w = w.shape[1]
    return pl.pallas_call(
        _proj_kernel,
        out_shape=jax.ShapeDtypeStruct((n_p, out_w), out_dtype),
        grid=(n_p // tile_m,),
        in_specs=[pl.BlockSpec((tile_m, in_w), lambda i: (i, 0)),
                  pl.BlockSpec((in_w, out_w), lambda i: (0, 0)),
                  pl.BlockSpec((tile_m, 1), lambda i: (i, 0))],
        out_specs=pl.BlockSpec((tile_m, out_w), lambda i: (i, 0)),
        compiler_params=pltpu.CompilerParams(
            dimension_semantics=("parallel",), vmem_limit_bytes=vmem_limit),
    )(x, w, d)


def _tiled_aggregate(adj, p, d, b, tile_m, vmem_limit, w=None):
    """One streamed aggregation pass: out = relu(d * (A @ P) [@ W] + b).
    A is streamed in (tile_m, Np) row blocks (auto double-buffered) while P / W / bias
    stay VMEM-resident; the row-block grid axis is 'parallel' (v7x megacore)."""
    n_p = adj.shape[0]
    p_w = p.shape[1]
    out_w = p_w if w is None else w.shape[1]
    params = pltpu.CompilerParams(dimension_semantics=("parallel",),
                                  vmem_limit_bytes=vmem_limit)
    a_spec = pl.BlockSpec((tile_m, n_p), lambda i: (i, 0))
    p_spec = pl.BlockSpec((n_p, p_w), lambda i: (0, 0))
    d_spec = pl.BlockSpec((tile_m, 1), lambda i: (i, 0))
    b_spec = pl.BlockSpec((1, out_w), lambda i: (0, 0))
    o_spec = pl.BlockSpec((tile_m, out_w), lambda i: (i, 0))
    out_shape = jax.ShapeDtypeStruct((n_p, out_w), jnp.float32)
    if w is None:
        return pl.pallas_call(_agg_scale_kernel, out_shape=out_shape, grid=(n_p // tile_m,),
                              in_specs=[a_spec, p_spec, d_spec, b_spec],
                              out_specs=o_spec, compiler_params=params)(adj, p, d, b)
    w_spec = pl.BlockSpec(w.shape, lambda i: (0, 0))
    return pl.pallas_call(_agg_weight_kernel, out_shape=out_shape, grid=(n_p // tile_m,),
                          in_specs=[a_spec, p_spec, d_spec, w_spec, b_spec],
                          out_specs=o_spec, compiler_params=params)(adj, p, d, w, b)


# ---------------------------------------------------------------------------
# Wrappers
# ---------------------------------------------------------------------------
def prepare_graph(adjacency_matrix, agg_dtype=jnp.bfloat16):
    """Pad A to a lane-dense (Np, Np), compute d = 1/(sqrt(deg)+1e-10) once (f32, exact
    degrees), and cast A to the aggregation dtype.  For a graph that is static across
    calls, run this once and reuse (adj_p, d, n) — otherwise the O(N^2) pad/degree pass
    is repaid on every forward call."""
    n = adjacency_matrix.shape[0]
    n_p = _round_up(n, _LANE)
    adj_f32 = jnp.zeros((n_p, n_p), jnp.float32).at[:n, :n].set(
        adjacency_matrix.astype(jnp.float32))
    deg = jnp.sum(adj_f32, axis=1, keepdims=True)
    d = 1.0 / (jnp.sqrt(deg) + 1e-10)     # matches torch.inverse(sqrt(D) + I*1e-10)
    return adj_f32.astype(agg_dtype), d, n


def gcn_forward_prepared(adj_p, d, n, feature_matrix, w1, b1, w2, b2, *,
                         agg_dtype=jnp.bfloat16, force_path=None, tile_m=None):
    f32 = jnp.float32
    n_p = adj_p.shape[0]
    f = feature_matrix.shape[1]
    hidden = w1.shape[0]
    classes = w2.shape[0]
    f_p, h_p, c_p = (_round_up(v, _LANE) for v in (f, hidden, classes))

    # Lane-dense zero padding (exact: padded rows/cols of A are zero, padded weight /
    # bias lanes are zero, padded output lanes/rows are sliced off).
    x_p = jnp.zeros((n_p, f_p), f32).at[:n, :f].set(feature_matrix.astype(f32))
    w1_t = jnp.zeros((f_p, h_p), f32).at[:f, :hidden].set(jnp.transpose(w1).astype(f32))
    b1_p = jnp.zeros((1, h_p), f32).at[:, :hidden].set(b1.astype(f32).reshape(1, -1))
    w2_t = jnp.zeros((h_p, c_p), f32).at[:hidden, :classes].set(jnp.transpose(w2).astype(f32))
    b2_p = jnp.zeros((1, c_p), f32).at[:, :classes].set(b2.astype(f32).reshape(1, -1))

    # Per layer, apply the dense weight on the side that narrows the O(N^2*width) matmul.
    project_first_1 = h_p <= f_p
    project_first_2 = c_p <= h_p

    vmem_limit = _vmem_limit_bytes()
    agg_bytes = jnp.dtype(agg_dtype).itemsize

    # Rough VMEM footprint of the grid-free fused kernel (A + operands + f32 intermediates).
    fused_bytes = (n_p * n_p * agg_bytes
                   + n_p * (f_p + 2 * max(f_p, h_p) + 2 * h_p + 2 * c_p) * 4
                   + (f_p * h_p + h_p * c_p) * 4)
    path = force_path or ("monolithic" if fused_bytes < 0.6 * vmem_limit else "tiled")

    if path == "monolithic":
        kernel = _make_fused_kernel(project_first_1, project_first_2, agg_dtype)
        vmem = pl.BlockSpec(memory_space=pltpu.MemorySpace.VMEM)
        out_p = pl.pallas_call(
            kernel,
            out_shape=jax.ShapeDtypeStruct((n_p, c_p), f32),
            in_specs=[vmem] * 7,
            out_specs=vmem,
            compiler_params=pltpu.CompilerParams(vmem_limit_bytes=vmem_limit),
        )(adj_p, d, x_p, w1_t, b1_p, w2_t, b2_p)
        return out_p[:n, :classes]

    # -------- tiled / streamed path --------
    if tile_m is None:
        tile_m = _pick_tile_m(n_p, agg_bytes, vmem_limit)
    assert n_p % tile_m == 0, "tile_m must divide the padded node count"

    # layer 1
    if project_first_1:
        p1 = _tiled_project(x_p, w1_t, d, tile_m, agg_dtype, vmem_limit)   # d*(X@W1^T)
        h = _tiled_aggregate(adj_p, p1, d, b1_p, tile_m, vmem_limit)
    else:
        p1 = (d * x_p).astype(agg_dtype)       # trivial elementwise glue (fuses with padding)
        h = _tiled_aggregate(adj_p, p1, d, b1_p, tile_m, vmem_limit, w=w1_t)

    # layer 2
    if project_first_2:
        p2 = _tiled_project(h, w2_t, d, tile_m, agg_dtype, vmem_limit)     # d*(h@W2^T)
        out_p = _tiled_aggregate(adj_p, p2, d, b2_p, tile_m, vmem_limit)
    else:
        p2 = (d * h).astype(agg_dtype)
        out_p = _tiled_aggregate(adj_p, p2, d, b2_p, tile_m, vmem_limit, w=w2_t)

    return out_p[:n, :classes]


def gcn_forward(adjacency_matrix, feature_matrix, w1, b1, w2, b2, *,
                agg_dtype=jnp.bfloat16, force_path=None, tile_m=None):
    """PyTorch-parity GCN forward: relu(A_norm @ relu(A_norm @ X @ W1^T + b1) @ W2^T + b2).
    For repeated calls on a static graph, call prepare_graph() once and use
    gcn_forward_prepared() to amortize the O(N^2) pad/degree/cast pass."""
    adj_p, d, n = prepare_graph(adjacency_matrix, agg_dtype)
    return gcn_forward_prepared(adj_p, d, n, feature_matrix, w1, b1, w2, b2,
                                agg_dtype=agg_dtype, force_path=force_path, tile_m=tile_m)


# ---------------------------------------------------------------------------
# Reference + self-test
# ---------------------------------------------------------------------------
def gcn_reference(adj, x, w1, b1, w2, b2):
    deg = jnp.sum(adj, axis=1)
    d = 1.0 / (jnp.sqrt(deg) + 1e-10)
    a_norm = d[:, None] * adj * d[None, :]
    h = jax.nn.relu(a_norm @ x @ w1.T + b1)
    return jax.nn.relu(a_norm @ h @ w2.T + b2)


def _make_problem(key, n, f, hidden, classes, thresh=1.6):
    k_adj, k_x, k_w1, k_b1, k_w2, k_b2 = jax.random.split(key, 6)
    a = jax.random.uniform(k_adj, (n, n), dtype=jnp.float32)
    adj = ((a + a.T) > thresh).astype(jnp.float32) + jnp.eye(n, dtype=jnp.float32)
    x = jax.random.normal(k_x, (n, f), dtype=jnp.float32)
    bound1 = 1.0 / (f ** 0.5)
    w1 = jax.random.uniform(k_w1, (hidden, f), jnp.float32, -bound1, bound1)
    b1 = jax.random.uniform(k_b1, (hidden,), jnp.float32, -bound1, bound1)
    bound2 = 1.0 / (hidden ** 0.5)
    w2 = jax.random.uniform(k_w2, (classes, hidden), jnp.float32, -bound2, bound2)
    b2 = jax.random.uniform(k_b2, (classes,), jnp.float32, -bound2, bound2)
    return adj, x, w1, b1, w2, b2


if __name__ == "__main__":
    # High-precision f32 matmuls everywhere (reference and in-kernel f32 dots) so the f32
    # checks are tight; the bf16-aggregation path is checked at a documented looser bound.
    jax.config.update("jax_default_matmul_precision", "float32")

    key = jax.random.PRNGKey(0)

    # (n, f, hidden, classes, path, agg_dtype, tol) — covers both per-layer re-association
    # branches on the monolithic and the tiled/streamed paths.
    cases = [
        (8,   16, 200, 8, "monolithic", jnp.float32,  2e-3),
        (8,   16, 200, 8, "monolithic", jnp.bfloat16, 1e-1),
        (200, 96, 32,  8, "monolithic", jnp.bfloat16, 1e-1),
        (200, 16, 200, 8, "tiled",      jnp.float32,  2e-3),
        (200, 16, 200, 8, "tiled",      jnp.bfloat16, 1e-1),
    ]

    for n, f, hidden, classes, path, agg_dtype, tol in cases:
        adj, x, w1, b1, w2, b2 = _make_problem(key, n, f, hidden, classes)
        out = gcn_forward(adj, x, w1, b1, w2, b2,
                          agg_dtype=agg_dtype, force_path=path, tile_m=128)
        out = jax.block_until_ready(out)
        ref = gcn_reference(adj, x, w1, b1, w2, b2)
        assert out.shape == (n, classes)
        scale = max(float(jnp.max(jnp.abs(ref))), 1e-3)
        err = float(jnp.max(jnp.abs(out - ref)))
        assert err <= tol * scale, (
            f"mismatch n={n} f={f} h={hidden} path={path} dtype={agg_dtype}: "
            f"max_err={err:.3e} scale={scale:.3e}")

    print("KERNEL_OK")
</pallas_src>

<mosaic_0001>
module attributes {stable_mosaic.version = 11 : i64} {
  func.func @kernel(%arg0: memref<128x128xf32, #tpu.memory_space<vmem>>, %arg1: memref<128x1xf32, #tpu.memory_space<vmem>>, %arg2: memref<128x128xf32, #tpu.memory_space<vmem>>, %arg3: memref<128x256xf32, #tpu.memory_space<vmem>>, %arg4: memref<1x256xf32, #tpu.memory_space<vmem>>, %arg5: memref<256x128xf32, #tpu.memory_space<vmem>>, %arg6: memref<1x128xf32, #tpu.memory_space<vmem>>, %arg7: memref<128x128xf32, #tpu.memory_space<vmem>>) attributes {dimension_semantics = [], scalar_prefetch = 0 : i64, scratch_operands = 0 : i64, tpu.core_type = #tpu.core_type<tc>} {
    %c0 = arith.constant 0 : index
    %c0_0 = arith.constant 0 : index
    %0 = vector.load %arg0[%c0, %c0_0] : memref<128x128xf32, #tpu.memory_space<vmem>>, vector<128x128xf32>
    %c0_1 = arith.constant 0 : index
    %c0_2 = arith.constant 0 : index
    %1 = vector.load %arg1[%c0_1, %c0_2] : memref<128x1xf32, #tpu.memory_space<vmem>>, vector<128x1xf32>
    %c0_3 = arith.constant 0 : index
    %c0_4 = arith.constant 0 : index
    %2 = vector.load %arg2[%c0_3, %c0_4] : memref<128x128xf32, #tpu.memory_space<vmem>>, vector<128x128xf32>
    %3 = vector.broadcast %1 : vector<128x1xf32> to vector<128x128xf32>
    %4 = arith.mulf %3, %2 : vector<128x128xf32>
    %cst = arith.constant dense<0.000000e+00> : vector<128x128xf32>
    %5 = tpu.matmul %0, %4, %cst {dimension_numbers = #tpu.dot_dimension_numbers<[1], [0], [0], [1], [0, 0, 1, 1], [], []>, precision = #tpu.contract_precision<fp32>} : vector<128x128xf32>, vector<128x128xf32>, vector<128x128xf32> -> vector<128x128xf32>
    %6 = vector.broadcast %1 : vector<128x1xf32> to vector<128x128xf32>
    %7 = arith.mulf %6, %5 : vector<128x128xf32>
    %c0_5 = arith.constant 0 : index
    %c0_6 = arith.constant 0 : index
    %8 = vector.load %arg3[%c0_5, %c0_6] : memref<128x256xf32, #tpu.memory_space<vmem>>, vector<128x256xf32>
    %cst_7 = arith.constant dense<0.000000e+00> : vector<128x256xf32>
    %9 = tpu.matmul %7, %8, %cst_7 {dimension_numbers = #tpu.dot_dimension_numbers<[1], [0], [0], [1], [0, 0, 1, 1], [], []>, precision = #tpu.contract_precision<fp32>} : vector<128x128xf32>, vector<128x256xf32>, vector<128x256xf32> -> vector<128x256xf32>
    %c0_8 = arith.constant 0 : index
    %c0_9 = arith.constant 0 : index
    %10 = vector.load %arg4[%c0_8, %c0_9] : memref<1x256xf32, #tpu.memory_space<vmem>>, vector<1x256xf32>
    %11 = vector.broadcast %10 : vector<1x256xf32> to vector<128x256xf32>
    %12 = arith.addf %9, %11 : vector<128x256xf32>
    %cst_10 = arith.constant 0.000000e+00 : f32
    %13 = vector.broadcast %cst_10 : f32 to vector<128x256xf32>
    %14 = arith.maximumf %12, %13 : vector<128x256xf32>
    %c0_11 = arith.constant 0 : index
    %c0_12 = arith.constant 0 : index
    %15 = vector.load %arg5[%c0_11, %c0_12] : memref<256x128xf32, #tpu.memory_space<vmem>>, vector<256x128xf32>
    %cst_13 = arith.constant dense<0.000000e+00> : vector<128x128xf32>
    %16 = tpu.matmul %14, %15, %cst_13 {dimension_numbers = #tpu.dot_dimension_numbers<[1], [0], [0], [1], [0, 0, 1, 1], [], []>, precision = #tpu.contract_precision<fp32>} : vector<128x256xf32>, vector<256x128xf32>, vector<128x128xf32> -> vector<128x128xf32>
    %17 = vector.broadcast %1 : vector<128x1xf32> to vector<128x128xf32>
    %18 = arith.mulf %17, %16 : vector<128x128xf32>
    %cst_14 = arith.constant dense<0.000000e+00> : vector<128x128xf32>
    %19 = tpu.matmul %0, %18, %cst_14 {dimension_numbers = #tpu.dot_dimension_numbers<[1], [0], [0], [1], [0, 0, 1, 1], [], []>, precision = #tpu.contract_precision<fp32>} : vector<128x128xf32>, vector<128x128xf32>, vector<128x128xf32> -> vector<128x128xf32>
    %20 = vector.broadcast %1 : vector<128x1xf32> to vector<128x128xf32>
    %21 = arith.mulf %20, %19 : vector<128x128xf32>
    %c0_15 = arith.constant 0 : index
    %c0_16 = arith.constant 0 : index
    %22 = vector.load %arg6[%c0_15, %c0_16] : memref<1x128xf32, #tpu.memory_space<vmem>>, vector<1x128xf32>
    %23 = vector.broadcast %22 : vector<1x128xf32> to vector<128x128xf32>
    %24 = arith.addf %21, %23 : vector<128x128xf32>
    %cst_17 = arith.constant 0.000000e+00 : f32
    %25 = vector.broadcast %cst_17 : f32 to vector<128x128xf32>
    %26 = arith.maximumf %24, %25 : vector<128x128xf32>
    %c0_18 = arith.constant 0 : index
    %c0_19 = arith.constant 0 : index
    %27 = vector.load %arg7[%c0_18, %c0_19] : memref<128x128xf32, #tpu.memory_space<vmem>>, vector<128x128xf32>
    tpu.vector_store %arg7[%c0_18, %c0_19], %26 {strides = array<i32>} : memref<128x128xf32, #tpu.memory_space<vmem>>, vector<128x128xf32>,
    return
  }
}

</mosaic_0001>

<bundles_post_ra>
// kernel: tpu_custom_call.1
= control target key start
LH: loop header
LB: loop body
LE: loop exit
PB: predicated region body
PF: predicated region fallthrough
CT: control target
= control target key end

     0   :  { %12 = vsyncpa [#allocation3], 0  ;;  %s11896_s0 = inlined_call_operand.vmem [shape: f32[128,128], index: 0, kind: input, shape index: {}]   ;;  %s11897_s1 = inlined_call_operand.vmem [shape: f32[128,1], index: 1, kind: input, shape index: {}]   ;;  %s11898_s2 = inlined_call_operand.hbm [shape: f32[128,128], index: 2, kind: input, shape index: {}]   ;;  %s11899_s3 = inlined_call_operand.hbm [shape: f32[128,256], index: 3, kind: input, shape index: {}]   ;;  %s11900_s4 = inlined_call_operand.vmem [shape: f32[1,256], index: 4, kind: input, shape index: {}]   ;;  %s11901_s5 = inlined_call_operand.hbm [shape: f32[256,128], index: 5, kind: input, shape index: {}]   ;;  %s11902_s6 = inlined_call_operand.vmem [shape: f32[1,128], index: 6, kind: input, shape index: {}]   ;;  %s11903_s7 = inlined_call_operand.hbm [shape: f32[128,128], index: 7, kind: output, shape index: {}]  }
   0x1   :  { %13 = vsyncpa [#allocation6], 0 }
   0x2   :  { %14 = vsyncpa [#allocation4], 0  ;;  %s7940_s24 = smov [#allocation5]  }
   0x3   :  { %s36_s25 = sshll.u32 %s7940_s24, 4  ;;  %s37_s25 = int_to_ptr.vmem [resolvable:$true] %s36_s25 }
   0x4   :  { %s7862_s26 = scalar_lea.vmem %s37_s25, 4096  ;;  %p7867_p1 = scmp.lt.s32.totalorder %s37_s25, %s37_s25 }
   0x5   :  { %p7863_p0 = scmp.ne.s32.totalorder %s37_s25, %s7862_s26  ;;  %p7868_p2 = scmp.lt.s32.totalorder %s7862_s26, %s7862_s26 }
   0x7   :  { %p7869_p3 = por %p7868_p2, %p7867_p1 }
   0x9   :  { %p7870_p4 = pnand %p7869_p3, %p7863_p0 }
   0xb   :  { %7873 = shalt.err (!%p7870_p4)
}
   0xc   :  { %s7941_s27 = smov 256   ;;  %s7942_s28 = smov 16  }
   0xd   :  { %42 = dma.hbm_to_vmem [thread:$0]  %s11899_s3, 4096, %s37_s25, [#allocation6], %s7941_s27, %s7941_s27, %s7942_s28  }
   0xe   :  { %s7943_s8 = smov [#allocation2]  }
   0xf   :  { %s24_s9 = sshll.u32 %s7943_s8, 4  ;;  %s25_s9 = int_to_ptr.vmem [resolvable:$true] %s24_s9 }
  0x10   :  { %s7882_s10 = scalar_lea.vmem %s25_s9, 2048  ;;  %p7887_p6 = scmp.lt.s32.totalorder %s25_s9, %s25_s9 }
  0x11   :  { %p7883_p5 = scmp.ne.s32.totalorder %s25_s9, %s7882_s10  ;;  %p7888_p7 = scmp.lt.s32.totalorder %s7882_s10, %s7882_s10 }
  0x13   :  { %p7889_p8 = por %p7888_p7, %p7887_p6 }
  0x15   :  { %p7890_p9 = pnand %p7889_p8, %p7883_p5 }
  0x17   :  { %7893 = shalt.err (!%p7890_p9)
}
  0x18   :  { %s7944_s11 = smov 128   ;;  %s7945_s12 = smov 8  }
  0x19   :  { %30 = dma.hbm_to_vmem [thread:$0]  %s11898_s2, 2048, %s25_s9, [#allocation3], %s7944_s11, %s7944_s11, %s7945_s12  }
  0x1a   :  { %s7946_s3 = smov [#allocation7]  }
  0x1b   :  { %s50_s15 = sshll.u32 %s7946_s3, 4  ;;  %s51_s15 = int_to_ptr.vmem [resolvable:$true] %s50_s15 }
  0x1c   :  { %s7902_s16 = scalar_lea.vmem %s51_s15, 4096  ;;  %p7907_p11 = scmp.lt.s32.totalorder %s51_s15, %s51_s15 }
  0x1d   :  { %p7903_p10 = scmp.ne.s32.totalorder %s51_s15, %s7902_s16  ;;  %p7908_p12 = scmp.lt.s32.totalorder %s7902_s16, %s7902_s16 }
  0x1f   :  { %p7909_p13 = por %p7908_p12, %p7907_p11 }
  0x21   :  { %p7910_p0 = pnand %p7909_p13, %p7903_p10 }
  0x23   :  { %7913 = shalt.err (!%p7910_p0)
}
  0x24   :  { %56 = dma.hbm_to_vmem [thread:$0]  %s11901_s5, 4096, %s51_s15, [#allocation6], %s7944_s11, %s7944_s11, %s7945_s12  }
  0x25   :  { %7934 = dma.done.wait [#allocation3], 2048  }
  0x26   :  { %7935 = vsyncadd [#allocation3], 4294965248 }
  0x27   :  { %7936 = dma.done.wait [#allocation6], 8192  }
  0x28   :  { %7937 = vsyncadd [#allocation6], 4294959104  ;;  %v7947_v0 = vmov 0   ;;  %v99_v1 = vld [vmem:[%s11897_s1 + $0x78] sm:$0xff]  ;;  %v97_v2 = vld [vmem:[%s11897_s1 + $0x68] sm:$0xff] }
  0x29   :  { %7853 = vset.pattern.permute.xlu1 %v7947_v0  ;;  %7852 = vset.pattern.permute.xlu0 %v7947_v0  ;;  %v98_v3 = vld [vmem:[%s11897_s1 + $0x70] sm:$0xff]  ;;  %v96_v4 = vld [vmem:[%s11897_s1 + $0x60] sm:$0xff]  ;;  %v95_v5 = vld [vmem:[%s11897_s1 + $0x58] sm:$0xff] }
  0x2a   :  { %193 = vperm.xlu0 %7852, %v99_v1   ;;  %183 = vperm.xlu1 %7853, %v97_v2   ;;  %v94_v6 = vld [vmem:[%s11897_s1 + $0x50] sm:$0xff]  ;;  %v93_v7 = vld [vmem:[%s11897_s1 + $0x48] sm:$0xff]  ;;  %v92_v8 = vld [vmem:[%s11897_s1 + $0x40] sm:$0xff] }
  0x2b   :  { %v91_v9 = vld [vmem:[%s11897_s1 + $0x38] sm:$0xff]  ;;  %v90_v10 = vld [vmem:[%s11897_s1 + $0x30] sm:$0xff]  ;;  %v89_v11 = vld [vmem:[%s11897_s1 + $0x28] sm:$0xff] }
  0x2c   :  { %v88_v12 = vld [vmem:[%s11897_s1 + $0x20] sm:$0xff]  ;;  %v87_v13 = vld [vmem:[%s11897_s1 + $0x18] sm:$0xff]  ;;  %v86_v14 = vld [vmem:[%s11897_s1 + $0x10] sm:$0xff] }
  0x2d   :  { %v68_v15 = vld [vmem:[%s11896_s0] sm:$0xff]  ;;  %v85_v17 = vld [vmem:[%s11897_s1 + $0x8] sm:$0xff]  ;;  %v115_v23 = vld [vmem:[#allocation2 + $0x78] sm:$0xff] }
  0x2e   :  { %188 = vperm.xlu0 %7852, %v98_v3   ;;  %178 = vperm.xlu1 %7853, %v96_v4   ;;  %v8050_v16 = vand.u32 4294901760, %v68_v15  ;;  %v84_v18 = vld [vmem:[%s11897_s1] sm:$0xff]  ;;  %v113_v24 = vld [vmem:[#allocation2 + $0x68] sm:$0xff]  ;;  %v114_v29 = vld [vmem:[#allocation2 + $0x70] sm:$0xff] }
  0x2f   :  { %v112_v30 = vld [vmem:[#allocation2 + $0x60] sm:$0xff]  ;;  %v111_v39 = vld [vmem:[#allocation2 + $0x58] sm:$0xff]  ;;  %v110_v40 = vld [vmem:[#allocation2 + $0x50] sm:$0xff] }
  0x30   :  { %12464 = vst [vmem:[#allocation12_spill] sm:$0xff] %v8050_v16  ;;  %v8059_v19 = vsub.f32 %v68_v15, %v8050_v16  ;;  %7258 = vmatprep.mubr.f32.mxu1 %v8050_v16  ;;  %v69_v50 = vld [vmem:[%s11896_s0 + $0x8] sm:$0xff]  ;;  %v108_v52 = vld [vmem:[#allocation2 + $0x40] sm:$0xff]  ;;  %v107_v3 = vld [vmem:[#allocation2 + $0x38] sm:$0xff] }
  0x31   :  { %v109_v51 = vld [vmem:[#allocation2 + $0x48] sm:$0xff]  ;;  %v8139_v62 = vand.u32 4294901760, %v69_v50  ;;  %v106_v4 = vld [vmem:[#allocation2 + $0x30] sm:$0xff] }
  0x32   :  { %173 = vperm.xlu0 %7852, %v95_v5   ;;  %168 = vperm.xlu1 %7853, %v94_v6   ;;  %12465 = vst [vmem:[#allocation13_spill] sm:$0xff] %v8059_v19  ;;  %v8063_v20 = vand.u32 4294901760, %v8059_v19 }
  0x33   :  { %12478 = vst [vmem:[#allocation26_spill] sm:$0xff] %v8139_v62  ;;  %v8174_v15 = vsub.f32 %v69_v50, %v8139_v62 }
  0x34   :  { %12466 = vst [vmem:[#allocation14_spill] sm:$0xff] %v8063_v20  ;;  %v296_v21 = vsub.f32 %v8059_v19, %v8063_v20 }
  0x35   :  { %12483 = vst [vmem:[#allocation31_spill] sm:$0xff] %v8174_v15 }
  0x36   :  { %163 = vperm.xlu0 %7852, %v93_v7   ;;  %158 = vperm.xlu1 %7853, %v92_v8   ;;  %v8067_v22 = vand.u32 4294901760, %v296_v21 }
  0x38   :  { %12467 = vst [vmem:[#allocation15_spill] sm:$0xff] %v8067_v22  ;;  %7202 = vmatprep.mubr.f32.mxu0 %v8067_v22 }
  0x3a   :  { %153 = vperm.xlu0 %7852, %v91_v9   ;;  %148 = vperm.xlu1 %7853, %v90_v10  }
  0x3e   :  { %143 = vperm.xlu0 %7852, %v89_v11   ;;  %138 = vperm.xlu1 %7853, %v88_v12  }
  0x42   :  { %133 = vperm.xlu0 %7852, %v87_v13   ;;  %128 = vperm.xlu1 %7853, %v86_v14  }
  0x46   :  { %123 = vperm.xlu0 %7852, %v85_v17   ;;  %118 = vperm.xlu1 %7853, %v84_v18  }
  0xa5   :  { %v8070_v25 = vpop.permute.xlu0 %193  ;;  %v8072_v26 = vpop.permute.xlu1 %183 }
  0xa6   :  { %12468 = vst [vmem:[#allocation16_spill] sm:$0xff] %v8070_v25  ;;  %12469 = vst [vmem:[#allocation17_spill] sm:$0xff] %v8072_v26  ;;  %v211_v27 = vmul.f32 %v8070_v25, %v115_v23  ;;  %v209_v28 = vmul.f32 %v8072_v26, %v113_v24  ;;  %v72_v26 = vld [vmem:[%s11896_s0 + $0x20] sm:$0xff] }
  0xa8   :  { %v8076_v31 = vand.u32 4294901760, %v211_v27  ;;  %v8078_v32 = vand.u32 4294901760, %v209_v28 }
  0xa9   :  { %v8080_v33 = vpop.permute.xlu0 %188  ;;  %v8082_v34 = vpop.permute.xlu1 %178 }
  0xaa   :  { %12470 = vst [vmem:[#allocation18_spill] sm:$0xff] %v8080_v33  ;;  %12471 = vst [vmem:[#allocation19_spill] sm:$0xff] %v8082_v34  ;;  %v8085_v35 = vsub.f32 %v211_v27, %v8076_v31  ;;  %v210_v36 = vmul.f32 %v8080_v33, %v114_v29  ;;  %v208_v37 = vmul.f32 %v8082_v34, %v112_v30  ;;  %7170 = vmatprep.subr.mxu0 %v8076_v31  ;;  %v105_v27 = vld [vmem:[#allocation2 + $0x28] sm:$0xff] }
  0xab   :  { %v8091_v38 = vsub.f32 %v209_v28, %v8078_v32  ;;  %7171 = vmatpush3.msra.mxu0 %v8076_v31  ;;  %v104_v28 = vld [vmem:[#allocation2 + $0x20] sm:$0xff] }
  0xac   :  { %v8094_v41 = vand.u32 4294901760, %v210_v36  ;;  %v8096_v42 = vand.u32 4294901760, %v208_v37  ;;  %v8099_v43 = vand.u32 4294901760, %v8085_v35 }
  0xad   :  { %v8101_v44 = vpop.permute.xlu0 %173  ;;  %v8103_v45 = vpop.permute.xlu1 %168  ;;  %v8121_v54 = vand.u32 4294901760, %v8091_v38 }
  0xae   :  { %12472 = vst [vmem:[#allocation20_spill] sm:$0xff] %v8101_v44  ;;  %12473 = vst [vmem:[#allocation21_spill] sm:$0xff] %v8103_v45  ;;  %v8106_v46 = vsub.f32 %v210_v36, %v8094_v41  ;;  %v8109_v47 = vsub.f32 %v208_v37, %v8096_v42  ;;  %v207_v48 = vmul.f32 %v8101_v44, %v111_v39  ;;  %7172 = vmatprep.subr.mxu0 %v8094_v41  ;;  %v70_v39 = vld [vmem:[%s11896_s0 + $0x10] sm:$0xff] }
  0xaf   :  { %v206_v49 = vmul.f32 %v8103_v45, %v110_v40  ;;  %7173 = vmatpush3.msra.mxu0 %v8094_v41  ;;  %v457_v53 = vsub.f32 %v8085_v35, %v8099_v43  ;;  %12474 = vst [vmem:[#allocation22_spill] sm:$0xff] %v8121_v54  ;;  %v471_v6 = vsub.f32 %v8091_v38, %v8121_v54 }
  0xb0   :  { %v8123_v55 = vand.u32 4294901760, %v207_v48  ;;  %7174 = vmatprep.subr.mxu0 %v8078_v32  ;;  %v8129_v57 = vand.u32 4294901760, %v8106_v46  ;;  %v8137_v61 = vand.u32 4294901760, %v8109_v47 }
  0xb1   :  { %v8125_v56 = vand.u32 4294901760, %v206_v49  ;;  %7175 = vmatpush3.msra.mxu0 %v8078_v32  ;;  %v8132_v58 = vpop.permute.xlu0 %163  ;;  %v8134_v59 = vpop.permute.xlu1 %158  ;;  %v458_v60 = vand.u32 4294901760, %v457_v53  ;;  %v472_v24 = vand.u32 4294901760, %v471_v6  ;;  %v71_v53 = vld [vmem:[%s11896_s0 + $0x18] sm:$0xff] }
  0xb2   :  { %12475 = vst [vmem:[#allocation23_spill] sm:$0xff] %v8132_v58  ;;  %12476 = vst [vmem:[#allocation24_spill] sm:$0xff] %v8134_v59  ;;  %v8142_v63 = vsub.f32 %v207_v48, %v8123_v55  ;;  %v205_v1 = vmul.f32 %v8132_v58, %v109_v51  ;;  %v204_v2 = vmul.f32 %v8134_v59, %v108_v52  ;;  %7176 = vmatprep.subr.mxu0 %v8096_v42  ;;  %v101_v58 = vld [vmem:[#allocation2 + $0x8] sm:$0xff]  ;;  %v100_v59 = vld [vmem:[#allocation2] sm:$0xff] }
  0xb3   :  { %12477 = vst [vmem:[#allocation25_spill] sm:$0xff] %v8137_v61  ;;  %v8145_v0 = vsub.f32 %v206_v49, %v8125_v56  ;;  %7226 = vmatprep.subr.mxu1 %v458_v60  ;;  %7177 = vmatpush3.msra.mxu0 %v8096_v42  ;;  %v464_v5 = vsub.f32 %v8106_v46, %v8129_v57  ;;  %v8210_v52 = vand.u32 4294901760, %v8174_v15 }
  0xb4   :  { %v8155_v7 = vand.u32 4294901760, %v205_v1  ;;  %v8157_v8 = vand.u32 4294901760, %v204_v2  ;;  %7227 = vmatpush3.msra.mxu1 %v458_v60  ;;  %7178 = vmatprep.subr.mxu0 %v8123_v55  ;;  %v8161_v9 = vand.u32 4294901760, %v8142_v63  ;;  %v478_v13 = vsub.f32 %v8109_v47, %v8137_v61 }
  0xb5   :  { %7179 = vmatpush3.msra.mxu0 %v8123_v55  ;;  %v8164_v10 = vpop.permute.xlu0 %153  ;;  %v8166_v11 = vpop.permute.xlu1 %148  ;;  %v465_v12 = vand.u32 4294901760, %v464_v5  ;;  %v8171_v14 = vand.u32 4294901760, %v8145_v0  ;;  %12488 = vst [vmem:[#allocation36_spill] sm:$0xff] %v8210_v52  ;;  %v103_v5 = vld [vmem:[#allocation2 + $0x18] sm:$0xff] }
  0xb6   :  { %12479 = vst [vmem:[#allocation27_spill] sm:$0xff] %v8161_v9  ;;  %12480 = vst [vmem:[#allocation28_spill] sm:$0xff] %v8164_v10  ;;  %v8177_v17 = vsub.f32 %v205_v1, %v8155_v7  ;;  %v8180_v18 = vsub.f32 %v204_v2, %v8157_v8  ;;  %v203_v21 = vmul.f32 %v8164_v10, %v107_v3  ;;  %7180 = vmatprep.subr.mxu0 %v8125_v56 }
  0xb7   :  { %12481 = vst [vmem:[#allocation29_spill] sm:$0xff] %v8166_v11  ;;  %12482 = vst [vmem:[#allocation30_spill] sm:$0xff] %v8171_v14  ;;  %v202_v23 = vmul.f32 %v8166_v11, %v106_v4  ;;  %7228 = vmatprep.subr.mxu1 %v465_v12  ;;  %7181 = vmatpush3.msra.mxu0 %v8125_v56  ;;  %v485_v29 = vsub.f32 %v8142_v63, %v8161_v9  ;;  %v479_v49 = vand.u32 4294901760, %v478_v13 }
  0xb8   :  { %v8188_v30 = vand.u32 4294901760, %v203_v21  ;;  %7229 = vmatpush3.msra.mxu1 %v465_v12  ;;  %7182 = vmatprep.subr.mxu0 %v8155_v7  ;;  %v8194_v37 = vand.u32 4294901760, %v8177_v17  ;;  %v492_v50 = vsub.f32 %v8145_v0, %v8171_v14  ;;  %v8207_v51 = vand.u32 4294901760, %v8180_v18 }
  0xb9   :  { %v8190_v36 = vand.u32 4294901760, %v202_v23  ;;  %7230 = vmatprep.subr.mxu1 %v472_v24  ;;  %7183 = vmatpush3.msra.mxu0 %v8155_v7  ;;  %v8200_v40 = vpop.permute.xlu0 %143  ;;  %v8202_v48 = vpop.permute.xlu1 %138  ;;  %v486_v4 = vand.u32 4294901760, %v485_v29  ;;  %v8226_v12 = vand.u32 4294901760, %v70_v39 }
  0xba   :  { %12484 = vst [vmem:[#allocation32_spill] sm:$0xff] %v8194_v37  ;;  %12485 = vst [vmem:[#allocation33_spill] sm:$0xff] %v8200_v40  ;;  %v8216_v60 = vsub.f32 %v203_v21, %v8188_v30  ;;  %7231 = vmatpush3.msra.mxu1 %v472_v24  ;;  %v201_v2 = vmul.f32 %v8200_v40, %v105_v27  ;;  %v200_v3 = vmul.f32 %v8202_v48, %v104_v28 }
  0xbb   :  { %12486 = vst [vmem:[#allocation34_spill] sm:$0xff] %v8202_v48  ;;  %12487 = vst [vmem:[#allocation35_spill] sm:$0xff] %v8207_v51  ;;  %v8219_v1 = vsub.f32 %v202_v23, %v8190_v36  ;;  %7184 = vmatprep.subr.mxu0 %v8157_v8  ;;  %7232 = vmatprep.subr.mxu1 %v479_v49  ;;  %v499_v6 = vsub.f32 %v8177_v17, %v8194_v37  ;;  %v102_v23 = vld [vmem:[#allocation2 + $0x10] sm:$0xff]  ;;  %v8236_v27 = vand.u32 4294901760, %v71_v53 }
  0xbc   :  { %12489 = vst [vmem:[#allocation37_spill] sm:$0xff] %v8226_v12  ;;  %v8228_v13 = vand.u32 4294901760, %v201_v2  ;;  %v8230_v21 = vand.u32 4294901760, %v200_v3  ;;  %7185 = vmatpush3.msra.mxu0 %v8157_v8  ;;  %7233 = vmatpush3.msra.mxu1 %v479_v49  ;;  %v8234_v24 = vand.u32 4294901760, %v8216_v60  ;;  %v493_v22 = vand.u32 4294901760, %v492_v50 }
  0xbd   :  { %12491 = vst [vmem:[#allocation39_spill] sm:$0xff] %v8236_v27  ;;  %7186 = vmatprep.subr.mxu0 %v8188_v30  ;;  %7234 = vmatprep.subr.mxu1 %v486_v4  ;;  %v8239_v28 = vpop.permute.xlu0 %133  ;;  %v8241_v29 = vpop.permute.xlu1 %128  ;;  %v506_v25 = vsub.f32 %v8180_v18, %v8207_v51  ;;  %v8246_v33 = vand.u32 4294901760, %v8219_v1  ;;  %v500_v49 = vand.u32 4294901760, %v499_v6  ;;  %v8266_v10 = vsub.f32 %v70_v39, %v8226_v12 }
  0xbe   :  { %12490 = vst [vmem:[#allocation38_spill] sm:$0xff] %v8234_v24  ;;  %12492 = vst [vmem:[#allocation40_spill] sm:$0xff] %v8239_v28  ;;  %v8254_v34 = vsub.f32 %v201_v2, %v8228_v13  ;;  %v8257_v44 = vsub.f32 %v200_v3, %v8230_v21  ;;  %7187 = vmatpush3.msra.mxu0 %v8188_v30  ;;  %7235 = vmatpush3.msra.mxu1 %v486_v4  ;;  %v8277_v6 = vand.u32 4294901760, %v72_v26 }
  0xbf   :  { %12493 = vst [vmem:[#allocation41_spill] sm:$0xff] %v8241_v29  ;;  %12494 = vst [vmem:[#allocation42_spill] sm:$0xff] %v8246_v33  ;;  %v199_v50 = vmul.f32 %v8239_v28, %v103_v5  ;;  %v198_v45 = vmul.f32 %v8241_v29, %v102_v23  ;;  %7188 = vmatprep.subr.mxu0 %v8190_v36  ;;  %7236 = vmatprep.subr.mxu1 %v493_v22  ;;  %v73_v23 = vld [vmem:[%s11896_s0 + $0x28] sm:$0xff]  ;;  %v507_v48 = vand.u32 4294901760, %v506_v25 }
  0xc0   :  { %v513_v2 = vsub.f32 %v8216_v60, %v8234_v24  ;;  %12495 = vst [vmem:[#allocation43_spill] sm:$0xff] %v8266_v10  ;;  %7189 = vmatpush3.msra.mxu0 %v8190_v36  ;;  %7237 = vmatpush3.msra.mxu1 %v493_v22  ;;  %v8272_v4 = vand.u32 4294901760, %v8254_v34  ;;  %v8275_v5 = vsub.f32 %v71_v53, %v8236_v27  ;;  %12498 = vst [vmem:[#allocation46_spill] sm:$0xff] %v8277_v6 }
  0xc1   :  { %v8268_v3 = vand.u32 4294901760, %v199_v50  ;;  %v8282_v11 = vand.u32 4294901760, %v198_v45  ;;  %7190 = vmatprep.subr.mxu0 %v8228_v13  ;;  %7238 = vmatprep.subr.mxu1 %v500_v49  ;;  %v8285_v39 = vpop.permute.xlu0 %123  ;;  %v8287_v22 = vpop.permute.xlu1 %118  ;;  %v520_v53 = vsub.f32 %v8219_v1, %v8246_v33  ;;  %v8292_v40 = vand.u32 4294901760, %v8257_v44 }
  0xc2   :  { %12496 = vst [vmem:[#allocation44_spill] sm:$0xff] %v8272_v4  ;;  %12497 = vst [vmem:[#allocation45_spill] sm:$0xff] %v8275_v5  ;;  %7191 = vmatpush3.msra.mxu0 %v8228_v13  ;;  %7239 = vmatpush3.msra.mxu1 %v500_v49  ;;  %v197_v28 = vmul.f32 %v8285_v39, %v101_v58  ;;  %v196_v16 = vmul.f32 %v8287_v22, %v100_v59  ;;  %v514_v25 = vand.u32 4294901760, %v513_v2  ;;  %v74_v59 = vld [vmem:[%s11896_s0 + $0x30] sm:$0xff] }
  0xc3   :  { %12499 = vst [vmem:[#allocation47_spill] sm:$0xff] %v8285_v39  ;;  %12500 = vst [vmem:[#allocation48_spill] sm:$0xff] %v8287_v22  ;;  %v8295_v29 = vsub.f32 %v199_v50, %v8268_v3  ;;  %v8301_v24 = vsub.f32 %v198_v45, %v8282_v11  ;;  %7192 = vmatprep.subr.mxu0 %v8230_v21  ;;  %7240 = vmatprep.subr.mxu1 %v507_v48  ;;  %v8306_v51 = vand.u32 4294901760, %v73_v23 }
  0xc4   :  { %12501 = vst [vmem:[#allocation49_spill] sm:$0xff] %v8292_v40  ;;  %v527_v33 = vsub.f32 %v8254_v34, %v8272_v4  ;;  %v8308_v50 = vand.u32 4294901760, %v197_v28  ;;  %v8310_v37 = vand.u32 4294901760, %v196_v16  ;;  %7193 = vmatpush3.msra.mxu0 %v8230_v21  ;;  %7241 = vmatpush3.msra.mxu1 %v507_v48  ;;  %v8317_v45 = vand.u32 4294901760, %v8266_v10 }
  0xc5   :  { %12502 = vst [vmem:[#allocation50_spill] sm:$0xff] %v8306_v51  ;;  %v8314_v58 = vand.u32 4294901760, %v8295_v29  ;;  %7194 = vmatprep.subr.mxu0 %v8268_v3  ;;  %7242 = vmatprep.subr.mxu1 %v514_v25  ;;  %v521_v49 = vand.u32 4294901760, %v520_v53  ;;  %v534_v2 = vsub.f32 %v8257_v44, %v8292_v40  ;;  %v8326_v22 = vand.u32 4294901760, %v8301_v24  ;;  %v75_v40 = vld [vmem:[%s11896_s0 + $0x38] sm:$0xff] }
  0xc6   :  { %12503 = vst [vmem:[#allocation51_spill] sm:$0xff] %v8308_v50  ;;  %12505 = vst [vmem:[#allocation53_spill] sm:$0xff] %v8317_v45  ;;  %v8329_v48 = vsub.f32 %v72_v26, %v8277_v6  ;;  %v8332_v39 = vsub.f32 %v197_v28, %v8308_v50  ;;  %v8335_v4 = vsub.f32 %v196_v16, %v8310_v37  ;;  %7195 = vmatpush3.msra.mxu0 %v8268_v3 }
  0xc7   :  { %12504 = vst [vmem:[#allocation52_spill] sm:$0xff] %v8314_v58  ;;  %12506 = vst [vmem:[#allocation54_spill] sm:$0xff] %v8326_v22  ;;  %7243 = vmatpush3.msra.mxu1 %v514_v25  ;;  %v8339_v53 = vand.u32 4294901760, %v8275_v5  ;;  %7196 = vmatprep.subr.mxu0 %v8282_v11  ;;  %v528_v26 = vand.u32 4294901760, %v527_v33  ;;  %v541_v28 = vsub.f32 %v8295_v29, %v8314_v58  ;;  %v8350_v14 = vand.u32 4294901760, %v74_v59 }
  0xc8   :  { %12507 = vst [vmem:[#allocation55_spill] sm:$0xff] %v8329_v48  ;;  %7244 = vmatprep.subr.mxu1 %v521_v49  ;;  %v8348_v16 = vsub.f32 %v73_v23, %v8306_v51  ;;  %7197 = vmatpush3.msra.mxu0 %v8282_v11  ;;  %v12511_v25 = vsub.f32 %v8174_v15, %v8210_v52  ;;  %v8361_v33 = vand.u32 4294901760, %v8332_v39  ;;  %v535_v23 = vand.u32 4294901760, %v534_v2  ;;  %v76_v2 = vld [vmem:[%s11896_s0 + $0x40] sm:$0xff] }
  0xc9   :  { %12508 = vst [vmem:[#allocation56_spill] sm:$0xff] %v8339_v53  ;;  %12510 = vst [vmem:[#allocation58_spill] sm:$0xff] %v8350_v14  ;;  %7245 = vmatpush3.msra.mxu1 %v521_v49  ;;  %v316_v20 = vsub.f32 %v8266_v10, %v8317_v45  ;;  %7198 = vmatprep.subr.mxu0 %v8308_v50  ;;  %v548_v58 = vsub.f32 %v8301_v24, %v8326_v22  ;;  %v8367_v49 = vand.u32 4294901760, %v8329_v48 }
  0xca   :  { %12509 = vst [vmem:[#allocation57_spill] sm:$0xff] %v8348_v16  ;;  %v8356_v9 = vand.u32 4294901760, %v12511_v25  ;;  %12513 = vst [vmem:[#allocation60_spill] sm:$0xff] %v8361_v33  ;;  %7246 = vmatprep.subr.mxu1 %v528_v26  ;;  %v8369_v61 = vand.u32 4294901760, %v75_v40  ;;  %7199 = vmatpush3.msra.mxu0 %v8308_v50  ;;  %v326_v25 = vsub.f32 %v8275_v5, %v8339_v53  ;;  %v8375_v45 = vand.u32 4294901760, %v8335_v4  ;;  %v77_v50 = vld [vmem:[%s11896_s0 + $0x48] sm:$0xff] }
  0xcb   :  { %12514 = vst [vmem:[#allocation61_spill] sm:$0xff] %v8367_v49  ;;  %7247 = vmatpush3.msra.mxu1 %v528_v26  ;;  %7200 = vmatprep.subr.mxu0 %v8310_v37  ;;  %v542_v22 = vand.u32 4294901760, %v541_v28  ;;  %v8382_v52 = vand.u32 4294901760, %v8348_v16  ;;  %v8385_v54 = vsub.f32 %v74_v59, %v8350_v14  ;;  %v8388_v26 = vand.u32 4294901760, %v316_v20 }
  0xcc   :  { %12512 = vst [vmem:[#allocation59_spill] sm:$0xff] %v8356_v9  ;;  %12515 = vst [vmem:[#allocation62_spill] sm:$0xff] %v8369_v61  ;;  %7248 = vmatprep.subr.mxu1 %v535_v23  ;;  %7201 = vmatpush3.msra.mxu0 %v8310_v37  ;;  %v555_v53 = vsub.f32 %v8332_v39, %v8361_v33  ;;  %v549_v28 = vand.u32 4294901760, %v548_v58  ;;  %v336_v59 = vsub.f32 %v8329_v48, %v8367_v49 }
  0xcd   :  { %12516 = vst [vmem:[#allocation63_spill] sm:$0xff] %v8375_v45  ;;  %12517 = vst [vmem:[#allocation64_spill] sm:$0xff] %v8382_v52  ;;  %7249 = vmatpush3.msra.mxu1 %v535_v23  ;;  %7203 = vmatmul.mubr.f32.vlgmr.msra.gmra.mxu0 %v8356_v9  ;;  %v8399_v5 = vsub.f32 %v75_v40, %v8369_v61  ;;  %v8401_v23 = vand.u32 4294901760, %v76_v2  ;;  %v8404_v20 = vand.u32 4294901760, %v326_v25  ;;  %v8412_v9 = vand.u32 4294901760, %v8385_v54  ;;  %v78_v25 = vld [vmem:[%s11896_s0 + $0x50] sm:$0xff] }
  0xce   :  { %12518 = vst [vmem:[#allocation65_spill] sm:$0xff] %v8385_v54  ;;  %12519 = vst [vmem:[#allocation66_spill] sm:$0xff] %v8388_v26  ;;  %7250 = vmatprep.subr.mxu1 %v542_v22  ;;  %7282 = vmatprep.subr.mxu0 %v8085_v35  ;;  %v562_v33 = vsub.f32 %v8335_v4, %v8375_v45  ;;  %v346_v58 = vsub.f32 %v8348_v16, %v8382_v52  ;;  %v8414_v40 = vand.u32 4294901760, %v77_v50 }
  0xcf   :  { %12520 = vst [vmem:[#allocation67_spill] sm:$0xff] %v8399_v5  ;;  %12521 = vst [vmem:[#allocation68_spill] sm:$0xff] %v8401_v23  ;;  %7251 = vmatpush3.msra.mxu1 %v542_v22  ;;  %7283 = vmatpush3.msra.mxu0 %v8085_v35  ;;  %v556_v22 = vand.u32 4294901760, %v555_v53  ;;  %v8422_v35 = vand.u32 4294901760, %v336_v59  ;;  %v8425_v45 = vand.u32 4294901760, %v8399_v5  ;;  %v8428_v52 = vsub.f32 %v76_v2, %v8401_v23  ;;  %v79_v53 = vld [vmem:[%s11896_s0 + $0x58] sm:$0xff] }
  0xd0   :  { %12522 = vst [vmem:[#allocation69_spill] sm:$0xff] %v8404_v20  ;;  %7252 = vmatprep.subr.mxu1 %v549_v28  ;;  %12523 = vst [vmem:[#allocation70_spill] sm:$0xff] %v8412_v9  ;;  %7284 = vmatprep.subr.mxu0 %v8106_v46  ;;  %v8440_v59 = vsub.f32 %v77_v50, %v8414_v40  ;;  %v8442_v2 = vand.u32 4294901760, %v78_v25 }
  0xd1   :  { %12524 = vst [vmem:[#allocation71_spill] sm:$0xff] %v8414_v40  ;;  %7205 = vmatprep.mubr.f32.mxu0 %v8388_v26  ;;  %7253 = vmatpush3.msra.mxu1 %v549_v28  ;;  %12525 = vst [vmem:[#allocation72_spill] sm:$0xff] %v8422_v35  ;;  %v563_v26 = vand.u32 4294901760, %v562_v33  ;;  %v356_v28 = vsub.f32 %v8385_v54, %v8412_v9  ;;  %v366_v33 = vsub.f32 %v8399_v5, %v8425_v45 }
  0xd2   :  { %7285 = vmatpush3.msra.mxu0 %v8106_v46  ;;  %12526 = vst [vmem:[#allocation73_spill] sm:$0xff] %v8425_v45  ;;  %12527 = vst [vmem:[#allocation74_spill] sm:$0xff] %v8428_v52  ;;  %7254 = vmatprep.subr.mxu1 %v556_v22  ;;  %v8435_v46 = vand.u32 4294901760, %v346_v58  ;;  %v8450_v58 = vand.u32 4294901760, %v8428_v52 }
  0xd3   :  { %7206 = vmatmul.mubr.f32.gmra.mxu0 %v8404_v20  ;;  %7286 = vmatprep.subr.mxu0 %v8091_v38  ;;  %12529 = vst [vmem:[#allocation76_spill] sm:$0xff] %v8440_v59  ;;  %12530 = vst [vmem:[#allocation77_spill] sm:$0xff] %v8442_v2  ;;  %v8460_v50 = vand.u32 4294901760, %v356_v28  ;;  %v8466_v20 = vsub.f32 %v78_v25, %v8442_v2 }
  0xd4   :  { %7255 = vmatpush3.msra.mxu1 %v556_v22  ;;  %12528 = vst [vmem:[#allocation75_spill] sm:$0xff] %v8435_v46  ;;  %7287 = vmatpush3.msra.mxu0 %v8091_v38  ;;  %12531 = vst [vmem:[#allocation78_spill] sm:$0xff] %v8450_v58  ;;  %v8452_v22 = vand.u32 4294901760, %v79_v53  ;;  %v80_v38 = vld [vmem:[%s11896_s0 + $0x60] sm:$0xff]  ;;  %v376_v28 = vsub.f32 %v8428_v52, %v8450_v58 }
  0xd5   :  { %7256 = vmatprep.subr.mxu1 %v563_v26  ;;  %7288 = vmatprep.subr.mxu0 %v8109_v47  ;;  %12533 = vst [vmem:[#allocation80_spill] sm:$0xff] %v8460_v50  ;;  %12535 = vst [vmem:[#allocation82_spill] sm:$0xff] %v8466_v20 }
  0xd6   :  { %7208 = vmatprep.mubr.f32.mxu0 %v8422_v35  ;;  %12532 = vst [vmem:[#allocation79_spill] sm:$0xff] %v8452_v22  ;;  %7257 = vmatpush3.msra.mxu1 %v563_v26  ;;  %v8463_v35 = vand.u32 4294901760, %v8440_v59  ;;  %v8475_v26 = vand.u32 4294901760, %v366_v33  ;;  %v8480_v25 = vsub.f32 %v79_v53, %v8452_v22  ;;  %v8491_v33 = vand.u32 4294901760, %v8466_v20  ;;  %v82_v53 = vld [vmem:[%s11896_s0 + $0x70] sm:$0xff] }
  0xd7   :  { %7289 = vmatpush3.msra.mxu0 %v8109_v47  ;;  %7259 = vmatmul.mubr.f32.vlgmr.msra.gmra.mxu1 %v8139_v62  ;;  %v81_v47 = vld [vmem:[%s11896_s0 + $0x68] sm:$0xff] }
  0xd8   :  { %7209 = vmatmul.mubr.f32.gmra.mxu0 %v8435_v46  ;;  %12534 = vst [vmem:[#allocation81_spill] sm:$0xff] %v8463_v35  ;;  %7290 = vmatprep.subr.mxu0 %v8142_v63  ;;  %12536 = vst [vmem:[#allocation83_spill] sm:$0xff] %v8475_v26  ;;  %v8482_v46 = vand.u32 4294901760, %v80_v38  ;;  %v8493_v62 = vand.u32 4294901760, %v81_v47 }
  0xd9   :  { %7338 = vmatprep.subr.mxu1 %v8076_v31  ;;  %7291 = vmatpush3.msra.mxu0 %v8142_v63  ;;  %12537 = vst [vmem:[#allocation84_spill] sm:$0xff] %v8480_v25  ;;  %v386_v63 = vsub.f32 %v8440_v59, %v8463_v35  ;;  %12539 = vst [vmem:[#allocation86_spill] sm:$0xff] %v8491_v33 }
  0xda   :  { %7339 = vmatpush3.msra.mxu1 %v8076_v31  ;;  %12538 = vst [vmem:[#allocation85_spill] sm:$0xff] %v8482_v46  ;;  %7292 = vmatprep.subr.mxu0 %v8145_v0  ;;  %12540 = vst [vmem:[#allocation87_spill] sm:$0xff] %v8493_v62  ;;  %v8508_v35 = vsub.f32 %v80_v38, %v8482_v46  ;;  %v8522_v38 = vsub.f32 %v81_v47, %v8493_v62 }
  0xdb   :  { %7340 = vmatprep.subr.mxu1 %v8094_v41  ;;  %7211 = vmatprep.mubr.f32.mxu0 %v8460_v50  ;;  %v8502_v50 = vand.u32 4294901760, %v376_v28  ;;  %v8517_v28 = vand.u32 4294901760, %v386_v63 }
  0xdc   :  { %7261 = vmatprep.mubr.f32.mxu1 %v8226_v12  ;;  %7293 = vmatpush3.msra.mxu0 %v8145_v0  ;;  %v8505_v12 = vand.u32 4294901760, %v8480_v25  ;;  %12543 = vst [vmem:[#allocation90_spill] sm:$0xff] %v8508_v35  ;;  %v83_v0 = vld [vmem:[%s11896_s0 + $0x78] sm:$0xff]  ;;  %12545 = vst [vmem:[#allocation92_spill] sm:$0xff] %v8522_v38  ;;  %v8533_v63 = vand.u32 4294901760, %v8508_v35 }
  0xdd   :  { %7341 = vmatpush3.msra.mxu1 %v8094_v41  ;;  %7212 = vmatmul.mubr.f32.gmra.mxu0 %v8475_v26  ;;  %12541 = vst [vmem:[#allocation88_spill] sm:$0xff] %v8502_v50  ;;  %12544 = vst [vmem:[#allocation91_spill] sm:$0xff] %v8517_v28  ;;  %v396_v26 = vsub.f32 %v8466_v20, %v8491_v33  ;;  %v8535_v33 = vand.u32 4294901760, %v83_v0 }
  0xde   :  { %7262 = vmatmul.mubr.f32.gmra.mxu1 %v8236_v27  ;;  %12542 = vst [vmem:[#allocation89_spill] sm:$0xff] %v8505_v12  ;;  %7294 = vmatprep.subr.mxu0 %v8177_v17  ;;  %v8524_v27 = vand.u32 4294901760, %v82_v53  ;;  %12547 = vst [vmem:[#allocation94_spill] sm:$0xff] %v8533_v63 }
  0xdf   :  { %7342 = vmatprep.subr.mxu1 %v8078_v32  ;;  %7295 = vmatpush3.msra.mxu0 %v8177_v17  ;;  %v406_v17 = vsub.f32 %v8480_v25, %v8505_v12  ;;  %12548 = vst [vmem:[#allocation95_spill] sm:$0xff] %v8535_v33  ;;  %v8541_v47 = vand.u32 4294901760, %v396_v26  ;;  %v416_v26 = vsub.f32 %v8508_v35, %v8533_v63 }
  0xe0   :  { %7343 = vmatpush3.msra.mxu1 %v8078_v32  ;;  %12546 = vst [vmem:[#allocation93_spill] sm:$0xff] %v8524_v27  ;;  %7296 = vmatprep.subr.mxu0 %v8180_v18 }
  0xe1   :  { %7344 = vmatprep.subr.mxu1 %v8096_v42  ;;  %7214 = vmatprep.mubr.f32.mxu0 %v8502_v50  ;;  %12549 = vst [vmem:[#allocation96_spill] sm:$0xff] %v8541_v47  ;;  %v8544_v50 = vand.u32 4294901760, %v8522_v38 }
  0xe2   :  { %7264 = vmatprep.mubr.f32.mxu1 %v8277_v6  ;;  %7297 = vmatpush3.msra.mxu0 %v8180_v18  ;;  %v8547_v6 = vsub.f32 %v82_v53, %v8524_v27  ;;  %v8553_v18 = vand.u32 4294901760, %v406_v17 }
  0xe3   :  { %7345 = vmatpush3.msra.mxu1 %v8096_v42  ;;  %7215 = vmatmul.mubr.f32.gmra.mxu0 %v8517_v28  ;;  %12550 = vst [vmem:[#allocation97_spill] sm:$0xff] %v8544_v50  ;;  %v8558_v28 = vsub.f32 %v83_v0, %v8535_v33  ;;  %v8573_v0 = vand.u32 4294901760, %v416_v26 }
  0xe4   :  { %7265 = vmatmul.mubr.f32.gmra.mxu1 %v8306_v51  ;;  %12551 = vst [vmem:[#allocation98_spill] sm:$0xff] %v8547_v6  ;;  %7298 = vmatprep.subr.mxu0 %v8216_v60  ;;  %12552 = vst [vmem:[#allocation99_spill] sm:$0xff] %v8553_v18  ;;  %v8567_v53 = vand.u32 4294901760, %v8547_v6 }
  0xe5   :  { %7346 = vmatprep.subr.mxu1 %v8123_v55  ;;  %7299 = vmatpush3.msra.mxu0 %v8216_v60  ;;  %12553 = vst [vmem:[#allocation100_spill] sm:$0xff] %v8558_v28  ;;  %v426_v60 = vsub.f32 %v8522_v38, %v8544_v50  ;;  %12555 = vst [vmem:[#allocation102_spill] sm:$0xff] %v8573_v0  ;;  %v8576_v17 = vand.u32 4294901760, %v8558_v28 }
  0xe6   :  { %7347 = vmatpush3.msra.mxu1 %v8123_v55  ;;  %7300 = vmatprep.subr.mxu0 %v8219_v1  ;;  %12554 = vst [vmem:[#allocation101_spill] sm:$0xff] %v8567_v53 }
  0xe7   :  { %7348 = vmatprep.subr.mxu1 %v8125_v56  ;;  %7217 = vmatprep.mubr.f32.mxu0 %v8541_v47  ;;  %12556 = vst [vmem:[#allocation103_spill] sm:$0xff] %v8576_v17  ;;  %v446_v26 = vsub.f32 %v8558_v28, %v8576_v17 }
  0xe8   :  { %7267 = vmatprep.mubr.f32.mxu1 %v8350_v14  ;;  %7301 = vmatpush3.msra.mxu0 %v8219_v1  ;;  %v8582_v1 = vand.u32 4294901760, %v426_v60 }
  0xe9   :  { %7349 = vmatpush3.msra.mxu1 %v8125_v56  ;;  %7218 = vmatmul.mubr.f32.gmra.mxu0 %v8553_v18  ;;  %v436_v18 = vsub.f32 %v8547_v6, %v8567_v53  ;;  %v8602_v60 = vand.u32 4294901760, %v446_v26  ;;  %v12568_v26 = vld [vmem:[#allocation53_spill] sm:$0xff] }
  0xea   :  { %7268 = vmatmul.mubr.f32.gmra.mxu1 %v8369_v61  ;;  %7302 = vmatprep.subr.mxu0 %v8254_v34  ;;  %12557 = vst [vmem:[#allocation104_spill] sm:$0xff] %v8582_v1 }
  0xeb   :  { %7350 = vmatprep.subr.mxu1 %v8155_v7  ;;  %7303 = vmatpush3.msra.mxu0 %v8254_v34  ;;  %v8596_v34 = vand.u32 4294901760, %v436_v18  ;;  %12559 = vst [vmem:[#allocation106_spill] sm:$0xff] %v8602_v60  ;;  %v12567_v18 = vld [vmem:[#allocation30_spill] sm:$0xff] }
  0xec   :  { %7351 = vmatpush3.msra.mxu1 %v8155_v7  ;;  %7304 = vmatprep.subr.mxu0 %v8257_v44 }
  0xed   :  { %7352 = vmatprep.subr.mxu1 %v8157_v8  ;;  %7220 = vmatprep.mubr.f32.mxu0 %v8573_v0  ;;  %12558 = vst [vmem:[#allocation105_spill] sm:$0xff] %v8596_v34 }
  0xee   :  { %7270 = vmatprep.mubr.f32.mxu1 %v8401_v23  ;;  %7305 = vmatpush3.msra.mxu0 %v8257_v44  ;;  %v12560_v44 = vld [vmem:[#allocation45_spill] sm:$0xff] }
  0xef   :  { %7353 = vmatpush3.msra.mxu1 %v8157_v8  ;;  %7221 = vmatmul.mubr.f32.gmra.mxu0 %v8582_v1 }
  0xf0   :  { %7271 = vmatmul.mubr.f32.gmra.mxu1 %v8414_v40  ;;  %7306 = vmatprep.subr.mxu0 %v8295_v29 }
  0xf1   :  { %7354 = vmatprep.subr.mxu1 %v8188_v30  ;;  %7307 = vmatpush3.msra.mxu0 %v8295_v29  ;;  %v12562_v29 = vld [vmem:[#allocation22_spill] sm:$0xff] }
  0xf2   :  { %7355 = vmatpush3.msra.mxu1 %v8188_v30  ;;  %7308 = vmatprep.subr.mxu0 %v8301_v24 }
  0xf3   :  { %7356 = vmatprep.subr.mxu1 %v8190_v36  ;;  %7223 = vmatprep.mubr.f32.mxu0 %v8596_v34 }
  0xf4   :  { %7273 = vmatprep.mubr.f32.mxu1 %v8442_v2  ;;  %7309 = vmatpush3.msra.mxu0 %v8301_v24  ;;  %v12561_v24 = vld [vmem:[#allocation51_spill] sm:$0xff] }
  0xf5   :  { %7357 = vmatpush3.msra.mxu1 %v8190_v36  ;;  %7224 = vmatmul.mubr.f32.gmra.mxu0 %v8602_v60 }
  0xf6   :  { %7274 = vmatmul.mubr.f32.gmra.mxu1 %v8452_v22  ;;  %7310 = vmatprep.subr.mxu0 %v8332_v39 }
  0xf7   :  { %7358 = vmatprep.subr.mxu1 %v8228_v13  ;;  %7311 = vmatpush3.msra.mxu0 %v8332_v39  ;;  %v12566_v39 = vld [vmem:[#allocation27_spill] sm:$0xff] }
  0xf8   :  { %7359 = vmatpush3.msra.mxu1 %v8228_v13  ;;  %7312 = vmatprep.subr.mxu0 %v8335_v4 }
  0xf9   :  { %7360 = vmatprep.subr.mxu1 %v8230_v21  ;;  %7276 = vmatprep.mubr.f32.mxu1 %v8482_v46 }
  0xfa   :  { %7313 = vmatpush3.msra.mxu0 %v8335_v4  ;;  %7314 = vmatprep.mubr.f32.mxu0 %v8059_v19  ;;  %v12565_v4 = vld [vmem:[#allocation36_spill] sm:$0xff]  ;;  %v1527_v19 = vld [vmem:[#allocation5 + $0x68] sm:$0xff] }
  0xfb   :  { %7361 = vmatpush3.msra.mxu1 %v8230_v21  ;;  %7315 = vmatmul.mubr.f32.vlgmr.msra.gmra.mxu0 %v8174_v15 }
  0xfc   :  { %7277 = vmatmul.mubr.f32.gmra.mxu1 %v8493_v62  ;;  %7362 = vmatprep.subr.mxu1 %v8268_v3 }
  0xfd   :  { %7394 = vmatprep.subr.mxu0 %v8099_v43  ;;  %7363 = vmatpush3.msra.mxu1 %v8268_v3 }
  0xfe   :  { %7395 = vmatpush3.msra.mxu0 %v8099_v43  ;;  %7364 = vmatprep.subr.mxu1 %v8282_v11  ;;  %v12563_v43 = vld [vmem:[#allocation25_spill] sm:$0xff] }
  0xff   :  { %7396 = vmatprep.subr.mxu0 %v8129_v57  ;;  %7279 = vmatprep.mubr.f32.mxu1 %v8524_v27 }
 0x100   :  { %7317 = vmatprep.mubr.f32.mxu0 %v8266_v10  ;;  %7365 = vmatpush3.msra.mxu1 %v8282_v11 }
 0x101   :  { %7397 = vmatpush3.msra.mxu0 %v8129_v57  ;;  %7280 = vmatmul.mubr.f32.gmra.mxu1 %v8535_v33  ;;  %v12564_v57 = vld [vmem:[#allocation14_spill] sm:$0xff] }
 0x102   :  { %7318 = vmatmul.mubr.f32.gmra.mxu0 %v12560_v44  ;;  %7366 = vmatprep.subr.mxu1 %v12561_v24 }
 0x103   :  { %7398 = vmatprep.subr.mxu0 %v12562_v29  ;;  %7367 = vmatpush3.msra.mxu1 %v12561_v24 }
 0x104   :  { %7399 = vmatpush3.msra.mxu0 %v12562_v29  ;;  %7368 = vmatprep.subr.mxu1 %v8310_v37  ;;  %v12569_v29 = vld [vmem:[#allocation56_spill] sm:$0xff] }
 0x105   :  { %7400 = vmatprep.subr.mxu0 %v12563_v43  ;;  %7320 = vmatprep.mubr.f32.mxu0 %v8329_v48 }
 0x106   :  { %7369 = vmatpush3.msra.mxu1 %v8310_v37  ;;  %7370 = vmatprep.mubr.f32.mxu1 %v12564_v57 }
 0x107   :  { %7401 = vmatpush3.msra.mxu0 %v12563_v43  ;;  %7371 = vmatmul.mubr.f32.vlgmr.msra.gmra.mxu1 %v12565_v4  ;;  %v12570_v43 = vld [vmem:[#allocation32_spill] sm:$0xff] }
 0x108   :  { %7321 = vmatmul.mubr.f32.gmra.mxu0 %v8348_v16  ;;  %7402 = vmatprep.subr.mxu0 %v12566_v39 }
 0x109   :  { %7450 = vmatprep.subr.mxu1 %v8076_v31  ;;  %7403 = vmatpush3.msra.mxu0 %v12566_v39  ;;  %v12573_v39 = vld [vmem:[#allocation38_spill] sm:$0xff] }
 0x10a   :  { %7451 = vmatpush3.msra.mxu1 %v8076_v31  ;;  %7404 = vmatprep.subr.mxu0 %v12567_v18  ;;  %v12571_v31 = vld [vmem:[#allocation35_spill] sm:$0xff] }
 0x10b   :  { %7452 = vmatprep.subr.mxu1 %v8094_v41  ;;  %7323 = vmatprep.mubr.f32.mxu0 %v8385_v54 }
 0x10c   :  { %7373 = vmatprep.mubr.f32.mxu1 %v12568_v26  ;;  %7405 = vmatpush3.msra.mxu0 %v12567_v18  ;;  %v12578_v18 = vld [vmem:[#allocation52_spill] sm:$0xff] }
 0x10d   :  { %7453 = vmatpush3.msra.mxu1 %v8094_v41  ;;  %7324 = vmatmul.mubr.f32.gmra.mxu0 %v8399_v5  ;;  %v12572_v41 = vld [vmem:[#allocation64_spill] sm:$0xff] }
 0x10e   :  { %7374 = vmatmul.mubr.f32.gmra.mxu1 %v12569_v29  ;;  %7406 = vmatprep.subr.mxu0 %v12570_v43  ;;  %v1534_v29 = vld [vmem:[#allocation5 + $0xa0] sm:$0xff] }
 0x10f   :  { %7454 = vmatprep.subr.mxu1 %v8078_v32  ;;  %7407 = vmatpush3.msra.mxu0 %v12570_v43  ;;  %v12580_v43 = vld [vmem:[#allocation86_spill] sm:$0xff] }
 0x110   :  { %7455 = vmatpush3.msra.mxu1 %v8078_v32  ;;  %7408 = vmatprep.subr.mxu0 %v12571_v31  ;;  %v12574_v32 = vld [vmem:[#allocation42_spill] sm:$0xff] }
 0x111   :  { %7456 = vmatprep.subr.mxu1 %v8096_v42  ;;  %7326 = vmatprep.mubr.f32.mxu0 %v8428_v52 }
 0x112   :  { %7376 = vmatprep.mubr.f32.mxu1 %v8367_v49  ;;  %7409 = vmatpush3.msra.mxu0 %v12571_v31  ;;  %v12584_v31 = vld [vmem:[#allocation26_spill] sm:$0xff]  ;;  %v1535_v49 = vld [vmem:[#allocation5 + $0xa8] sm:$0xff] }
 0x113   :  { %7457 = vmatpush3.msra.mxu1 %v8096_v42  ;;  %7327 = vmatmul.mubr.f32.gmra.mxu0 %v8440_v59  ;;  %v12575_v42 = vld [vmem:[#allocation44_spill] sm:$0xff] }
 0x114   :  { %7377 = vmatmul.mubr.f32.gmra.mxu1 %v12572_v41  ;;  %7410 = vmatprep.subr.mxu0 %v12573_v39 }
 0x115   :  { %7458 = vmatprep.subr.mxu1 %v8123_v55  ;;  %7411 = vmatpush3.msra.mxu0 %v12573_v39  ;;  %v12586_v39 = vld [vmem:[#allocation39_spill] sm:$0xff] }
 0x116   :  { %7459 = vmatpush3.msra.mxu1 %v8123_v55  ;;  %7412 = vmatprep.subr.mxu0 %v12574_v32  ;;  %v12576_v55 = vld [vmem:[#allocation49_spill] sm:$0xff] }
 0x117   :  { %7460 = vmatprep.subr.mxu1 %v8125_v56  ;;  %7329 = vmatprep.mubr.f32.mxu0 %v8466_v20 }
 0x118   :  { %7379 = vmatprep.mubr.f32.mxu1 %v8412_v9  ;;  %7413 = vmatpush3.msra.mxu0 %v12574_v32  ;;  %v1543_v32 = vld [vmem:[#allocation5 + $0xe8] sm:$0xff] }
 0x119   :  { %7461 = vmatpush3.msra.mxu1 %v8125_v56  ;;  %7330 = vmatmul.mubr.f32.gmra.mxu0 %v8480_v25  ;;  %v12577_v56 = vld [vmem:[#allocation81_spill] sm:$0xff] }
 0x11a   :  { %7380 = vmatmul.mubr.f32.gmra.mxu1 %v8425_v45  ;;  %7414 = vmatprep.subr.mxu0 %v12575_v42 }
 0x11b   :  { %7462 = vmatprep.subr.mxu1 %v8155_v7  ;;  %7415 = vmatpush3.msra.mxu0 %v12575_v42 }
 0x11c   :  { %7463 = vmatpush3.msra.mxu1 %v8155_v7  ;;  %7416 = vmatprep.subr.mxu0 %v12576_v55  ;;  %v12579_v7 = vld [vmem:[#allocation54_spill] sm:$0xff] }
 0x11d   :  { %7464 = vmatprep.subr.mxu1 %v8157_v8  ;;  %7332 = vmatprep.mubr.f32.mxu0 %v8508_v35 }
 0x11e   :  { %7382 = vmatprep.mubr.f32.mxu1 %v8450_v58  ;;  %7417 = vmatpush3.msra.mxu0 %v12576_v55  ;;  %v8767_v55 = vand.u32 4294901760, %v1543_v32 }
 0x11f   :  { %7465 = vmatpush3.msra.mxu1 %v8157_v8  ;;  %7333 = vmatmul.mubr.f32.gmra.mxu0 %v8522_v38  ;;  %v12581_v8 = vld [vmem:[#allocation60_spill] sm:$0xff] }
 0x120   :  { %7383 = vmatmul.mubr.f32.gmra.mxu1 %v12577_v56  ;;  %7418 = vmatprep.subr.mxu0 %v12578_v18 }
 0x121   :  { %7466 = vmatprep.subr.mxu1 %v8188_v30  ;;  %7419 = vmatpush3.msra.mxu0 %v12578_v18  ;;  %v1542_v18 = vld [vmem:[#allocation5 + $0xe0] sm:$0xff] }
 0x122   :  { %7467 = vmatpush3.msra.mxu1 %v8188_v30  ;;  %7420 = vmatprep.subr.mxu0 %v12579_v7  ;;  %v12582_v30 = vld [vmem:[#allocation63_spill] sm:$0xff] }
 0x123   :  { %7468 = vmatprep.subr.mxu1 %v8190_v36  ;;  %7335 = vmatprep.mubr.f32.mxu0 %v8547_v6 }
 0x124   :  { %7385 = vmatprep.mubr.f32.mxu1 %v12580_v43  ;;  %7421 = vmatpush3.msra.mxu0 %v12579_v7  ;;  %v1537_v43 = vld [vmem:[#allocation5 + $0xb8] sm:$0xff] }
 0x125   :  { %7469 = vmatpush3.msra.mxu1 %v8190_v36  ;;  %7336 = vmatmul.mubr.f32.gmra.mxu0 %v8558_v28  ;;  %v12583_v36 = vld [vmem:[#allocation12_spill] sm:$0xff]  ;;  %v1539_v28 = vld [vmem:[#allocation5 + $0xc8] sm:$0xff]  ;;  %v8830_v52 = vand.u32 4294901760, %v1537_v43 }
 0x126   :  { %7386 = vmatmul.mubr.f32.gmra.mxu1 %v8505_v12  ;;  %7422 = vmatprep.subr.mxu0 %v12581_v8  ;;  %v8797_v56 = vand.u32 4294901760, %v1539_v28 }
 0x127   :  { %7470 = vmatprep.subr.mxu1 %v8228_v13  ;;  %7423 = vmatpush3.msra.mxu0 %v12581_v8  ;;  %v8773_v8 = vand.u32 4294901760, %v1542_v18  ;;  %v8842_v54 = vsub.f32 %v1537_v43, %v8830_v52 }
 0x128   :  { %7471 = vmatpush3.msra.mxu1 %v8228_v13  ;;  %7424 = vmatprep.subr.mxu0 %v12582_v30  ;;  %v12585_v13 = vld [vmem:[#allocation37_spill] sm:$0xff]  ;;  %v8815_v20 = vsub.f32 %v1539_v28, %v8797_v56 }
 0x129   :  { %7472 = vmatprep.subr.mxu1 %v8230_v21  ;;  %7388 = vmatprep.mubr.f32.mxu1 %v8533_v63  ;;  %v1538_v63 = vld [vmem:[#allocation5 + $0xc0] sm:$0xff]  ;;  %12597 = vst [vmem:[#allocation38_spill] sm:$0xff] %v8842_v54  ;;  %v12030_v16 = vand.u32 4294901760, %v8842_v54 }
 0x12a   :  { %7425 = vmatpush3.msra.mxu0 %v12582_v30  ;;  %7426 = vmatprep.mubr.f32.mxu0 %v12583_v36  ;;  %v1541_v30 = vld [vmem:[#allocation5 + $0xd8] sm:$0xff]  ;;  %12595 = vst [vmem:[#allocation32_spill] sm:$0xff] %v8815_v20 }
 0x12b   :  { %7473 = vmatpush3.msra.mxu1 %v8230_v21  ;;  %7427 = vmatmul.mubr.f32.vlgmr.msra.gmra.mxu0 %v12584_v31  ;;  %v12587_v21 = vld [vmem:[#allocation46_spill] sm:$0xff] }
 0x12c   :  { %7389 = vmatmul.mubr.f32.gmra.mxu1 %v8544_v50  ;;  %7474 = vmatprep.subr.mxu1 %v8268_v3  ;;  %v1540_v50 = vld [vmem:[#allocation5 + $0xd0] sm:$0xff] }
 0x12d   :  { %7391 = vmatprep.mubr.f32.mxu1 %v8567_v53  ;;  %7475 = vmatpush3.msra.mxu1 %v8268_v3  ;;  %v1544_v3 = vld [vmem:[#allocation5 + $0xf0] sm:$0xff]  ;;  %v8778_v53 = vsub.f32 %v1543_v32, %v8767_v55  ;;  %v8787_v12 = vand.u32 4294901760, %v1540_v50 }
 0x12e   :  { %7429 = vmatprep.mubr.f32.mxu0 %v12585_v13  ;;  %7476 = vmatprep.subr.mxu1 %v8282_v11 }
 0x12f   :  { %7477 = vmatpush3.msra.mxu1 %v8282_v11  ;;  %7430 = vmatmul.mubr.f32.gmra.mxu0 %v12586_v39  ;;  %v1545_v11 = vld [vmem:[#allocation5 + $0xf8] sm:$0xff]  ;;  %v8805_v35 = vsub.f32 %v1540_v50, %v8787_v12  ;;  %v12594_v45 = vand.u32 4294901760, %v8778_v53 }
 0x130   :  { %7392 = vmatmul.mubr.f32.gmra.mxu1 %v8576_v17  ;;  %7478 = vmatprep.subr.mxu1 %v12561_v24 }
 0x131   :  { %7479 = vmatpush3.msra.mxu1 %v12561_v24  ;;  %7432 = vmatprep.mubr.f32.mxu0 %v12587_v21  ;;  %v8762_v24 = vand.u32 4294901760, %v1544_v3  ;;  %12593 = vst [vmem:[#allocation30_spill] sm:$0xff] %v8805_v35  ;;  %v1846_v25 = vsub.f32 %v8778_v53, %v12594_v45  ;;  %v12025_v59 = vand.u32 4294901760, %v8805_v35 }
 0x132   :  { %7480 = vmatprep.subr.mxu1 %v8310_v37  ;;  %7482 = vmatprep.mubr.f32.mxu1 %v12583_v36  ;;  %v1518_v36 = vld [vmem:[#allocation5 + $0x20] sm:$0xff] }
 0x133   :  { %7481 = vmatpush3.msra.mxu1 %v8310_v37  ;;  %7433 = vmatmul.mubr.f32.gmra.mxu0 %v8306_v51  ;;  %v8760_v37 = vand.u32 4294901760, %v1545_v11  ;;  %v8771_v7 = vsub.f32 %v1544_v3, %v8762_v24  ;;  %v8785_v3 = vsub.f32 %v1542_v18, %v8773_v8  ;;  %v1847_v45 = vand.u32 4294901760, %v1846_v25  ;;  %v1533_v25 = vld [vmem:[#allocation5 + $0x98] sm:$0xff] }
 0x134   :  { %7483 = vmatmul.mubr.f32.vlgmr.msra.gmra.mxu1 %v12584_v31  ;;  %7435 = vmatprep.mubr.f32.mxu0 %v8350_v14 }
 0x135   :  { %7485 = vmatprep.mubr.f32.mxu1 %v12585_v13  ;;  %12588 = vst [vmem:[#allocation51_spill] sm:$0xff] %v8760_v37  ;;  %v8765_v42 = vsub.f32 %v1545_v11, %v8760_v37  ;;  %1559 = vmatprep.subr.mxu0 %v8760_v37  ;;  %v8780_v11 = vand.u32 4294901760, %v1541_v30  ;;  %12590 = vst [vmem:[#allocation25_spill] sm:$0xff] %v8785_v3  ;;  %v12592_v18 = vand.u32 4294901760, %v8771_v7  ;;  %v12021_v58 = vand.u32 4294901760, %v8785_v3  ;;  %v1519_v13 = vld [vmem:[#allocation5 + $0x28] sm:$0xff] }
 0x136   :  { %1561 = vmatpush1.msra.mxu0 %v8762_v24 }
 0x137   :  { %7436 = vmatmul.mubr.f32.gmra.mxu0 %v8369_v61  ;;  %12589 = vst [vmem:[#allocation22_spill] sm:$0xff] %v8765_v42  ;;  %v12013_v17 = vand.u32 4294901760, %v8765_v42  ;;  %1563 = vmatprep.subr.mxu0 %v8767_v55  ;;  %v8795_v6 = vsub.f32 %v1541_v30, %v8780_v11  ;;  %v1840_v38 = vsub.f32 %v8771_v7, %v12592_v18  ;;  %v1536_v18 = vld [vmem:[#allocation5 + $0xb0] sm:$0xff] }
 0x138   :  { %7486 = vmatmul.mubr.f32.gmra.mxu1 %v12586_v39  ;;  %7438 = vmatprep.mubr.f32.mxu0 %v8401_v23  ;;  %v1852_v41 = vsub.f32 %v8785_v3, %v12021_v58  ;;  %v8836_v26 = vand.u32 4294901760, %v1536_v18 }
 0x139   :  { %7488 = vmatprep.mubr.f32.mxu1 %v12587_v21  ;;  %1565 = vmatpush1.msra.mxu0 %v8773_v8  ;;  %v1834_v32 = vsub.f32 %v8765_v42, %v12013_v17  ;;  %12591 = vst [vmem:[#allocation27_spill] sm:$0xff] %v8795_v6  ;;  %v8807_v17 = vand.u32 4294901760, %v1538_v63  ;;  %v12023_v9 = vand.u32 4294901760, %v8795_v6  ;;  %v1841_v50 = vand.u32 4294901760, %v1840_v38 }
 0x13a   :  { %1567 = vmatprep.subr.mxu0 %v8780_v11  ;;  %v12026_v38 = vand.u32 4294901760, %v8815_v20  ;;  %v1853_v58 = vand.u32 4294901760, %v1852_v41  ;;  %v1532_v41 = vld [vmem:[#allocation5 + $0x90] sm:$0xff] }
 0x13b   :  { %7439 = vmatmul.mubr.f32.gmra.mxu0 %v8414_v40  ;;  %v1835_v30 = vand.u32 4294901760, %v1834_v32  ;;  %v8823_v32 = vsub.f32 %v1538_v63, %v8807_v17  ;;  %v1858_v28 = vsub.f32 %v8795_v6, %v12023_v9  ;;  %v1864_v63 = vsub.f32 %v8805_v35, %v12025_v59 }
 0x13c   :  { %7489 = vmatmul.mubr.f32.gmra.mxu1 %v8306_v51  ;;  %7441 = vmatprep.mubr.f32.mxu0 %v8442_v2  ;;  %v1870_v9 = vsub.f32 %v8815_v20, %v12026_v38  ;;  %v1531_v38 = vld [vmem:[#allocation5 + $0x88] sm:$0xff]  ;;  %v8867_v44 = vand.u32 4294901760, %v1532_v41 }
 0x13d   :  { %7491 = vmatprep.mubr.f32.mxu1 %v8350_v14  ;;  %1569 = vmatpush1.msra.mxu0 %v8787_v12  ;;  %12596 = vst [vmem:[#allocation35_spill] sm:$0xff] %v8823_v32  ;;  %v12028_v5 = vand.u32 4294901760, %v8823_v32  ;;  %v1865_v59 = vand.u32 4294901760, %v1864_v63  ;;  %v1530_v63 = vld [vmem:[#allocation5 + $0x80] sm:$0xff] }
 0x13e   :  { %1571 = vmatprep.subr.mxu0 %v8797_v56  ;;  %1836 = vmatprep.subr.mxu1 %v1835_v30  ;;  %v1859_v30 = vand.u32 4294901760, %v1858_v28  ;;  %v8853_v28 = vand.u32 4294901760, %v1534_v29  ;;  %v1871_v43 = vand.u32 4294901760, %v1870_v9  ;;  %12604 = vst [vmem:[#allocation63_spill] sm:$0xff] %v8867_v44  ;;  %v1882_v9 = vsub.f32 %v8842_v54, %v12030_v16 }
 0x13f   :  { %7442 = vmatmul.mubr.f32.gmra.mxu0 %v8452_v22  ;;  %1842 = vmatpush1.msra.mxu1 %v1841_v50  ;;  %v8844_v50 = vand.u32 4294901760, %v1535_v49  ;;  %v1876_v4 = vsub.f32 %v8823_v32, %v12028_v5  ;;  %v8887_v16 = vand.u32 4294901760, %v1530_v63 }
 0x140   :  { %7492 = vmatmul.mubr.f32.gmra.mxu1 %v8369_v61  ;;  %7444 = vmatprep.mubr.f32.mxu0 %v8482_v46  ;;  %12600 = vst [vmem:[#allocation49_spill] sm:$0xff] %v8853_v28  ;;  %v8865_v48 = vsub.f32 %v1534_v29, %v8853_v28 }
 0x141   :  { %7494 = vmatprep.mubr.f32.mxu1 %v8401_v23  ;;  %1573 = vmatpush1.msra.mxu0 %v8807_v17  ;;  %12598 = vst [vmem:[#allocation42_spill] sm:$0xff] %v8844_v50  ;;  %v8858_v57 = vsub.f32 %v1535_v49, %v8844_v50  ;;  %12608 = vst [vmem:[#allocation110_spill] sm:$0xff] %v8887_v16  ;;  %v1529_v49 = vld [vmem:[#allocation5 + $0x78] sm:$0xff] }
 0x142   :  { %1848 = vmatprep.subr.mxu1 %v1847_v45  ;;  %1575 = vmatprep.subr.mxu0 %v8830_v52  ;;  %v8851_v45 = vsub.f32 %v1536_v18, %v8836_v26  ;;  %v1877_v18 = vand.u32 4294901760, %v1876_v4  ;;  %12603 = vst [vmem:[#allocation60_spill] sm:$0xff] %v8865_v48  ;;  %v12045_v29 = vand.u32 4294901760, %v8865_v48 }
 0x143   :  { %7445 = vmatmul.mubr.f32.gmra.mxu0 %v8493_v62  ;;  %1854 = vmatpush1.msra.mxu1 %v1853_v58  ;;  %12601 = vst [vmem:[#allocation52_spill] sm:$0xff] %v8858_v57  ;;  %v8860_v58 = vand.u32 4294901760, %v1533_v25 }
 0x144   :  { %7495 = vmatmul.mubr.f32.gmra.mxu1 %v8414_v40  ;;  %7447 = vmatprep.mubr.f32.mxu0 %v8524_v27  ;;  %12599 = vst [vmem:[#allocation44_spill] sm:$0xff] %v8851_v45  ;;  %v12036_v5 = vand.u32 4294901760, %v8851_v45  ;;  %v1900_v15 = vsub.f32 %v8865_v48, %v12045_v29 }
 0x145   :  { %7497 = vmatprep.mubr.f32.mxu1 %v8442_v2  ;;  %1577 = vmatpush1.msra.mxu0 %v8836_v26  ;;  %12602 = vst [vmem:[#allocation54_spill] sm:$0xff] %v8860_v58 }
 0x146   :  { %1860 = vmatprep.subr.mxu1 %v1859_v30  ;;  %1579 = vmatprep.subr.mxu0 %v8844_v50  ;;  %v8875_v30 = vsub.f32 %v1533_v25, %v8860_v58  ;;  %v1888_v4 = vsub.f32 %v8851_v45, %v12036_v5  ;;  %v1883_v25 = vand.u32 4294901760, %v1882_v9  ;;  %v1528_v5 = vld [vmem:[#allocation5 + $0x70] sm:$0xff]  ;;  %v8903_v9 = vsub.f32 %v1530_v63, %v8887_v16 }
 0x147   :  { %7448 = vmatmul.mubr.f32.gmra.mxu0 %v8535_v33  ;;  %1866 = vmatpush1.msra.mxu1 %v1865_v59  ;;  %v8877_v59 = vand.u32 4294901760, %v1531_v38  ;;  %v1901_v29 = vand.u32 4294901760, %v1900_v15  ;;  %v8916_v2 = vand.u32 4294901760, %v1528_v5  ;;  %v1524_v15 = vld [vmem:[#allocation5 + $0x50] sm:$0xff] }
 0x148   :  { %7498 = vmatmul.mubr.f32.gmra.mxu1 %v8452_v22  ;;  %1581 = vmatpush1.msra.mxu0 %v8853_v28  ;;  %12605 = vst [vmem:[#allocation107_spill] sm:$0xff] %v8875_v30  ;;  %12611 = vst [vmem:[#allocation112_spill] sm:$0xff] %v8903_v9  ;;  %v1526_v22 = vld [vmem:[#allocation5 + $0x60] sm:$0xff]  ;;  %v12058_v60 = vand.u32 4294901760, %v8903_v9  ;;  %v8947_v61 = vand.u32 4294901760, %v1524_v15 }
 0x149   :  { %7500 = vmatprep.mubr.f32.mxu1 %v8482_v46  ;;  %1872 = vmatprep.subr.mxu1 %v1871_v43  ;;  %12606 = vst [vmem:[#allocation108_spill] sm:$0xff] %v8877_v59  ;;  %v8885_v43 = vsub.f32 %v1532_v41, %v8867_v44  ;;  %v1889_v41 = vand.u32 4294901760, %v1888_v4  ;;  %v8910_v46 = vand.u32 4294901760, %v1529_v49  ;;  %12613 = vst [vmem:[#allocation114_spill] sm:$0xff] %v8916_v2 }
 0x14a   :  { %1583 = vmatprep.subr.mxu0 %v8860_v58  ;;  %1878 = vmatpush1.msra.mxu1 %v1877_v18  ;;  %v12049_v18 = vand.u32 4294901760, %v8875_v30  ;;  %v1924_v40 = vsub.f32 %v8903_v9, %v12058_v60  ;;  %12621 = vst [vmem:[#allocation122_spill] sm:$0xff] %v8947_v61 }
 0x14b   :  { %12607 = vst [vmem:[#allocation109_spill] sm:$0xff] %v8885_v43  ;;  %1585 = vmatpush1.msra.mxu0 %v8867_v44  ;;  %1884 = vmatprep.subr.mxu1 %v1883_v25  ;;  %12612 = vst [vmem:[#allocation113_spill] sm:$0xff] %v8910_v46  ;;  %v8922_v34 = vsub.f32 %v1529_v49, %v8910_v46 }
 0x14c   :  { %7501 = vmatmul.mubr.f32.gmra.mxu1 %v8493_v62  ;;  %1587 = vmatprep.subr.mxu0 %v8877_v59  ;;  %v12051_v62 = vand.u32 4294901760, %v8885_v43 }
 0x14d   :  { %7503 = vmatprep.mubr.f32.mxu1 %v8524_v27  ;;  %v8895_v27 = vsub.f32 %v1531_v38, %v8877_v59  ;;  %1589 = vmatpush1.msra.mxu0 %v8887_v16  ;;  %v1906_v38 = vsub.f32 %v8875_v30, %v12049_v18  ;;  %12614 = vst [vmem:[#allocation115_spill] sm:$0xff] %v8922_v34  ;;  %v12062_v1 = vand.u32 4294901760, %v8922_v34 }
 0x14e   :  { %1890 = vmatpush1.msra.mxu1 %v1889_v41  ;;  %v1912_v63 = vsub.f32 %v8885_v43, %v12051_v62  ;;  %v8924_v41 = vand.u32 4294901760, %v1527_v19  ;;  %1591 = vmatprep.subr.mxu0 %v8910_v46 }
 0x14f   :  { %12610 = vst [vmem:[#allocation111_spill] sm:$0xff] %v8895_v27  ;;  %v12054_v4 = vand.u32 4294901760, %v8895_v27  ;;  %v1907_v25 = vand.u32 4294901760, %v1906_v38  ;;  %v8933_v38 = vand.u32 4294901760, %v1526_v22  ;;  %1593 = vmatpush1.msra.mxu0 %v8916_v2 }
 0x150   :  { %7504 = vmatmul.mubr.f32.gmra.mxu1 %v8535_v33  ;;  %v12609_v33 = vand.u32 4294901760, %v8858_v57  ;;  %12615 = vst [vmem:[#allocation116_spill] sm:$0xff] %v8924_v41  ;;  %v1913_v62 = vand.u32 4294901760, %v1912_v63  ;;  %v8938_v23 = vsub.f32 %v1527_v19, %v8924_v41  ;;  %v1522_v63 = vld [vmem:[#allocation5 + $0x40] sm:$0xff]  ;;  %1595 = vmatprep.subr.mxu0 %v8924_v41  ;;  %v1930_v19 = vsub.f32 %v8922_v34, %v12062_v1 }
 0x151   :  { %v1918_v18 = vsub.f32 %v8895_v27, %v12054_v4  ;;  %12617 = vst [vmem:[#allocation118_spill] sm:$0xff] %v8933_v38  ;;  %v1523_v4 = vld [vmem:[#allocation5 + $0x48] sm:$0xff]  ;;  %v8945_v0 = vsub.f32 %v1526_v22, %v8933_v38  ;;  %1597 = vmatpush1.msra.mxu0 %v8933_v38  ;;  %v8967_v1 = vand.u32 4294901760, %v1522_v63 }
 0x152   :  { %v1894_v10 = vsub.f32 %v8858_v57, %v12609_v33  ;;  %12618 = vst [vmem:[#allocation119_spill] sm:$0xff] %v8938_v23  ;;  %v12626_v14 = vand.u32 4294901760, %v8938_v23 }
 0x153   :  { %v1919_v49 = vand.u32 4294901760, %v1918_v18  ;;  %12620 = vst [vmem:[#allocation121_spill] sm:$0xff] %v8945_v0  ;;  %v12074_v22 = vand.u32 4294901760, %v8945_v0  ;;  %12625 = vst [vmem:[#allocation126_spill] sm:$0xff] %v8967_v1  ;;  %v1521_v18 = vld [vmem:[#allocation5 + $0x38] sm:$0xff] }
 0x154   :  { %v1895_v33 = vand.u32 4294901760, %v1894_v10  ;;  %v1525_v10 = vld [vmem:[#allocation5 + $0x58] sm:$0xff]  ;;  %v1942_v47 = vsub.f32 %v8938_v23, %v12626_v14  ;;  %v8990_v31 = vand.u32 4294901760, %v1521_v18 }
 0x155   :  { %v1948_v21 = vsub.f32 %v8945_v0, %v12074_v22 }
 0x156   :  { %1896 = vmatprep.subr.mxu1 %v1895_v33  ;;  %v8931_v33 = vsub.f32 %v1528_v5, %v8916_v2  ;;  %v1925_v5 = vand.u32 4294901760, %v1924_v40  ;;  %v1943_v14 = vand.u32 4294901760, %v1942_v47  ;;  %12629 = vst [vmem:[#allocation129_spill] sm:$0xff] %v8990_v31  ;;  %v1517_v47 = vld [vmem:[#allocation5 + $0x18] sm:$0xff] }
 0x157   :  { %1902 = vmatpush1.msra.mxu1 %v1901_v29  ;;  %v8940_v29 = vand.u32 4294901760, %v1525_v10  ;;  %v1949_v22 = vand.u32 4294901760, %v1948_v21  ;;  %v1516_v21 = vld [vmem:[#allocation5 + $0x10] sm:$0xff] }
 0x158   :  { %12616 = vst [vmem:[#allocation117_spill] sm:$0xff] %v8931_v33  ;;  %1908 = vmatprep.subr.mxu1 %v1907_v25  ;;  %v12068_v60 = vand.u32 4294901760, %v8931_v33 }
 0x159   :  { %12619 = vst [vmem:[#allocation120_spill] sm:$0xff] %v8940_v29  ;;  %1914 = vmatpush1.msra.mxu1 %v1913_v62  ;;  %v8955_v25 = vsub.f32 %v1525_v10, %v8940_v29  ;;  %v8957_v62 = vand.u32 4294901760, %v1523_v4  ;;  %1599 = vmatprep.subr.mxu0 %v8940_v29  ;;  %v1931_v10 = vand.u32 4294901760, %v1930_v19  ;;  %v8983_v19 = vsub.f32 %v1522_v63, %v8967_v1 }
 0x15a   :  { %1920 = vmatprep.subr.mxu1 %v1919_v49  ;;  %v1936_v40 = vsub.f32 %v8931_v33, %v12068_v60  ;;  %v8965_v49 = vsub.f32 %v1524_v15, %v8947_v61  ;;  %1601 = vmatpush1.msra.mxu0 %v8947_v61  ;;  %v1520_v60 = vld [vmem:[#allocation5 + $0x30] sm:$0xff] }
 0x15b   :  { %12622 = vst [vmem:[#allocation123_spill] sm:$0xff] %v8955_v25  ;;  %12623 = vst [vmem:[#allocation124_spill] sm:$0xff] %v8957_v62  ;;  %1926 = vmatpush1.msra.mxu1 %v1925_v5  ;;  %v12079_v5 = vand.u32 4294901760, %v8955_v25  ;;  %v8975_v51 = vsub.f32 %v1523_v4, %v8957_v62  ;;  %1603 = vmatprep.subr.mxu0 %v8957_v62  ;;  %v12090_v0 = vand.u32 4294901760, %v8983_v19  ;;  %v8996_v23 = vand.u32 4294901760, %v1520_v60 }
 0x15c   :  { %12624 = vst [vmem:[#allocation125_spill] sm:$0xff] %v8965_v49  ;;  %v1937_v15 = vand.u32 4294901760, %v1936_v40  ;;  %v12082_v39 = vand.u32 4294901760, %v8965_v49  ;;  %12628 = vst [vmem:[#allocation128_spill] sm:$0xff] %v8983_v19  ;;  %1605 = vmatpush1.msra.mxu0 %v8967_v1  ;;  %1932 = vmatprep.subr.mxu1 %v1931_v10 }
 0x15d   :  { %12627 = vst [vmem:[#allocation127_spill] sm:$0xff] %v8975_v51  ;;  %v1954_v4 = vsub.f32 %v8955_v25, %v12079_v5  ;;  %v12085_v40 = vand.u32 4294901760, %v8975_v51  ;;  %12630 = vst [vmem:[#allocation130_spill] sm:$0xff] %v8996_v23  ;;  %v9002_v25 = vsub.f32 %v1521_v18, %v8990_v31  ;;  %1607 = vmatprep.subr.mxu0 %v8990_v31 }
 0x15e   :  { %1938 = vmatpush1.msra.mxu1 %v1937_v15  ;;  %v1960_v63 = vsub.f32 %v8965_v49, %v12082_v39  ;;  %v9004_v15 = vand.u32 4294901760, %v1519_v13  ;;  %v1972_v49 = vsub.f32 %v8983_v19, %v12090_v0  ;;  %1609 = vmatpush1.msra.mxu0 %v8996_v23 }
 0x15f   :  { %1944 = vmatprep.subr.mxu1 %v1943_v14  ;;  %v1955_v10 = vand.u32 4294901760, %v1954_v4  ;;  %v1966_v5 = vsub.f32 %v8975_v51, %v12085_v40  ;;  %12631 = vst [vmem:[#allocation131_spill] sm:$0xff] %v9002_v25  ;;  %v9011_v14 = vsub.f32 %v1520_v60, %v8996_v23  ;;  %v9013_v4 = vand.u32 4294901760, %v1518_v36  ;;  %v1515_v40 = vld [vmem:[#allocation5 + $0x8] sm:$0xff] }
 0x160   :  { %12632 = vst [vmem:[#allocation132_spill] sm:$0xff] %v9004_v15  ;;  %1950 = vmatpush1.msra.mxu1 %v1949_v22  ;;  %v1961_v39 = vand.u32 4294901760, %v1960_v63  ;;  %v12095_v51 = vand.u32 4294901760, %v9002_v25  ;;  %v9018_v33 = vsub.f32 %v1519_v13, %v9004_v15  ;;  %v9020_v22 = vand.u32 4294901760, %v1517_v47  ;;  %v1514_v63 = vld [vmem:[#allocation5] sm:$0xff]  ;;  %1611 = vmatprep.subr.mxu0 %v9004_v15 }
 0x161   :  { %12633 = vst [vmem:[#allocation133_spill] sm:$0xff] %v9011_v14  ;;  %12634 = vst [vmem:[#allocation134_spill] sm:$0xff] %v9013_v4  ;;  %1956 = vmatprep.subr.mxu1 %v1955_v10  ;;  %v1967_v18 = vand.u32 4294901760, %v1966_v5  ;;  %v1973_v60 = vand.u32 4294901760, %v1972_v49  ;;  %v12100_v0 = vand.u32 4294901760, %v9011_v14  ;;  %v9025_v19 = vsub.f32 %v1518_v36, %v9013_v4  ;;  %1613 = vmatpush1.msra.mxu0 %v9013_v4 }
 0x162   :  { %12635 = vst [vmem:[#allocation135_spill] sm:$0xff] %v9018_v33  ;;  %12636 = vst [vmem:[#allocation136_spill] sm:$0xff] %v9020_v22  ;;  %1962 = vmatpush1.msra.mxu1 %v1961_v39  ;;  %v9027_v23 = vand.u32 4294901760, %v1516_v21  ;;  %v1978_v13 = vsub.f32 %v9002_v25, %v12095_v51  ;;  %v12103_v5 = vand.u32 4294901760, %v9018_v33  ;;  %v9035_v10 = vsub.f32 %v1517_v47, %v9020_v22 }
 0x163   :  { %12637 = vst [vmem:[#allocation137_spill] sm:$0xff] %v9025_v19  ;;  %1968 = vmatprep.subr.mxu1 %v1967_v18  ;;  %v9037_v39 = vand.u32 4294901760, %v1515_v40  ;;  %1615 = vmatprep.subr.mxu0 %v9020_v22  ;;  %v1984_v36 = vsub.f32 %v9011_v14, %v12100_v0  ;;  %v12106_v49 = vand.u32 4294901760, %v9025_v19  ;;  %v9047_v51 = vand.u32 4294901760, %v1514_v63 }
 0x164   :  { %12638 = vst [vmem:[#allocation138_spill] sm:$0xff] %v9027_v23  ;;  %12639 = vst [vmem:[#allocation139_spill] sm:$0xff] %v9035_v10  ;;  %1974 = vmatpush1.msra.mxu1 %v1973_v60  ;;  %v9045_v18 = vsub.f32 %v1516_v21, %v9027_v23  ;;  %1617 = vmatpush1.msra.mxu0 %v9027_v23  ;;  %v1979_v47 = vand.u32 4294901760, %v1978_v13  ;;  %v1990_v25 = vsub.f32 %v9018_v33, %v12103_v5 }
 0x165   :  { %12640 = vst [vmem:[#allocation140_spill] sm:$0xff] %v9037_v39  ;;  %12642 = vst [vmem:[#allocation142_spill] sm:$0xff] %v9047_v51  ;;  %v12110_v60 = vand.u32 4294901760, %v9035_v10  ;;  %v9055_v22 = vsub.f32 %v1515_v40, %v9037_v39  ;;  %1619 = vmatprep.subr.mxu0 %v9037_v39  ;;  %v1985_v0 = vand.u32 4294901760, %v1984_v36  ;;  %v1996_v21 = vsub.f32 %v9025_v19, %v12106_v49 }
 0x166   :  { %12641 = vst [vmem:[#allocation141_spill] sm:$0xff] %v9045_v18  ;;  %v12109_v14 = vand.u32 4294901760, %v9045_v18  ;;  %v9063_v13 = vsub.f32 %v1514_v63, %v9047_v51  ;;  %1621 = vmatpush1.msra.mxu0 %v9047_v51  ;;  %1980 = vmatprep.subr.mxu1 %v1979_v47  ;;  %v1991_v5 = vand.u32 4294901760, %v1990_v25  ;;  %v12112_v19 = vmov 0.0  }
 0x167   :  { %12643 = vst [vmem:[#allocation143_spill] sm:$0xff] %v9055_v22  ;;  %v2002_v40 = vsub.f32 %v9035_v10, %v12110_v60  ;;  %v12111_v33 = vand.u32 4294901760, %v9055_v22  ;;  %2170 = vmatprep.subr.mxu0 %v8765_v42  ;;  %1986 = vmatpush1.msra.mxu1 %v1985_v0  ;;  %v1997_v36 = vand.u32 4294901760, %v1996_v21 }
 0x168   :  { %12644 = vst [vmem:[#allocation144_spill] sm:$0xff] %v9063_v13  ;;  %v2008_v49 = vsub.f32 %v9045_v18, %v12109_v14  ;;  %v12115_v63 = vand.u32 4294901760, %v9063_v13  ;;  %2055 = vmatprep.mubr.f32.mxu1 %v12112_v19  ;;  %1992 = vmatprep.subr.mxu1 %v1991_v5 }
 0x169   :  { %v2003_v25 = vand.u32 4294901760, %v2002_v40  ;;  %v2014_v47 = vsub.f32 %v9055_v22, %v12111_v33  ;;  %1654 = vmatprep.mubr.f32.mxu0 %v12112_v19  ;;  %1998 = vmatpush1.msra.mxu1 %v1997_v36 }
 0x16a   :  { %v2009_v0 = vand.u32 4294901760, %v2008_v49  ;;  %v2020_v21 = vsub.f32 %v9063_v13, %v12115_v63 }
 0x16b   :  { %2004 = vmatprep.subr.mxu1 %v2003_v25  ;;  %v2015_v14 = vand.u32 4294901760, %v2014_v47 }
 0x16c   :  { %2010 = vmatpush1.msra.mxu1 %v2009_v0  ;;  %v2021_v60 = vand.u32 4294901760, %v2020_v21 }
 0x16d   :  { %2016 = vmatprep.subr.mxu1 %v2015_v14 }
 0x16e   :  { %2022 = vmatpush1.msra.mxu1 %v2021_v60 }
 0x16f   :  { %2426 = vmatprep.subr.mxu1 %v8760_v37 }
 0x18d   :  { %v9084_v5 = vpop.f32.mrf.mxu0 }
 0x18f   :  { %v9086_v40 = vpop.f32.mrf.mxu0 }
 0x193   :  { %v7207_v33 = vpop.f32.mrf.mxu0 }
 0x195   :  { %v9088_v19 = vpop.f32.mrf.mxu0 }
 0x197   :  { %v9090_v36 = vpop.f32.mrf.mxu1 }
 0x198   :  { %v7210_v49 = vpop.f32.mrf.mxu0 }
 0x199   :  { %v9094_v25 = vpop.f32.mrf.mxu1 }
 0x19a   :  { %v9092_v42 = vpop.f32.mrf.mxu0 }
 0x19d   :  { %v7213_v47 = vpop.f32.mrf.mxu0 }
 0x19e   :  { %v7263_v0 = vpop.f32.mrf.mxu1 }
 0x19f   :  { %v9096_v14 = vadd.f32 %v7263_v0, %v7207_v33  ;;  %v9098_v60 = vpop.f32.mrf.mxu0 }
 0x1a0   :  { %v9100_v21 = vpop.f32.mrf.mxu1 }
 0x1a3   :  { %v7216_v63 = vpop.f32.mrf.mxu0 }
 0x1a4   :  { %v7266_v13 = vpop.f32.mrf.mxu1 }
 0x1a5   :  { %v9102_v22 = vadd.f32 %v7266_v13, %v7210_v49  ;;  %v9104_v18 = vpop.f32.mrf.mxu0 }
 0x1a6   :  { %v9106_v10 = vpop.f32.mrf.mxu1 }
 0x1a9   :  { %v7219_v37 = vpop.f32.mrf.mxu0 }
 0x1aa   :  { %v7269_v51 = vpop.f32.mrf.mxu1 }
 0x1ab   :  { %v9108_v39 = vadd.f32 %v7269_v51, %v7213_v47  ;;  %v9110_v23 = vpop.f32.mrf.mxu0 }
 0x1ac   :  { %v9112_v33 = vpop.f32.mrf.mxu1 }
 0x1af   :  { %v7222_v0 = vpop.f32.mrf.mxu0 }
 0x1b0   :  { %v7272_v4 = vpop.f32.mrf.mxu1 }
 0x1b1   :  { %v9114_v15 = vadd.f32 %v7272_v4, %v7216_v63  ;;  %v9116_v31 = vpop.f32.mrf.mxu0 }
 0x1b2   :  { %12645 = vst [vmem:[#allocation145_spill] sm:$0xff] %v9116_v31  ;;  %v9118_v13 = vpop.f32.mrf.mxu1 }
 0x1b5   :  { %v7225_v49 = vpop.f32.mrf.mxu0 }
 0x1b6   :  { %v7275_v34 = vpop.f32.mrf.mxu1 }
 0x1b7   :  { %v9120_v1 = vadd.f32 %v7275_v34, %v7219_v37  ;;  %v9122_v9 = vpop.f32.mrf.mxu0 }
 0x1b8   :  { %12647 = vst [vmem:[#allocation147_spill] sm:$0xff] %v9122_v9  ;;  %v9124_v51 = vpop.f32.mrf.mxu1 }
 0x1b9   :  { %12646 = vst [vmem:[#allocation146_spill] sm:$0xff] %v9120_v1 }
 0x1bb   :  { %v7316_v62 = vpop.f32.mrf.mxu0 }
 0x1bc   :  { %v7278_v47 = vpop.f32.mrf.mxu1 }
 0x1bd   :  { %v9126_v27 = vadd.f32 %v7278_v47, %v7222_v0  ;;  %v794_v4 = vpop.f32.mrf.mxu0 }
 0x1be   :  { %v9128_v61 = vpop.f32.mrf.mxu1 }
 0x1bf   :  { %12648 = vst [vmem:[#allocation148_spill] sm:$0xff] %v9126_v27  ;;  %12649 = vst [vmem:[#allocation149_spill] sm:$0xff] %v9128_v61 }
 0x1c1   :  { %v7281_v63 = vpop.f32.mrf.mxu1 }
 0x1c2   :  { %v7319_v43 = vpop.f32.mrf.mxu0  ;;  %v9130_v29 = vadd.f32 %v7281_v63, %v7225_v49 }
 0x1c3   :  { %v9132_v30 = vpop.f32.mrf.mxu1 }
 0x1c4   :  { %12650 = vst [vmem:[#allocation150_spill] sm:$0xff] %v9130_v29  ;;  %12651 = vst [vmem:[#allocation151_spill] sm:$0xff] %v9132_v30  ;;  %v808_v38 = vpop.f32.mrf.mxu0 }
 0x1c7   :  { %v7372_v37 = vpop.f32.mrf.mxu1 }
 0x1c8   :  { %v7322_v34 = vpop.f32.mrf.mxu0 }
 0x1c9   :  { %v988_v41 = vpop.f32.mrf.mxu1 }
 0x1ca   :  { %v822_v48 = vpop.f32.mrf.mxu0 }
 0x1cd   :  { %v9134_v9 = vpop.f32.mrf.mxu0 }
 0x1ce   :  { %v7375_v57 = vpop.f32.mrf.mxu1 }
 0x1cf   :  { %v9136_v2 = vpop.f32.mrf.mxu0 }
 0x1d0   :  { %v1004_v0 = vpop.f32.mrf.mxu1 }
 0x1d3   :  { %v9138_v47 = vpop.f32.mrf.mxu0 }
 0x1d4   :  { %v7378_v45 = vpop.f32.mrf.mxu1 }
 0x1d5   :  { %v9140_v46 = vpop.f32.mrf.mxu0 }
 0x1d6   :  { %v1020_v49 = vpop.f32.mrf.mxu1 }
 0x1d9   :  { %v9142_v63 = vpop.f32.mrf.mxu0 }
 0x1da   :  { %12652 = vst [vmem:[#allocation152_spill] sm:$0xff] %v9142_v63  ;;  %v9144_v29 = vpop.f32.mrf.mxu1 }
 0x1db   :  { %v9146_v30 = vpop.f32.mrf.mxu0 }
 0x1dc   :  { %12653 = vst [vmem:[#allocation153_spill] sm:$0xff] %v9146_v30  ;;  %v9148_v27 = vpop.f32.mrf.mxu1 }
 0x1df   :  { %v9150_v54 = vpop.f32.mrf.mxu0 }
 0x1e0   :  { %12654 = vst [vmem:[#allocation154_spill] sm:$0xff] %v9150_v54  ;;  %v9152_v16 = vpop.f32.mrf.mxu1  ;;  %v607_v54 = vadd.f32 %v9090_v36, %v9084_v5  ;;  %v816_v5 = vadd.f32 %v7319_v43, %v9096_v14  ;;  %v830_v43 = vadd.f32 %v7322_v34, %v9102_v22  ;;  %v12669_v22 = vld [vmem:[#allocation40_spill] sm:$0xff] }
 0x1e1   :  { %12655 = vst [vmem:[#allocation155_spill] sm:$0xff] %v9152_v16  ;;  %v9154_v32 = vpop.f32.mrf.mxu0 }
 0x1e2   :  { %12656 = vst [vmem:[#allocation156_spill] sm:$0xff] %v9154_v32  ;;  %v9156_v59 = vpop.f32.mrf.mxu1  ;;  %v601_v32 = vadd.f32 %v9094_v25, %v9086_v40  ;;  %v802_v6 = vadd.f32 %v7316_v62, %v607_v54  ;;  %v1013_v40 = vadd.f32 %v7375_v57, %v816_v5 }
 0x1e5   :  { %v9158_v61 = vpop.f32.mrf.mxu0 }
 0x1e6   :  { %12657 = vst [vmem:[#allocation157_spill] sm:$0xff] %v9158_v61  ;;  %v9160_v31 = vpop.f32.mrf.mxu1 }
 0x1e7   :  { %12658 = vst [vmem:[#allocation158_spill] sm:$0xff] %v9160_v31  ;;  %v9162_v20 = vpop.f32.mrf.mxu0  ;;  %v795_v31 = vadd.f32 %v794_v4, %v601_v32  ;;  %v12665_v4 = vld [vmem:[#allocation47_spill] sm:$0xff] }
 0x1e8   :  { %12659 = vst [vmem:[#allocation159_spill] sm:$0xff] %v9162_v20  ;;  %v9164_v44 = vpop.f32.mrf.mxu1  ;;  %v997_v20 = vadd.f32 %v7372_v37, %v802_v6 }
 0x1e9   :  { %12660 = vst [vmem:[#allocation160_spill] sm:$0xff] %v9164_v44  ;;  %v989_v36 = vadd.f32 %v988_v41, %v795_v31 }
 0x1eb   :  { %v7428_v58 = vpop.f32.mrf.mxu0 }
 0x1ec   :  { %v9166_v35 = vpop.f32.mrf.mxu1 }
 0x1ed   :  { %12661 = vst [vmem:[#allocation161_spill] sm:$0xff] %v9166_v35  ;;  %v1227_v1 = vpop.f32.mrf.mxu0  ;;  %v613_v35 = vadd.f32 %v9100_v21, %v9088_v19  ;;  %v625_v19 = vadd.f32 %v9106_v10, %v9092_v42 }
 0x1ee   :  { %v9170_v63 = vpop.f32.mrf.mxu1  ;;  %v1228_v54 = vadd.f32 %v1227_v1, %v989_v36 }
 0x1ef   :  { %12662 = vst [vmem:[#allocation162_spill] sm:$0xff] %v9170_v63  ;;  %v7431_v61 = vpop.f32.mrf.mxu0  ;;  %v1234_v63 = vadd.f32 %v7428_v58, %v997_v20  ;;  %v809_v16 = vadd.f32 %v808_v38, %v613_v35  ;;  %v12667_v35 = vld [vmem:[#allocation48_spill] sm:$0xff] }
 0x1f0   :  { %v9174_v28 = vpop.f32.mrf.mxu1  ;;  %v1246_v6 = vadd.f32 %v7431_v61, %v1013_v40  ;;  %v1029_v61 = vadd.f32 %v7378_v45, %v830_v43  ;;  %v12675_v43 = vld [vmem:[#allocation34_spill] sm:$0xff] }
 0x1f1   :  { %12663 = vst [vmem:[#allocation163_spill] sm:$0xff] %v9174_v28  ;;  %v1239_v30 = vpop.f32.mrf.mxu0  ;;  %v1005_v32 = vadd.f32 %v1004_v0, %v809_v16  ;;  %v823_v16 = vadd.f32 %v822_v48, %v625_v19  ;;  %v12670_v48 = vld [vmem:[#allocation41_spill] sm:$0xff] }
 0x1f2   :  { %v9176_v44 = vpop.f32.mrf.mxu1 }
 0x1f3   :  { %12664 = vst [vmem:[#allocation164_spill] sm:$0xff] %v9176_v44  ;;  %v7434_v3 = vpop.f32.mrf.mxu0  ;;  %v1240_v20 = vadd.f32 %v1239_v30, %v1005_v32  ;;  %v1021_v14 = vadd.f32 %v1020_v49, %v823_v16 }
 0x1f4   :  { %v7484_v50 = vpop.f32.mrf.mxu1  ;;  %v1258_v21 = vadd.f32 %v7434_v3, %v1029_v61  ;;  %v12672_v3 = vmov 0.0  }
 0x1f5   :  { %v1411_v62 = vadd.f32 %v7484_v50, %v1234_v63  ;;  %v1251_v25 = vpop.f32.mrf.mxu0  ;;  %v637_v50 = vadd.f32 %v9112_v33, %v9098_v60  ;;  %v844_v60 = vadd.f32 %v9134_v9, %v9108_v39  ;;  %v649_v9 = vadd.f32 %v9118_v13, %v9104_v18  ;;  %v12674_v13 = vld [vmem:[#allocation33_spill] sm:$0xff] }
 0x1f6   :  { %v1404_v28 = vpop.f32.mrf.mxu1  ;;  %v1252_v33 = vadd.f32 %v1251_v25, %v1021_v14  ;;  %v858_v14 = vadd.f32 %v9138_v47, %v9114_v15 }
 0x1f7   :  { %v1499_v37 = vmul.f32 %v1411_v62, %v12665_v4  ;;  %v1405_v44 = vadd.f32 %v1404_v28, %v1228_v54  ;;  %v7437_v41 = vpop.f32.mrf.mxu0  ;;  %v1045_v39 = vadd.f32 %v9144_v29, %v844_v60  ;;  %v851_v16 = vadd.f32 %v9140_v46, %v649_v9  ;;  %v12678_v60 = vld [vmem:[#allocation29_spill] sm:$0xff] }
 0x1f8   :  { %v7487_v31 = vpop.f32.mrf.mxu1 }
 0x1f9   :  { %v9185_v58 = vand.u32 4294901760, %v1499_v37  ;;  %v1498_v57 = vmul.f32 %v1405_v44, %v12667_v35  ;;  %v1423_v1 = vadd.f32 %v7487_v31, %v1246_v6  ;;  %v837_v44 = vadd.f32 %v9136_v2, %v637_v50  ;;  %v1263_v5 = vpop.f32.mrf.mxu0 }
 0x1fa   :  { %v1416_v38 = vpop.f32.mrf.mxu1  ;;  %v1270_v61 = vadd.f32 %v7437_v41, %v1045_v39 }
 0x1fb   :  { %12666 = vst [vmem:[#allocation165_spill] sm:$0xff] %v9185_v58  ;;  %v9191_v28 = vsub.f32 %v1499_v37, %v9185_v58  ;;  %v9193_v42 = vand.u32 4294901760, %v1498_v57  ;;  %v1501_v10 = vmul.f32 %v1423_v1, %v12669_v22  ;;  %v1417_v30 = vadd.f32 %v1416_v38, %v1240_v20  ;;  %v7440_v29 = vpop.f32.mrf.mxu0 }
 0x1fc   :  { %v7490_v34 = vpop.f32.mrf.mxu1  ;;  %v1037_v2 = vadd.f32 %v9148_v27, %v837_v44 }
 0x1fd   :  { %12668 = vst [vmem:[#allocation166_spill] sm:$0xff] %v9193_v42  ;;  %v9198_v0 = vsub.f32 %v1498_v57, %v9193_v42  ;;  %v1500_v45 = vmul.f32 %v1417_v30, %v12670_v48  ;;  %2057 = vmatmul.mubr.f32.vlgmr.msra.gmra.mxu1 %v9193_v42  ;;  %v9204_v63 = vand.u32 4294901760, %v1501_v10  ;;  %v1435_v36 = vadd.f32 %v7490_v34, %v1258_v21  ;;  %v1275_v44 = vpop.f32.mrf.mxu0  ;;  %v12727_v42 = vld [vmem:[#allocation107_spill] sm:$0xff] }
 0x1fe   :  { %v1428_v49 = vpop.f32.mrf.mxu1  ;;  %2062 = vmatprep.mubr.f32.mxu1 %v12672_v3  ;;  %2428 = vmatpush1.msra.mxu1 %v8762_v24  ;;  %v12195_v62 = vand.u32 4294901760, %v9191_v28  ;;  %v1264_v6 = vadd.f32 %v1263_v5, %v1037_v2  ;;  %v1053_v21 = vadd.f32 %v9156_v59, %v851_v16  ;;  %v661_v5 = vadd.f32 %v9124_v51, %v9110_v23 }
 0x1ff   :  { %12671 = vst [vmem:[#allocation167_spill] sm:$0xff] %v9204_v63  ;;  %v12196_v40 = vand.u32 4294901760, %v9198_v0  ;;  %v9210_v54 = vand.u32 4294901760, %v1500_v45  ;;  %2430 = vmatprep.subr.mxu1 %v8767_v55  ;;  %v1429_v25 = vadd.f32 %v1428_v49, %v1252_v33  ;;  %v9227_v18 = vsub.f32 %v1501_v10, %v9204_v63  ;;  %v7443_v39 = vpop.f32.mrf.mxu0 }
 0x200   :  { %v7493_v32 = vpop.f32.mrf.mxu1  ;;  %2432 = vmatpush1.msra.mxu1 %v8773_v8  ;;  %v1503_v19 = vmul.f32 %v1435_v36, %v12674_v13  ;;  %v1669_v50 = vsub.f32 %v9191_v28, %v12195_v62  ;;  %v12679_v36 = vld [vmem:[#allocation155_spill] sm:$0xff]  ;;  %v1276_v2 = vadd.f32 %v1275_v44, %v1053_v21  ;;  %v12687_v21 = vld [vmem:[#allocation146_spill] sm:$0xff]  ;;  %v12688_v44 = vld [vmem:[#allocation152_spill] sm:$0xff] }
 0x201   :  { %12673 = vst [vmem:[#allocation168_spill] sm:$0xff] %v9210_v54  ;;  %v1658_v27 = vsub.f32 %v9198_v0, %v12196_v40  ;;  %v9222_v37 = vsub.f32 %v1500_v45, %v9210_v54  ;;  %2064 = vmatmul.mubr.f32.gmra.mxu1 %v9185_v58  ;;  %2434 = vmatprep.subr.mxu1 %v8780_v11  ;;  %v12193_v41 = vand.u32 4294901760, %v9227_v18  ;;  %v12698_v62 = vld [vmem:[#allocation158_spill] sm:$0xff] }
 0x202   :  { %v1502_v31 = vmul.f32 %v1429_v25, %v12675_v43  ;;  %v1440_v20 = vpop.f32.mrf.mxu1  ;;  %2069 = vmatprep.mubr.f32.mxu1 %v12672_v3  ;;  %2436 = vmatpush1.msra.mxu1 %v8787_v12  ;;  %v9246_v34 = vand.u32 4294901760, %v1503_v19  ;;  %v1447_v46 = vadd.f32 %v7493_v32, %v1270_v61  ;;  %v1670_v47 = vand.u32 4294901760, %v1669_v50  ;;  %v12680_v25 = vld [vmem:[#allocation28_spill] sm:$0xff]  ;;  %v12685_v61 = vld [vmem:[#allocation49_spill] sm:$0xff]  ;;  %v12705_v43 = vld [vmem:[#allocation110_spill] sm:$0xff] }
 0x203   :  { %v1659_v57 = vand.u32 4294901760, %v1658_v27  ;;  %v1441_v1 = vadd.f32 %v1440_v20, %v1264_v6  ;;  %2438 = vmatprep.subr.mxu1 %v8797_v56  ;;  %v12194_v30 = vand.u32 4294901760, %v9222_v37  ;;  %v1061_v49 = vadd.f32 %v12679_v36, %v858_v14  ;;  %v12682_v20 = vld [vmem:[#allocation42_spill] sm:$0xff]  ;;  %v12686_v14 = vld [vmem:[#allocation27_spill] sm:$0xff]  ;;  %v1287_v36 = vpop.f32.mrf.mxu0 }
 0x204   :  { %v9238_v38 = vand.u32 4294901760, %v1502_v31  ;;  %v7496_v10 = vpop.f32.mrf.mxu1  ;;  %2440 = vmatpush1.msra.mxu1 %v8807_v17  ;;  %12677 = vst [vmem:[#allocation170_spill] sm:$0xff] %v9246_v34  ;;  %v9267_v9 = vsub.f32 %v1503_v19, %v9246_v34  ;;  %v1505_v32 = vmul.f32 %v1447_v46, %v12680_v25  ;;  %v1691_v23 = vsub.f32 %v9227_v18, %v12193_v41  ;;  %v12683_v19 = vld [vmem:[#allocation25_spill] sm:$0xff]  ;;  %v12706_v13 = vld [vmem:[#allocation38_spill] sm:$0xff] }
 0x205   :  { %1660 = vmatmul.mubr.f32.vlgmr.msra.gmra.mxu0 %v1659_v57  ;;  %2071 = vmatmul.mubr.f32.gmra.mxu1 %v9210_v54  ;;  %v1504_v15 = vmul.f32 %v1441_v1, %v12678_v60  ;;  %v1680_v59 = vsub.f32 %v9222_v37, %v12194_v30  ;;  %v12684_v57 = vld [vmem:[#allocation153_spill] sm:$0xff]  ;;  %v1282_v50 = vadd.f32 %v7440_v29, %v1061_v49  ;;  %v12691_v49 = vld [vmem:[#allocation24_spill] sm:$0xff]  ;;  %v12699_v29 = vld [vmem:[#allocation23_spill] sm:$0xff] }
 0x206   :  { %12676 = vst [vmem:[#allocation169_spill] sm:$0xff] %v9238_v38  ;;  %1665 = vmatprep.mubr.f32.mxu0 %v12672_v3  ;;  %2076 = vmatprep.mubr.f32.mxu1 %v12672_v3  ;;  %v9252_v45 = vsub.f32 %v1502_v31, %v9238_v38  ;;  %v1452_v33 = vpop.f32.mrf.mxu1  ;;  %v865_v1 = vadd.f32 %v12684_v57, %v661_v5  ;;  %v12696_v41 = vld [vmem:[#allocation145_spill] sm:$0xff]  ;;  %v12700_v4 = vand.u32 4294901760, %v9267_v9  ;;  %v12707_v60 = vld [vmem:[#allocation148_spill] sm:$0xff]  ;;  %v12726_v58 = vld [vmem:[#allocation118_spill] sm:$0xff] }
 0x207   :  { %2442 = vmatprep.subr.mxu1 %v8830_v52  ;;  %2173 = vmatpush1.msra.mxu0 %v8771_v7  ;;  %v9275_v51 = vand.u32 4294901760, %v1504_v15  ;;  %v1453_v27 = vadd.f32 %v1452_v33, %v1276_v2  ;;  %v1681_v6 = vand.u32 4294901760, %v1680_v59  ;;  %v872_v46 = vadd.f32 %v12688_v44, %v12687_v21  ;;  %v12692_v21 = vld [vmem:[#allocation54_spill] sm:$0xff]  ;;  %v12697_v30 = vld [vmem:[#allocation149_spill] sm:$0xff] }
 0x208   :  { %2444 = vmatpush1.msra.mxu1 %v8836_v26  ;;  %2176 = vmatprep.subr.mxu0 %v8778_v53  ;;  %v12197_v31 = vand.u32 4294901760, %v9252_v45  ;;  %v7499_v16 = vpop.f32.mrf.mxu1  ;;  %v9287_v33 = vand.u32 4294901760, %v1505_v32  ;;  %v1459_v2 = vadd.f32 %v7496_v10, %v1282_v50  ;;  %v12693_v44 = vld [vmem:[#allocation30_spill] sm:$0xff]  ;;  %v12694_v50 = vld [vmem:[#allocation63_spill] sm:$0xff] }
 0x209   :  { %1671 = vmatmul.mubr.f32.gmra.mxu0 %v1670_v47  ;;  %2078 = vmatmul.mubr.f32.gmra.mxu1 %v9204_v63  ;;  %12681 = vst [vmem:[#allocation155_spill] sm:$0xff] %v9275_v51  ;;  %v12689_v47 = vld [vmem:[#allocation160_spill] sm:$0xff]  ;;  %v9293_v5 = vsub.f32 %v1504_v15, %v9275_v51  ;;  %v1506_v57 = vmul.f32 %v1453_v27, %v12691_v49 }
 0x20a   :  { %1676 = vmatprep.mubr.f32.mxu0 %v12672_v3  ;;  %2083 = vmatprep.mubr.f32.mxu1 %v12672_v3  ;;  %v1069_v59 = vadd.f32 %v12689_v47, %v865_v1  ;;  %12690 = vst [vmem:[#allocation42_spill] sm:$0xff] %v9287_v33  ;;  %v1702_v1 = vsub.f32 %v9252_v45, %v12197_v31  ;;  %v1464_v10 = vpop.f32.mrf.mxu1  ;;  %v12695_v47 = vld [vmem:[#allocation32_spill] sm:$0xff]  ;;  %v7446_v31 = vpop.f32.mrf.mxu0 }
 0x20b   :  { %2446 = vmatprep.subr.mxu1 %v12682_v20  ;;  %2179 = vmatpush1.msra.mxu0 %v12683_v19  ;;  %v673_v15 = vadd.f32 %v12697_v30, %v12696_v41  ;;  %v1077_v40 = vadd.f32 %v12698_v62, %v872_v46  ;;  %v1507_v35 = vmul.f32 %v1459_v2, %v12699_v29  ;;  %v9316_v41 = vand.u32 4294901760, %v1506_v57  ;;  %v12716_v29 = vld [vmem:[#allocation52_spill] sm:$0xff] }
 0x20c   :  { %2448 = vmatpush1.msra.mxu1 %v12685_v61  ;;  %2182 = vmatprep.subr.mxu0 %v12686_v14  ;;  %v1288_v27 = vadd.f32 %v1287_v36, %v1069_v59  ;;  %v1713_v30 = vsub.f32 %v9267_v9, %v12700_v4  ;;  %v1703_v46 = vand.u32 4294901760, %v1702_v1  ;;  %v12702_v36 = vld [vmem:[#allocation108_spill] sm:$0xff]  ;;  %v7502_v22 = vpop.f32.mrf.mxu1  ;;  %v12708_v4 = vld [vmem:[#allocation154_spill] sm:$0xff]  ;;  %v1299_v59 = vpop.f32.mrf.mxu0 }
 0x20d   :  { %1682 = vmatmul.mubr.f32.gmra.mxu0 %v1681_v6  ;;  %2085 = vmatmul.mubr.f32.gmra.mxu1 %v9238_v38  ;;  %v1692_v6 = vand.u32 4294901760, %v1691_v23  ;;  %v9308_v23 = vsub.f32 %v1505_v32, %v9287_v33  ;;  %12701 = vst [vmem:[#allocation25_spill] sm:$0xff] %v9316_v41  ;;  %v12703_v32 = vld [vmem:[#allocation35_spill] sm:$0xff]  ;;  %v1294_v48 = vadd.f32 %v7443_v39, %v1077_v40  ;;  %v12709_v1 = vld [vmem:[#allocation162_spill] sm:$0xff] }
 0x20e   :  { %1687 = vmatprep.mubr.f32.mxu0 %v12672_v3  ;;  %2090 = vmatprep.mubr.f32.mxu1 %v12672_v3  ;;  %v1465_v62 = vadd.f32 %v1464_v10, %v1288_v27  ;;  %v886_v25 = vadd.f32 %v12708_v4, %v12707_v60  ;;  %v9328_v27 = vand.u32 4294901760, %v1507_v35  ;;  %v9334_v39 = vsub.f32 %v1506_v57, %v9316_v41  ;;  %v12713_v4 = vld [vmem:[#allocation113_spill] sm:$0xff]  ;;  %v12717_v40 = vld [vmem:[#allocation147_spill] sm:$0xff] }
 0x20f   :  { %2450 = vmatprep.subr.mxu1 %v12692_v21  ;;  %2185 = vmatpush1.msra.mxu0 %v12693_v44  ;;  %v1471_v49 = vadd.f32 %v7499_v16, %v1294_v48  ;;  %v1476_v48 = vpop.f32.mrf.mxu1  ;;  %v12715_v16 = vld [vmem:[#allocation114_spill] sm:$0xff]  ;;  %v12721_v54 = vand.u32 4294901760, %v9308_v23 }
 0x210   :  { %2452 = vmatpush1.msra.mxu1 %v12694_v50  ;;  %2188 = vmatprep.subr.mxu0 %v12695_v47  ;;  %12710 = vst [vmem:[#allocation153_spill] sm:$0xff] %v9328_v27 }
 0x211   :  { %1693 = vmatmul.mubr.f32.gmra.mxu0 %v1692_v6  ;;  %2092 = vmatmul.mubr.f32.gmra.mxu1 %v9246_v34  ;;  %v12704_v6 = vld [vmem:[#allocation156_spill] sm:$0xff]  ;;  %v12719_v34 = vld [vmem:[#allocation161_spill] sm:$0xff] }
 0x212   :  { %1698 = vmatprep.mubr.f32.mxu0 %v12672_v3  ;;  %2097 = vmatprep.mubr.f32.mxu1 %v12672_v3  ;;  %v879_v2 = vadd.f32 %v12704_v6, %v673_v15  ;;  %v12711_v15 = vld [vmem:[#allocation21_spill] sm:$0xff]  ;;  %v12712_v6 = vand.u32 4294901760, %v9293_v5  ;;  %v1093_v38 = vadd.f32 %v12719_v34, %v886_v25 }
 0x213   :  { %2454 = vmatprep.subr.mxu1 %v12702_v36  ;;  %2191 = vmatpush1.msra.mxu0 %v12703_v32  ;;  %v1508_v60 = vmul.f32 %v1465_v62, %v12711_v15  ;;  %v12720_v15 = vld [vmem:[#allocation20_spill] sm:$0xff] }
 0x214   :  { %2456 = vmatpush1.msra.mxu1 %v12705_v43  ;;  %2194 = vmatprep.subr.mxu0 %v12706_v13  ;;  %v1085_v10 = vadd.f32 %v12709_v1, %v879_v2  ;;  %v1724_v2 = vsub.f32 %v9293_v5, %v12712_v6  ;;  %v12714_v1 = vld [vmem:[#allocation44_spill] sm:$0xff]  ;;  %v7449_v6 = vpop.f32.mrf.mxu0  ;;  %v1509_v63 = vmul.f32 %v1471_v49, %v12720_v15 }
 0x215   :  { %1704 = vmatmul.mubr.f32.gmra.mxu0 %v1703_v46  ;;  %2099 = vmatmul.mubr.f32.gmra.mxu1 %v9275_v51  ;;  %v1714_v46 = vand.u32 4294901760, %v1713_v30  ;;  %v12718_v51 = vld [vmem:[#allocation151_spill] sm:$0xff]  ;;  %v9349_v30 = vsub.f32 %v1507_v35, %v9328_v27  ;;  %v12724_v35 = vld [vmem:[#allocation60_spill] sm:$0xff]  ;;  %v1306_v15 = vadd.f32 %v7446_v31, %v1093_v38 }
 0x216   :  { %1709 = vmatprep.mubr.f32.mxu0 %v12672_v3  ;;  %2104 = vmatprep.mubr.f32.mxu1 %v12672_v3  ;;  %v685_v57 = vadd.f32 %v12718_v51, %v12717_v40  ;;  %v1300_v62 = vadd.f32 %v1299_v59, %v1085_v10  ;;  %v1735_v51 = vsub.f32 %v9308_v23, %v12721_v54  ;;  %v9357_v40 = vand.u32 4294901760, %v1508_v60  ;;  %v12723_v10 = vld [vmem:[#allocation116_spill] sm:$0xff]  ;;  %v12729_v54 = vld [vmem:[#allocation157_spill] sm:$0xff]  ;;  %v1311_v59 = vpop.f32.mrf.mxu0  ;;  %v12738_v38 = vld [vmem:[#allocation163_spill] sm:$0xff] }
 0x217   :  { %2458 = vmatprep.subr.mxu1 %v12713_v4  ;;  %2197 = vmatpush1.msra.mxu0 %v12714_v1  ;;  %v1725_v25 = vand.u32 4294901760, %v1724_v2  ;;  %v12730_v2 = vld [vmem:[#allocation164_spill] sm:$0xff] }
 0x218   :  { %2460 = vmatpush1.msra.mxu1 %v12715_v16  ;;  %2200 = vmatprep.subr.mxu0 %v12716_v29  ;;  %12722 = vst [vmem:[#allocation49_spill] sm:$0xff] %v9357_v40  ;;  %v1477_v34 = vadd.f32 %v1476_v48, %v1300_v62  ;;  %v12728_v16 = vld [vmem:[#allocation150_spill] sm:$0xff]  ;;  %v9369_v62 = vand.u32 4294901760, %v1509_v63  ;;  %v9375_v31 = vsub.f32 %v1508_v60, %v9357_v40 }
 0x219   :  { %1715 = vmatmul.mubr.f32.gmra.mxu0 %v1714_v46  ;;  %2106 = vmatmul.mubr.f32.gmra.mxu1 %v9287_v33  ;;  %v12725_v46 = vld [vmem:[#allocation159_spill] sm:$0xff]  ;;  %v7505_v33 = vpop.f32.mrf.mxu1  ;;  %v900_v4 = vadd.f32 %v12729_v54, %v12728_v16  ;;  %v12734_v54 = vld [vmem:[#allocation120_spill] sm:$0xff] }
 0x21a   :  { %1720 = vmatprep.mubr.f32.mxu0 %v12672_v3  ;;  %2111 = vmatprep.mubr.f32.mxu1 %v12672_v3  ;;  %v893_v49 = vadd.f32 %v12725_v46, %v685_v57  ;;  %12731 = vst [vmem:[#allocation27_spill] sm:$0xff] %v9369_v62  ;;  %v12732_v57 = vld [vmem:[#allocation19_spill] sm:$0xff]  ;;  %v12733_v46 = vand.u32 4294901760, %v9334_v39 }
 0x21b   :  { %2462 = vmatprep.subr.mxu1 %v12723_v10  ;;  %2203 = vmatpush1.msra.mxu0 %v12724_v35  ;;  %v1483_v10 = vadd.f32 %v7502_v22, %v1306_v15  ;;  %v1510_v16 = vmul.f32 %v1477_v34, %v12732_v57  ;;  %v1488_v22 = vpop.f32.mrf.mxu1  ;;  %v12736_v15 = vld [vmem:[#allocation122_spill] sm:$0xff]  ;;  %v12739_v34 = vld [vmem:[#allocation17_spill] sm:$0xff]  ;;  %v12740_v57 = vand.u32 4294901760, %v9349_v30 }
 0x21c   :  { %2464 = vmatpush1.msra.mxu1 %v12726_v58  ;;  %2206 = vmatprep.subr.mxu0 %v12727_v42  ;;  %v1101_v48 = vadd.f32 %v12730_v2, %v893_v49  ;;  %v1746_v49 = vsub.f32 %v9334_v39, %v12733_v46  ;;  %v12735_v2 = vld [vmem:[#allocation109_spill] sm:$0xff]  ;;  %v1109_v58 = vadd.f32 %v12738_v38, %v900_v4  ;;  %v12742_v38 = vld [vmem:[#allocation124_spill] sm:$0xff] }
 0x21d   :  { %1726 = vmatmul.mubr.f32.gmra.mxu0 %v1725_v25  ;;  %2113 = vmatmul.mubr.f32.gmra.mxu1 %v9316_v41  ;;  %v1736_v25 = vand.u32 4294901760, %v1735_v51  ;;  %v12737_v41 = vld [vmem:[#allocation111_spill] sm:$0xff]  ;;  %v9388_v51 = vsub.f32 %v1509_v63, %v9369_v62  ;;  %v1511_v46 = vmul.f32 %v1483_v10, %v12739_v34  ;;  %v12743_v63 = vld [vmem:[#allocation112_spill] sm:$0xff]  ;;  %v12744_v10 = vld [vmem:[#allocation126_spill] sm:$0xff] }
 0x21e   :  { %1731 = vmatprep.mubr.f32.mxu0 %v12672_v3  ;;  %2118 = vmatprep.mubr.f32.mxu1 %v12672_v3  ;;  %v1312_v60 = vadd.f32 %v1311_v59, %v1101_v48  ;;  %v1747_v59 = vand.u32 4294901760, %v1746_v49  ;;  %v12220_v48 = vand.u32 4294901760, %v9375_v31  ;;  %v12745_v34 = vld [vmem:[#allocation115_spill] sm:$0xff] }
 0x21f   :  { %2466 = vmatprep.subr.mxu1 %v12734_v54  ;;  %2209 = vmatpush1.msra.mxu0 %v12735_v2  ;;  %v9396_v54 = vand.u32 4294901760, %v1510_v16 }
 0x220   :  { %2468 = vmatpush1.msra.mxu1 %v12736_v15  ;;  %2212 = vmatprep.subr.mxu0 %v12737_v41  ;;  %v1757_v15 = vsub.f32 %v9349_v30, %v12740_v57  ;;  %v1489_v4 = vadd.f32 %v1488_v22, %v1312_v60  ;;  %v12747_v60 = vld [vmem:[#allocation18_spill] sm:$0xff] }
 0x221   :  { %1737 = vmatmul.mubr.f32.gmra.mxu0 %v1736_v25  ;;  %2120 = vmatmul.mubr.f32.gmra.mxu1 %v9328_v27  ;;  %12741 = vst [vmem:[#allocation146_spill] sm:$0xff] %v9396_v54  ;;  %v1318_v25 = vadd.f32 %v7449_v6, %v1109_v58  ;;  %v9404_v27 = vand.u32 4294901760, %v1511_v46  ;;  %v9409_v22 = vsub.f32 %v1510_v16, %v9396_v54 }
 0x222   :  { %1742 = vmatprep.mubr.f32.mxu0 %v12672_v3  ;;  %2125 = vmatprep.mubr.f32.mxu1 %v12672_v3  ;;  %v1758_v49 = vand.u32 4294901760, %v1757_v15  ;;  %v1512_v58 = vmul.f32 %v1489_v4, %v12747_v60  ;;  %v1768_v6 = vsub.f32 %v9375_v31, %v12220_v48  ;;  %v12752_v15 = vld [vmem:[#allocation16_spill] sm:$0xff]  ;;  %v12754_v60 = vand.u32 4294901760, %v9388_v51 }
 0x223   :  { %2470 = vmatprep.subr.mxu1 %v12742_v38  ;;  %2215 = vmatpush1.msra.mxu0 %v12743_v63  ;;  %12746 = vst [vmem:[#allocation152_spill] sm:$0xff] %v9404_v27  ;;  %v1495_v57 = vadd.f32 %v7505_v33, %v1318_v25  ;;  %v12750_v33 = vld [vmem:[#allocation130_spill] sm:$0xff]  ;;  %v12751_v25 = vld [vmem:[#allocation119_spill] sm:$0xff]  ;;  %v9422_v16 = vsub.f32 %v1511_v46, %v9404_v27 }
 0x224   :  { %2472 = vmatpush1.msra.mxu1 %v12744_v10  ;;  %2218 = vmatprep.subr.mxu0 %v12745_v34  ;;  %v12749_v10 = vld [vmem:[#allocation117_spill] sm:$0xff]  ;;  %v9427_v48 = vand.u32 4294901760, %v1512_v58  ;;  %v12757_v46 = vld [vmem:[#allocation134_spill] sm:$0xff] }
 0x225   :  { %1748 = vmatmul.mubr.f32.gmra.mxu0 %v1747_v59  ;;  %2127 = vmatmul.mubr.f32.gmra.mxu1 %v9357_v40  ;;  %v12748_v40 = vld [vmem:[#allocation129_spill] sm:$0xff]  ;;  %v1513_v4 = vmul.f32 %v1495_v57, %v12752_v15  ;;  %v1769_v59 = vand.u32 4294901760, %v1768_v6  ;;  %v12758_v57 = vld [vmem:[#allocation123_spill] sm:$0xff] }
 0x226   :  { %1753 = vmatprep.mubr.f32.mxu0 %v12672_v3  ;;  %2132 = vmatprep.mubr.f32.mxu1 %v12672_v3  ;;  %12753 = vst [vmem:[#allocation160_spill] sm:$0xff] %v9427_v48 }
 0x227   :  { %2474 = vmatprep.subr.mxu1 %v12748_v40  ;;  %2221 = vmatpush1.msra.mxu0 %v12749_v10  ;;  %v12755_v40 = vld [vmem:[#allocation132_spill] sm:$0xff]  ;;  %v9438_v15 = vand.u32 4294901760, %v1513_v4 }
 0x228   :  { %2476 = vmatpush1.msra.mxu1 %v12750_v33  ;;  %2224 = vmatprep.subr.mxu0 %v12751_v25  ;;  %v1779_v33 = vsub.f32 %v9388_v51, %v12754_v60  ;;  %v9443_v60 = vsub.f32 %v1512_v58, %v9427_v48 }
 0x229   :  { %1759 = vmatmul.mubr.f32.gmra.mxu0 %v1758_v49  ;;  %2134 = vmatmul.mubr.f32.gmra.mxu1 %v9369_v62  ;;  %v12225_v49 = vand.u32 4294901760, %v9409_v22  ;;  %v12756_v62 = vld [vmem:[#allocation121_spill] sm:$0xff]  ;;  %12759 = vst [vmem:[#allocation54_spill] sm:$0xff] %v9438_v15  ;;  %v9457_v58 = vsub.f32 %v1513_v4, %v9438_v15 }
 0x22a   :  { %1764 = vmatprep.mubr.f32.mxu0 %v12672_v3  ;;  %2139 = vmatprep.mubr.f32.mxu1 %v12672_v3  ;;  %v1780_v6 = vand.u32 4294901760, %v1779_v33 }
 0x22b   :  { %2478 = vmatprep.subr.mxu1 %v12755_v40  ;;  %2227 = vmatpush1.msra.mxu0 %v12756_v62  ;;  %v1790_v40 = vsub.f32 %v9409_v22, %v12225_v49  ;;  %v12763_v62 = vld [vmem:[#allocation127_spill] sm:$0xff] }
 0x22c   :  { %2480 = vmatpush1.msra.mxu1 %v12757_v46  ;;  %2230 = vmatprep.subr.mxu0 %v12758_v57  ;;  %v12228_v46 = vand.u32 4294901760, %v9422_v16  ;;  %v12760_v57 = vld [vmem:[#allocation136_spill] sm:$0xff] }
 0x22d   :  { %1770 = vmatmul.mubr.f32.gmra.mxu0 %v1769_v59  ;;  %2141 = vmatmul.mubr.f32.gmra.mxu1 %v9396_v54  ;;  %v12761_v59 = vld [vmem:[#allocation125_spill] sm:$0xff]  ;;  %v12762_v54 = vld [vmem:[#allocation138_spill] sm:$0xff]  ;;  %v1791_v33 = vand.u32 4294901760, %v1790_v40 }
 0x22e   :  { %1775 = vmatprep.mubr.f32.mxu0 %v12672_v3  ;;  %2146 = vmatprep.mubr.f32.mxu1 %v12672_v3  ;;  %v1801_v49 = vsub.f32 %v9422_v16, %v12228_v46  ;;  %v12768_v46 = vld [vmem:[#allocation133_spill] sm:$0xff] }
 0x22f   :  { %2482 = vmatprep.subr.mxu1 %v12760_v57  ;;  %2233 = vmatpush1.msra.mxu0 %v12761_v59  ;;  %v12764_v57 = vld [vmem:[#allocation140_spill] sm:$0xff] }
 0x230   :  { %2484 = vmatpush1.msra.mxu1 %v12762_v54  ;;  %2236 = vmatprep.subr.mxu0 %v12763_v62  ;;  %v12765_v54 = vld [vmem:[#allocation128_spill] sm:$0xff]  ;;  %v12766_v62 = vld [vmem:[#allocation142_spill] sm:$0xff]  ;;  %v1802_v40 = vand.u32 4294901760, %v1801_v49 }
 0x231   :  { %1781 = vmatmul.mubr.f32.gmra.mxu0 %v1780_v6  ;;  %2148 = vmatmul.mubr.f32.gmra.mxu1 %v9404_v27  ;;  %v12229_v6 = vand.u32 4294901760, %v9443_v60  ;;  %v12767_v27 = vld [vmem:[#allocation131_spill] sm:$0xff] }
 0x232   :  { %1786 = vmatprep.mubr.f32.mxu0 %v12672_v3  ;;  %2153 = vmatprep.mubr.f32.mxu1 %v12672_v3 }
 0x233   :  { %2486 = vmatprep.subr.mxu1 %v12764_v57  ;;  %2239 = vmatpush1.msra.mxu0 %v12765_v54  ;;  %v1812_v4 = vsub.f32 %v9443_v60, %v12229_v6  ;;  %v12234_v57 = vand.u32 4294901760, %v9457_v58  ;;  %v12769_v54 = vld [vmem:[#allocation51_spill] sm:$0xff] }
 0x234   :  { %2488 = vmatpush1.msra.mxu1 %v12766_v62  ;;  %2242 = vmatprep.subr.mxu0 %v12767_v27  ;;  %v12770_v62 = vld [vmem:[#allocation135_spill] sm:$0xff] }
 0x235   :  { %1792 = vmatmul.mubr.f32.gmra.mxu0 %v1791_v33  ;;  %2155 = vmatmul.mubr.f32.gmra.mxu1 %v9427_v48  ;;  %v1813_v49 = vand.u32 4294901760, %v1812_v4  ;;  %v12771_v33 = vld [vmem:[#allocation137_spill] sm:$0xff]  ;;  %v1823_v6 = vsub.f32 %v9457_v58, %v12234_v57  ;;  %v12772_v48 = vld [vmem:[#allocation139_spill] sm:$0xff]  ;;  %v12776_v57 = vand.u32 4294901760, %v9191_v28 }
 0x236   :  { %1797 = vmatprep.mubr.f32.mxu0 %v12672_v3  ;;  %2160 = vmatprep.mubr.f32.mxu1 %v12672_v3  ;;  %v12775_v4 = vld [vmem:[#allocation143_spill] sm:$0xff] }
 0x237   :  { %2245 = vmatpush1.msra.mxu0 %v12768_v46  ;;  %2940 = vmatprep.subr.mxu1 %v12769_v54  ;;  %v12773_v54 = vand.u32 4294901760, %v9198_v0 }
 0x238   :  { %2248 = vmatprep.subr.mxu0 %v12770_v62 }
 0x239   :  { %1803 = vmatmul.mubr.f32.gmra.mxu0 %v1802_v40  ;;  %2162 = vmatmul.mubr.f32.gmra.mxu1 %v9438_v15  ;;  %v1824_v40 = vand.u32 4294901760, %v1823_v6  ;;  %v12774_v15 = vld [vmem:[#allocation141_spill] sm:$0xff]  ;;  %v12778_v6 = vld [vmem:[#allocation22_spill] sm:$0xff] }
 0x23a   :  { %1808 = vmatprep.mubr.f32.mxu0 %v12672_v3  ;;  %2521 = vmatprep.mubr.f32.mxu1 %v12672_v3 }
 0x23b   :  { %2251 = vmatpush1.msra.mxu0 %v12771_v33 }
 0x23c   :  { %2254 = vmatprep.subr.mxu0 %v12772_v48 }
 0x23d   :  { %1814 = vmatmul.mubr.f32.gmra.mxu0 %v1813_v49  ;;  %2525 = vmatmul.mubr.f32.vlgmr.msra.gmra.mxu1 %v12773_v54  ;;  %v12777_v49 = vld [vmem:[#allocation144_spill] sm:$0xff]  ;;  %v12824_v54 = vld [vmem:[#allocation127_spill] sm:$0xff] }
 0x23e   :  { %1819 = vmatprep.mubr.f32.mxu0 %v12672_v3  ;;  %2530 = vmatprep.mubr.f32.mxu1 %v12672_v3 }
 0x23f   :  { %2257 = vmatpush1.msra.mxu0 %v12774_v15  ;;  %2942 = vmatpush1.msra.mxu1 %v8762_v24  ;;  %v12779_v24 = vand.u32 4294901760, %v12778_v6  ;;  %v12827_v6 = vld [vmem:[#allocation134_spill] sm:$0xff] }
 0x240   :  { %2260 = vmatprep.subr.mxu0 %v12775_v4  ;;  %2944 = vmatprep.subr.mxu1 %v8767_v55  ;;  %v12780_v55 = vand.u32 4294901760, %v9222_v37 }
 0x241   :  { %1825 = vmatmul.mubr.f32.gmra.mxu0 %v1824_v40  ;;  %2534 = vmatmul.mubr.f32.gmra.mxu1 %v12776_v57  ;;  %v12781_v57 = vand.u32 4294901760, %v8771_v7  ;;  %v12789_v7 = vand.u32 4294901760, %v9267_v9  ;;  %v12825_v40 = vand.u32 4294901760, %v12824_v54 }
 0x242   :  { %2263 = vmatpush1.msra.mxu0 %v12777_v49  ;;  %2296 = vmatprep.mubr.f32.mxu0 %v12672_v3 }
 0x243   :  { %2539 = vmatprep.mubr.f32.mxu1 %v12672_v3  ;;  %2946 = vmatpush1.msra.mxu1 %v8773_v8  ;;  %v12782_v8 = vand.u32 4294901760, %v8778_v53  ;;  %v12786_v53 = vand.u32 4294901760, %v9252_v45 }
 0x244   :  { %2948 = vmatprep.subr.mxu1 %v8780_v11  ;;  %2669 = vmatprep.subr.mxu0 %v12779_v24  ;;  %v12783_v11 = vand.u32 4294901760, %v9227_v18  ;;  %v12828_v24 = vld [vmem:[#allocation128_spill] sm:$0xff] }
 0x245   :  { %2299 = vmatmul.mubr.f32.vlgmr.msra.gmra.mxu0 %v9198_v0  ;;  %2543 = vmatmul.mubr.f32.gmra.mxu1 %v12780_v55  ;;  %v12792_v0 = vand.u32 4294901760, %v9293_v5  ;;  %v12829_v55 = vand.u32 4294901760, %v12828_v24 }
 0x246   :  { %2304 = vmatprep.mubr.f32.mxu0 %v12672_v3  ;;  %2548 = vmatprep.mubr.f32.mxu1 %v12672_v3 }
 0x247   :  { %2950 = vmatpush1.msra.mxu1 %v8787_v12  ;;  %2673 = vmatpush1.msra.mxu0 %v12781_v57  ;;  %v12784_v12 = vand.u32 4294901760, %v12683_v19  ;;  %v12798_v19 = vand.u32 4294901760, %v12727_v42  ;;  %v12804_v42 = vand.u32 4294901760, %v9349_v30  ;;  %v12831_v57 = vand.u32 4294901760, %v12767_v27 }
 0x248   :  { %2952 = vmatprep.subr.mxu1 %v8797_v56  ;;  %2677 = vmatprep.subr.mxu0 %v12782_v8  ;;  %v12785_v56 = vand.u32 4294901760, %v12686_v14  ;;  %v12802_v14 = vld [vmem:[#allocation116_spill] sm:$0xff]  ;;  %v12833_v8 = vld [vmem:[#allocation138_spill] sm:$0xff]  ;;  %v12837_v27 = vand.u32 4294901760, %v9457_v58 }
 0x249   :  { %2307 = vmatmul.mubr.f32.gmra.mxu0 %v9191_v28  ;;  %2552 = vmatmul.mubr.f32.gmra.mxu1 %v12783_v11  ;;  %v12791_v28 = vand.u32 4294901760, %v12706_v13  ;;  %v12795_v13 = vand.u32 4294901760, %v9308_v23  ;;  %v12834_v11 = vand.u32 4294901760, %v12768_v46  ;;  %v12840_v46 = vand.u32 4294901760, %v12772_v48 }
 0x24a   :  { %2312 = vmatprep.mubr.f32.mxu0 %v12672_v3  ;;  %2557 = vmatprep.mubr.f32.mxu1 %v12672_v3  ;;  %v12845_v48 = vand.u32 4294901760, %v12777_v49  ;;  %v12850_v49 = vld [vmem:[#allocation155_spill] sm:$0xff] }
 0x24b   :  { %2954 = vmatpush1.msra.mxu1 %v8807_v17  ;;  %2681 = vmatpush1.msra.mxu0 %v12784_v12  ;;  %v12787_v17 = vand.u32 4294901760, %v12693_v44  ;;  %v12807_v44 = vld [vmem:[#allocation120_spill] sm:$0xff] }
 0x24c   :  { %2956 = vmatprep.subr.mxu1 %v8830_v52  ;;  %2685 = vmatprep.subr.mxu0 %v12785_v56  ;;  %v12788_v52 = vand.u32 4294901760, %v12695_v47  ;;  %v12809_v47 = vand.u32 4294901760, %v9375_v31  ;;  %v12835_v12 = vld [vmem:[#allocation140_spill] sm:$0xff]  ;;  %v12836_v56 = vand.u32 4294901760, %v12770_v62  ;;  %v12841_v62 = vld [vmem:[#allocation166_spill] sm:$0xff] }
 0x24d   :  { %2315 = vmatmul.mubr.f32.gmra.mxu0 %v9222_v37  ;;  %2561 = vmatmul.mubr.f32.gmra.mxu1 %v12786_v53  ;;  %v12793_v37 = vand.u32 4294901760, %v12714_v1  ;;  %v12815_v1 = vld [vmem:[#allocation121_spill] sm:$0xff]  ;;  %v12839_v53 = vand.u32 4294901760, %v12771_v33 }
 0x24e   :  { %2320 = vmatprep.mubr.f32.mxu0 %v12672_v3  ;;  %2566 = vmatprep.mubr.f32.mxu1 %v12672_v3  ;;  %v12844_v33 = vld [vmem:[#allocation165_spill] sm:$0xff] }
 0x24f   :  { %2958 = vmatpush1.msra.mxu1 %v8836_v26  ;;  %2689 = vmatpush1.msra.mxu0 %v12787_v17  ;;  %v12790_v26 = vand.u32 4294901760, %v12703_v32  ;;  %v12813_v32 = vand.u32 4294901760, %v9388_v51  ;;  %v12843_v17 = vand.u32 4294901760, %v12775_v4  ;;  %v12849_v4 = vld [vmem:[#allocation170_spill] sm:$0xff] }
 0x250   :  { %2960 = vmatprep.subr.mxu1 %v12682_v20  ;;  %2693 = vmatprep.subr.mxu0 %v12788_v52  ;;  %v12797_v20 = vld [vmem:[#allocation113_spill] sm:$0xff]  ;;  %v12851_v52 = vld [vmem:[#allocation42_spill] sm:$0xff] }
 0x251   :  { %2323 = vmatmul.mubr.f32.gmra.mxu0 %v9227_v18  ;;  %2570 = vmatmul.mubr.f32.gmra.mxu1 %v12789_v7  ;;  %v12794_v18 = vand.u32 4294901760, %v12716_v29  ;;  %v12803_v29 = vand.u32 4294901760, %v12737_v41  ;;  %v12811_v41 = vand.u32 4294901760, %v12749_v10  ;;  %v12822_v10 = vand.u32 4294901760, %v12761_v59  ;;  %v12830_v59 = vld [vmem:[#allocation136_spill] sm:$0xff]  ;;  %v12852_v7 = vld [vmem:[#allocation25_spill] sm:$0xff] }
 0x252   :  { %2328 = vmatprep.mubr.f32.mxu0 %v12672_v3  ;;  %2575 = vmatprep.mubr.f32.mxu1 %v12672_v3 }
 0x253   :  { %2962 = vmatpush1.msra.mxu1 %v12685_v61  ;;  %2697 = vmatpush1.msra.mxu0 %v12790_v26  ;;  %v12800_v61 = vld [vmem:[#allocation114_spill] sm:$0xff]  ;;  %v12853_v26 = vld [vmem:[#allocation153_spill] sm:$0xff] }
 0x254   :  { %2964 = vmatprep.subr.mxu1 %v12692_v21  ;;  %2701 = vmatprep.subr.mxu0 %v12791_v28  ;;  %v12806_v21 = vand.u32 4294901760, %v12743_v63  ;;  %v12821_v63 = vld [vmem:[#allocation130_spill] sm:$0xff]  ;;  %v1548_v28 = vlaneseq }
 0x255   :  { %2331 = vmatmul.mubr.f32.gmra.mxu0 %v9252_v45  ;;  %2579 = vmatmul.mubr.f32.gmra.mxu1 %v12792_v0  ;;  %v12796_v45 = vand.u32 4294901760, %v12724_v35  ;;  %v12816_v35 = vand.u32 4294901760, %v12815_v1  ;;  %v12854_v0 = vld [vmem:[#allocation49_spill] sm:$0xff] }
 0x256   :  { %2336 = vmatprep.mubr.f32.mxu0 %v12672_v3  ;;  %2584 = vmatprep.mubr.f32.mxu1 %v12672_v3 }
 0x257   :  { %2966 = vmatpush1.msra.mxu1 %v12694_v50  ;;  %2705 = vmatpush1.msra.mxu0 %v12793_v37  ;;  %v12808_v50 = vand.u32 4294901760, %v12745_v34  ;;  %v12818_v34 = vld [vmem:[#allocation123_spill] sm:$0xff]  ;;  %v9703_v37 = vshrl.u32 %v1548_v28, 7  ;;  %v12878_v28 = vld [vmem:[#allocation160_spill] sm:$0xff] }
 0x258   :  { %2968 = vmatprep.subr.mxu1 %v12702_v36  ;;  %2709 = vmatprep.subr.mxu0 %v12794_v18  ;;  %v12812_v36 = vand.u32 4294901760, %v12751_v25  ;;  %v12823_v25 = vld [vmem:[#allocation132_spill] sm:$0xff]  ;;  %v3211_v18 = vld [vmem:[#allocation7 + $0xf8] sm:$0xff] }
 0x259   :  { %2339 = vmatmul.mubr.f32.gmra.mxu0 %v9267_v9  ;;  %2588 = vmatmul.mubr.f32.gmra.mxu1 %v12795_v13  ;;  %v12799_v9 = vand.u32 4294901760, %v9334_v39  ;;  %v9707_v13 = vand.u32 4294901760, %v3211_v18 }
 0x25a   :  { %2344 = vmatprep.mubr.f32.mxu0 %v12672_v3  ;;  %2593 = vmatprep.mubr.f32.mxu1 %v12672_v3 }
 0x25b   :  { %2970 = vmatpush1.msra.mxu1 %v12705_v43  ;;  %2713 = vmatpush1.msra.mxu0 %v12796_v45  ;;  %v12801_v43 = vand.u32 4294901760, %v12735_v2  ;;  %v12817_v2 = vld [vmem:[#allocation129_spill] sm:$0xff]  ;;  %12855 = vst [vmem:[#allocation30_spill] sm:$0xff] %v9707_v13  ;;  %v3195_v45 = vld [vmem:[#allocation7 + $0x78] sm:$0xff] }
 0x25c   :  { %2972 = vmatprep.subr.mxu1 %v12797_v20  ;;  %2717 = vmatprep.subr.mxu0 %v12798_v19  ;;  %v12856_v20 = vld [vmem:[#allocation27_spill] sm:$0xff]  ;;  %v1550_v19 = vsub.s32 0, %v9703_v37 }
 0x25d   :  { %2347 = vmatmul.mubr.f32.gmra.mxu0 %v9293_v5  ;;  %2597 = vmatmul.mubr.f32.gmra.mxu1 %v12799_v9  ;;  %v12805_v5 = vld [vmem:[#allocation118_spill] sm:$0xff]  ;;  %v9712_v9 = vand.u32 4294901760, %v3195_v45 }
 0x25e   :  { %2352 = vmatprep.mubr.f32.mxu0 %v12672_v3  ;;  %2602 = vmatprep.mubr.f32.mxu1 %v12672_v3 }
 0x25f   :  { %2974 = vmatpush1.msra.mxu1 %v12800_v61  ;;  %2721 = vmatpush1.msra.mxu0 %v12801_v43  ;;  %12857 = vst [vmem:[#allocation63_spill] sm:$0xff] %v9712_v9  ;;  %v3210_v61 = vld [vmem:[#allocation7 + $0xf0] sm:$0xff]  ;;  %v9719_v43 = vld [vmem:[%s11900_s4] sm:$0x3] }
 0x260   :  { %2976 = vmatprep.subr.mxu1 %v12802_v14  ;;  %2725 = vmatprep.subr.mxu0 %v12803_v29  ;;  %v9722_v14 = vsub.f32 %v3211_v18, %v9707_v13  ;;  %v9724_v29 = vand.u32 4294901760, %v3210_v61 }
 0x261   :  { %2355 = vmatmul.mubr.f32.gmra.mxu0 %v9308_v23  ;;  %2606 = vmatmul.mubr.f32.gmra.mxu1 %v12804_v42  ;;  %v12810_v23 = vld [vmem:[#allocation122_spill] sm:$0xff] }
 0x262   :  { %2360 = vmatprep.mubr.f32.mxu0 %v12672_v3  ;;  %2611 = vmatprep.mubr.f32.mxu1 %v12672_v3  ;;  %12858 = vst [vmem:[#allocation32_spill] sm:$0xff] %v9722_v14  ;;  %12859 = vst [vmem:[#allocation145_spill] sm:$0xff] %v9724_v29  ;;  %v3194_v42 = vld [vmem:[#allocation7 + $0x70] sm:$0xff] }
 0x263   :  { %2978 = vmatpush1.msra.mxu1 %v12805_v5  ;;  %2729 = vmatpush1.msra.mxu0 %v12806_v21  ;;  %v9727_v5 = vsub.f32 %v3195_v45, %v9712_v9  ;;  %v9729_v21 = vand.u32 4294901760, %v3194_v42 }
 0x264   :  { %2980 = vmatprep.subr.mxu1 %v12807_v44  ;;  %2733 = vmatprep.subr.mxu0 %v12808_v50  ;;  %v3209_v44 = vld [vmem:[#allocation7 + $0xe8] sm:$0xff]  ;;  %v12250_v50 = vand.u32 4294901760, %v9722_v14 }
 0x265   :  { %2363 = vmatmul.mubr.f32.gmra.mxu0 %v9334_v39  ;;  %2615 = vmatmul.mubr.f32.gmra.mxu1 %v12809_v47  ;;  %v12814_v39 = vld [vmem:[#allocation126_spill] sm:$0xff]  ;;  %12860 = vst [vmem:[#allocation149_spill] sm:$0xff] %v9727_v5  ;;  %12861 = vst [vmem:[#allocation158_spill] sm:$0xff] %v9729_v21  ;;  %v9734_v47 = vsub.f32 %v3210_v61, %v9724_v29  ;;  %v9746_v1 = vsub.f32 %v3194_v42, %v9729_v21 }
 0x266   :  { %2368 = vmatprep.mubr.f32.mxu0 %v12672_v3  ;;  %2620 = vmatprep.mubr.f32.mxu1 %v12672_v3 }
 0x267   :  { %2982 = vmatpush1.msra.mxu1 %v12810_v23  ;;  %2737 = vmatpush1.msra.mxu0 %v12811_v41  ;;  %12862 = vst [vmem:[#allocation108_spill] sm:$0xff] %v9734_v47  ;;  %v9736_v23 = vand.u32 4294901760, %v3209_v44  ;;  %v3193_v41 = vld [vmem:[#allocation7 + $0x68] sm:$0xff]  ;;  %12865 = vst [vmem:[#allocation156_spill] sm:$0xff] %v9746_v1  ;;  %v12246_v54 = vand.u32 4294901760, %v9746_v1 }
 0x268   :  { %2984 = vmatprep.subr.mxu1 %v12742_v38  ;;  %2741 = vmatprep.subr.mxu0 %v12812_v36  ;;  %v12819_v38 = vand.u32 4294901760, %v12818_v34  ;;  %v12864_v36 = vld [vmem:[#allocation146_spill] sm:$0xff]  ;;  %v3665_v34 = vsub.f32 %v9722_v14, %v12250_v50 }
 0x269   :  { %2371 = vmatmul.mubr.f32.gmra.mxu0 %v9349_v30  ;;  %2624 = vmatmul.mubr.f32.gmra.mxu1 %v12813_v32  ;;  %v12820_v30 = vand.u32 4294901760, %v9409_v22  ;;  %12863 = vst [vmem:[#allocation35_spill] sm:$0xff] %v9736_v23  ;;  %v9742_v32 = vrot.slane %v9719_v43, %v1550_v19  ;;  %v3204_v19 = vld [vmem:[#allocation7 + $0xc0] sm:$0xff] }
 0x26a   :  { %2376 = vmatprep.mubr.f32.mxu0 %v12672_v3  ;;  %2629 = vmatprep.mubr.f32.mxu1 %v12672_v3  ;;  %v3666_v24 = vand.u32 4294901760, %v3665_v34 }
 0x26b   :  { %2986 = vmatpush1.msra.mxu1 %v12814_v39  ;;  %2745 = vmatpush1.msra.mxu0 %v12816_v35  ;;  %v12249_v39 = vand.u32 4294901760, %v9727_v5  ;;  %v9748_v35 = vand.u32 4294901760, %v3193_v41 }
 0x26c   :  { %2988 = vmatprep.subr.mxu1 %v12817_v2  ;;  %2749 = vmatprep.subr.mxu0 %v12819_v38  ;;  %v3208_v2 = vld [vmem:[#allocation7 + $0xe0] sm:$0xff]  ;;  %v12247_v38 = vand.u32 4294901760, %v9734_v47 }
 0x26d   :  { %2379 = vmatmul.mubr.f32.gmra.mxu0 %v9375_v31  ;;  %2633 = vmatmul.mubr.f32.gmra.mxu1 %v12820_v30  ;;  %v12826_v31 = vand.u32 4294901760, %v9422_v16  ;;  %12866 = vst [vmem:[#allocation110_spill] sm:$0xff] %v9748_v35  ;;  %v9757_v30 = vsub.f32 %v3209_v44, %v9736_v23 }
 0x26e   :  { %2384 = vmatprep.mubr.f32.mxu0 %v12672_v3  ;;  %2638 = vmatprep.mubr.f32.mxu1 %v12672_v3 }
 0x26f   :  { %2990 = vmatpush1.msra.mxu1 %v12821_v63  ;;  %2753 = vmatpush1.msra.mxu0 %v12822_v10  ;;  %12867 = vst [vmem:[#allocation38_spill] sm:$0xff] %v9757_v30  ;;  %v9759_v63 = vand.u32 4294901760, %v3208_v2  ;;  %v3192_v10 = vld [vmem:[#allocation7 + $0x60] sm:$0xff] }
 0x270   :  { %2992 = vmatprep.subr.mxu1 %v12823_v25  ;;  %2757 = vmatprep.subr.mxu0 %v12825_v40  ;;  %v3553_v25 = vsub.f32 %v9727_v5, %v12249_v39  ;;  %v9766_v40 = vsub.f32 %v3193_v41, %v9748_v35 }
 0x271   :  { %2387 = vmatmul.mubr.f32.gmra.mxu0 %v9388_v51  ;;  %2642 = vmatmul.mubr.f32.gmra.mxu1 %v12826_v31  ;;  %v12832_v51 = vand.u32 4294901760, %v9443_v60  ;;  %12868 = vst [vmem:[#allocation148_spill] sm:$0xff] %v9759_v63  ;;  %v9768_v31 = vand.u32 4294901760, %v3192_v10 }
 0x272   :  { %2392 = vmatprep.mubr.f32.mxu0 %v12672_v3  ;;  %2647 = vmatprep.mubr.f32.mxu1 %v12672_v3  ;;  %12869 = vst [vmem:[#allocation154_spill] sm:$0xff] %v9766_v40 }
 0x273   :  { %2994 = vmatpush1.msra.mxu1 %v12827_v6  ;;  %2761 = vmatpush1.msra.mxu0 %v12829_v55  ;;  %12870 = vst [vmem:[#allocation162_spill] sm:$0xff] %v9768_v31  ;;  %v3207_v6 = vld [vmem:[#allocation7 + $0xd8] sm:$0xff]  ;;  %v3672_v55 = vsub.f32 %v9734_v47, %v12247_v38 }
 0x274   :  { %2996 = vmatprep.subr.mxu1 %v12830_v59  ;;  %2765 = vmatprep.subr.mxu0 %v12831_v57  ;;  %v12244_v59 = vand.u32 4294901760, %v9757_v30  ;;  %v9776_v57 = vsub.f32 %v3208_v2, %v9759_v63 }
 0x275   :  { %2395 = vmatmul.mubr.f32.gmra.mxu0 %v9409_v22  ;;  %2651 = vmatmul.mubr.f32.gmra.mxu1 %v12832_v51  ;;  %v12838_v22 = vld [vmem:[#allocation142_spill] sm:$0xff]  ;;  %v3191_v51 = vld [vmem:[#allocation7 + $0x58] sm:$0xff] }
 0x276   :  { %2400 = vmatprep.mubr.f32.mxu0 %v12672_v3  ;;  %2656 = vmatprep.mubr.f32.mxu1 %v12672_v3  ;;  %12871 = vst [vmem:[#allocation44_spill] sm:$0xff] %v9776_v57 }
 0x277   :  { %2998 = vmatpush1.msra.mxu1 %v12833_v8  ;;  %2769 = vmatpush1.msra.mxu0 %v12834_v11  ;;  %v12872_v8 = vld [vmem:[#allocation152_spill] sm:$0xff]  ;;  %v3554_v11 = vand.u32 4294901760, %v3553_v25 }
 0x278   :  { %3000 = vmatprep.subr.mxu1 %v12835_v12  ;;  %2773 = vmatprep.subr.mxu0 %v12836_v56  ;;  %v3560_v12 = vsub.f32 %v9746_v1, %v12246_v54  ;;  %v12242_v56 = vand.u32 4294901760, %v9766_v40 }
 0x279   :  { %2403 = vmatmul.mubr.f32.gmra.mxu0 %v9422_v16  ;;  %2660 = vmatmul.mubr.f32.gmra.mxu1 %v12837_v27  ;;  %v12842_v16 = vand.u32 4294901760, %v12774_v15  ;;  %v12847_v15 = vld [vmem:[#allocation167_spill] sm:$0xff]  ;;  %v9786_v27 = vsub.f32 %v3192_v10, %v9768_v31 }
 0x27a   :  { %2408 = vmatprep.mubr.f32.mxu0 %v12672_v3  ;;  %3002 = vmatpush1.msra.mxu1 %v12838_v22  ;;  %v3206_v22 = vld [vmem:[#allocation7 + $0xd0] sm:$0xff] }
 0x27b   :  { %3035 = vmatprep.mubr.f32.mxu1 %v12672_v3  ;;  %2777 = vmatpush1.msra.mxu0 %v12839_v53  ;;  %12873 = vst [vmem:[#allocation52_spill] sm:$0xff] %v9786_v27  ;;  %v3673_v53 = vand.u32 4294901760, %v3672_v55 }
 0x27c   :  { %2781 = vmatprep.subr.mxu0 %v12840_v46  ;;  %v3679_v46 = vsub.f32 %v9757_v30, %v12244_v59  ;;  %6578 = vmatprep.subr.mxu1 %v3666_v24 }
 0x27d   :  { %2411 = vmatmul.mubr.f32.gmra.mxu0 %v9443_v60  ;;  %3037 = vmatmul.mubr.f32.vlgmr.msra.gmra.mxu1 %v12841_v62  ;;  %v12846_v60 = vld [vmem:[#allocation168_spill] sm:$0xff] }
 0x27e   :  { %2416 = vmatprep.mubr.f32.mxu0 %v12672_v3  ;;  %3042 = vmatprep.mubr.f32.mxu1 %v12672_v3 }
 0x27f   :  { %2785 = vmatpush1.msra.mxu0 %v12842_v16  ;;  %v9794_v16 = vand.u32 4294901760, %v3207_v6  ;;  %6579 = vmatpush3.msra.mxu1 %v3554_v11  ;;  %v12887_v11 = vld [vmem:[#allocation54_spill] sm:$0xff] }
 0x280   :  { %2789 = vmatprep.subr.mxu0 %v12843_v17  ;;  %v3190_v17 = vld [vmem:[#allocation7 + $0x50] sm:$0xff]  ;;  %6580 = vmatprep.subr.mxu1 %v3673_v53 }
 0x281   :  { %2419 = vmatmul.mubr.f32.gmra.mxu0 %v9457_v58  ;;  %3044 = vmatmul.mubr.f32.gmra.mxu1 %v12844_v33  ;;  %v12848_v58 = vld [vmem:[#allocation169_spill] sm:$0xff]  ;;  %12874 = vst [vmem:[#allocation147_spill] sm:$0xff] %v9794_v16 }
 0x282   :  { %2793 = vmatpush1.msra.mxu0 %v12845_v48  ;;  %2826 = vmatprep.mubr.f32.mxu0 %v12672_v3  ;;  %v3567_v48 = vsub.f32 %v9766_v40, %v12242_v56 }
 0x283   :  { %3049 = vmatprep.mubr.f32.mxu1 %v12672_v3  ;;  %6498 = vmatprep.subr.mxu0 %v9707_v13 }
 0x285   :  { %2828 = vmatmul.mubr.f32.vlgmr.msra.gmra.mxu0 %v12841_v62  ;;  %3051 = vmatmul.mubr.f32.gmra.mxu1 %v12846_v60  ;;  %v12241_v62 = vand.u32 4294901760, %v9776_v57 }
 0x286   :  { %2833 = vmatprep.mubr.f32.mxu0 %v12672_v3  ;;  %3056 = vmatprep.mubr.f32.mxu1 %v12672_v3 }
 0x287   :  { %6499 = vmatpush3.msra.mxu0 %v9712_v9 }
 0x288   :  { %6500 = vmatprep.subr.mxu0 %v9724_v29 }
 0x289   :  { %2835 = vmatmul.mubr.f32.gmra.mxu0 %v12844_v33  ;;  %3058 = vmatmul.mubr.f32.gmra.mxu1 %v12847_v15  ;;  %v3561_v33 = vand.u32 4294901760, %v3560_v12 }
 0x28a   :  { %2840 = vmatprep.mubr.f32.mxu0 %v12672_v3  ;;  %3063 = vmatprep.mubr.f32.mxu1 %v12672_v3 }
 0x28b   :  { %6501 = vmatpush3.msra.mxu0 %v9729_v21  ;;  %6581 = vmatpush3.msra.mxu1 %v3561_v33 }
 0x28c   :  { %6502 = vmatprep.subr.mxu0 %v9736_v23 }
 0x28d   :  { %2842 = vmatmul.mubr.f32.gmra.mxu0 %v12846_v60  ;;  %3065 = vmatmul.mubr.f32.gmra.mxu1 %v12848_v58  ;;  %v12240_v60 = vand.u32 4294901760, %v9786_v27 }
 0x28e   :  { %2847 = vmatprep.mubr.f32.mxu0 %v12672_v3  ;;  %3070 = vmatprep.mubr.f32.mxu1 %v12672_v3 }
 0x28f   :  { %6503 = vmatpush3.msra.mxu0 %v9748_v35  ;;  %v3574_v18 = vsub.f32 %v9786_v27, %v12240_v60  ;;  %v3201_v60 = vld [vmem:[#allocation7 + $0xa8] sm:$0xff] }
 0x290   :  { %6504 = vmatprep.subr.mxu0 %v9759_v63 }
 0x291   :  { %2849 = vmatmul.mubr.f32.gmra.mxu0 %v12847_v15  ;;  %3072 = vmatmul.mubr.f32.gmra.mxu1 %v12849_v4  ;;  %v9800_v15 = vand.u32 4294901760, %v3191_v51  ;;  %v3575_v2 = vand.u32 4294901760, %v3574_v18 }
 0x292   :  { %2854 = vmatprep.mubr.f32.mxu0 %v12672_v3  ;;  %3077 = vmatprep.mubr.f32.mxu1 %v12672_v3 }
 0x293   :  { %12875 = vst [vmem:[#allocation151_spill] sm:$0xff] %v9800_v15  ;;  %v9818_v45 = vsub.f32 %v3191_v51, %v9800_v15  ;;  %v9844_v51 = vand.u32 4294901760, %v3204_v19  ;;  %6505 = vmatpush3.msra.mxu0 %v9768_v31 }
 0x294   :  { %6506 = vmatprep.subr.mxu0 %v9794_v16 }
 0x295   :  { %2856 = vmatmul.mubr.f32.gmra.mxu0 %v12848_v58  ;;  %3079 = vmatmul.mubr.f32.gmra.mxu1 %v12850_v49  ;;  %v3205_v58 = vld [vmem:[#allocation7 + $0xc8] sm:$0xff]  ;;  %12879 = vst [vmem:[#allocation159_spill] sm:$0xff] %v9818_v45  ;;  %v12235_v34 = vand.u32 4294901760, %v9818_v45  ;;  %12886 = vst [vmem:[#allocation163_spill] sm:$0xff] %v9844_v51 }
 0x296   :  { %2861 = vmatprep.mubr.f32.mxu0 %v12672_v3  ;;  %3084 = vmatprep.mubr.f32.mxu1 %v12672_v3  ;;  %v9828_v41 = vand.u32 4294901760, %v3205_v58 }
 0x297   :  { %v3581_v12 = vsub.f32 %v9818_v45, %v12235_v34  ;;  %6507 = vmatpush3.msra.mxu0 %v9800_v15  ;;  %v3180_v45 = vld [vmem:[#allocation7] sm:$0xff] }
 0x298   :  { %12882 = vst [vmem:[#allocation157_spill] sm:$0xff] %v9828_v41  ;;  %v9842_v55 = vsub.f32 %v3205_v58, %v9828_v41  ;;  %v9864_v58 = vsub.f32 %v3204_v19, %v9844_v51 }
 0x299   :  { %2863 = vmatmul.mubr.f32.gmra.mxu0 %v12849_v4  ;;  %3086 = vmatmul.mubr.f32.gmra.mxu1 %v12851_v52  ;;  %v3680_v4 = vand.u32 4294901760, %v3679_v46 }
 0x29a   :  { %2868 = vmatprep.mubr.f32.mxu0 %v12672_v3  ;;  %3091 = vmatprep.mubr.f32.mxu1 %v12672_v3  ;;  %12885 = vst [vmem:[#allocation111_spill] sm:$0xff] %v9842_v55  ;;  %12890 = vst [vmem:[#allocation115_spill] sm:$0xff] %v9864_v58 }
 0x29b   :  { %6582 = vmatprep.subr.mxu1 %v3680_v4 }
 0x29d   :  { %2870 = vmatmul.mubr.f32.gmra.mxu0 %v12850_v49  ;;  %3093 = vmatmul.mubr.f32.gmra.mxu1 %v12852_v7  ;;  %v3686_v49 = vsub.f32 %v9776_v57, %v12241_v62 }
 0x29e   :  { %2875 = vmatprep.mubr.f32.mxu0 %v12672_v3  ;;  %3098 = vmatprep.mubr.f32.mxu1 %v12672_v3 }
 0x29f   :  { %v3687_v61 = vand.u32 4294901760, %v3686_v49  ;;  %v3187_v49 = vld [vmem:[#allocation7 + $0x38] sm:$0xff] }
 0x2a1   :  { %2877 = vmatmul.mubr.f32.gmra.mxu0 %v12851_v52  ;;  %3100 = vmatmul.mubr.f32.gmra.mxu1 %v12853_v26  ;;  %v9807_v52 = vsub.f32 %v3207_v6, %v9794_v16 }
 0x2a2   :  { %2882 = vmatprep.mubr.f32.mxu0 %v12672_v3  ;;  %3105 = vmatprep.mubr.f32.mxu1 %v12672_v3 }
 0x2a3   :  { %12876 = vst [vmem:[#allocation161_spill] sm:$0xff] %v9807_v52  ;;  %v12238_v42 = vand.u32 4294901760, %v9807_v52 }
 0x2a5   :  { %2884 = vmatmul.mubr.f32.gmra.mxu0 %v12852_v7  ;;  %3107 = vmatmul.mubr.f32.gmra.mxu1 %v12854_v0  ;;  %v9809_v7 = vand.u32 4294901760, %v3206_v22  ;;  %v3693_v6 = vsub.f32 %v9807_v52, %v12238_v42 }
 0x2a6   :  { %2889 = vmatprep.mubr.f32.mxu0 %v12672_v3  ;;  %3112 = vmatprep.mubr.f32.mxu1 %v12672_v3 }
 0x2a7   :  { %12877 = vst [vmem:[#allocation60_spill] sm:$0xff] %v9809_v7  ;;  %v9826_v44 = vsub.f32 %v3206_v22, %v9809_v7  ;;  %v3694_v33 = vand.u32 4294901760, %v3693_v6  ;;  %v3202_v6 = vld [vmem:[#allocation7 + $0xb0] sm:$0xff]  ;;  %6508 = vmatprep.subr.mxu0 %v9809_v7 }
 0x2a9   :  { %2891 = vmatmul.mubr.f32.gmra.mxu0 %v12853_v26  ;;  %3114 = vmatmul.mubr.f32.gmra.mxu1 %v12856_v20  ;;  %v3189_v26 = vld [vmem:[#allocation7 + $0x48] sm:$0xff]  ;;  %12881 = vst [vmem:[#allocation150_spill] sm:$0xff] %v9826_v44  ;;  %v12236_v24 = vand.u32 4294901760, %v9826_v44 }
 0x2aa   :  { %2896 = vmatprep.mubr.f32.mxu0 %v12672_v3  ;;  %3119 = vmatprep.mubr.f32.mxu1 %v12672_v3  ;;  %v9834_v25 = vand.u32 4294901760, %v3189_v26 }
 0x2ac   :  { %12884 = vst [vmem:[#allocation109_spill] sm:$0xff] %v9834_v25  ;;  %v9854_v53 = vsub.f32 %v3189_v26, %v9834_v25  ;;  %v3582_v26 = vand.u32 4294901760, %v3581_v12 }
 0x2ad   :  { %2898 = vmatmul.mubr.f32.gmra.mxu0 %v12854_v0  ;;  %3121 = vmatmul.mubr.f32.gmra.mxu1 %v12864_v36  ;;  %v3568_v0 = vand.u32 4294901760, %v3567_v48  ;;  %v12239_v48 = vand.u32 4294901760, %v9842_v55 }
 0x2ae   :  { %2903 = vmatprep.mubr.f32.mxu0 %v12672_v3  ;;  %3126 = vmatprep.mubr.f32.mxu1 %v12672_v3  ;;  %12888 = vst [vmem:[#allocation124_spill] sm:$0xff] %v9854_v53  ;;  %v12243_v34 = vand.u32 4294901760, %v9854_v53 }
 0x2af   :  { %6583 = vmatpush3.msra.mxu1 %v3568_v0  ;;  %v3707_v19 = vsub.f32 %v9842_v55, %v12239_v48  ;;  %v12245_v0 = vand.u32 4294901760, %v9864_v58  ;;  %v9888_v48 = vand.u32 4294901760, %v3187_v49 }
 0x2b0   :  { %6584 = vmatprep.subr.mxu1 %v3687_v61  ;;  %v3595_v61 = vsub.f32 %v9854_v53, %v12243_v34 }
 0x2b1   :  { %2905 = vmatmul.mubr.f32.gmra.mxu0 %v12856_v20  ;;  %3128 = vmatmul.mubr.f32.gmra.mxu1 %v12872_v8  ;;  %v9820_v20 = vand.u32 4294901760, %v3190_v17  ;;  %12893 = vst [vmem:[#allocation125_spill] sm:$0xff] %v9888_v48  ;;  %v3708_v62 = vand.u32 4294901760, %v3707_v19  ;;  %v3714_v56 = vsub.f32 %v9864_v58, %v12245_v0 }
 0x2b2   :  { %2910 = vmatprep.mubr.f32.mxu0 %v12672_v3  ;;  %3133 = vmatprep.mubr.f32.mxu1 %v12672_v3  ;;  %v3596_v59 = vand.u32 4294901760, %v3595_v61  ;;  %v3184_v61 = vld [vmem:[#allocation7 + $0x20] sm:$0xff] }
 0x2b3   :  { %12880 = vst [vmem:[#allocation107_spill] sm:$0xff] %v9820_v20  ;;  %v9832_v10 = vsub.f32 %v3190_v17, %v9820_v20  ;;  %v3203_v17 = vld [vmem:[#allocation7 + $0xb8] sm:$0xff]  ;;  %6585 = vmatpush3.msra.mxu1 %v3575_v2  ;;  %v9897_v2 = vand.u32 4294901760, %v3202_v6  ;;  %v3715_v0 = vand.u32 4294901760, %v3714_v56  ;;  %6509 = vmatpush3.msra.mxu0 %v9820_v20  ;;  %v9946_v50 = vand.u32 4294901760, %v3184_v61 }
 0x2b4   :  { %v9878_v12 = vand.u32 4294901760, %v3203_v17  ;;  %6586 = vmatprep.subr.mxu1 %v3694_v33  ;;  %v9905_v33 = vsub.f32 %v3187_v49, %v9888_v48  ;;  %6510 = vmatprep.subr.mxu0 %v9828_v41 }
 0x2b5   :  { %2912 = vmatmul.mubr.f32.gmra.mxu0 %v12864_v36  ;;  %3135 = vmatmul.mubr.f32.gmra.mxu1 %v12878_v28  ;;  %v3188_v36 = vld [vmem:[#allocation7 + $0x40] sm:$0xff]  ;;  %12883 = vst [vmem:[#allocation164_spill] sm:$0xff] %v9832_v10  ;;  %v12237_v22 = vand.u32 4294901760, %v9832_v10  ;;  %12895 = vst [vmem:[#allocation133_spill] sm:$0xff] %v9897_v2  ;;  %v9912_v38 = vsub.f32 %v3202_v6, %v9897_v2 }
 0x2b6   :  { %2917 = vmatprep.mubr.f32.mxu0 %v12672_v3  ;;  %3140 = vmatprep.mubr.f32.mxu1 %v12672_v3  ;;  %v9856_v46 = vand.u32 4294901760, %v3188_v36  ;;  %12892 = vst [vmem:[#allocation119_spill] sm:$0xff] %v9878_v12  ;;  %12896 = vst [vmem:[#allocation51_spill] sm:$0xff] %v9905_v33  ;;  %v12256_v39 = vand.u32 4294901760, %v9905_v33 }
 0x2b7   :  { %v3588_v18 = vsub.f32 %v9832_v10, %v12237_v22  ;;  %v3186_v22 = vld [vmem:[#allocation7 + $0x30] sm:$0xff]  ;;  %6587 = vmatpush3.msra.mxu1 %v3582_v26  ;;  %12898 = vst [vmem:[#allocation137_spill] sm:$0xff] %v9912_v38  ;;  %v9915_v26 = vand.u32 4294901760, %v3201_v60  ;;  %6511 = vmatpush3.msra.mxu0 %v9834_v25  ;;  %12905 = vst [vmem:[#allocation114_spill] sm:$0xff] %v9946_v50 }
 0x2b8   :  { %12889 = vst [vmem:[#allocation112_spill] sm:$0xff] %v9856_v46  ;;  %v9871_v4 = vsub.f32 %v3188_v36, %v9856_v46  ;;  %v9908_v19 = vand.u32 4294901760, %v3186_v22  ;;  %6512 = vmatprep.subr.mxu0 %v9844_v51 }
 0x2b9   :  { %2919 = vmatmul.mubr.f32.gmra.mxu0 %v12872_v8  ;;  %3142 = vmatmul.mubr.f32.gmra.mxu1 %v12887_v11  ;;  %v3700_v8 = vsub.f32 %v9826_v44, %v12236_v24  ;;  %v3589_v36 = vand.u32 4294901760, %v3588_v18  ;;  %v3185_v18 = vld [vmem:[#allocation7 + $0x28] sm:$0xff]  ;;  %12899 = vst [vmem:[#allocation139_spill] sm:$0xff] %v9915_v26 }
 0x2ba   :  { %2924 = vmatprep.mubr.f32.mxu0 %v12672_v3  ;;  %12891 = vst [vmem:[#allocation117_spill] sm:$0xff] %v9871_v4  ;;  %12897 = vst [vmem:[#allocation135_spill] sm:$0xff] %v9908_v19  ;;  %v9922_v56 = vsub.f32 %v3186_v22, %v9908_v19  ;;  %v3199_v22 = vld [vmem:[#allocation7 + $0x98] sm:$0xff]  ;;  %6513 = vmatpush3.msra.mxu0 %v9856_v46 }
 0x2bb   :  { %v3701_v24 = vand.u32 4294901760, %v3700_v8  ;;  %v12248_v8 = vand.u32 4294901760, %v9871_v4  ;;  %6514 = vmatprep.subr.mxu0 %v9878_v12 }
 0x2bc   :  { %12900 = vst [vmem:[#allocation141_spill] sm:$0xff] %v9922_v56  ;;  %6515 = vmatpush3.msra.mxu0 %v9888_v48 }
 0x2bd   :  { %v9881_v42 = vpop.f32.mrf.mxu1  ;;  %2926 = vmatmul.mubr.f32.gmra.mxu0 %v12878_v28  ;;  %v9895_v28 = vsub.f32 %v3203_v17, %v9878_v12  ;;  %v3200_v17 = vld [vmem:[#allocation7 + $0xa0] sm:$0xff]  ;;  %6588 = vmatprep.subr.mxu1 %v3701_v24  ;;  %v9924_v24 = vand.u32 4294901760, %v3185_v18 }
 0x2be   :  { %2931 = vmatprep.mubr.f32.mxu0 %v12672_v3  ;;  %v3602_v3 = vsub.f32 %v9871_v4, %v12248_v8  ;;  %6589 = vmatpush3.msra.mxu1 %v3589_v36  ;;  %v9934_v36 = vand.u32 4294901760, %v3200_v17 }
 0x2bf   :  { %12894 = vst [vmem:[#allocation131_spill] sm:$0xff] %v9895_v28  ;;  %v9899_v34 = vpop.f32.mrf.mxu1  ;;  %v12251_v54 = vand.u32 4294901760, %v9895_v28  ;;  %12901 = vst [vmem:[#allocation143_spill] sm:$0xff] %v9924_v24  ;;  %6590 = vmatprep.subr.mxu1 %v3708_v62  ;;  %v3609_v62 = vsub.f32 %v9905_v33, %v12256_v39  ;;  %6516 = vmatprep.subr.mxu0 %v9897_v2 }
 0x2c0   :  { %v3603_v49 = vand.u32 4294901760, %v3602_v3  ;;  %12903 = vst [vmem:[#allocation22_spill] sm:$0xff] %v9934_v36  ;;  %6591 = vmatpush3.msra.mxu1 %v3596_v59  ;;  %v9954_v39 = vsub.f32 %v3200_v17, %v9934_v36  ;;  %6517 = vmatpush3.msra.mxu0 %v9908_v19 }
 0x2c1   :  { %v9917_v8 = vpop.f32.mrf.mxu1  ;;  %2933 = vmatmul.mubr.f32.gmra.mxu0 %v12887_v11  ;;  %v3721_v6 = vsub.f32 %v9895_v28, %v12251_v54  ;;  %v9932_v11 = vsub.f32 %v3201_v60, %v9915_v26  ;;  %v9944_v54 = vsub.f32 %v3185_v18, %v9924_v24  ;;  %6592 = vmatprep.subr.mxu1 %v3715_v0  ;;  %v12906_v28 = vand.u32 4294901760, %v9912_v38 }
 0x2c2   :  { %12907 = vst [vmem:[#allocation116_spill] sm:$0xff] %v9954_v39  ;;  %6593 = vmatpush3.msra.mxu1 %v3603_v49  ;;  %v3610_v18 = vand.u32 4294901760, %v3609_v62  ;;  %v12908_v0 = vand.u32 4294901760, %v9922_v56  ;;  %v12913_v10 = vand.u32 4294901760, %v9954_v39  ;;  %6518 = vmatprep.subr.mxu0 %v9915_v26 }
 0x2c3   :  { %12902 = vst [vmem:[#allocation144_spill] sm:$0xff] %v9932_v11  ;;  %v9936_v3 = vpop.f32.mrf.mxu1  ;;  %12904 = vst [vmem:[#allocation113_spill] sm:$0xff] %v9944_v54  ;;  %v3722_v60 = vand.u32 4294901760, %v3721_v6  ;;  %v3728_v4 = vsub.f32 %v9912_v38, %v12906_v28  ;;  %v9964_v28 = vsub.f32 %v3184_v61, %v9946_v50  ;;  %v12910_v38 = vand.u32 4294901760, %v9932_v11  ;;  %6519 = vmatpush3.msra.mxu0 %v9924_v24 }
 0x2c4   :  { %v3616_v6 = vsub.f32 %v9922_v56, %v12908_v0  ;;  %v3183_v0 = vld [vmem:[#allocation7 + $0x18] sm:$0xff]  ;;  %v12911_v55 = vand.u32 4294901760, %v9944_v54  ;;  %6520 = vmatprep.subr.mxu0 %v9934_v36 }
 0x2c5   :  { %v1661_v33 = vpop.f32.mrf.mxu0  ;;  %v9956_v58 = vpop.f32.mrf.mxu1  ;;  %12909 = vst [vmem:[#allocation118_spill] sm:$0xff] %v9964_v28  ;;  %6594 = vmatprep.subr.mxu1 %v3722_v60  ;;  %v3729_v59 = vand.u32 4294901760, %v3728_v4  ;;  %v3735_v49 = vsub.f32 %v9932_v11, %v12910_v38  ;;  %v9980_v60 = vand.u32 4294901760, %v3199_v22  ;;  %v3198_v38 = vld [vmem:[#allocation7 + $0x90] sm:$0xff]  ;;  %v12914_v44 = vand.u32 4294901760, %v9964_v28  ;;  %6521 = vmatpush3.msra.mxu0 %v9946_v50 }
 0x2c6   :  { %v1662_v17 = vadd.f32 %v1661_v33, %v9742_v32  ;;  %6595 = vmatpush3.msra.mxu1 %v3610_v18  ;;  %v3617_v61 = vand.u32 4294901760, %v3616_v6  ;;  %v3623_v33 = vsub.f32 %v9944_v54, %v12911_v55  ;;  %v3742_v18 = vsub.f32 %v9954_v39, %v12913_v10  ;;  %v3182_v6 = vld [vmem:[#allocation7 + $0x10] sm:$0xff]  ;;  %v3197_v10 = vld [vmem:[#allocation7 + $0x88] sm:$0xff] }
 0x2c7   :  { %v9972_v56 = vpop.f32.mrf.mxu0  ;;  %v9974_v53 = vpop.f32.mrf.mxu1  ;;  %12912 = vst [vmem:[#allocation120_spill] sm:$0xff] %v9980_v60  ;;  %6596 = vmatprep.subr.mxu1 %v3729_v59  ;;  %v3736_v11 = vand.u32 4294901760, %v3735_v49  ;;  %v3630_v48 = vsub.f32 %v9964_v28, %v12914_v44  ;;  %v9998_v59 = vand.u32 4294901760, %v3183_v0  ;;  %v10002_v39 = vand.u32 4294901760, %v3198_v38  ;;  %6522 = vmatprep.subr.mxu0 %v9980_v60 }
 0x2c8   :  { %v9984_v62 = vadd.f32 %v9881_v42, %v1662_v17  ;;  %6597 = vmatpush3.msra.mxu1 %v3617_v61  ;;  %v3624_v4 = vand.u32 4294901760, %v3623_v33  ;;  %v9996_v42 = vsub.f32 %v3199_v22, %v9980_v60  ;;  %v3743_v49 = vand.u32 4294901760, %v3742_v18  ;;  %v3181_v61 = vld [vmem:[#allocation7 + $0x8] sm:$0xff] }
 0x2c9   :  { %v1672_v55 = vpop.f32.mrf.mxu0  ;;  %v9990_v54 = vpop.f32.mrf.mxu1  ;;  %12916 = vst [vmem:[#allocation126_spill] sm:$0xff] %v9998_v59  ;;  %6598 = vmatprep.subr.mxu1 %v3736_v11  ;;  %12917 = vst [vmem:[#allocation121_spill] sm:$0xff] %v10002_v39  ;;  %v3631_v22 = vand.u32 4294901760, %v3630_v48  ;;  %v10011_v19 = vsub.f32 %v3183_v0, %v9998_v59  ;;  %v10013_v2 = vand.u32 4294901760, %v3182_v6  ;;  %v10020_v18 = vsub.f32 %v3198_v38, %v10002_v39 }
 0x2ca   :  { %12915 = vst [vmem:[#allocation122_spill] sm:$0xff] %v9996_v42  ;;  %v1673_v17 = vadd.f32 %v1672_v55, %v9742_v32  ;;  %6599 = vmatpush3.msra.mxu1 %v3624_v4  ;;  %v12291_v28 = vand.u32 4294901760, %v9996_v42  ;;  %v10022_v55 = vand.u32 4294901760, %v3197_v10  ;;  %6523 = vmatpush3.msra.mxu0 %v9998_v59 }
 0x2cb   :  { %v10005_v33 = vpop.f32.mrf.mxu0  ;;  %v10007_v44 = vpop.f32.mrf.mxu1  ;;  %12918 = vst [vmem:[#allocation129_spill] sm:$0xff] %v10011_v19  ;;  %12919 = vst [vmem:[#allocation123_spill] sm:$0xff] %v10013_v2  ;;  %6600 = vmatprep.subr.mxu1 %v3743_v49  ;;  %v12306_v49 = vand.u32 4294901760, %v10020_v18  ;;  %6524 = vmatprep.subr.mxu0 %v10002_v39 }
 0x2cc   :  { %v10017_v11 = vadd.f32 %v9917_v8, %v1673_v17  ;;  %12920 = vst [vmem:[#allocation130_spill] sm:$0xff] %v10020_v18  ;;  %12921 = vst [vmem:[#allocation132_spill] sm:$0xff] %v10022_v55  ;;  %6601 = vmatpush3.msra.mxu1 %v3631_v22  ;;  %v3749_v0 = vsub.f32 %v9996_v42, %v12291_v28  ;;  %v10032_v8 = vsub.f32 %v3182_v6, %v10013_v2  ;;  %v3196_v22 = vld [vmem:[#allocation7 + $0x80] sm:$0xff] }
 0x2cd   :  { %v1683_v48 = vpop.f32.mrf.mxu0  ;;  %v10025_v4 = vpop.f32.mrf.mxu1  ;;  %v10034_v17 = vand.u32 4294901760, %v3181_v61  ;;  %v10040_v36 = vsub.f32 %v3197_v10, %v10022_v55  ;;  %v12925_v42 = vand.u32 4294901760, %v10011_v19  ;;  %v3756_v60 = vsub.f32 %v10020_v18, %v12306_v49  ;;  %6525 = vmatpush3.msra.mxu0 %v10013_v2 }
 0x2ce   :  { %12922 = vst [vmem:[#allocation127_spill] sm:$0xff] %v10032_v8  ;;  %v1684_v38 = vadd.f32 %v1683_v48, %v9742_v32  ;;  %v3750_v6 = vand.u32 4294901760, %v3749_v0  ;;  %6526 = vmatprep.subr.mxu0 %v10022_v55 }
 0x2cf   :  { %12923 = vst [vmem:[#allocation134_spill] sm:$0xff] %v10034_v17  ;;  %12924 = vst [vmem:[#allocation128_spill] sm:$0xff] %v10040_v36  ;;  %v10043_v28 = vpop.f32.mrf.mxu0  ;;  %v10045_v24 = vpop.f32.mrf.mxu1  ;;  %v3637_v26 = vsub.f32 %v10011_v19, %v12925_v42  ;;  %v10052_v48 = vsub.f32 %v3181_v61, %v10034_v17  ;;  %v12927_v61 = vand.u32 4294901760, %v10032_v8  ;;  %v3757_v0 = vand.u32 4294901760, %v3756_v60  ;;  %6527 = vmatpush3.msra.mxu0 %v10034_v17 }
 0x2d0   :  { %v10056_v10 = vadd.f32 %v9956_v58, %v1684_v38  ;;  %6602 = vmatprep.subr.mxu1 %v3750_v6  ;;  %v10067_v38 = vand.u32 4294901760, %v3196_v22  ;;  %v12929_v18 = vand.u32 4294901760, %v10040_v36  ;;  %v10085_v60 = vand.u32 4294901760, %v3180_v45 }
 0x2d1   :  { %12926 = vst [vmem:[#allocation136_spill] sm:$0xff] %v10052_v48  ;;  %v1694_v42 = vpop.f32.mrf.mxu0  ;;  %v2093_v19 = vpop.f32.mrf.mxu1  ;;  %v3638_v50 = vand.u32 4294901760, %v3637_v26  ;;  %v3644_v59 = vsub.f32 %v10032_v8, %v12927_v61  ;;  %v12317_v58 = vand.u32 4294901760, %v10052_v48 }
 0x2d2   :  { %12928 = vst [vmem:[#allocation138_spill] sm:$0xff] %v10067_v38  ;;  %v1695_v49 = vadd.f32 %v1694_v42, %v9742_v32  ;;  %v3763_v39 = vsub.f32 %v10040_v36, %v12929_v18  ;;  %v10083_v2 = vsub.f32 %v3196_v22, %v10067_v38  ;;  %12931 = vst [vmem:[#allocation142_spill] sm:$0xff] %v10085_v60  ;;  %6528 = vmatprep.subr.mxu0 %v10067_v38 }
 0x2d3   :  { %v10075_v26 = vpop.f32.mrf.mxu0  ;;  %v10077_v6 = vpop.f32.mrf.mxu1  ;;  %6603 = vmatpush3.msra.mxu1 %v3638_v50  ;;  %v3645_v61 = vand.u32 4294901760, %v3644_v59  ;;  %v3651_v8 = vsub.f32 %v10052_v48, %v12317_v58  ;;  %v10094_v22 = vsub.f32 %v3180_v45, %v10085_v60  ;;  %6529 = vmatpush3.msra.mxu0 %v10085_v60 }
 0x2d4   :  { %12930 = vst [vmem:[#allocation140_spill] sm:$0xff] %v10083_v2  ;;  %v10089_v18 = vadd.f32 %v9990_v54, %v1695_v49  ;;  %6604 = vmatprep.subr.mxu1 %v3757_v0  ;;  %v3764_v42 = vand.u32 4294901760, %v3763_v39  ;;  %v12323_v58 = vand.u32 4294901760, %v10083_v2  ;;  %6658 = vmatprep.subr.mxu0 %v9722_v14 }
 0x2d5   :  { %v1705_v50 = vpop.f32.mrf.mxu0  ;;  %v2100_v59 = vpop.f32.mrf.mxu1  ;;  %6605 = vmatpush3.msra.mxu1 %v3645_v61  ;;  %v3652_v36 = vand.u32 4294901760, %v3651_v8  ;;  %12932 = vst [vmem:[#allocation166_spill] sm:$0xff] %v10094_v22  ;;  %v12328_v49 = vand.u32 4294901760, %v10094_v22 }
 0x2d6   :  { %v1706_v48 = vadd.f32 %v1705_v50, %v9742_v32  ;;  %6606 = vmatprep.subr.mxu1 %v3764_v42  ;;  %v3770_v8 = vsub.f32 %v10083_v2, %v12323_v58 }
 0x2d7   :  { %v10099_v54 = vpop.f32.mrf.mxu0  ;;  %v10101_v39 = vpop.f32.mrf.mxu1  ;;  %6607 = vmatpush3.msra.mxu1 %v3652_v36  ;;  %v3658_v42 = vsub.f32 %v10094_v22, %v12328_v49 }
 0x2d8   :  { %v10108_v45 = vadd.f32 %v10025_v4, %v1706_v48  ;;  %v3771_v50 = vand.u32 4294901760, %v3770_v8 }
 0x2d9   :  { %v1716_v0 = vpop.f32.mrf.mxu0  ;;  %v2107_v61 = vpop.f32.mrf.mxu1  ;;  %v3659_v58 = vand.u32 4294901760, %v3658_v42 }
 0x2da   :  { %v1717_v14 = vadd.f32 %v1716_v0, %v9742_v32  ;;  %6608 = vmatprep.subr.mxu1 %v3771_v50 }
 0x2db   :  { %v10114_v60 = vpop.f32.mrf.mxu0  ;;  %v10116_v36 = vpop.f32.mrf.mxu1  ;;  %6609 = vmatpush3.msra.mxu1 %v3659_v58 }
 0x2dc   :  { %v10118_v2 = vadd.f32 %v2093_v19, %v1717_v14  ;;  %6738 = vmatprep.subr.mxu1 %v9707_v13 }
 0x2dd   :  { %v1727_v38 = vpop.f32.mrf.mxu0  ;;  %v2114_v4 = vpop.f32.mrf.mxu1 }
 0x2de   :  { %v1728_v48 = vadd.f32 %v1727_v38, %v9742_v32 }
 0x2df   :  { %v10122_v8 = vpop.f32.mrf.mxu0  ;;  %v10124_v49 = vpop.f32.mrf.mxu1 }
 0x2e0   :  { %v10126_v0 = vadd.f32 %v2100_v59, %v1728_v48 }
 0x2e1   :  { %v1738_v22 = vpop.f32.mrf.mxu0  ;;  %v2121_v17 = vpop.f32.mrf.mxu1 }
 0x2e2   :  { %v1739_v50 = vadd.f32 %v1738_v22, %v9742_v32 }
 0x2e3   :  { %v10129_v42 = vpop.f32.mrf.mxu0  ;;  %v10131_v14 = vpop.f32.mrf.mxu1 }
 0x2e4   :  { %v10133_v19 = vadd.f32 %v2107_v61, %v1739_v50 }
 0x2e5   :  { %v1749_v58 = vpop.f32.mrf.mxu0  ;;  %v2128_v38 = vpop.f32.mrf.mxu1 }
 0x2e6   :  { %v1750_v13 = vadd.f32 %v1749_v58, %v9742_v32 }
 0x2e7   :  { %v10136_v55 = vpop.f32.mrf.mxu0  ;;  %v10138_v12 = vpop.f32.mrf.mxu1 }
 0x2e8   :  { %v10140_v59 = vadd.f32 %v2114_v4, %v1750_v13 }
 0x2e9   :  { %v1760_v48 = vpop.f32.mrf.mxu0  ;;  %v2135_v52 = vpop.f32.mrf.mxu1 }
 0x2ea   :  { %v1761_v22 = vadd.f32 %v1760_v48, %v9742_v32 }
 0x2eb   :  { %v10143_v46 = vpop.f32.mrf.mxu0  ;;  %v10145_v27 = vpop.f32.mrf.mxu1 }
 0x2ec   :  { %12933 = vst [vmem:[#allocation165_spill] sm:$0xff] %v10145_v27  ;;  %v10147_v61 = vadd.f32 %v2121_v17, %v1761_v22 }
 0x2ed   :  { %v1771_v50 = vpop.f32.mrf.mxu0  ;;  %v2142_v51 = vpop.f32.mrf.mxu1 }
 0x2ee   :  { %v1772_v58 = vadd.f32 %v1771_v50, %v9742_v32 }
 0x2ef   :  { %v10150_v57 = vpop.f32.mrf.mxu0  ;;  %v10152_v25 = vpop.f32.mrf.mxu1 }
 0x2f0   :  { %12934 = vst [vmem:[#allocation168_spill] sm:$0xff] %v10152_v25  ;;  %v10154_v13 = vadd.f32 %v2128_v38, %v1772_v58 }
 0x2f1   :  { %v1782_v4 = vpop.f32.mrf.mxu0  ;;  %v2149_v40 = vpop.f32.mrf.mxu1 }
 0x2f2   :  { %v1783_v48 = vadd.f32 %v1782_v4, %v9742_v32 }
 0x2f3   :  { %v10157_v41 = vpop.f32.mrf.mxu0  ;;  %v10159_v30 = vpop.f32.mrf.mxu1 }
 0x2f4   :  { %12935 = vst [vmem:[#allocation167_spill] sm:$0xff] %v10159_v30  ;;  %v10161_v17 = vadd.f32 %v2135_v52, %v1783_v48 }
 0x2f5   :  { %v1793_v22 = vpop.f32.mrf.mxu0  ;;  %v2156_v20 = vpop.f32.mrf.mxu1 }
 0x2f6   :  { %v1794_v50 = vadd.f32 %v1793_v22, %v9742_v32 }
 0x2f7   :  { %v10164_v1 = vpop.f32.mrf.mxu0  ;;  %v10166_v7 = vpop.f32.mrf.mxu1 }
 0x2f8   :  { %12936 = vst [vmem:[#allocation169_spill] sm:$0xff] %v10166_v7  ;;  %v10168_v38 = vadd.f32 %v2142_v51, %v1794_v50 }
 0x2f9   :  { %v1804_v58 = vpop.f32.mrf.mxu0  ;;  %v2163_v47 = vpop.f32.mrf.mxu1 }
 0x2fa   :  { %v1805_v4 = vadd.f32 %v1804_v58, %v9742_v32 }
 0x2fb   :  { %v10171_v15 = vpop.f32.mrf.mxu0  ;;  %v10173_v5 = vpop.f32.mrf.mxu1 }
 0x2fc   :  { %12937 = vst [vmem:[#allocation170_spill] sm:$0xff] %v10173_v5  ;;  %v10175_v52 = vadd.f32 %v2149_v40, %v1805_v4 }
 0x2fd   :  { %v1815_v48 = vpop.f32.mrf.mxu0  ;;  %v10177_v16 = vpop.f32.mrf.mxu1 }
 0x2fe   :  { %12938 = vst [vmem:[#allocation155_spill] sm:$0xff] %v10177_v16  ;;  %v1816_v22 = vadd.f32 %v1815_v48, %v9742_v32 }
 0x2ff   :  { %v10180_v31 = vpop.f32.mrf.mxu0  ;;  %v10182_v63 = vpop.f32.mrf.mxu1 }
 0x300   :  { %12939 = vst [vmem:[#allocation42_spill] sm:$0xff] %v10182_v63  ;;  %v10184_v51 = vadd.f32 %v2156_v20, %v1816_v22 }
 0x301   :  { %v1826_v50 = vpop.f32.mrf.mxu0  ;;  %v10186_v35 = vpop.f32.mrf.mxu1 }
 0x302   :  { %12940 = vst [vmem:[#allocation25_spill] sm:$0xff] %v10186_v35  ;;  %v1827_v58 = vadd.f32 %v1826_v50, %v9742_v32 }
 0x303   :  { %v10189_v23 = vpop.f32.mrf.mxu0  ;;  %v10191_v40 = vpop.f32.mrf.mxu1 }
 0x304   :  { %12941 = vst [vmem:[#allocation153_spill] sm:$0xff] %v10191_v40  ;;  %v10193_v4 = vadd.f32 %v2163_v47, %v1827_v58 }
 0x305   :  { %v10195_v21 = vpop.f32.mrf.mxu0  ;;  %v2544_v48 = vpop.f32.mrf.mxu1 }
 0x307   :  { %v10197_v29 = vpop.f32.mrf.mxu0  ;;  %v10199_v9 = vpop.f32.mrf.mxu1 }
 0x308   :  { %12942 = vst [vmem:[#allocation49_spill] sm:$0xff] %v10199_v9 }
 0x309   :  { %v10201_v20 = vpop.f32.mrf.mxu0  ;;  %v2553_v22 = vpop.f32.mrf.mxu1 }
 0x30b   :  { %v10203_v63 = vpop.f32.mrf.mxu0  ;;  %v10205_v35 = vpop.f32.mrf.mxu1 }
 0x30c   :  { %12943 = vst [vmem:[#allocation27_spill] sm:$0xff] %v10203_v63  ;;  %12944 = vst [vmem:[#allocation146_spill] sm:$0xff] %v10205_v35 }
 0x30d   :  { %v2316_v32 = vpop.f32.mrf.mxu0  ;;  %v2562_v50 = vpop.f32.mrf.mxu1 }
 0x30e   :  { %v2317_v40 = vadd.f32 %v2316_v32, %v10056_v10 }
 0x30f   :  { %v10208_v47 = vpop.f32.mrf.mxu0  ;;  %v10210_v58 = vpop.f32.mrf.mxu1 }
 0x310   :  { %12945 = vst [vmem:[#allocation152_spill] sm:$0xff] %v10208_v47  ;;  %12946 = vst [vmem:[#allocation160_spill] sm:$0xff] %v10210_v58  ;;  %v10212_v5 = vadd.f32 %v2544_v48, %v2317_v40 }
 0x311   :  { %v2324_v7 = vpop.f32.mrf.mxu0  ;;  %v2571_v30 = vpop.f32.mrf.mxu1 }
 0x312   :  { %12947 = vst [vmem:[#allocation54_spill] sm:$0xff] %v10212_v5  ;;  %v2325_v9 = vadd.f32 %v2324_v7, %v10089_v18 }
 0x313   :  { %v10215_v16 = vpop.f32.mrf.mxu0  ;;  %v10217_v25 = vpop.f32.mrf.mxu1 }
 0x314   :  { %12948 = vst [vmem:[#allocation171_spill] sm:$0xff] %v10217_v25  ;;  %v10219_v27 = vadd.f32 %v2553_v22, %v2325_v9 }
 0x315   :  { %v2332_v35 = vpop.f32.mrf.mxu0  ;;  %v2580_v63 = vpop.f32.mrf.mxu1 }
 0x316   :  { %12949 = vst [vmem:[#allocation172_spill] sm:$0xff] %v10219_v27  ;;  %v2333_v10 = vadd.f32 %v2332_v35, %v10108_v45 }
 0x317   :  { %v10222_v32 = vpop.f32.mrf.mxu0  ;;  %v10224_v47 = vpop.f32.mrf.mxu1 }
 0x318   :  { %12950 = vst [vmem:[#allocation173_spill] sm:$0xff] %v10224_v47  ;;  %v10226_v40 = vadd.f32 %v2562_v50, %v2333_v10 }
 0x319   :  { %v2340_v48 = vpop.f32.mrf.mxu0  ;;  %v2589_v5 = vpop.f32.mrf.mxu1 }
 0x31a   :  { %12951 = vst [vmem:[#allocation174_spill] sm:$0xff] %v10226_v40  ;;  %v2341_v7 = vadd.f32 %v2340_v48, %v10118_v2 }
 0x31b   :  { %v10229_v18 = vpop.f32.mrf.mxu0  ;;  %v10231_v58 = vpop.f32.mrf.mxu1 }
 0x31c   :  { %12952 = vst [vmem:[#allocation175_spill] sm:$0xff] %v10231_v58  ;;  %v10233_v9 = vadd.f32 %v2571_v30, %v2341_v7 }
 0x31d   :  { %v2348_v22 = vpop.f32.mrf.mxu0  ;;  %v2598_v27 = vpop.f32.mrf.mxu1 }
 0x31e   :  { %12953 = vst [vmem:[#allocation176_spill] sm:$0xff] %v10233_v9  ;;  %v2349_v35 = vadd.f32 %v2348_v22, %v10126_v0 }
 0x31f   :  { %v10236_v45 = vpop.f32.mrf.mxu0  ;;  %v10238_v25 = vpop.f32.mrf.mxu1 }
 0x320   :  { %12954 = vst [vmem:[#allocation177_spill] sm:$0xff] %v10238_v25  ;;  %v10240_v50 = vadd.f32 %v2580_v63, %v2349_v35 }
 0x321   :  { %v2356_v10 = vpop.f32.mrf.mxu0  ;;  %v2607_v40 = vpop.f32.mrf.mxu1 }
 0x322   :  { %12955 = vst [vmem:[#allocation178_spill] sm:$0xff] %v10240_v50  ;;  %v2357_v2 = vadd.f32 %v2356_v10, %v10133_v19 }
 0x323   :  { %v10243_v48 = vpop.f32.mrf.mxu0  ;;  %v10245_v47 = vpop.f32.mrf.mxu1 }
 0x324   :  { %12956 = vst [vmem:[#allocation179_spill] sm:$0xff] %v10245_v47  ;;  %v10247_v30 = vadd.f32 %v2589_v5, %v2357_v2 }
 0x325   :  { %v2364_v7 = vpop.f32.mrf.mxu0  ;;  %v2616_v9 = vpop.f32.mrf.mxu1 }
 0x326   :  { %12957 = vst [vmem:[#allocation180_spill] sm:$0xff] %v10247_v30  ;;  %v2365_v0 = vadd.f32 %v2364_v7, %v10140_v59 }
 0x327   :  { %v10250_v22 = vpop.f32.mrf.mxu0  ;;  %v10252_v58 = vpop.f32.mrf.mxu1 }
 0x328   :  { %12958 = vst [vmem:[#allocation181_spill] sm:$0xff] %v10252_v58  ;;  %v10254_v63 = vadd.f32 %v2598_v27, %v2365_v0  ;;  %v1554_v0 = vsub.s32 1, %v9703_v37 }
 0x329   :  { %v2372_v35 = vpop.f32.mrf.mxu0  ;;  %v2625_v50 = vpop.f32.mrf.mxu1 }
 0x32a   :  { %12959 = vst [vmem:[#allocation182_spill] sm:$0xff] %v10254_v63  ;;  %v2373_v19 = vadd.f32 %v2372_v35, %v10147_v61 }
 0x32b   :  { %v10257_v10 = vpop.f32.mrf.mxu0  ;;  %v10259_v25 = vpop.f32.mrf.mxu1 }
 0x32c   :  { %v10261_v5 = vadd.f32 %v2607_v40, %v2373_v19 }
 0x32d   :  { %v2380_v2 = vpop.f32.mrf.mxu0  ;;  %v2634_v30 = vpop.f32.mrf.mxu1 }
 0x32e   :  { %12960 = vst [vmem:[#allocation183_spill] sm:$0xff] %v10261_v5  ;;  %v2381_v59 = vadd.f32 %v2380_v2, %v10154_v13  ;;  %v1555_v13 = vrot.slane %v9719_v43, %v1554_v0 }
 0x32f   :  { %v10264_v7 = vpop.f32.mrf.mxu0  ;;  %v10266_v47 = vpop.f32.mrf.mxu1 }
 0x330   :  { %12961 = vst [vmem:[#allocation184_spill] sm:$0xff] %v10266_v47  ;;  %v10268_v27 = vadd.f32 %v2616_v9, %v2381_v59  ;;  %v1697_v43 = vadd.f32 %v10075_v26, %v1555_v13  ;;  %v1763_v26 = vadd.f32 %v10143_v46, %v1555_v13 }
 0x331   :  { %v2388_v63 = vpop.f32.mrf.mxu0  ;;  %v2643_v61 = vpop.f32.mrf.mxu1 }
 0x332   :  { %12962 = vst [vmem:[#allocation185_spill] sm:$0xff] %v10268_v27  ;;  %v2389_v35 = vadd.f32 %v2388_v63, %v10161_v17  ;;  %v1664_v17 = vadd.f32 %v9972_v56, %v1555_v13  ;;  %v1675_v63 = vadd.f32 %v10005_v33, %v1555_v13  ;;  %v1730_v56 = vadd.f32 %v10122_v8, %v1555_v13 }
 0x333   :  { %v10272_v58 = vpop.f32.mrf.mxu0  ;;  %v10274_v40 = vpop.f32.mrf.mxu1  ;;  %v1741_v33 = vadd.f32 %v10129_v42, %v1555_v13  ;;  %v2082_v8 = vadd.f32 %v10007_v44, %v1697_v43  ;;  %v1829_v43 = vadd.f32 %v10189_v23, %v1555_v13 }
 0x334   :  { %12963 = vst [vmem:[#allocation186_spill] sm:$0xff] %v10274_v40  ;;  %v10276_v19 = vadd.f32 %v2625_v50, %v2389_v35  ;;  %v1686_v50 = vadd.f32 %v10043_v28, %v1555_v13  ;;  %v1719_v35 = vadd.f32 %v10114_v60, %v1555_v13  ;;  %v1752_v28 = vadd.f32 %v10136_v55, %v1555_v13 }
 0x335   :  { %v2396_v2 = vpop.f32.mrf.mxu0  ;;  %v2652_v5 = vpop.f32.mrf.mxu1  ;;  %v1796_v55 = vadd.f32 %v10164_v1, %v1555_v13  ;;  %v2110_v44 = vadd.f32 %v10116_v36, %v1741_v33  ;;  %v1818_v1 = vadd.f32 %v10180_v31, %v1555_v13  ;;  %v2309_v36 = vadd.f32 %v10201_v20, %v10017_v11  ;;  %v12967_v31 = vld [vmem:[#allocation165_spill] sm:$0xff]  ;;  %v12971_v20 = vld [vmem:[#allocation167_spill] sm:$0xff] }
 0x336   :  { %12964 = vst [vmem:[#allocation187_spill] sm:$0xff] %v10276_v19  ;;  %v2397_v47 = vadd.f32 %v2396_v2, %v10168_v38  ;;  %v1708_v38 = vadd.f32 %v10099_v54, %v1555_v13  ;;  %v2068_v54 = vadd.f32 %v9936_v3, %v1675_v63  ;;  %v2075_v19 = vadd.f32 %v9974_v53, %v1686_v50 }
 0x337   :  { %v10280_v9 = vpop.f32.mrf.mxu0  ;;  %v10282_v59 = vpop.f32.mrf.mxu1  ;;  %v2103_v53 = vadd.f32 %v10101_v39, %v1730_v56  ;;  %v12969_v56 = vld [vmem:[#allocation152_spill] sm:$0xff]  ;;  %v2327_v23 = vadd.f32 %v10215_v16, %v2082_v8  ;;  %v12974_v16 = vld [vmem:[#allocation42_spill] sm:$0xff] }
 0x338   :  { %v10284_v37 = vadd.f32 %v2634_v30, %v2397_v47  ;;  %v2089_v46 = vadd.f32 %v10045_v24, %v1708_v38  ;;  %v2117_v24 = vadd.f32 %v10124_v49, %v1752_v28  ;;  %v12968_v49 = vld [vmem:[#allocation168_spill] sm:$0xff]  ;;  %v2319_v33 = vadd.f32 %v12969_v56, %v2075_v19  ;;  %v12972_v28 = vld [vmem:[#allocation169_spill] sm:$0xff] }
 0x339   :  { %v2404_v27 = vpop.f32.mrf.mxu0  ;;  %v2661_v40 = vpop.f32.mrf.mxu1  ;;  %v2145_v38 = vadd.f32 %v12968_v49, %v1796_v55  ;;  %v12981_v56 = vld [vmem:[#allocation173_spill] sm:$0xff] }
 0x33a   :  { %12965 = vst [vmem:[#allocation188_spill] sm:$0xff] %v10284_v37  ;;  %v2405_v0 = vadd.f32 %v2404_v27, %v10175_v52  ;;  %v2061_v52 = vadd.f32 %v9899_v34, %v1664_v17  ;;  %v1774_v37 = vadd.f32 %v10150_v57, %v1555_v13  ;;  %v2096_v34 = vadd.f32 %v10077_v6, %v1719_v35 }
 0x33b   :  { %v10293_v2 = vpop.f32.mrf.mxu0  ;;  %v10295_v47 = vpop.f32.mrf.mxu1  ;;  %v2301_v57 = vadd.f32 %v10195_v21, %v9984_v62  ;;  %v2124_v6 = vadd.f32 %v10131_v14, %v1763_v26  ;;  %v2159_v26 = vadd.f32 %v12972_v28, %v1818_v1  ;;  %v2367_v55 = vadd.f32 %v10250_v22, %v2117_v24  ;;  %v12979_v22 = vld [vmem:[#allocation160_spill] sm:$0xff] }
 0x33c   :  { %v10299_v30 = vadd.f32 %v2643_v61, %v2405_v0  ;;  %v1785_v61 = vadd.f32 %v10157_v41, %v1555_v13  ;;  %v1807_v41 = vadd.f32 %v10171_v15, %v1555_v13  ;;  %v2303_v21 = vadd.f32 %v10197_v29, %v2061_v52  ;;  %v12966_v15 = vld [vmem:[#allocation27_spill] sm:$0xff] }
 0x33d   :  { %v2412_v27 = vpop.f32.mrf.mxu0  ;;  %v3038_v60 = vpop.f32.mrf.mxu1  ;;  %v2131_v62 = vadd.f32 %v10138_v12, %v1774_v37  ;;  %v12970_v29 = vld [vmem:[#allocation155_spill] sm:$0xff]  ;;  %v2343_v11 = vadd.f32 %v10229_v18, %v2096_v34  ;;  %v12975_v18 = vld [vmem:[#allocation25_spill] sm:$0xff] }
 0x33e   :  { %v2413_v42 = vadd.f32 %v2412_v27, %v10184_v51  ;;  %v2138_v0 = vadd.f32 %v12967_v31, %v1785_v61  ;;  %v2527_v13 = vadd.f32 %v12970_v29, %v2301_v57  ;;  %v2152_v37 = vadd.f32 %v12971_v20, %v1807_v41  ;;  %v12976_v57 = vld [vmem:[#allocation153_spill] sm:$0xff]  ;;  %v12980_v31 = vld [vmem:[#allocation171_spill] sm:$0xff] }
 0x33f   :  { %v10313_v17 = vpop.f32.mrf.mxu0  ;;  %v3040_v3 = vpop.f32.mrf.mxu1  ;;  %v2351_v27 = vadd.f32 %v10236_v45, %v2103_v53  ;;  %v2529_v8 = vadd.f32 %v12974_v16, %v2303_v21  ;;  %v2536_v34 = vadd.f32 %v12975_v18, %v2309_v36  ;;  %v12978_v45 = vld [vmem:[#allocation146_spill] sm:$0xff]  ;;  %v2383_v21 = vadd.f32 %v10264_v7, %v2131_v62  ;;  %v12982_v62 = vld [vmem:[#allocation175_spill] sm:$0xff]  ;;  %v12989_v18 = vld [vmem:[#allocation184_spill] sm:$0xff] }
 0x340   :  { %v10319_v63 = vadd.f32 %v2652_v5, %v2413_v42  ;;  %v2311_v5 = vadd.f32 %v12966_v15, %v2068_v54  ;;  %v12973_v42 = vld [vmem:[#allocation170_spill] sm:$0xff]  ;;  %v10352_v53 = vadd.f32 %v12978_v45, %v2327_v23  ;;  %v10360_v36 = vadd.f32 %v12980_v31, %v2343_v11  ;;  %v12994_v31 = vld [vmem:[#allocation63_spill] sm:$0xff] }
 0x341   :  { %v2420_v51 = vpop.f32.mrf.mxu0  ;;  %v3045_v50 = vpop.f32.mrf.mxu1  ;;  %v2166_v19 = vadd.f32 %v12973_v42, %v1829_v43  ;;  %v2375_v43 = vadd.f32 %v10257_v10, %v2124_v6  ;;  %v2391_v23 = vadd.f32 %v10272_v58, %v2138_v0  ;;  %v2399_v10 = vadd.f32 %v10280_v9, %v2145_v38  ;;  %v12985_v38 = vld [vmem:[#allocation179_spill] sm:$0xff]  ;;  %v12986_v42 = vld [vmem:[#allocation181_spill] sm:$0xff] }
 0x342   :  { %v2421_v39 = vadd.f32 %v2420_v51, %v10193_v4  ;;  %v2335_v4 = vadd.f32 %v10222_v32, %v2089_v46  ;;  %v2538_v41 = vadd.f32 %v12976_v57, %v2311_v5  ;;  %v2415_v58 = vadd.f32 %v10313_v17, %v2159_v26 }
 0x343   :  { %v2422_v14 = vpop.f32.mrf.mxu0  ;;  %v3047_v35 = vpop.f32.mrf.mxu1 }
 0x344   :  { %v10337_v12 = vadd.f32 %v2661_v40, %v2421_v39  ;;  %v2359_v40 = vadd.f32 %v10243_v48, %v2110_v44  ;;  %v12977_v39 = vld [vmem:[#allocation49_spill] sm:$0xff]  ;;  %v10357_v24 = vadd.f32 %v12979_v22, %v2335_v4 }
 0x345   :  { %v2829_v52 = vpop.f32.mrf.mxu0  ;;  %v3052_v54 = vpop.f32.mrf.mxu1  ;;  %v2547_v15 = vadd.f32 %v12977_v39, %v2319_v33  ;;  %v10363_v33 = vadd.f32 %v12981_v56, %v2351_v27  ;;  %v10382_v27 = vadd.f32 %v12985_v38, %v2375_v43  ;;  %v10415_v43 = vadd.f32 %v10282_v59, %v2415_v58  ;;  %v12998_v38 = vld [vmem:[#allocation35_spill] sm:$0xff] }
 0x346   :  { %v2830_v61 = vadd.f32 %v2829_v52, %v2527_v13  ;;  %v10370_v29 = vadd.f32 %v12982_v62, %v2359_v40  ;;  %v12983_v13 = vld [vmem:[#allocation177_spill] sm:$0xff]  ;;  %v2407_v52 = vadd.f32 %v10293_v2, %v2152_v37  ;;  %v12988_v2 = vld [vmem:[#allocation54_spill] sm:$0xff] }
 0x347   :  { %v2831_v32 = vpop.f32.mrf.mxu0  ;;  %v3054_v46 = vpop.f32.mrf.mxu1  ;;  %v10373_v4 = vadd.f32 %v12983_v13, %v2367_v55  ;;  %v2423_v55 = vadd.f32 %v2422_v14, %v2166_v19 }
 0x348   :  { %v3039_v1 = vadd.f32 %v3038_v60, %v2830_v61  ;;  %v2832_v51 = vadd.f32 %v2831_v32, %v2529_v8  ;;  %v10385_v61 = vadd.f32 %v12986_v42, %v2383_v21  ;;  %v10396_v32 = vadd.f32 %v10259_v25, %v2391_v23  ;;  %v12991_v25 = vld [vmem:[#allocation186_spill] sm:$0xff]  ;;  %v12995_v23 = vld [vmem:[#allocation145_spill] sm:$0xff] }
 0x349   :  { %v2836_v48 = vpop.f32.mrf.mxu0  ;;  %v3059_v44 = vpop.f32.mrf.mxu1  ;;  %v10412_v45 = vadd.f32 %v12991_v25, %v2407_v52  ;;  %v12999_v42 = vld [vmem:[#allocation174_spill] sm:$0xff] }
 0x34a   :  { %v3148_v5 = vmax.f32 %v3039_v1, 0.0  ;;  %v3041_v60 = vadd.f32 %v3040_v3, %v2832_v51  ;;  %v2837_v49 = vadd.f32 %v2836_v48, %v2536_v34  ;;  %v10399_v34 = vadd.f32 %v12989_v18, %v2399_v10 }
 0x34b   :  { %v2838_v6 = vpop.f32.mrf.mxu0  ;;  %v10367_v7 = vpop.f32.mrf.mxu1  ;;  %v10432_v10 = vadd.f32 %v10295_v47, %v2423_v55  ;;  %v13000_v55 = vld [vmem:[#allocation110_spill] sm:$0xff] }
 0x34c   :  { %v10375_v11 = vand.u32 4294901760, %v3148_v5  ;;  %v3149_v3 = vmax.f32 %v3041_v60, 0.0  ;;  %v3046_v20 = vadd.f32 %v3045_v50, %v2837_v49  ;;  %v2839_v28 = vadd.f32 %v2838_v6, %v2538_v41 }
 0x34d   :  { %v2843_v0 = vpop.f32.mrf.mxu0  ;;  %v10379_v9 = vpop.f32.mrf.mxu1 }
 0x34e   :  { %12984 = vst [vmem:[#allocation27_spill] sm:$0xff] %v10375_v11  ;;  %v10388_v16 = vsub.f32 %v3148_v5, %v10375_v11  ;;  %v10390_v8 = vand.u32 4294901760, %v3149_v3  ;;  %v3150_v50 = vmax.f32 %v3046_v20, 0.0  ;;  %v3048_v40 = vadd.f32 %v3047_v35, %v2839_v28 }
 0x34f   :  { %v2844_v37 = vadd.f32 %v2843_v0, %v12988_v2  ;;  %v2845_v17 = vpop.f32.mrf.mxu0  ;;  %v10393_v26 = vpop.f32.mrf.mxu1 }
 0x350   :  { %12987 = vst [vmem:[#allocation165_spill] sm:$0xff] %v10390_v8  ;;  %v12387_v57 = vand.u32 4294901760, %v10388_v16  ;;  %v10403_v41 = vsub.f32 %v3149_v3, %v10390_v8  ;;  %v10405_v1 = vand.u32 4294901760, %v3150_v50  ;;  %v3151_v35 = vmax.f32 %v3048_v40, 0.0  ;;  %3774 = vmatprep.mubr.f32.mxu1 %v10390_v8 }
 0x351   :  { %v3053_v14 = vadd.f32 %v3052_v54, %v2844_v37  ;;  %v2846_v19 = vadd.f32 %v2845_v17, %v2547_v15  ;;  %v2850_v51 = vpop.f32.mrf.mxu0  ;;  %v10408_v39 = vpop.f32.mrf.mxu1  ;;  %3776 = vmatmul.mubr.f32.vlgmr.msra.gmra.mxu1 %v10375_v11  ;;  %v12993_v15 = vld [vmem:[#allocation172_spill] sm:$0xff] }
 0x352   :  { %12990 = vst [vmem:[#allocation168_spill] sm:$0xff] %v10405_v1  ;;  %v3317_v21 = vsub.f32 %v10388_v16, %v12387_v57  ;;  %v10421_v48 = vsub.f32 %v3150_v50, %v10405_v1  ;;  %v10423_v54 = vand.u32 4294901760, %v3151_v35  ;;  %v2851_v22 = vadd.f32 %v2850_v51, %v12993_v15  ;;  %6739 = vmatpush3.msra.mxu1 %v12994_v31 }
 0x353   :  { %v3152_v5 = vmax.f32 %v3053_v14, 0.0  ;;  %v3055_v60 = vadd.f32 %v3054_v46, %v2846_v19  ;;  %v2852_v49 = vpop.f32.mrf.mxu0  ;;  %v10427_v56 = vpop.f32.mrf.mxu1  ;;  %v12388_v59 = vand.u32 4294901760, %v10403_v41  ;;  %6740 = vmatprep.subr.mxu1 %v12995_v23  ;;  %v12996_v46 = vld [vmem:[#allocation158_spill] sm:$0xff]  ;;  %v13002_v19 = vld [vmem:[#allocation148_spill] sm:$0xff] }
 0x354   :  { %12992 = vst [vmem:[#allocation152_spill] sm:$0xff] %v10423_v54  ;;  %v3318_v6 = vand.u32 4294901760, %v3317_v21  ;;  %v12384_v62 = vand.u32 4294901760, %v10421_v48  ;;  %v10436_v13 = vsub.f32 %v3151_v35, %v10423_v54  ;;  %v3060_v3 = vadd.f32 %v3059_v44, %v2851_v22  ;;  %3781 = vmatprep.mubr.f32.mxu1 %v10423_v54  ;;  %6741 = vmatpush3.msra.mxu1 %v12996_v46  ;;  %v13004_v22 = vld [vmem:[#allocation162_spill] sm:$0xff] }
 0x355   :  { %v10440_v20 = vand.u32 4294901760, %v3152_v5  ;;  %v3153_v28 = vmax.f32 %v3055_v60, 0.0  ;;  %v2853_v52 = vadd.f32 %v2852_v49, %v10352_v53  ;;  %v2857_v58 = vpop.f32.mrf.mxu0  ;;  %v10443_v0 = vpop.f32.mrf.mxu1  ;;  %3783 = vmatmul.mubr.f32.gmra.mxu1 %v10405_v1  ;;  %v3311_v47 = vsub.f32 %v10403_v41, %v12388_v59  ;;  %6742 = vmatprep.subr.mxu1 %v12998_v38  ;;  %v13020_v54 = vld [vmem:[#allocation38_spill] sm:$0xff] }
 0x356   :  { %v3154_v44 = vmax.f32 %v3060_v3, 0.0  ;;  %v2858_v50 = vadd.f32 %v2857_v58, %v12999_v42  ;;  %v12386_v40 = vand.u32 4294901760, %v10436_v13  ;;  %v3332_v53 = vsub.f32 %v10421_v48, %v12384_v62  ;;  %6743 = vmatpush3.msra.mxu1 %v13000_v55 }
 0x357   :  { %12997 = vst [vmem:[#allocation155_spill] sm:$0xff] %v10440_v20  ;;  %v10457_v2 = vsub.f32 %v3152_v5, %v10440_v20  ;;  %v10459_v37 = vand.u32 4294901760, %v3153_v28  ;;  %v3062_v17 = vadd.f32 %v10367_v7, %v2853_v52  ;;  %v2859_v18 = vpop.f32.mrf.mxu0  ;;  %v10462_v35 = vpop.f32.mrf.mxu1  ;;  %v3312_v14 = vand.u32 4294901760, %v3311_v47  ;;  %6744 = vmatprep.subr.mxu1 %v13002_v19  ;;  %v13005_v47 = vld [vmem:[#allocation176_spill] sm:$0xff] }
 0x358   :  { %v10465_v51 = vand.u32 4294901760, %v3154_v44  ;;  %v3067_v25 = vadd.f32 %v10379_v9, %v2858_v50  ;;  %v2860_v21 = vadd.f32 %v2859_v18, %v10357_v24  ;;  %v3326_v15 = vsub.f32 %v10436_v13, %v12386_v40  ;;  %6745 = vmatpush3.msra.mxu1 %v13004_v22 }
 0x359   :  { %13001 = vst [vmem:[#allocation167_spill] sm:$0xff] %v10459_v37  ;;  %v12385_v7 = vand.u32 4294901760, %v10457_v2  ;;  %v10475_v5 = vsub.f32 %v3153_v28, %v10459_v37  ;;  %v3155_v60 = vmax.f32 %v3062_v17, 0.0  ;;  %3313 = vmatprep.mubr.f32.mxu0 %v3312_v14  ;;  %3788 = vmatprep.mubr.f32.mxu1 %v10459_v37  ;;  %v2864_v49 = vpop.f32.mrf.mxu0  ;;  %v10478_v3 = vpop.f32.mrf.mxu1  ;;  %v3333_v9 = vand.u32 4294901760, %v3332_v53  ;;  %v13007_v53 = vld [vmem:[#allocation147_spill] sm:$0xff]  ;;  %v13015_v37 = vld [vmem:[#allocation60_spill] sm:$0xff] }
 0x35a   :  { %13003 = vst [vmem:[#allocation169_spill] sm:$0xff] %v10465_v51  ;;  %v10481_v24 = vsub.f32 %v3154_v44, %v10465_v51  ;;  %v3156_v52 = vmax.f32 %v3067_v25, 0.0  ;;  %v3069_v58 = vadd.f32 %v10393_v26, %v2860_v21  ;;  %v2865_v42 = vadd.f32 %v2864_v49, %v13005_v47  ;;  %3319 = vmatmul.mubr.f32.vlgmr.msra.gmra.mxu0 %v3318_v6  ;;  %v13008_v26 = vld [vmem:[#allocation149_spill] sm:$0xff]  ;;  %v13010_v47 = vld [vmem:[#allocation151_spill] sm:$0xff]  ;;  %v13013_v6 = vld [vmem:[#allocation178_spill] sm:$0xff] }
 0x35b   :  { %3790 = vmatmul.mubr.f32.gmra.mxu1 %v10440_v20  ;;  %v10486_v28 = vand.u32 4294901760, %v3155_v60  ;;  %v2866_v50 = vpop.f32.mrf.mxu0  ;;  %v10488_v17 = vpop.f32.mrf.mxu1  ;;  %v3327_v18 = vand.u32 4294901760, %v3326_v15  ;;  %v12393_v14 = vand.u32 4294901760, %v10475_v5  ;;  %v3347_v44 = vsub.f32 %v10457_v2, %v12385_v7  ;;  %6746 = vmatprep.subr.mxu1 %v13007_v53  ;;  %v13011_v15 = vld [vmem:[#allocation108_spill] sm:$0xff] }
 0x35c   :  { %6659 = vmatpush3.msra.mxu0 %v13008_v26  ;;  %v10497_v25 = vand.u32 4294901760, %v3156_v52  ;;  %v3157_v21 = vmax.f32 %v3069_v58, 0.0  ;;  %v3074_v49 = vadd.f32 %v10408_v39, %v2865_v42  ;;  %6747 = vmatpush3.msra.mxu1 %v13010_v47  ;;  %v2867_v7 = vadd.f32 %v2866_v50, %v10360_v36 }
 0x35d   :  { %13006 = vst [vmem:[#allocation170_spill] sm:$0xff] %v10486_v28  ;;  %6660 = vmatprep.subr.mxu0 %v13011_v15  ;;  %v10503_v62 = vsub.f32 %v3155_v60, %v10486_v28  ;;  %3328 = vmatprep.mubr.f32.mxu0 %v3327_v18  ;;  %v2871_v40 = vpop.f32.mrf.mxu0  ;;  %v10507_v57 = vpop.f32.mrf.mxu1  ;;  %v3341_v58 = vsub.f32 %v10475_v5, %v12393_v14  ;;  %v3348_v39 = vand.u32 4294901760, %v3347_v44  ;;  %v13014_v44 = vand.u32 4294901760, %v10481_v24 }
 0x35e   :  { %13009 = vst [vmem:[#allocation42_spill] sm:$0xff] %v10497_v25  ;;  %3795 = vmatprep.mubr.f32.mxu1 %v10486_v28  ;;  %v10513_v42 = vsub.f32 %v3156_v52, %v10497_v25  ;;  %v10515_v59 = vand.u32 4294901760, %v3157_v21  ;;  %v3158_v60 = vmax.f32 %v3074_v49, 0.0  ;;  %v2872_v20 = vadd.f32 %v2871_v40, %v13013_v6  ;;  %3334 = vmatmul.mubr.f32.gmra.mxu0 %v3333_v9  ;;  %v13016_v49 = vld [vmem:[#allocation156_spill] sm:$0xff]  ;;  %v13018_v6 = vld [vmem:[#allocation107_spill] sm:$0xff] }
 0x35f   :  { %3797 = vmatmul.mubr.f32.gmra.mxu1 %v10465_v51  ;;  %v3076_v36 = vadd.f32 %v10427_v56, %v2867_v7  ;;  %v2873_v50 = vpop.f32.mrf.mxu0  ;;  %v10520_v18 = vpop.f32.mrf.mxu1  ;;  %v3342_v28 = vand.u32 4294901760, %v3341_v58  ;;  %v3362_v52 = vsub.f32 %v10481_v24, %v13014_v44  ;;  %6748 = vmatprep.subr.mxu1 %v13015_v37  ;;  %v13019_v40 = vand.u32 4294901760, %v10503_v62 }
 0x360   :  { %13012 = vst [vmem:[#allocation25_spill] sm:$0xff] %v10515_v59  ;;  %6661 = vmatpush3.msra.mxu0 %v13016_v49  ;;  %v10530_v9 = vsub.f32 %v3157_v21, %v10515_v59  ;;  %v10532_v56 = vand.u32 4294901760, %v3158_v60  ;;  %v3081_v7 = vadd.f32 %v10443_v0, %v2872_v20  ;;  %3802 = vmatprep.mubr.f32.mxu1 %v10515_v59  ;;  %v13022_v59 = vld [vmem:[#allocation180_spill] sm:$0xff]  ;;  %v13024_v8 = vand.u32 4294901760, %v10513_v42 }
 0x361   :  { %6749 = vmatpush3.msra.mxu1 %v13018_v6  ;;  %v3159_v58 = vmax.f32 %v3076_v36, 0.0  ;;  %v2874_v44 = vadd.f32 %v2873_v50, %v10363_v33  ;;  %3343 = vmatprep.mubr.f32.mxu0 %v3342_v28  ;;  %v2878_v14 = vpop.f32.mrf.mxu0  ;;  %v10538_v51 = vpop.f32.mrf.mxu1  ;;  %v3356_v21 = vsub.f32 %v10503_v62, %v13019_v40  ;;  %v3363_v1 = vand.u32 4294901760, %v3362_v52 }
 0x362   :  { %13017 = vst [vmem:[#allocation153_spill] sm:$0xff] %v10532_v56  ;;  %6662 = vmatprep.subr.mxu0 %v13020_v54  ;;  %v10545_v20 = vsub.f32 %v3158_v60, %v10532_v56  ;;  %v3160_v0 = vmax.f32 %v3081_v7, 0.0  ;;  %v2879_v11 = vadd.f32 %v2878_v14, %v13022_v59  ;;  %3349 = vmatmul.mubr.f32.gmra.mxu0 %v3348_v39  ;;  %v13025_v7 = vld [vmem:[#allocation157_spill] sm:$0xff]  ;;  %v13026_v59 = vld [vmem:[#allocation154_spill] sm:$0xff]  ;;  %v13030_v14 = vand.u32 4294901760, %v10530_v9 }
 0x363   :  { %3804 = vmatmul.mubr.f32.gmra.mxu1 %v10497_v25  ;;  %v10550_v28 = vand.u32 4294901760, %v3159_v58  ;;  %v3083_v36 = vadd.f32 %v10462_v35, %v2874_v44  ;;  %v2880_v50 = vpop.f32.mrf.mxu0  ;;  %v10553_v40 = vpop.f32.mrf.mxu1  ;;  %v3357_v52 = vand.u32 4294901760, %v3356_v21  ;;  %v3377_v60 = vsub.f32 %v10513_v42, %v13024_v8  ;;  %6750 = vmatprep.subr.mxu1 %v13025_v7  ;;  %v13028_v44 = vld [vmem:[#allocation109_spill] sm:$0xff]  ;;  %v13029_v25 = vld [vmem:[#allocation44_spill] sm:$0xff] }
 0x364   :  { %13021 = vst [vmem:[#allocation49_spill] sm:$0xff] %v10545_v20  ;;  %6663 = vmatpush3.msra.mxu0 %v13026_v59  ;;  %v10561_v39 = vand.u32 4294901760, %v3160_v0  ;;  %v3088_v33 = vadd.f32 %v10478_v3, %v2879_v11  ;;  %v2881_v35 = vadd.f32 %v2880_v50, %v10370_v29  ;;  %6751 = vmatpush3.msra.mxu1 %v13028_v44  ;;  %v13044_v59 = vld [vmem:[#allocation119_spill] sm:$0xff] }
 0x365   :  { %13023 = vst [vmem:[#allocation146_spill] sm:$0xff] %v10550_v28  ;;  %6664 = vmatprep.subr.mxu0 %v13029_v25  ;;  %v10568_v21 = vsub.f32 %v3159_v58, %v10550_v28  ;;  %v3161_v8 = vmax.f32 %v3083_v36, 0.0  ;;  %3358 = vmatprep.mubr.f32.mxu0 %v3357_v52  ;;  %v2885_v7 = vpop.f32.mrf.mxu0  ;;  %v10571_v6 = vpop.f32.mrf.mxu1  ;;  %v3371_v11 = vsub.f32 %v10530_v9, %v13030_v14  ;;  %v3378_v3 = vand.u32 4294901760, %v3377_v60  ;;  %v13031_v58 = vld [vmem:[#allocation182_spill] sm:$0xff] }
 0x366   :  { %13027 = vst [vmem:[#allocation160_spill] sm:$0xff] %v10561_v39  ;;  %3809 = vmatprep.mubr.f32.mxu1 %v10550_v28  ;;  %v10577_v29 = vsub.f32 %v3160_v0, %v10561_v39  ;;  %v3162_v50 = vmax.f32 %v3088_v33, 0.0  ;;  %v3090_v44 = vadd.f32 %v10488_v17, %v2881_v35  ;;  %v2886_v25 = vadd.f32 %v2885_v7, %v13031_v58  ;;  %v13034_v33 = vld [vmem:[#allocation163_spill] sm:$0xff]  ;;  %v13035_v17 = vld [vmem:[#allocation52_spill] sm:$0xff] }
 0x367   :  { %3364 = vmatmul.mubr.f32.gmra.mxu0 %v3363_v1  ;;  %3811 = vmatmul.mubr.f32.gmra.mxu1 %v10532_v56  ;;  %v10582_v36 = vand.u32 4294901760, %v3161_v8  ;;  %v2887_v52 = vpop.f32.mrf.mxu0  ;;  %v10584_v28 = vpop.f32.mrf.mxu1  ;;  %v3372_v37 = vand.u32 4294901760, %v3371_v11  ;;  %v13033_v60 = vand.u32 4294901760, %v10545_v20  ;;  %v13037_v56 = vld [vmem:[#allocation112_spill] sm:$0xff]  ;;  %v13038_v11 = vld [vmem:[#allocation161_spill] sm:$0xff]  ;;  %v13039_v1 = vand.u32 4294901760, %v10568_v21 }
 0x368   :  { %6752 = vmatprep.subr.mxu1 %v13034_v33  ;;  %6665 = vmatpush3.msra.mxu0 %v13035_v17  ;;  %v10593_v7 = vand.u32 4294901760, %v3162_v50  ;;  %v3163_v35 = vmax.f32 %v3090_v44, 0.0  ;;  %v3095_v58 = vadd.f32 %v10507_v57, %v2886_v25 }
 0x369   :  { %13032 = vst [vmem:[#allocation171_spill] sm:$0xff] %v10582_v36  ;;  %v3392_v0 = vsub.f32 %v10545_v20, %v13033_v60  ;;  %6753 = vmatpush3.msra.mxu1 %v13037_v56  ;;  %6666 = vmatprep.subr.mxu0 %v13038_v11  ;;  %v10599_v14 = vsub.f32 %v3161_v8, %v10582_v36  ;;  %v2892_v33 = vpop.f32.mrf.mxu0  ;;  %v10603_v17 = vpop.f32.mrf.mxu1  ;;  %v13042_v11 = vld [vmem:[#allocation183_spill] sm:$0xff] }
 0x36a   :  { %13036 = vst [vmem:[#allocation173_spill] sm:$0xff] %v10593_v7  ;;  %v2888_v60 = vadd.f32 %v2887_v52, %v10373_v4  ;;  %3373 = vmatprep.mubr.f32.mxu0 %v3372_v37  ;;  %3816 = vmatprep.mubr.f32.mxu1 %v10582_v36  ;;  %v3386_v44 = vsub.f32 %v10568_v21, %v13039_v1  ;;  %v10611_v56 = vand.u32 4294901760, %v3163_v35  ;;  %v3164_v8 = vmax.f32 %v3095_v58, 0.0  ;;  %v13045_v58 = vld [vmem:[#allocation159_spill] sm:$0xff] }
 0x36b   :  { %v3393_v57 = vand.u32 4294901760, %v3392_v0  ;;  %v10609_v25 = vsub.f32 %v3162_v50, %v10593_v7  ;;  %v2893_v20 = vadd.f32 %v2892_v33, %v13042_v11  ;;  %3379 = vmatmul.mubr.f32.gmra.mxu0 %v3378_v3  ;;  %3818 = vmatmul.mubr.f32.gmra.mxu1 %v10561_v39  ;;  %v2894_v37 = vpop.f32.mrf.mxu0  ;;  %v10616_v52 = vpop.f32.mrf.mxu1  ;;  %v13043_v0 = vand.u32 4294901760, %v10577_v29 }
 0x36c   :  { %13041 = vst [vmem:[#allocation177_spill] sm:$0xff] %v10611_v56  ;;  %v3097_v4 = vadd.f32 %v10520_v18, %v2888_v60  ;;  %v3387_v36 = vand.u32 4294901760, %v3386_v44  ;;  %6754 = vmatprep.subr.mxu1 %v13044_v59  ;;  %6667 = vmatpush3.msra.mxu0 %v13045_v58  ;;  %v10626_v33 = vsub.f32 %v3163_v35, %v10611_v56  ;;  %v10628_v18 = vand.u32 4294901760, %v3164_v8  ;;  %v13047_v60 = vld [vmem:[#allocation125_spill] sm:$0xff]  ;;  %v13049_v58 = vld [vmem:[#allocation150_spill] sm:$0xff] }
 0x36d   :  { %13040 = vst [vmem:[#allocation175_spill] sm:$0xff] %v10609_v25  ;;  %v3407_v50 = vsub.f32 %v10577_v29, %v13043_v0  ;;  %v3102_v11 = vadd.f32 %v10538_v51, %v2893_v20  ;;  %3823 = vmatprep.mubr.f32.mxu1 %v10611_v56  ;;  %6755 = vmatpush3.msra.mxu1 %v13047_v60  ;;  %v2899_v1 = vpop.f32.mrf.mxu0  ;;  %v10634_v39 = vpop.f32.mrf.mxu1  ;;  %v13048_v3 = vand.u32 4294901760, %v10599_v14  ;;  %v13051_v56 = vld [vmem:[#allocation185_spill] sm:$0xff] }
 0x36e   :  { %13046 = vst [vmem:[#allocation179_spill] sm:$0xff] %v10628_v18  ;;  %v3165_v44 = vmax.f32 %v3097_v4, 0.0  ;;  %v2895_v0 = vadd.f32 %v2894_v37, %v10382_v27  ;;  %3388 = vmatprep.mubr.f32.mxu0 %v3387_v36  ;;  %6668 = vmatprep.subr.mxu0 %v13049_v58  ;;  %v10641_v51 = vsub.f32 %v3164_v8, %v10628_v18  ;;  %v13053_v58 = vand.u32 4294901760, %v10609_v25 }
 0x36f   :  { %v3401_v35 = vsub.f32 %v10599_v14, %v13048_v3  ;;  %v3408_v59 = vand.u32 4294901760, %v3407_v50  ;;  %v3166_v20 = vmax.f32 %v3102_v11, 0.0  ;;  %v2900_v60 = vadd.f32 %v2899_v1, %v13051_v56  ;;  %3394 = vmatmul.mubr.f32.gmra.mxu0 %v3393_v57  ;;  %3825 = vmatmul.mubr.f32.gmra.mxu1 %v10593_v7  ;;  %v2901_v37 = vpop.f32.mrf.mxu0  ;;  %v10649_v3 = vpop.f32.mrf.mxu1  ;;  %v13054_v11 = vld [vmem:[#allocation133_spill] sm:$0xff]  ;;  %v13055_v56 = vld [vmem:[#allocation164_spill] sm:$0xff]  ;;  %v13058_v7 = vld [vmem:[#allocation111_spill] sm:$0xff] }
 0x370   :  { %13050 = vst [vmem:[#allocation181_spill] sm:$0xff] %v10641_v51  ;;  %v10646_v36 = vand.u32 4294901760, %v3165_v44  ;;  %v3104_v4 = vadd.f32 %v10553_v40, %v2895_v0  ;;  %v3422_v8 = vsub.f32 %v10609_v25, %v13053_v58  ;;  %6756 = vmatprep.subr.mxu1 %v13054_v11  ;;  %6669 = vmatpush3.msra.mxu0 %v13055_v56  ;;  %v13057_v0 = vld [vmem:[#allocation135_spill] sm:$0xff]  ;;  %v13059_v57 = vand.u32 4294901760, %v10626_v33 }
 0x371   :  { %v3402_v50 = vand.u32 4294901760, %v3401_v35  ;;  %v10657_v1 = vand.u32 4294901760, %v3166_v20  ;;  %v3109_v27 = vadd.f32 %v10571_v6, %v2900_v60  ;;  %v2902_v40 = vadd.f32 %v2901_v37, %v10385_v61  ;;  %6757 = vmatpush3.msra.mxu1 %v13057_v0  ;;  %6670 = vmatprep.subr.mxu0 %v13058_v7  ;;  %v2906_v11 = vpop.f32.mrf.mxu0  ;;  %v13060_v37 = vld [vmem:[#allocation187_spill] sm:$0xff]  ;;  %v13073_v7 = vld [vmem:[#allocation117_spill] sm:$0xff] }
 0x372   :  { %13052 = vst [vmem:[#allocation54_spill] sm:$0xff] %v10646_v36  ;;  %v10664_v35 = vsub.f32 %v3165_v44, %v10646_v36  ;;  %v3167_v58 = vmax.f32 %v3104_v4, 0.0  ;;  %3830 = vmatprep.mubr.f32.mxu1 %v10646_v36  ;;  %v3416_v56 = vsub.f32 %v10626_v33, %v13059_v57  ;;  %v3423_v25 = vand.u32 4294901760, %v3422_v8  ;;  %v10675_v44 = vpop.f32.mrf.mxu1 }
 0x373   :  { %13056 = vst [vmem:[#allocation184_spill] sm:$0xff] %v10657_v1  ;;  %3403 = vmatprep.mubr.f32.mxu0 %v3402_v50  ;;  %v10671_v6 = vsub.f32 %v3166_v20, %v10657_v1  ;;  %v3168_v61 = vmax.f32 %v3109_v27, 0.0  ;;  %v3111_v60 = vadd.f32 %v10584_v28, %v2902_v40  ;;  %v2907_v0 = vadd.f32 %v2906_v11, %v13060_v37  ;;  %v2908_v50 = vpop.f32.mrf.mxu0  ;;  %v13063_v27 = vld [vmem:[#allocation139_spill] sm:$0xff]  ;;  %v13064_v28 = vld [vmem:[#allocation124_spill] sm:$0xff] }
 0x374   :  { %3409 = vmatmul.mubr.f32.gmra.mxu0 %v3408_v59  ;;  %3832 = vmatmul.mubr.f32.gmra.mxu1 %v10628_v18  ;;  %v10678_v4 = vand.u32 4294901760, %v3167_v58  ;;  %v3417_v36 = vand.u32 4294901760, %v3416_v56  ;;  %v13062_v8 = vand.u32 4294901760, %v10641_v51  ;;  %v13066_v18 = vld [vmem:[#allocation143_spill] sm:$0xff]  ;;  %v13068_v11 = vand.u32 4294901760, %v10664_v35 }
 0x375   :  { %6758 = vmatprep.subr.mxu1 %v13063_v27  ;;  %6671 = vmatpush3.msra.mxu0 %v13064_v28  ;;  %v10687_v40 = vand.u32 4294901760, %v3168_v61  ;;  %v3169_v59 = vmax.f32 %v3111_v60, 0.0  ;;  %v3116_v37 = vadd.f32 %v10603_v17, %v2907_v0  ;;  %v13067_v56 = vld [vmem:[#allocation115_spill] sm:$0xff]  ;;  %v2913_v27 = vpop.f32.mrf.mxu0 }
 0x376   :  { %13061 = vst [vmem:[#allocation186_spill] sm:$0xff] %v10678_v4  ;;  %v3437_v20 = vsub.f32 %v10641_v51, %v13062_v8  ;;  %6759 = vmatpush3.msra.mxu1 %v13066_v18  ;;  %6672 = vmatprep.subr.mxu0 %v13067_v56  ;;  %v10693_v57 = vsub.f32 %v3167_v58, %v10678_v4  ;;  %v3131_v56 = vpop.f32.mrf.mxu1  ;;  %v13070_v58 = vld [vmem:[#allocation188_spill] sm:$0xff] }
 0x377   :  { %13065 = vst [vmem:[#allocation172_spill] sm:$0xff] %v10687_v40  ;;  %v2909_v8 = vadd.f32 %v2908_v50, %v10396_v32  ;;  %3418 = vmatprep.mubr.f32.mxu0 %v3417_v36  ;;  %3837 = vmatprep.mubr.f32.mxu1 %v10678_v4  ;;  %v3431_v28 = vsub.f32 %v10664_v35, %v13068_v11  ;;  %v10703_v0 = vand.u32 4294901760, %v3169_v59  ;;  %v3170_v18 = vmax.f32 %v3116_v37, 0.0  ;;  %v2915_v36 = vpop.f32.mrf.mxu0  ;;  %v13072_v11 = vld [vmem:[#allocation22_spill] sm:$0xff] }
 0x378   :  { %v3438_v60 = vand.u32 4294901760, %v3437_v20  ;;  %v10701_v17 = vsub.f32 %v3168_v61, %v10687_v40  ;;  %v2914_v51 = vadd.f32 %v2913_v27, %v13070_v58  ;;  %3424 = vmatmul.mubr.f32.gmra.mxu0 %v3423_v25  ;;  %3839 = vmatmul.mubr.f32.gmra.mxu1 %v10657_v1  ;;  %v12438_v4 = vand.u32 4294901760, %v10693_v57 }
 0x379   :  { %13069 = vst [vmem:[#allocation63_spill] sm:$0xff] %v10703_v0  ;;  %v3118_v32 = vadd.f32 %v10616_v52, %v2909_v8  ;;  %v3432_v50 = vand.u32 4294901760, %v3431_v28  ;;  %v13071_v20 = vand.u32 4294901760, %v10671_v6  ;;  %6760 = vmatprep.subr.mxu1 %v13072_v11  ;;  %6673 = vmatpush3.msra.mxu0 %v13073_v7  ;;  %v10716_v25 = vsub.f32 %v3169_v59, %v10703_v0  ;;  %v13075_v28 = vld [vmem:[#allocation114_spill] sm:$0xff]  ;;  %v13076_v59 = vld [vmem:[#allocation131_spill] sm:$0xff] }
 0x37a   :  { %v10718_v27 = vand.u32 4294901760, %v3170_v18  ;;  %v3123_v52 = vadd.f32 %v10634_v39, %v2914_v51  ;;  %3844 = vmatprep.mubr.f32.mxu1 %v10703_v0  ;;  %6761 = vmatpush3.msra.mxu1 %v13075_v28  ;;  %v2916_v58 = vadd.f32 %v2915_v36, %v10399_v34  ;;  %v3446_v37 = vsub.f32 %v10693_v57, %v12438_v4  ;;  %v3136_v51 = vpop.f32.mrf.mxu1  ;;  %v13079_v28 = vld [vmem:[#allocation120_spill] sm:$0xff] }
 0x37b   :  { %v3452_v61 = vsub.f32 %v10671_v6, %v13071_v20  ;;  %v3171_v8 = vmax.f32 %v3118_v32, 0.0  ;;  %3433 = vmatprep.mubr.f32.mxu0 %v3432_v50  ;;  %v2920_v20 = vpop.f32.mrf.mxu0  ;;  %6674 = vmatprep.subr.mxu0 %v13076_v59  ;;  %v13078_v4 = vand.u32 4294901760, %v10701_v17 }
 0x37c   :  { %13074 = vst [vmem:[#allocation145_spill] sm:$0xff] %v10718_v27  ;;  %v10729_v11 = vsub.f32 %v3170_v18, %v10718_v27  ;;  %v3172_v39 = vmax.f32 %v3123_v52, 0.0  ;;  %v2921_v0 = vadd.f32 %v2920_v20, %v10299_v30  ;;  %3439 = vmatmul.mubr.f32.gmra.mxu0 %v3438_v60  ;;  %3846 = vmatmul.mubr.f32.gmra.mxu1 %v10687_v40  ;;  %v13080_v52 = vld [vmem:[#allocation51_spill] sm:$0xff]  ;;  %v13082_v40 = vld [vmem:[#allocation126_spill] sm:$0xff]  ;;  %v13084_v30 = vand.u32 4294901760, %v10716_v25 }
 0x37d   :  { %v3453_v1 = vand.u32 4294901760, %v3452_v61  ;;  %v10734_v32 = vand.u32 4294901760, %v3171_v8  ;;  %v3125_v36 = vadd.f32 %v10649_v3, %v2916_v58  ;;  %v2922_v50 = vpop.f32.mrf.mxu0  ;;  %v3447_v61 = vand.u32 4294901760, %v3446_v37  ;;  %6762 = vmatprep.subr.mxu1 %v13079_v28  ;;  %6675 = vmatpush3.msra.mxu0 %v13080_v52  ;;  %v13083_v3 = vld [vmem:[#allocation137_spill] sm:$0xff] }
 0x37e   :  { %v3467_v18 = vsub.f32 %v10701_v17, %v13078_v4  ;;  %v10743_v60 = vand.u32 4294901760, %v3172_v39  ;;  %v3130_v20 = vadd.f32 %v10675_v44, %v2921_v0  ;;  %v2923_v34 = vadd.f32 %v2922_v50, %v10412_v45  ;;  %6763 = vmatpush3.msra.mxu1 %v13082_v40  ;;  %6676 = vmatprep.subr.mxu0 %v13083_v3  ;;  %v3138_v45 = vpop.f32.mrf.mxu1  ;;  %v13088_v3 = vld [vmem:[#allocation141_spill] sm:$0xff] }
 0x37f   :  { %13077 = vst [vmem:[#allocation158_spill] sm:$0xff] %v10734_v32  ;;  %v10750_v37 = vsub.f32 %v3171_v8, %v10734_v32  ;;  %v3173_v4 = vmax.f32 %v3125_v36, 0.0  ;;  %3448 = vmatprep.mubr.f32.mxu0 %v3447_v61  ;;  %3851 = vmatprep.mubr.f32.mxu1 %v10734_v32  ;;  %v2927_v58 = vpop.f32.mrf.mxu0  ;;  %v3461_v28 = vsub.f32 %v10716_v25, %v13084_v30  ;;  %v13086_v30 = vand.u32 4294901760, %v10729_v11 }
 0x380   :  { %13081 = vst [vmem:[#allocation35_spill] sm:$0xff] %v10743_v60  ;;  %v3468_v52 = vand.u32 4294901760, %v3467_v18  ;;  %v10757_v44 = vsub.f32 %v3172_v39, %v10743_v60  ;;  %v3174_v0 = vmax.f32 %v3130_v20, 0.0  ;;  %v3132_v50 = vadd.f32 %v3131_v56, %v2923_v34  ;;  %3454 = vmatmul.mubr.f32.gmra.mxu0 %v3453_v1  ;;  %3853 = vmatmul.mubr.f32.gmra.mxu1 %v10718_v27  ;;  %v13087_v39 = vld [vmem:[#allocation121_spill] sm:$0xff]  ;;  %v13090_v20 = vld [vmem:[#allocation123_spill] sm:$0xff] }
 0x381   :  { %v2928_v40 = vadd.f32 %v2927_v58, %v10319_v63  ;;  %v10761_v8 = vand.u32 4294901760, %v3173_v4  ;;  %v2929_v36 = vpop.f32.mrf.mxu0  ;;  %v3462_v61 = vand.u32 4294901760, %v3461_v28  ;;  %v3482_v18 = vsub.f32 %v10729_v11, %v13086_v30  ;;  %6764 = vmatprep.subr.mxu1 %v13087_v39  ;;  %6677 = vmatpush3.msra.mxu0 %v13088_v3  ;;  %v13091_v58 = vld [vmem:[#allocation144_spill] sm:$0xff] }
 0x382   :  { %v10770_v63 = vand.u32 4294901760, %v3174_v0  ;;  %v3175_v1 = vmax.f32 %v3132_v50, 0.0  ;;  %6765 = vmatpush3.msra.mxu1 %v13090_v20  ;;  %6678 = vmatprep.subr.mxu0 %v13091_v58  ;;  %v2930_v32 = vadd.f32 %v2929_v36, %v10415_v43  ;;  %v13092_v27 = vand.u32 4294901760, %v10750_v37  ;;  %v13096_v58 = vld [vmem:[#allocation113_spill] sm:$0xff] }
 0x383   :  { %13085 = vst [vmem:[#allocation174_spill] sm:$0xff] %v10761_v8  ;;  %v3137_v34 = vadd.f32 %v3136_v51, %v2928_v40  ;;  %v10775_v28 = vsub.f32 %v3173_v4, %v10761_v8  ;;  %3463 = vmatprep.mubr.f32.mxu0 %v3462_v61  ;;  %3858 = vmatprep.mubr.f32.mxu1 %v10761_v8  ;;  %v2934_v30 = vpop.f32.mrf.mxu0  ;;  %v3483_v39 = vand.u32 4294901760, %v3482_v18  ;;  %v3143_v51 = vpop.f32.mrf.mxu1 }
 0x384   :  { %13089 = vst [vmem:[#allocation110_spill] sm:$0xff] %v10770_v63  ;;  %v3476_v56 = vsub.f32 %v10750_v37, %v13092_v27  ;;  %v10783_v40 = vsub.f32 %v3174_v0, %v10770_v63  ;;  %v10785_v50 = vand.u32 4294901760, %v3175_v1  ;;  %v2935_v4 = vadd.f32 %v2934_v30, %v10337_v12  ;;  %3469 = vmatmul.mubr.f32.gmra.mxu0 %v3468_v52  ;;  %v13095_v0 = vld [vmem:[#allocation132_spill] sm:$0xff] }
 0x385   :  { %v3176_v20 = vmax.f32 %v3137_v34, 0.0  ;;  %3860 = vmatmul.mubr.f32.gmra.mxu1 %v10743_v60  ;;  %v3139_v43 = vadd.f32 %v3138_v45, %v2930_v32  ;;  %v2936_v36 = vpop.f32.mrf.mxu0  ;;  %v12449_v8 = vand.u32 4294901760, %v10775_v28  ;;  %v13094_v27 = vand.u32 4294901760, %v10757_v44  ;;  %6766 = vmatprep.subr.mxu1 %v13095_v0  ;;  %v13098_v45 = vld [vmem:[#allocation134_spill] sm:$0xff]  ;;  %v13099_v60 = vld [vmem:[#allocation116_spill] sm:$0xff]  ;;  %v3145_v34 = vpop.f32.mrf.mxu1 }
 0x386   :  { %13093 = vst [vmem:[#allocation148_spill] sm:$0xff] %v10785_v50  ;;  %v3477_v61 = vand.u32 4294901760, %v3476_v56  ;;  %6679 = vmatpush3.msra.mxu0 %v13096_v58  ;;  %v10797_v12 = vsub.f32 %v3175_v1, %v10785_v50  ;;  %v3144_v32 = vadd.f32 %v3143_v51, %v2935_v4  ;;  %3865 = vmatprep.mubr.f32.mxu1 %v10785_v50 }
 0x387   :  { %v3497_v18 = vsub.f32 %v10757_v44, %v13094_v27  ;;  %v10799_v52 = vand.u32 4294901760, %v3176_v20  ;;  %6767 = vmatpush3.msra.mxu1 %v13098_v45  ;;  %v3177_v56 = vmax.f32 %v3139_v43, 0.0  ;;  %v2937_v30 = vadd.f32 %v2936_v36, %v10432_v10  ;;  %6680 = vmatprep.subr.mxu0 %v13099_v60 }
 0x388   :  { %3478 = vmatprep.mubr.f32.mxu0 %v3477_v61  ;;  %v3491_v27 = vsub.f32 %v10775_v28, %v12449_v8  ;;  %v3178_v0 = vmax.f32 %v3144_v32, 0.0  ;;  %v12454_v51 = vand.u32 4294901760, %v10797_v12  ;;  %v13101_v61 = vld [vmem:[#allocation138_spill] sm:$0xff] }
 0x389   :  { %13097 = vst [vmem:[#allocation162_spill] sm:$0xff] %v10799_v52  ;;  %v10809_v1 = vsub.f32 %v3176_v20, %v10799_v52  ;;  %3484 = vmatmul.mubr.f32.gmra.mxu0 %v3483_v39  ;;  %3867 = vmatmul.mubr.f32.gmra.mxu1 %v10770_v63  ;;  %v10813_v4 = vand.u32 4294901760, %v3177_v56  ;;  %v3146_v10 = vadd.f32 %v3145_v34, %v2937_v30  ;;  %v3498_v36 = vand.u32 4294901760, %v3497_v18  ;;  %v13102_v8 = vld [vmem:[#allocation118_spill] sm:$0xff] }
 0x38a   :  { %v3492_v43 = vand.u32 4294901760, %v3491_v27  ;;  %6768 = vmatprep.subr.mxu1 %v13101_v61  ;;  %6681 = vmatpush3.msra.mxu0 %v13102_v8  ;;  %v10818_v45 = vand.u32 4294901760, %v3178_v0  ;;  %v3506_v39 = vsub.f32 %v10797_v12, %v12454_v51  ;;  %v13104_v20 = vand.u32 4294901760, %v10783_v40  ;;  %v13105_v63 = vld [vmem:[#allocation142_spill] sm:$0xff] }
 0x38b   :  { %13100 = vst [vmem:[#allocation176_spill] sm:$0xff] %v10813_v4  ;;  %6769 = vmatpush3.msra.mxu1 %v13105_v63  ;;  %v13106_v34 = vld [vmem:[#allocation122_spill] sm:$0xff]  ;;  %v10829_v18 = vsub.f32 %v3177_v56, %v10813_v4  ;;  %v3179_v30 = vmax.f32 %v3146_v10, 0.0  ;;  %3872 = vmatprep.mubr.f32.mxu1 %v10813_v4  ;;  %v13108_v63 = vld [vmem:[#allocation129_spill] sm:$0xff]  ;;  %v13114_v56 = vld [vmem:[#allocation128_spill] sm:$0xff] }
 0x38c   :  { %13103 = vst [vmem:[#allocation147_spill] sm:$0xff] %v10818_v45  ;;  %v3512_v32 = vsub.f32 %v10783_v40, %v13104_v20  ;;  %6682 = vmatprep.subr.mxu0 %v13106_v34  ;;  %3493 = vmatprep.mubr.f32.mxu0 %v3492_v43  ;;  %v10833_v27 = vsub.f32 %v3178_v0, %v10818_v45  ;;  %v3507_v51 = vand.u32 4294901760, %v3506_v39  ;;  %v13109_v61 = vld [vmem:[#allocation30_spill] sm:$0xff]  ;;  %v13110_v43 = vand.u32 4294901760, %v10809_v1 }
 0x38d   :  { %3499 = vmatmul.mubr.f32.gmra.mxu0 %v3498_v36  ;;  %3874 = vmatmul.mubr.f32.gmra.mxu1 %v10799_v52  ;;  %v10836_v50 = vand.u32 4294901760, %v3179_v30  ;;  %v12461_v20 = vand.u32 4294901760, %v10829_v18  ;;  %v13111_v36 = vld [vmem:[#allocation130_spill] sm:$0xff] }
 0x38e   :  { %6683 = vmatpush3.msra.mxu0 %v13108_v63  ;;  %6898 = vmatprep.subr.mxu1 %v13109_v61  ;;  %v3513_v10 = vand.u32 4294901760, %v3512_v32  ;;  %v3527_v0 = vsub.f32 %v10809_v1, %v13110_v43  ;;  %v13112_v61 = vld [vmem:[#allocation127_spill] sm:$0xff] }
 0x38f   :  { %13107 = vst [vmem:[#allocation149_spill] sm:$0xff] %v10836_v50  ;;  %3508 = vmatprep.mubr.f32.mxu0 %v3507_v51  ;;  %6684 = vmatprep.subr.mxu0 %v13111_v36  ;;  %v10847_v39 = vsub.f32 %v3179_v30, %v10836_v50  ;;  %v3521_v52 = vsub.f32 %v10829_v18, %v12461_v20  ;;  %v13113_v51 = vand.u32 4294901760, %v10403_v41  ;;  %v13116_v36 = vld [vmem:[#allocation136_spill] sm:$0xff] }
 0x390   :  { %3879 = vmatprep.mubr.f32.mxu1 %v10836_v50  ;;  %6685 = vmatpush3.msra.mxu0 %v13112_v61  ;;  %v3528_v30 = vand.u32 4294901760, %v3527_v0  ;;  %v13115_v50 = vand.u32 4294901760, %v10833_v27  ;;  %v13117_v20 = vld [vmem:[#allocation140_spill] sm:$0xff] }
 0x391   :  { %3514 = vmatmul.mubr.f32.gmra.mxu0 %v3513_v10  ;;  %3881 = vmatmul.mubr.f32.gmra.mxu1 %v10818_v45  ;;  %v3522_v32 = vand.u32 4294901760, %v3521_v52  ;;  %v3535_v43 = vand.u32 4294901760, %v10847_v39  ;;  %v13118_v52 = vand.u32 4294901760, %v10388_v16  ;;  %v13120_v45 = vld [vmem:[#allocation166_spill] sm:$0xff] }
 0x392   :  { %4258 = vmatprep.mubr.f32.mxu1 %v13113_v51  ;;  %6686 = vmatprep.subr.mxu0 %v13114_v56  ;;  %v3542_v4 = vsub.f32 %v10833_v27, %v13115_v50  ;;  %v13119_v51 = vand.u32 4294901760, %v10436_v13 }
 0x393   :  { %6687 = vmatpush3.msra.mxu0 %v13116_v36  ;;  %3523 = vmatprep.mubr.f32.mxu0 %v3522_v32  ;;  %v3536_v10 = vsub.f32 %v10847_v39, %v3535_v43  ;;  %v13121_v32 = vld [vmem:[#allocation32_spill] sm:$0xff] }
 0x394   :  { %6688 = vmatprep.subr.mxu0 %v13117_v20  ;;  %v3543_v50 = vand.u32 4294901760, %v3542_v4  ;;  %v13122_v36 = vand.u32 4294901760, %v13121_v32 }
 0x395   :  { %3529 = vmatmul.mubr.f32.gmra.mxu0 %v3528_v30  ;;  %4262 = vmatmul.mubr.f32.vlgmr.msra.gmra.mxu1 %v13118_v52  ;;  %v3537_v0 = vand.u32 4294901760, %v3536_v10  ;;  %v13123_v30 = vand.u32 4294901760, %v10421_v48  ;;  %v13124_v52 = vand.u32 4294901760, %v10475_v5  ;;  %v13147_v10 = vld [vmem:[#allocation161_spill] sm:$0xff] }
 0x396   :  { %4269 = vmatprep.mubr.f32.mxu1 %v13119_v51  ;;  %6689 = vmatpush3.msra.mxu0 %v13120_v45  ;;  %v13148_v51 = vand.u32 4294901760, %v13147_v10  ;;  %v13184_v10 = vld [vmem:[#allocation51_spill] sm:$0xff] }
 0x397   :  { %6899 = vmatpush3.msra.mxu1 %v12994_v31  ;;  %6818 = vmatprep.subr.mxu0 %v13122_v36  ;;  %v13125_v31 = vand.u32 4294901760, %v10457_v2  ;;  %v13146_v36 = vld [vmem:[#allocation157_spill] sm:$0xff] }
 0x398   :  { %3538 = vmatprep.mubr.f32.mxu0 %v3537_v0  ;;  %6900 = vmatprep.subr.mxu1 %v12995_v23  ;;  %v13126_v23 = vand.u32 4294901760, %v10503_v62  ;;  %v13151_v0 = vld [vmem:[#allocation109_spill] sm:$0xff] }
 0x399   :  { %3544 = vmatmul.mubr.f32.gmra.mxu0 %v3543_v50  ;;  %4273 = vmatmul.mubr.f32.gmra.mxu1 %v13123_v30  ;;  %v13152_v50 = vld [vmem:[#allocation159_spill] sm:$0xff] }
 0x39a   :  { %4016 = vmatprep.mubr.f32.mxu0 %v10403_v41  ;;  %4280 = vmatprep.mubr.f32.mxu1 %v13124_v52  ;;  %v13127_v41 = vand.u32 4294901760, %v13008_v26  ;;  %v13137_v26 = vld [vmem:[#allocation60_spill] sm:$0xff]  ;;  %v13153_v32 = vand.u32 4294901760, %v13152_v50  ;;  %v13154_v30 = vld [vmem:[#allocation163_spill] sm:$0xff]  ;;  %v13155_v52 = vld [vmem:[#allocation150_spill] sm:$0xff]  ;;  %v13192_v50 = vand.u32 4294901760, %v13088_v3 }
 0x39b   :  { %6901 = vmatpush3.msra.mxu1 %v12996_v46  ;;  %v13128_v46 = vand.u32 4294901760, %v13011_v15  ;;  %v13199_v3 = vand.u32 4294901760, %v13096_v58  ;;  %v13205_v58 = vand.u32 4294901760, %v13102_v8  ;;  %v13210_v8 = vand.u32 4294901760, %v13108_v63 }
 0x39c   :  { %6902 = vmatprep.subr.mxu1 %v12998_v38  ;;  %v13131_v38 = vand.u32 4294901760, %v13016_v49  ;;  %v13143_v49 = vld [vmem:[#allocation107_spill] sm:$0xff]  ;;  %v13218_v63 = vand.u32 4294901760, %v13114_v56 }
 0x39d   :  { %4019 = vmatmul.mubr.f32.vlgmr.msra.gmra.mxu0 %v10388_v16  ;;  %4284 = vmatmul.mubr.f32.gmra.mxu1 %v13125_v31  ;;  %v13129_v16 = vand.u32 4294901760, %v10481_v24  ;;  %v13156_v31 = vand.u32 4294901760, %v13155_v52  ;;  %v13225_v56 = vld [vmem:[#allocation167_spill] sm:$0xff] }
 0x39e   :  { %4025 = vmatprep.mubr.f32.mxu0 %v10436_v13  ;;  %4291 = vmatprep.mubr.f32.mxu1 %v13126_v23  ;;  %v13130_v13 = vand.u32 4294901760, %v10530_v9 }
 0x39f   :  { %6903 = vmatpush3.msra.mxu1 %v13000_v55  ;;  %6819 = vmatpush3.msra.mxu0 %v13127_v41  ;;  %v13132_v55 = vand.u32 4294901760, %v13020_v54  ;;  %v13160_v41 = vld [vmem:[#allocation112_spill] sm:$0xff] }
 0x3a0   :  { %6904 = vmatprep.subr.mxu1 %v13002_v19  ;;  %6820 = vmatprep.subr.mxu0 %v13128_v46  ;;  %v13134_v19 = vand.u32 4294901760, %v10568_v21  ;;  %v13161_v46 = vld [vmem:[#allocation164_spill] sm:$0xff] }
 0x3a1   :  { %4028 = vmatmul.mubr.f32.gmra.mxu0 %v10421_v48  ;;  %4295 = vmatmul.mubr.f32.gmra.mxu1 %v13129_v16  ;;  %v13133_v48 = vand.u32 4294901760, %v10513_v42  ;;  %v13162_v16 = vand.u32 4294901760, %v13161_v46  ;;  %v13211_v46 = vld [vmem:[#allocation138_spill] sm:$0xff] }
 0x3a2   :  { %4034 = vmatprep.mubr.f32.mxu0 %v10475_v5  ;;  %4302 = vmatprep.mubr.f32.mxu1 %v13130_v13  ;;  %v13163_v13 = vld [vmem:[#allocation119_spill] sm:$0xff] }
 0x3a3   :  { %6905 = vmatpush3.msra.mxu1 %v13004_v22  ;;  %6821 = vmatpush3.msra.mxu0 %v13131_v38  ;;  %v13135_v22 = vld [vmem:[#allocation154_spill] sm:$0xff]  ;;  %v13164_v38 = vld [vmem:[#allocation111_spill] sm:$0xff] }
 0x3a4   :  { %6906 = vmatprep.subr.mxu1 %v13007_v53  ;;  %6822 = vmatprep.subr.mxu0 %v13132_v55  ;;  %v13136_v5 = vand.u32 4294901760, %v13135_v22  ;;  %v13138_v53 = vld [vmem:[#allocation44_spill] sm:$0xff]  ;;  %v13165_v55 = vand.u32 4294901760, %v13164_v38  ;;  %v13169_v22 = vld [vmem:[#allocation125_spill] sm:$0xff]  ;;  %v13219_v38 = vld [vmem:[#allocation27_spill] sm:$0xff] }
 0x3a5   :  { %4037 = vmatmul.mubr.f32.gmra.mxu0 %v10457_v2  ;;  %4306 = vmatmul.mubr.f32.gmra.mxu1 %v13133_v48  ;;  %v13139_v54 = vand.u32 4294901760, %v13138_v53  ;;  %v13140_v2 = vld [vmem:[#allocation49_spill] sm:$0xff] }
 0x3a6   :  { %4043 = vmatprep.mubr.f32.mxu0 %v10503_v62  ;;  %4313 = vmatprep.mubr.f32.mxu1 %v13134_v19  ;;  %v13141_v15 = vand.u32 4294901760, %v13140_v2  ;;  %v13142_v62 = vand.u32 4294901760, %v10599_v14  ;;  %v13166_v48 = vld [vmem:[#allocation181_spill] sm:$0xff] }
 0x3a7   :  { %6907 = vmatpush3.msra.mxu1 %v13010_v47  ;;  %6823 = vmatpush3.msra.mxu0 %v13136_v5  ;;  %v13144_v47 = vld [vmem:[#allocation52_spill] sm:$0xff]  ;;  %v13167_v19 = vand.u32 4294901760, %v13166_v48  ;;  %v13172_v53 = vld [vmem:[#allocation133_spill] sm:$0xff] }
 0x3a8   :  { %6908 = vmatprep.subr.mxu1 %v13137_v26  ;;  %6824 = vmatprep.subr.mxu0 %v13139_v54  ;;  %v13145_v4 = vand.u32 4294901760, %v13144_v47  ;;  %v13170_v5 = vld [vmem:[#allocation124_spill] sm:$0xff]  ;;  %v13173_v54 = vld [vmem:[#allocation115_spill] sm:$0xff]  ;;  %v13180_v47 = vand.u32 4294901760, %v13076_v59 }
 0x3a9   :  { %4046 = vmatmul.mubr.f32.gmra.mxu0 %v10481_v24  ;;  %4317 = vmatmul.mubr.f32.gmra.mxu1 %v13141_v15  ;;  %v13149_v24 = vand.u32 4294901760, %v10577_v29  ;;  %v13171_v26 = vand.u32 4294901760, %v13170_v5  ;;  %v13177_v15 = vld [vmem:[#allocation135_spill] sm:$0xff] }
 0x3aa   :  { %4052 = vmatprep.mubr.f32.mxu0 %v10530_v9  ;;  %4324 = vmatprep.mubr.f32.mxu1 %v13142_v62  ;;  %v13150_v9 = vand.u32 4294901760, %v10626_v33  ;;  %v13178_v62 = vand.u32 4294901760, %v13073_v7  ;;  %v13185_v7 = vand.u32 4294901760, %v13184_v10  ;;  %v13234_v5 = vld [vmem:[#allocation171_spill] sm:$0xff]  ;;  %v13248_v10 = vld [vmem:[#allocation148_spill] sm:$0xff] }
 0x3ab   :  { %6909 = vmatpush3.msra.mxu1 %v13143_v49  ;;  %6825 = vmatpush3.msra.mxu0 %v13145_v4  ;;  %v13179_v49 = vld [vmem:[#allocation139_spill] sm:$0xff]  ;;  %v13181_v4 = vand.u32 4294901760, %v10701_v17 }
 0x3ac   :  { %6910 = vmatprep.subr.mxu1 %v13146_v36  ;;  %6826 = vmatprep.subr.mxu0 %v13148_v51  ;;  %v13183_v36 = vld [vmem:[#allocation143_spill] sm:$0xff]  ;;  %v13186_v51 = vld [vmem:[#allocation22_spill] sm:$0xff] }
 0x3ad   :  { %4055 = vmatmul.mubr.f32.gmra.mxu0 %v10513_v42  ;;  %4328 = vmatmul.mubr.f32.gmra.mxu1 %v13149_v24  ;;  %v13157_v42 = vld [vmem:[#allocation175_spill] sm:$0xff]  ;;  %v13187_v24 = vld [vmem:[#allocation137_spill] sm:$0xff] }
 0x3ae   :  { %4061 = vmatprep.mubr.f32.mxu0 %v10568_v21  ;;  %4335 = vmatprep.mubr.f32.mxu1 %v13150_v9  ;;  %v13158_v23 = vand.u32 4294901760, %v13157_v42  ;;  %v13159_v21 = vand.u32 4294901760, %v10664_v35  ;;  %v13188_v59 = vand.u32 4294901760, %v13187_v24  ;;  %v13189_v9 = vand.u32 4294901760, %v10729_v11  ;;  %v13251_v24 = vld [vmem:[#allocation162_spill] sm:$0xff] }
 0x3af   :  { %6911 = vmatpush3.msra.mxu1 %v13151_v0  ;;  %6827 = vmatpush3.msra.mxu0 %v13153_v32  ;;  %v13191_v0 = vld [vmem:[#allocation114_spill] sm:$0xff]  ;;  %v13193_v32 = vld [vmem:[#allocation120_spill] sm:$0xff] }
 0x3b0   :  { %6912 = vmatprep.subr.mxu1 %v13154_v30  ;;  %6828 = vmatprep.subr.mxu0 %v13156_v31  ;;  %v13194_v30 = vld [vmem:[#allocation144_spill] sm:$0xff]  ;;  %v13198_v31 = vld [vmem:[#allocation126_spill] sm:$0xff] }
 0x3b1   :  { %4064 = vmatmul.mubr.f32.gmra.mxu0 %v13140_v2  ;;  %4339 = vmatmul.mubr.f32.gmra.mxu1 %v13158_v23  ;;  %v13174_v2 = vand.u32 4294901760, %v13173_v54  ;;  %v13195_v52 = vand.u32 4294901760, %v13194_v30  ;;  %v13201_v23 = vand.u32 4294901760, %v13099_v60  ;;  %v13207_v60 = vand.u32 4294901760, %v13106_v34  ;;  %v13237_v54 = vld [vmem:[#allocation173_spill] sm:$0xff] }
 0x3b2   :  { %4070 = vmatprep.mubr.f32.mxu0 %v10599_v14  ;;  %4346 = vmatprep.mubr.f32.mxu1 %v13159_v21  ;;  %v13168_v14 = vand.u32 4294901760, %v10693_v57  ;;  %v13204_v21 = vld [vmem:[#allocation123_spill] sm:$0xff] }
 0x3b3   :  { %6913 = vmatpush3.msra.mxu1 %v13160_v41  ;;  %6829 = vmatpush3.msra.mxu0 %v13162_v16  ;;  %v13206_v41 = vld [vmem:[#allocation132_spill] sm:$0xff]  ;;  %v13212_v16 = vld [vmem:[#allocation130_spill] sm:$0xff] }
 0x3b4   :  { %6914 = vmatprep.subr.mxu1 %v13163_v13  ;;  %6830 = vmatprep.subr.mxu0 %v13165_v55  ;;  %v13213_v34 = vand.u32 4294901760, %v13212_v16  ;;  %v13217_v13 = vand.u32 4294901760, %v13112_v61  ;;  %v13221_v55 = vld [vmem:[#allocation136_spill] sm:$0xff] }
 0x3b5   :  { %4073 = vmatmul.mubr.f32.gmra.mxu0 %v10577_v29  ;;  %4350 = vmatmul.mubr.f32.gmra.mxu1 %v13167_v19  ;;  %v13175_v29 = vand.u32 4294901760, %v10671_v6  ;;  %v13224_v61 = vld [vmem:[#allocation168_spill] sm:$0xff]  ;;  %v13228_v19 = vld [vmem:[#allocation170_spill] sm:$0xff] }
 0x3b6   :  { %4079 = vmatprep.mubr.f32.mxu0 %v10626_v33  ;;  %4357 = vmatprep.mubr.f32.mxu1 %v13168_v14  ;;  %v13176_v33 = vand.u32 4294901760, %v10716_v25  ;;  %v13232_v14 = vld [vmem:[#allocation146_spill] sm:$0xff] }
 0x3b7   :  { %6915 = vmatpush3.msra.mxu1 %v13169_v22  ;;  %6831 = vmatpush3.msra.mxu0 %v13171_v26  ;;  %v13233_v22 = vld [vmem:[#allocation153_spill] sm:$0xff]  ;;  %v13235_v26 = vld [vmem:[#allocation160_spill] sm:$0xff] }
 0x3b8   :  { %6916 = vmatprep.subr.mxu1 %v13172_v53  ;;  %6832 = vmatprep.subr.mxu0 %v13174_v2  ;;  %v13236_v53 = vld [vmem:[#allocation177_spill] sm:$0xff]  ;;  %v13238_v2 = vld [vmem:[#allocation54_spill] sm:$0xff] }
 0x3b9   :  { %4082 = vmatmul.mubr.f32.gmra.mxu0 %v13157_v42  ;;  %4361 = vmatmul.mubr.f32.gmra.mxu1 %v13175_v29  ;;  %v13200_v42 = vld [vmem:[#allocation121_spill] sm:$0xff]  ;;  %v13239_v29 = vld [vmem:[#allocation179_spill] sm:$0xff] }
 0x3ba   :  { %4088 = vmatprep.mubr.f32.mxu0 %v10664_v35  ;;  %4368 = vmatprep.mubr.f32.mxu1 %v13176_v33  ;;  %v13182_v35 = vand.u32 4294901760, %v10750_v37  ;;  %v13240_v33 = vld [vmem:[#allocation186_spill] sm:$0xff] }
 0x3bb   :  { %6917 = vmatpush3.msra.mxu1 %v13177_v15  ;;  %6833 = vmatpush3.msra.mxu0 %v13178_v62  ;;  %v13241_v15 = vld [vmem:[#allocation184_spill] sm:$0xff]  ;;  %v13242_v62 = vld [vmem:[#allocation63_spill] sm:$0xff] }
 0x3bc   :  { %6918 = vmatprep.subr.mxu1 %v13179_v49  ;;  %6834 = vmatprep.subr.mxu0 %v13180_v47  ;;  %v13243_v49 = vld [vmem:[#allocation172_spill] sm:$0xff]  ;;  %v13244_v47 = vld [vmem:[#allocation158_spill] sm:$0xff] }
 0x3bd   :  { %4091 = vmatmul.mubr.f32.gmra.mxu0 %v13166_v48  ;;  %4372 = vmatmul.mubr.f32.gmra.mxu1 %v13181_v4  ;;  %v13223_v48 = vand.u32 4294901760, %v13117_v20  ;;  %v13230_v20 = vld [vmem:[#allocation25_spill] sm:$0xff] }
 0x3be   :  { %4097 = vmatprep.mubr.f32.mxu0 %v10693_v57  ;;  %4379 = vmatprep.mubr.f32.mxu1 %v13182_v35  ;;  %v13190_v57 = vand.u32 4294901760, %v10775_v28  ;;  %v13245_v4 = vld [vmem:[#allocation145_spill] sm:$0xff]  ;;  %v13246_v35 = vld [vmem:[#allocation174_spill] sm:$0xff] }
 0x3bf   :  { %6919 = vmatpush3.msra.mxu1 %v13183_v36  ;;  %6835 = vmatpush3.msra.mxu0 %v13185_v7  ;;  %v13247_v36 = vld [vmem:[#allocation35_spill] sm:$0xff]  ;;  %v13249_v7 = vld [vmem:[#allocation110_spill] sm:$0xff] }
 0x3c0   :  { %6920 = vmatprep.subr.mxu1 %v13186_v51  ;;  %6836 = vmatprep.subr.mxu0 %v13188_v59  ;;  %v13250_v51 = vld [vmem:[#allocation176_spill] sm:$0xff]  ;;  %v13252_v59 = vld [vmem:[#allocation149_spill] sm:$0xff] }
 0x3c1   :  { %4100 = vmatmul.mubr.f32.gmra.mxu0 %v10671_v6  ;;  %4383 = vmatmul.mubr.f32.gmra.mxu1 %v13189_v9  ;;  %v13196_v6 = vand.u32 4294901760, %v10757_v44  ;;  %v13253_v9 = vld [vmem:[#allocation147_spill] sm:$0xff] }
 0x3c2   :  { %4106 = vmatprep.mubr.f32.mxu0 %v10716_v25  ;;  %4390 = vmatprep.mubr.f32.mxu1 %v13190_v57  ;;  %v13197_v25 = vand.u32 4294901760, %v10797_v12  ;;  %v13254_v57 = vld [vmem:[#allocation12_spill] sm:$0xff] }
 0x3c3   :  { %6921 = vmatpush3.msra.mxu1 %v13191_v0  ;;  %6837 = vmatpush3.msra.mxu0 %v13192_v50 }
 0x3c4   :  { %6922 = vmatprep.subr.mxu1 %v13193_v32  ;;  %6838 = vmatprep.subr.mxu0 %v13195_v52  ;;  %v13255_v52 = vld [vmem:[#allocation15_spill] sm:$0xff] }
 0x3c5   :  { %4109 = vmatmul.mubr.f32.gmra.mxu0 %v10701_v17  ;;  %4394 = vmatmul.mubr.f32.gmra.mxu1 %v13196_v6  ;;  %v13202_v17 = vand.u32 4294901760, %v10783_v40 }
 0x3c6   :  { %4115 = vmatprep.mubr.f32.mxu0 %v10750_v37  ;;  %4401 = vmatprep.mubr.f32.mxu1 %v13197_v25  ;;  %v13203_v37 = vand.u32 4294901760, %v10829_v18 }
 0x3c7   :  { %6923 = vmatpush3.msra.mxu1 %v13198_v31  ;;  %6839 = vmatpush3.msra.mxu0 %v13199_v3 }
 0x3c8   :  { %6924 = vmatprep.subr.mxu1 %v13200_v42  ;;  %6840 = vmatprep.subr.mxu0 %v13201_v23 }
 0x3c9   :  { %4118 = vmatmul.mubr.f32.gmra.mxu0 %v10729_v11  ;;  %4405 = vmatmul.mubr.f32.gmra.mxu1 %v13202_v17  ;;  %v13208_v11 = vand.u32 4294901760, %v10809_v1 }
 0x3ca   :  { %4124 = vmatprep.mubr.f32.mxu0 %v10775_v28  ;;  %4412 = vmatprep.mubr.f32.mxu1 %v13203_v37  ;;  %v13209_v28 = vld [vmem:[#allocation134_spill] sm:$0xff] }
 0x3cb   :  { %6925 = vmatpush3.msra.mxu1 %v13204_v21  ;;  %6841 = vmatpush3.msra.mxu0 %v13205_v58 }
 0x3cc   :  { %6926 = vmatprep.subr.mxu1 %v13206_v41  ;;  %6842 = vmatprep.subr.mxu0 %v13207_v60 }
 0x3cd   :  { %4127 = vmatmul.mubr.f32.gmra.mxu0 %v10757_v44  ;;  %4416 = vmatmul.mubr.f32.gmra.mxu1 %v13208_v11  ;;  %v13214_v44 = vand.u32 4294901760, %v10833_v27 }
 0x3ce   :  { %4133 = vmatprep.mubr.f32.mxu0 %v10797_v12  ;;  %4423 = vmatprep.mubr.f32.mxu1 %v3535_v43  ;;  %v13215_v12 = vld [vmem:[#allocation165_spill] sm:$0xff]  ;;  %v13216_v43 = vld [vmem:[#allocation142_spill] sm:$0xff] }
 0x3cf   :  { %6927 = vmatpush3.msra.mxu1 %v13209_v28  ;;  %6843 = vmatpush3.msra.mxu0 %v13210_v8 }
 0x3d0   :  { %6928 = vmatprep.subr.mxu1 %v13211_v46  ;;  %6844 = vmatprep.subr.mxu0 %v13213_v34 }
 0x3d1   :  { %4136 = vmatmul.mubr.f32.gmra.mxu0 %v10783_v40  ;;  %4427 = vmatmul.mubr.f32.gmra.mxu1 %v13214_v44  ;;  %v13220_v40 = vld [vmem:[#allocation152_spill] sm:$0xff] }
 0x3d2   :  { %4142 = vmatprep.mubr.f32.mxu0 %v10829_v18  ;;  %4802 = vmatprep.mubr.f32.mxu1 %v13215_v12  ;;  %v13222_v18 = vand.u32 4294901760, %v13221_v55 }
 0x3d3   :  { %6929 = vmatpush3.msra.mxu1 %v13216_v43  ;;  %6845 = vmatpush3.msra.mxu0 %v13217_v13 }
 0x3d4   :  { %6846 = vmatprep.subr.mxu0 %v13218_v63 }
 0x3d5   :  { %4145 = vmatmul.mubr.f32.gmra.mxu0 %v10809_v1  ;;  %4804 = vmatmul.mubr.f32.vlgmr.msra.gmra.mxu1 %v13219_v38  ;;  %v13226_v1 = vand.u32 4294901760, %v13120_v45  ;;  %v13231_v45 = vld [vmem:[#allocation42_spill] sm:$0xff] }
 0x3d6   :  { %4151 = vmatprep.mubr.f32.mxu0 %v10847_v39  ;;  %4809 = vmatprep.mubr.f32.mxu1 %v13220_v40  ;;  %v13227_v39 = vld [vmem:[#allocation155_spill] sm:$0xff] }
 0x3d7   :  { %6847 = vmatpush3.msra.mxu0 %v13222_v18 }
 0x3d8   :  { %6848 = vmatprep.subr.mxu0 %v13223_v48 }
 0x3d9   :  { %4154 = vmatmul.mubr.f32.gmra.mxu0 %v10833_v27  ;;  %4811 = vmatmul.mubr.f32.gmra.mxu1 %v13224_v61  ;;  %v13229_v27 = vld [vmem:[#allocation169_spill] sm:$0xff] }
 0x3da   :  { %4593 = vmatprep.mubr.f32.mxu0 %v13215_v12  ;;  %4816 = vmatprep.mubr.f32.mxu1 %v13225_v56 }
 0x3db   :  { %6849 = vmatpush3.msra.mxu0 %v13226_v1 }
 0x3dd   :  { %4595 = vmatmul.mubr.f32.vlgmr.msra.gmra.mxu0 %v13219_v38  ;;  %4818 = vmatmul.mubr.f32.gmra.mxu1 %v13227_v39 }
 0x3de   :  { %4600 = vmatprep.mubr.f32.mxu0 %v13220_v40  ;;  %4823 = vmatprep.mubr.f32.mxu1 %v13228_v19 }
 0x3e1   :  { %4602 = vmatmul.mubr.f32.gmra.mxu0 %v13224_v61  ;;  %4825 = vmatmul.mubr.f32.gmra.mxu1 %v13229_v27 }
 0x3e2   :  { %4607 = vmatprep.mubr.f32.mxu0 %v13225_v56  ;;  %4830 = vmatprep.mubr.f32.mxu1 %v13230_v20 }
 0x3e5   :  { %4609 = vmatmul.mubr.f32.gmra.mxu0 %v13227_v39  ;;  %4832 = vmatmul.mubr.f32.gmra.mxu1 %v13231_v45 }
 0x3e6   :  { %4614 = vmatprep.mubr.f32.mxu0 %v13228_v19  ;;  %4837 = vmatprep.mubr.f32.mxu1 %v13232_v14 }
 0x3e9   :  { %4616 = vmatmul.mubr.f32.gmra.mxu0 %v13229_v27  ;;  %4839 = vmatmul.mubr.f32.gmra.mxu1 %v13233_v22 }
 0x3ea   :  { %4621 = vmatprep.mubr.f32.mxu0 %v13230_v20  ;;  %4844 = vmatprep.mubr.f32.mxu1 %v13234_v5 }
 0x3ed   :  { %4623 = vmatmul.mubr.f32.gmra.mxu0 %v13231_v45  ;;  %4846 = vmatmul.mubr.f32.gmra.mxu1 %v13235_v26 }
 0x3ee   :  { %4628 = vmatprep.mubr.f32.mxu0 %v13232_v14  ;;  %4851 = vmatprep.mubr.f32.mxu1 %v13236_v53 }
 0x3f1   :  { %4630 = vmatmul.mubr.f32.gmra.mxu0 %v13233_v22  ;;  %4853 = vmatmul.mubr.f32.gmra.mxu1 %v13237_v54 }
 0x3f2   :  { %4635 = vmatprep.mubr.f32.mxu0 %v13234_v5  ;;  %4858 = vmatprep.mubr.f32.mxu1 %v13238_v2 }
 0x3f5   :  { %4637 = vmatmul.mubr.f32.gmra.mxu0 %v13235_v26  ;;  %4860 = vmatmul.mubr.f32.gmra.mxu1 %v13239_v29 }
 0x3f6   :  { %4642 = vmatprep.mubr.f32.mxu0 %v13236_v53  ;;  %4865 = vmatprep.mubr.f32.mxu1 %v13240_v33 }
 0x3f9   :  { %4644 = vmatmul.mubr.f32.gmra.mxu0 %v13237_v54  ;;  %4867 = vmatmul.mubr.f32.gmra.mxu1 %v13241_v15 }
 0x3fa   :  { %4649 = vmatprep.mubr.f32.mxu0 %v13238_v2  ;;  %4872 = vmatprep.mubr.f32.mxu1 %v13242_v62 }
 0x3fd   :  { %4651 = vmatmul.mubr.f32.gmra.mxu0 %v13239_v29  ;;  %4874 = vmatmul.mubr.f32.gmra.mxu1 %v13243_v49 }
 0x3fe   :  { %4656 = vmatprep.mubr.f32.mxu0 %v13240_v33  ;;  %4879 = vmatprep.mubr.f32.mxu1 %v13244_v47 }
 0x401   :  { %4658 = vmatmul.mubr.f32.gmra.mxu0 %v13241_v15  ;;  %4881 = vmatmul.mubr.f32.gmra.mxu1 %v13245_v4 }
 0x402   :  { %4663 = vmatprep.mubr.f32.mxu0 %v13242_v62  ;;  %4886 = vmatprep.mubr.f32.mxu1 %v13246_v35 }
 0x405   :  { %4665 = vmatmul.mubr.f32.gmra.mxu0 %v13243_v49  ;;  %4888 = vmatmul.mubr.f32.gmra.mxu1 %v13247_v36 }
 0x406   :  { %4670 = vmatprep.mubr.f32.mxu0 %v13244_v47  ;;  %4893 = vmatprep.mubr.f32.mxu1 %v13248_v10 }
 0x409   :  { %4672 = vmatmul.mubr.f32.gmra.mxu0 %v13245_v4  ;;  %4895 = vmatmul.mubr.f32.gmra.mxu1 %v13249_v7 }
 0x40a   :  { %4677 = vmatprep.mubr.f32.mxu0 %v13246_v35  ;;  %4900 = vmatprep.mubr.f32.mxu1 %v13250_v51 }
 0x40d   :  { %4679 = vmatmul.mubr.f32.gmra.mxu0 %v13247_v36  ;;  %4902 = vmatmul.mubr.f32.gmra.mxu1 %v13251_v24 }
 0x40e   :  { %4684 = vmatprep.mubr.f32.mxu0 %v13248_v10  ;;  %4907 = vmatprep.mubr.f32.mxu1 %v13252_v59 }
 0x411   :  { %4686 = vmatmul.mubr.f32.gmra.mxu0 %v13249_v7  ;;  %4909 = vmatmul.mubr.f32.gmra.mxu1 %v13253_v9  ;;  %v6610_v0 = vpop.f32.mrf.mxu1 }
 0x412   :  { %4691 = vmatprep.mubr.f32.mxu0 %v13250_v51  ;;  %7594 = vmatprep.mubr.f32.mxu1 %v13254_v57 }
 0x413   :  { %v6611_v50 = vpop.f32.mrf.mxu1 }
 0x414   :  { %v6612_v42 = vadd.f32 %v6611_v50, %v6610_v0 }
 0x415   :  { %4693 = vmatmul.mubr.f32.gmra.mxu0 %v13251_v24  ;;  %v6613_v32 = vpop.f32.mrf.mxu1 }
 0x416   :  { %4698 = vmatprep.mubr.f32.mxu0 %v13252_v59 }
 0x417   :  { %v6614_v30 = vpop.f32.mrf.mxu1 }
 0x418   :  { %v6615_v60 = vadd.f32 %v6614_v30, %v6613_v32 }
 0x419   :  { %4700 = vmatmul.mubr.f32.gmra.mxu0 %v13253_v9 }
 0x41a   :  { %7538 = vmatprep.mubr.f32.mxu0 %v13255_v52  ;;  %v6530_v6 = vpop.f32.mrf.mxu0 }
 0x41b   :  { %v6616_v25 = vpop.f32.mrf.mxu1 }
 0x41c   :  { %v6531_v31 = vpop.f32.mrf.mxu0 }
 0x41d   :  { %v6617_v3 = vpop.f32.mrf.mxu1  ;;  %v6532_v23 = vadd.f32 %v6531_v31, %v6530_v6 }
 0x41e   :  { %v6533_v17 = vpop.f32.mrf.mxu0  ;;  %v6618_v44 = vadd.f32 %v6617_v3, %v6616_v25 }
 0x41f   :  { %v6619_v37 = vpop.f32.mrf.mxu1  ;;  %v11123_v21 = vadd.f32 %v6612_v42, %v6532_v23 }
 0x420   :  { %v6534_v58 = vpop.f32.mrf.mxu0 }
 0x421   :  { %v6620_v41 = vpop.f32.mrf.mxu1  ;;  %v6535_v11 = vadd.f32 %v6534_v58, %v6533_v17 }
 0x422   :  { %v6536_v28 = vpop.f32.mrf.mxu0  ;;  %v6621_v55 = vadd.f32 %v6620_v41, %v6619_v37 }
 0x423   :  { %v6622_v8 = vpop.f32.mrf.mxu1  ;;  %v11125_v46 = vadd.f32 %v6615_v60, %v6535_v11 }
 0x424   :  { %v6537_v16 = vpop.f32.mrf.mxu0 }
 0x425   :  { %v6623_v34 = vpop.f32.mrf.mxu1  ;;  %v6538_v12 = vadd.f32 %v6537_v16, %v6536_v28 }
 0x426   :  { %v6624_v19 = vadd.f32 %v6623_v34, %v6622_v8 }
 0x427   :  { %v6539_v43 = vpop.f32.mrf.mxu0  ;;  %v6625_v13 = vpop.f32.mrf.mxu1  ;;  %v11127_v63 = vadd.f32 %v6618_v44, %v6538_v12 }
 0x429   :  { %v6540_v38 = vpop.f32.mrf.mxu0  ;;  %v6626_v40 = vpop.f32.mrf.mxu1 }
 0x42a   :  { %v6541_v18 = vadd.f32 %v6540_v38, %v6539_v43  ;;  %v6627_v26 = vadd.f32 %v6626_v40, %v6625_v13 }
 0x42b   :  { %v6542_v48 = vpop.f32.mrf.mxu0  ;;  %v6628_v61 = vpop.f32.mrf.mxu1 }
 0x42c   :  { %v11129_v56 = vadd.f32 %v6621_v55, %v6541_v18 }
 0x42d   :  { %v6543_v1 = vpop.f32.mrf.mxu0  ;;  %v6629_v39 = vpop.f32.mrf.mxu1 }
 0x42e   :  { %v6544_v27 = vadd.f32 %v6543_v1, %v6542_v48  ;;  %v6630_v62 = vadd.f32 %v6629_v39, %v6628_v61 }
 0x42f   :  { %v6545_v20 = vpop.f32.mrf.mxu0  ;;  %v6631_v45 = vpop.f32.mrf.mxu1 }
 0x430   :  { %v11131_v14 = vadd.f32 %v6624_v19, %v6544_v27 }
 0x431   :  { %v6546_v22 = vpop.f32.mrf.mxu0  ;;  %v6632_v5 = vpop.f32.mrf.mxu1 }
 0x432   :  { %v6547_v53 = vadd.f32 %v6546_v22, %v6545_v20  ;;  %v6633_v7 = vadd.f32 %v6632_v5, %v6631_v45 }
 0x434   :  { %v6548_v54 = vpop.f32.mrf.mxu0  ;;  %v6634_v2 = vpop.f32.mrf.mxu1  ;;  %v11133_v29 = vadd.f32 %v6627_v26, %v6547_v53 }
 0x436   :  { %v6549_v33 = vpop.f32.mrf.mxu0  ;;  %v6635_v15 = vpop.f32.mrf.mxu1 }
 0x437   :  { %v6550_v49 = vadd.f32 %v6549_v33, %v6548_v54  ;;  %v6636_v32 = vadd.f32 %v6635_v15, %v6634_v2 }
 0x438   :  { %v6551_v47 = vpop.f32.mrf.mxu0  ;;  %v6637_v4 = vpop.f32.mrf.mxu1 }
 0x439   :  { %v11135_v35 = vadd.f32 %v6630_v62, %v6550_v49 }
 0x43a   :  { %v6552_v36 = vpop.f32.mrf.mxu0  ;;  %v6638_v10 = vpop.f32.mrf.mxu1 }
 0x43b   :  { %v6553_v51 = vadd.f32 %v6552_v36, %v6551_v47  ;;  %v6639_v42 = vadd.f32 %v6638_v10, %v6637_v4 }
 0x43c   :  { %v6554_v24 = vpop.f32.mrf.mxu0  ;;  %v6640_v59 = vpop.f32.mrf.mxu1 }
 0x43d   :  { %v11137_v9 = vadd.f32 %v6633_v7, %v6553_v51 }
 0x43e   :  { %v6555_v0 = vpop.f32.mrf.mxu0  ;;  %v6641_v50 = vpop.f32.mrf.mxu1 }
 0x43f   :  { %v6556_v30 = vadd.f32 %v6555_v0, %v6554_v24  ;;  %v6642_v11 = vadd.f32 %v6641_v50, %v6640_v59 }
 0x440   :  { %v6557_v52 = vpop.f32.mrf.mxu0  ;;  %v6643_v6 = vpop.f32.mrf.mxu1 }
 0x441   :  { %v11139_v25 = vadd.f32 %v6636_v32, %v6556_v30 }
 0x442   :  { %v6558_v31 = vpop.f32.mrf.mxu0  ;;  %v6644_v3 = vpop.f32.mrf.mxu1 }
 0x443   :  { %v6559_v23 = vadd.f32 %v6558_v31, %v6557_v52  ;;  %v6645_v43 = vadd.f32 %v6644_v3, %v6643_v6 }
 0x444   :  { %v6560_v17 = vpop.f32.mrf.mxu0 }
 0x445   :  { %v6646_v37 = vpop.f32.mrf.mxu1  ;;  %v11141_v58 = vadd.f32 %v6639_v42, %v6559_v23 }
 0x446   :  { %v6561_v41 = vpop.f32.mrf.mxu0 }
 0x447   :  { %v6647_v60 = vpop.f32.mrf.mxu1  ;;  %v6562_v28 = vadd.f32 %v6561_v41, %v6560_v17 }
 0x448   :  { %v6648_v61 = vadd.f32 %v6647_v60, %v6646_v37 }
 0x449   :  { %v6563_v8 = vpop.f32.mrf.mxu0  ;;  %v6649_v16 = vpop.f32.mrf.mxu1  ;;  %v11143_v34 = vadd.f32 %v6642_v11, %v6562_v28 }
 0x44b   :  { %v6564_v44 = vpop.f32.mrf.mxu0  ;;  %v6650_v12 = vpop.f32.mrf.mxu1 }
 0x44c   :  { %v6565_v13 = vadd.f32 %v6564_v44, %v6563_v8  ;;  %v6651_v22 = vadd.f32 %v6650_v12, %v6649_v16 }
 0x44d   :  { %v6566_v38 = vpop.f32.mrf.mxu0  ;;  %v6652_v40 = vpop.f32.mrf.mxu1 }
 0x44e   :  { %v11145_v55 = vadd.f32 %v6645_v43, %v6565_v13 }
 0x44f   :  { %v6567_v18 = vpop.f32.mrf.mxu0  ;;  %v6653_v48 = vpop.f32.mrf.mxu1 }
 0x450   :  { %v6568_v1 = vadd.f32 %v6567_v18, %v6566_v38  ;;  %v6654_v15 = vadd.f32 %v6653_v48, %v6652_v40 }
 0x451   :  { %v6569_v39 = vpop.f32.mrf.mxu0  ;;  %v6655_v19 = vpop.f32.mrf.mxu1 }
 0x452   :  { %v11147_v27 = vadd.f32 %v6648_v61, %v6568_v1 }
 0x453   :  { %v6570_v20 = vpop.f32.mrf.mxu0  ;;  %v6656_v45 = vpop.f32.mrf.mxu1 }
 0x454   :  { %v6571_v5 = vadd.f32 %v6570_v20, %v6569_v39  ;;  %v6657_v51 = vadd.f32 %v6656_v45, %v6655_v19 }
 0x455   :  { %v6572_v26 = vpop.f32.mrf.mxu0  ;;  %v6770_v53 = vpop.f32.mrf.mxu1 }
 0x456   :  { %v11149_v54 = vadd.f32 %v6651_v22, %v6571_v5 }
 0x457   :  { %v6573_v2 = vpop.f32.mrf.mxu0  ;;  %v6771_v33 = vpop.f32.mrf.mxu1 }
 0x458   :  { %v6574_v62 = vadd.f32 %v6573_v2, %v6572_v26  ;;  %v6772_v49 = vadd.f32 %v6771_v33, %v6770_v53 }
 0x459   :  { %v6575_v47 = vpop.f32.mrf.mxu0  ;;  %v6773_v4 = vpop.f32.mrf.mxu1 }
 0x45a   :  { %v11151_v36 = vadd.f32 %v6654_v15, %v6574_v62 }
 0x45b   :  { %v6576_v10 = vpop.f32.mrf.mxu0  ;;  %v6774_v7 = vpop.f32.mrf.mxu1 }
 0x45c   :  { %v6577_v24 = vadd.f32 %v6576_v10, %v6575_v47  ;;  %v6775_v59 = vadd.f32 %v6774_v7, %v6773_v4 }
 0x45d   :  { %v6690_v0 = vpop.f32.mrf.mxu0  ;;  %v6776_v50 = vpop.f32.mrf.mxu1 }
 0x45e   :  { %v11153_v32 = vadd.f32 %v6657_v51, %v6577_v24 }
 0x45f   :  { %v6691_v30 = vpop.f32.mrf.mxu0  ;;  %v6777_v52 = vpop.f32.mrf.mxu1 }
 0x460   :  { %v6692_v6 = vadd.f32 %v6691_v30, %v6690_v0  ;;  %v6778_v31 = vadd.f32 %v6777_v52, %v6776_v50 }
 0x461   :  { %v6693_v3 = vpop.f32.mrf.mxu0  ;;  %v6779_v42 = vpop.f32.mrf.mxu1 }
 0x462   :  { %v4021_v23 = vadd.f32 %v6692_v6, %v11123_v21 }
 0x463   :  { %v6694_v17 = vpop.f32.mrf.mxu0  ;;  %v6780_v37 = vpop.f32.mrf.mxu1 }
 0x464   :  { %v6695_v41 = vadd.f32 %v6694_v17, %v6693_v3  ;;  %v6781_v60 = vadd.f32 %v6780_v37, %v6779_v42  ;;  %v11156_v11 = vadd.f32 %v6772_v49, %v4021_v23 }
 0x465   :  { %v6696_v28 = vpop.f32.mrf.mxu0  ;;  %v6782_v8 = vpop.f32.mrf.mxu1 }
 0x466   :  { %v4030_v16 = vadd.f32 %v6695_v41, %v11125_v46 }
 0x467   :  { %v6697_v44 = vpop.f32.mrf.mxu0  ;;  %v6783_v12 = vpop.f32.mrf.mxu1 }
 0x468   :  { %v6698_v43 = vadd.f32 %v6697_v44, %v6696_v28  ;;  %v6784_v13 = vadd.f32 %v6783_v12, %v6782_v8  ;;  %v11159_v38 = vadd.f32 %v6775_v59, %v4030_v16 }
 0x469   :  { %v6699_v40 = vpop.f32.mrf.mxu0  ;;  %v6785_v18 = vpop.f32.mrf.mxu1 }
 0x46a   :  { %v4039_v21 = vadd.f32 %v6698_v43, %v11127_v63 }
 0x46b   :  { %v6700_v48 = vpop.f32.mrf.mxu0  ;;  %v6786_v61 = vpop.f32.mrf.mxu1 }
 0x46c   :  { %v6701_v1 = vadd.f32 %v6700_v48, %v6699_v40  ;;  %v6787_v39 = vadd.f32 %v6786_v61, %v6785_v18  ;;  %v11162_v19 = vadd.f32 %v6778_v31, %v4039_v21 }
 0x46d   :  { %v6702_v20 = vpop.f32.mrf.mxu0  ;;  %v6788_v45 = vpop.f32.mrf.mxu1 }
 0x46e   :  { %v4048_v46 = vadd.f32 %v6701_v1, %v11129_v56 }
 0x46f   :  { %v6703_v22 = vpop.f32.mrf.mxu0  ;;  %v6789_v5 = vpop.f32.mrf.mxu1 }
 0x470   :  { %v6704_v26 = vadd.f32 %v6703_v22, %v6702_v20  ;;  %v6790_v53 = vadd.f32 %v6789_v5, %v6788_v45  ;;  %v11165_v2 = vadd.f32 %v6781_v60, %v4048_v46 }
 0x471   :  { %v6705_v33 = vpop.f32.mrf.mxu0  ;;  %v6791_v15 = vpop.f32.mrf.mxu1 }
 0x472   :  { %v4057_v63 = vadd.f32 %v6704_v26, %v11131_v14 }
 0x473   :  { %v6706_v62 = vpop.f32.mrf.mxu0  ;;  %v6792_v49 = vpop.f32.mrf.mxu1 }
 0x474   :  { %v6707_v47 = vadd.f32 %v6706_v62, %v6705_v33  ;;  %v6793_v4 = vadd.f32 %v6792_v49, %v6791_v15  ;;  %v11168_v10 = vadd.f32 %v6784_v13, %v4057_v63 }
 0x475   :  { %v6708_v7 = vpop.f32.mrf.mxu0  ;;  %v6794_v51 = vpop.f32.mrf.mxu1 }
 0x476   :  { %v4066_v56 = vadd.f32 %v6707_v47, %v11133_v29 }
 0x477   :  { %v6709_v24 = vpop.f32.mrf.mxu0  ;;  %v6795_v59 = vpop.f32.mrf.mxu1 }
 0x478   :  { %v6710_v0 = vadd.f32 %v6709_v24, %v6708_v7  ;;  %v6796_v50 = vadd.f32 %v6795_v59, %v6794_v51  ;;  %v11171_v30 = vadd.f32 %v6787_v39, %v4066_v56 }
 0x479   :  { %v6711_v52 = vpop.f32.mrf.mxu0  ;;  %v6797_v6 = vpop.f32.mrf.mxu1 }
 0x47a   :  { %v4075_v14 = vadd.f32 %v6710_v0, %v11135_v35 }
 0x47b   :  { %v6712_v31 = vpop.f32.mrf.mxu0  ;;  %v6798_v3 = vpop.f32.mrf.mxu1 }
 0x47c   :  { %v6713_v42 = vadd.f32 %v6712_v31, %v6711_v52  ;;  %v6799_v23 = vadd.f32 %v6798_v3, %v6797_v6  ;;  %v11174_v17 = vadd.f32 %v6790_v53, %v4075_v14 }
 0x47d   :  { %v6714_v37 = vpop.f32.mrf.mxu0  ;;  %v6800_v41 = vpop.f32.mrf.mxu1 }
 0x47e   :  { %v4084_v29 = vadd.f32 %v6713_v42, %v11137_v9 }
 0x47f   :  { %v6715_v60 = vpop.f32.mrf.mxu0  ;;  %v6801_v28 = vpop.f32.mrf.mxu1 }
 0x480   :  { %v6716_v8 = vadd.f32 %v6715_v60, %v6714_v37  ;;  %v6802_v16 = vadd.f32 %v6801_v28, %v6800_v41  ;;  %v11177_v44 = vadd.f32 %v6793_v4, %v4084_v29 }
 0x481   :  { %v6717_v12 = vpop.f32.mrf.mxu0  ;;  %v6803_v43 = vpop.f32.mrf.mxu1 }
 0x482   :  { %v4093_v35 = vadd.f32 %v6716_v8, %v11139_v25 }
 0x483   :  { %v6718_v13 = vpop.f32.mrf.mxu0  ;;  %v6804_v40 = vpop.f32.mrf.mxu1 }
 0x484   :  { %v6719_v18 = vadd.f32 %v6718_v13, %v6717_v12  ;;  %v6805_v21 = vadd.f32 %v6804_v40, %v6803_v43  ;;  %v11180_v48 = vadd.f32 %v6796_v50, %v4093_v35 }
 0x485   :  { %v6720_v61 = vpop.f32.mrf.mxu0  ;;  %v6806_v1 = vpop.f32.mrf.mxu1 }
 0x486   :  { %v4102_v9 = vadd.f32 %v6719_v18, %v11141_v58 }
 0x487   :  { %v6721_v39 = vpop.f32.mrf.mxu0  ;;  %v6807_v20 = vpop.f32.mrf.mxu1 }
 0x488   :  { %v6722_v45 = vadd.f32 %v6721_v39, %v6720_v61  ;;  %v6808_v46 = vadd.f32 %v6807_v20, %v6806_v1  ;;  %v11183_v22 = vadd.f32 %v6799_v23, %v4102_v9 }
 0x489   :  { %v6723_v5 = vpop.f32.mrf.mxu0  ;;  %v6809_v26 = vpop.f32.mrf.mxu1 }
 0x48a   :  { %v4111_v25 = vadd.f32 %v6722_v45, %v11143_v34 }
 0x48b   :  { %v6724_v53 = vpop.f32.mrf.mxu0  ;;  %v6810_v33 = vpop.f32.mrf.mxu1 }
 0x48c   :  { %v6725_v15 = vadd.f32 %v6724_v53, %v6723_v5  ;;  %v6811_v63 = vadd.f32 %v6810_v33, %v6809_v26  ;;  %v11186_v62 = vadd.f32 %v6802_v16, %v4111_v25 }
 0x48d   :  { %v6726_v49 = vpop.f32.mrf.mxu0  ;;  %v6812_v47 = vpop.f32.mrf.mxu1 }
 0x48e   :  { %v4120_v58 = vadd.f32 %v6725_v15, %v11145_v55 }
 0x48f   :  { %v6727_v4 = vpop.f32.mrf.mxu0  ;;  %v6813_v7 = vpop.f32.mrf.mxu1 }
 0x490   :  { %v6728_v51 = vadd.f32 %v6727_v4, %v6726_v49  ;;  %v6814_v56 = vadd.f32 %v6813_v7, %v6812_v47  ;;  %v11189_v24 = vadd.f32 %v6805_v21, %v4120_v58 }
 0x491   :  { %v6729_v59 = vpop.f32.mrf.mxu0  ;;  %v11191_v0 = vpop.f32.mrf.mxu1 }
 0x492   :  { %v4129_v34 = vadd.f32 %v6728_v51, %v11147_v27 }
 0x493   :  { %v6730_v50 = vpop.f32.mrf.mxu0  ;;  %v11194_v52 = vpop.f32.mrf.mxu1 }
 0x494   :  { %v6731_v6 = vadd.f32 %v6730_v50, %v6729_v59  ;;  %v11196_v14 = vadd.f32 %v6808_v46, %v4129_v34 }
 0x495   :  { %v6732_v31 = vpop.f32.mrf.mxu0  ;;  %v6930_v3 = vpop.f32.mrf.mxu1 }
 0x496   :  { %v4138_v55 = vadd.f32 %v6731_v6, %v11149_v54 }
 0x497   :  { %v6733_v42 = vpop.f32.mrf.mxu0  ;;  %v6931_v23 = vpop.f32.mrf.mxu1 }
 0x498   :  { %v6734_v37 = vadd.f32 %v6733_v42, %v6732_v31  ;;  %v6932_v41 = vadd.f32 %v6931_v23, %v6930_v3  ;;  %v11199_v29 = vadd.f32 %v6811_v63, %v4138_v55 }
 0x499   :  { %v11201_v60 = vpop.f32.mrf.mxu0  ;;  %v6933_v28 = vpop.f32.mrf.mxu1 }
 0x49a   :  { %v4147_v27 = vadd.f32 %v6734_v37, %v11151_v36 }
 0x49b   :  { %v11204_v8 = vpop.f32.mrf.mxu0  ;;  %v6934_v16 = vpop.f32.mrf.mxu1 }
 0x49c   :  { %v6935_v12 = vadd.f32 %v6934_v16, %v6933_v28  ;;  %v11206_v43 = vadd.f32 %v6814_v56, %v4147_v27 }
 0x49d   :  { %v6850_v35 = vpop.f32.mrf.mxu0  ;;  %v6936_v13 = vpop.f32.mrf.mxu1 }
 0x49f   :  { %v6851_v54 = vpop.f32.mrf.mxu0  ;;  %v6937_v40 = vpop.f32.mrf.mxu1 }
 0x4a0   :  { %v6852_v18 = vadd.f32 %v6851_v54, %v6850_v35  ;;  %v6938_v21 = vadd.f32 %v6937_v40, %v6936_v13 }
 0x4a1   :  { %v6853_v61 = vpop.f32.mrf.mxu0  ;;  %v6939_v1 = vpop.f32.mrf.mxu1 }
 0x4a2   :  { %v4597_v9 = vadd.f32 %v6852_v18, %v11156_v11 }
 0x4a3   :  { %v6854_v39 = vpop.f32.mrf.mxu0  ;;  %v6940_v20 = vpop.f32.mrf.mxu1 }
 0x4a4   :  { %v11209_v45 = vadd.f32 %v6932_v41, %v4597_v9  ;;  %v6855_v36 = vadd.f32 %v6854_v39, %v6853_v61  ;;  %v6941_v46 = vadd.f32 %v6940_v20, %v6939_v1 }
 0x4a5   :  { %v6856_v5 = vpop.f32.mrf.mxu0  ;;  %v6942_v26 = vpop.f32.mrf.mxu1 }
 0x4a6   :  { %13256 = vst [vmem:[#allocation151_spill] sm:$0xff] %v11209_v45  ;;  %v4604_v25 = vadd.f32 %v6855_v36, %v11159_v38 }
 0x4a7   :  { %v6857_v53 = vpop.f32.mrf.mxu0  ;;  %v6943_v33 = vpop.f32.mrf.mxu1 }
 0x4a8   :  { %v11212_v15 = vadd.f32 %v6935_v12, %v4604_v25  ;;  %v6858_v63 = vadd.f32 %v6857_v53, %v6856_v5  ;;  %v6944_v49 = vadd.f32 %v6943_v33, %v6942_v26 }
 0x4a9   :  { %v6859_v47 = vpop.f32.mrf.mxu0  ;;  %v11214_v58 = vpop.f32.mrf.mxu1 }
 0x4aa   :  { %13257 = vst [vmem:[#allocation108_spill] sm:$0xff] %v11212_v15  ;;  %13258 = vst [vmem:[#allocation178_spill] sm:$0xff] %v11214_v58  ;;  %v4611_v11 = vadd.f32 %v6858_v63, %v11162_v19 }
 0x4ab   :  { %v6860_v4 = vpop.f32.mrf.mxu0  ;;  %v11217_v7 = vpop.f32.mrf.mxu1 }
 0x4ac   :  { %13259 = vst [vmem:[#allocation156_spill] sm:$0xff] %v11217_v7  ;;  %v11219_v51 = vadd.f32 %v6938_v21, %v4611_v11  ;;  %v6861_v56 = vadd.f32 %v6860_v4, %v6859_v47 }
 0x4ad   :  { %v6862_v59 = vpop.f32.mrf.mxu0  ;;  %v11221_v34 = vpop.f32.mrf.mxu1 }
 0x4ae   :  { %13260 = vst [vmem:[#allocation38_spill] sm:$0xff] %v11219_v51  ;;  %v4618_v38 = vadd.f32 %v6861_v56, %v11165_v2  ;;  %v6737_v56 = vadd.f32 %v11204_v8, %v11201_v60 }
 0x4af   :  { %v6863_v50 = vpop.f32.mrf.mxu0  ;;  %v11224_v6 = vpop.f32.mrf.mxu1 }
 0x4b0   :  { %v11226_v31 = vadd.f32 %v6941_v46, %v4618_v38  ;;  %v6864_v3 = vadd.f32 %v6863_v50, %v6862_v59 }
 0x4b1   :  { %v11228_v55 = vpop.f32.mrf.mxu0  ;;  %v11230_v19 = vpop.f32.mrf.mxu1 }
 0x4b2   :  { %13261 = vst [vmem:[#allocation180_spill] sm:$0xff] %v11226_v31  ;;  %v4625_v42 = vadd.f32 %v6864_v3, %v11168_v10  ;;  %v4156_v31 = vadd.f32 %v6737_v56, %v11153_v32 }
 0x4b3   :  { %v11233_v23 = vpop.f32.mrf.mxu0  ;;  %v11235_v37 = vpop.f32.mrf.mxu1 }
 0x4b4   :  { %v11237_v41 = vadd.f32 %v6944_v49, %v4625_v42 }
 0x4b5   :  { %v11239_v28 = vpop.f32.mrf.mxu0  ;;  %v11241_v2 = vpop.f32.mrf.mxu1 }
 0x4b6   :  { %13262 = vst [vmem:[#allocation182_spill] sm:$0xff] %v11237_v41 }
 0x4b7   :  { %v11243_v27 = vpop.f32.mrf.mxu0  ;;  %v11245_v16 = vpop.f32.mrf.mxu1 }
 0x4b9   :  { %v6871_v12 = vpop.f32.mrf.mxu0  ;;  %v6957_v35 = vpop.f32.mrf.mxu1 }
 0x4bb   :  { %v6872_v13 = vpop.f32.mrf.mxu0  ;;  %v6958_v54 = vpop.f32.mrf.mxu1 }
 0x4bd   :  { %v6874_v40 = vpop.f32.mrf.mxu0  ;;  %v6960_v10 = vpop.f32.mrf.mxu1 }
 0x4bf   :  { %v6875_v18 = vpop.f32.mrf.mxu0  ;;  %v6961_v21 = vpop.f32.mrf.mxu1 }
 0x4c1   :  { %v6877_v61 = vpop.f32.mrf.mxu0  ;;  %v6963_v1 = vpop.f32.mrf.mxu1 }
 0x4c3   :  { %v6878_v9 = vpop.f32.mrf.mxu0  ;;  %v6964_v39 = vpop.f32.mrf.mxu1 }
 0x4c4   :  { %v6879_v41 = vadd.f32 %v6878_v9, %v6877_v61  ;;  %v6873_v61 = vadd.f32 %v6872_v13, %v6871_v12  ;;  %v6962_v9 = vadd.f32 %v6961_v21, %v6960_v10  ;;  %v13265_v10 = vld [vmem:[#allocation18_spill] sm:$0xff]  ;;  %v6956_v21 = vadd.f32 %v11245_v16, %v11241_v2  ;;  %v13268_v2 = vld [vmem:[#allocation16_spill] sm:$0xff] }
 0x4c5   :  { %v6880_v20 = vpop.f32.mrf.mxu0  ;;  %v6966_v36 = vpop.f32.mrf.mxu1 }
 0x4c7   :  { %v6881_v46 = vpop.f32.mrf.mxu0  ;;  %v6967_v5 = vpop.f32.mrf.mxu1 }
 0x4c8   :  { %v6882_v42 = vadd.f32 %v6881_v46, %v6880_v20  ;;  %v6876_v20 = vadd.f32 %v6875_v18, %v6874_v40  ;;  %v6959_v40 = vadd.f32 %v6958_v54, %v6957_v35 }
 0x4c9   :  { %v6883_v26 = vpop.f32.mrf.mxu0  ;;  %v6969_v25 = vpop.f32.mrf.mxu1 }
 0x4ca   :  { %v4667_v46 = vadd.f32 %v6882_v42, %v11186_v62  ;;  %v6870_v62 = vadd.f32 %v11243_v27, %v11239_v28  ;;  %v13266_v28 = vld [vmem:[#allocation20_spill] sm:$0xff] }
 0x4cb   :  { %v6884_v53 = vpop.f32.mrf.mxu0  ;;  %v6970_v33 = vpop.f32.mrf.mxu1  ;;  %v13271_v42 = vld [vmem:[#allocation156_spill] sm:$0xff] }
 0x4cc   :  { %v6885_v50 = vadd.f32 %v6884_v53, %v6883_v26  ;;  %v6971_v45 = vadd.f32 %v6970_v33, %v6969_v25  ;;  %v6817_v26 = vadd.f32 %v11194_v52, %v11191_v0  ;;  %v4876_v18 = vadd.f32 %v6962_v9, %v4667_v46  ;;  %v13273_v46 = vld [vmem:[#allocation28_spill] sm:$0xff] }
 0x4cd   :  { %v6886_v63 = vpop.f32.mrf.mxu0  ;;  %v6972_v49 = vpop.f32.mrf.mxu1  ;;  %v4639_v33 = vadd.f32 %v6870_v62, %v11174_v17 }
 0x4cf   :  { %v6887_v47 = vpop.f32.mrf.mxu0  ;;  %v6973_v59 = vpop.f32.mrf.mxu1 }
 0x4d0   :  { %v6888_v4 = vadd.f32 %v6887_v47, %v6886_v63  ;;  %v6968_v63 = vadd.f32 %v6967_v5, %v6966_v36  ;;  %v4674_v47 = vadd.f32 %v6885_v50, %v11189_v24  ;;  %v4660_v36 = vadd.f32 %v6879_v41, %v11183_v22 }
 0x4d1   :  { %v6889_v11 = vpop.f32.mrf.mxu0  ;;  %v6975_v7 = vpop.f32.mrf.mxu1  ;;  %v4429_v24 = vadd.f32 %v6817_v26, %v4156_v31  ;;  %v6867_v31 = vadd.f32 %v11233_v23, %v11228_v55  ;;  %v13267_v55 = vld [vmem:[#allocation21_spill] sm:$0xff] }
 0x4d2   :  { %v4681_v15 = vadd.f32 %v6888_v4, %v11196_v14  ;;  %v6965_v14 = vadd.f32 %v6964_v39, %v6963_v1  ;;  %v4646_v1 = vadd.f32 %v6873_v61, %v11177_v44  ;;  %v4869_v39 = vadd.f32 %v6959_v40, %v4660_v36  ;;  %v13274_v61 = vld [vmem:[#allocation29_spill] sm:$0xff] }
 0x4d3   :  { %v6890_v38 = vpop.f32.mrf.mxu0  ;;  %v6976_v5 = vpop.f32.mrf.mxu1  ;;  %v4924_v23 = vmul.f32 %v4876_v18, %v13267_v55  ;;  %v6950_v4 = vadd.f32 %v11224_v6, %v11221_v34  ;;  %v4632_v56 = vadd.f32 %v6867_v31, %v11171_v30 }
 0x4d4   :  { %v6891_v3 = vadd.f32 %v6890_v38, %v6889_v11  ;;  %v4890_v53 = vadd.f32 %v6968_v63, %v4681_v15  ;;  %v4653_v15 = vadd.f32 %v6876_v20, %v11180_v48  ;;  %v6977_v13 = vadd.f32 %v6976_v5, %v6975_v7  ;;  %v13269_v38 = vld [vmem:[#allocation23_spill] sm:$0xff] }
 0x4d5   :  { %v6892_v57 = vpop.f32.mrf.mxu0  ;;  %v6953_v7 = vadd.f32 %v11235_v37, %v11230_v19  ;;  %v4923_v19 = vmul.f32 %v4869_v39, %v13269_v38  ;;  %v11298_v26 = vand.u32 4294901760, %v4924_v23 }
 0x4d6   :  { %v4688_v51 = vadd.f32 %v6891_v3, %v11199_v29  ;;  %v6974_v29 = vadd.f32 %v6973_v59, %v6972_v49  ;;  %v4862_v49 = vadd.f32 %v6956_v21, %v4653_v15  ;;  %v13270_v3 = vld [vmem:[#allocation178_spill] sm:$0xff] }
 0x4d7   :  { %v6893_v58 = vpop.f32.mrf.mxu0  ;;  %v4855_v59 = vadd.f32 %v6953_v7, %v4646_v1  ;;  %v6947_v63 = vadd.f32 %v13271_v42, %v13270_v3  ;;  %v11329_v5 = vsub.f32 %v4924_v23, %v11298_v26 }
 0x4d8   :  { %v4897_v60 = vadd.f32 %v6971_v45, %v4688_v51  ;;  %v6894_v8 = vadd.f32 %v6893_v58, %v6892_v57  ;;  %v4883_v57 = vadd.f32 %v6965_v14, %v4674_v47  ;;  %v13263_v58 = vld [vmem:[#allocation17_spill] sm:$0xff]  ;;  %v4848_v47 = vadd.f32 %v6950_v4, %v4639_v33 }
 0x4d9   :  { %v6895_v25 = vpop.f32.mrf.mxu0  ;;  %v4841_v20 = vadd.f32 %v6947_v63, %v4632_v56  ;;  %v11312_v14 = vand.u32 4294901760, %v4923_v19  ;;  %v11364_v39 = vand.u32 4294901760, %v11329_v5  ;;  %v13280_v56 = vld [vmem:[#allocation41_spill] sm:$0xff] }
 0x4da   :  { %v4695_v32 = vadd.f32 %v6894_v8, %v11206_v43  ;;  %v4927_v51 = vmul.f32 %v4897_v60, %v13263_v58  ;;  %v13264_v43 = vld [vmem:[#allocation19_spill] sm:$0xff]  ;;  %v4925_v27 = vmul.f32 %v4883_v57, %v13266_v28  ;;  %v13272_v60 = vld [vmem:[#allocation24_spill] sm:$0xff]  ;;  %v4920_v9 = vmul.f32 %v4848_v47, %v13274_v61 }
 0x4db   :  { %v6896_v45 = vpop.f32.mrf.mxu0  ;;  %v4926_v12 = vmul.f32 %v4890_v53, %v13264_v43  ;;  %v4922_v8 = vmul.f32 %v4862_v49, %v13272_v60  ;;  %v11344_v62 = vsub.f32 %v4923_v19, %v11312_v14  ;;  %v5210_v47 = vsub.f32 %v11329_v5, %v11364_v39 }
 0x4dc   :  { %v4904_v0 = vadd.f32 %v6974_v29, %v4695_v32  ;;  %v6897_v52 = vadd.f32 %v6896_v45, %v6895_v25  ;;  %v11270_v35 = vand.u32 4294901760, %v4927_v51  ;;  %v11288_v37 = vand.u32 4294901760, %v4925_v27 }
 0x4dd   :  { %v11278_v11 = vand.u32 4294901760, %v4926_v12  ;;  %v4921_v25 = vmul.f32 %v4855_v59, %v13273_v46  ;;  %v11325_v36 = vand.u32 4294901760, %v4922_v8  ;;  %v11378_v4 = vand.u32 4294901760, %v11344_v62  ;;  %v13281_v59 = vld [vmem:[#allocation38_spill] sm:$0xff] }
 0x4de   :  { %v4928_v22 = vmul.f32 %v4904_v0, %v13265_v10  ;;  %v4702_v41 = vadd.f32 %v6897_v52, %v4429_v24  ;;  %v11291_v17 = vsub.f32 %v4927_v51, %v11270_v35  ;;  %v11315_v53 = vsub.f32 %v4925_v27, %v11288_v37  ;;  %v13275_v51 = vld [vmem:[#allocation33_spill] sm:$0xff]  ;;  %v13278_v27 = vld [vmem:[#allocation40_spill] sm:$0xff] }
 0x4df   :  { %v11301_v30 = vsub.f32 %v4926_v12, %v11278_v11  ;;  %v4919_v0 = vmul.f32 %v4841_v20, %v13275_v51  ;;  %v11340_v52 = vand.u32 4294901760, %v4921_v25  ;;  %v13276_v12 = vld [vmem:[#allocation34_spill] sm:$0xff]  ;;  %v11358_v31 = vsub.f32 %v4922_v8, %v11325_v36 }
 0x4e0   :  { %v11272_v48 = vand.u32 4294901760, %v4928_v22  ;;  %v4911_v54 = vadd.f32 %v6977_v13, %v4702_v41  ;;  %v11322_v32 = vand.u32 4294901760, %v11291_v17  ;;  %v11350_v18 = vand.u32 4294901760, %v11315_v53  ;;  %v13277_v13 = vld [vmem:[#allocation182_spill] sm:$0xff] }
 0x4e1   :  { %v11337_v57 = vand.u32 4294901760, %v11301_v30  ;;  %v11354_v41 = vand.u32 4294901760, %v4920_v9  ;;  %v11368_v33 = vand.u32 4294901760, %v4919_v0  ;;  %v11372_v49 = vsub.f32 %v4921_v25, %v11340_v52 }
 0x4e2   :  { %v11281_v44 = vsub.f32 %v4928_v22, %v11272_v48  ;;  %v4929_v16 = vmul.f32 %v4911_v54, %v13268_v2  ;;  %v5189_v15 = vsub.f32 %v11291_v17, %v11322_v32  ;;  %v4918_v22 = vmul.f32 %v13277_v13, %v13276_v12  ;;  %v13279_v54 = vld [vmem:[#allocation180_spill] sm:$0xff] }
 0x4e3   :  { %v5196_v1 = vsub.f32 %v11301_v30, %v11337_v57  ;;  %v4917_v7 = vmul.f32 %v13279_v54, %v13278_v27  ;;  %v4916_v19 = vmul.f32 %v13281_v59, %v13280_v56  ;;  %v11386_v42 = vsub.f32 %v4920_v9, %v11354_v41  ;;  %v13285_v59 = vld [vmem:[#allocation151_spill] sm:$0xff] }
 0x4e4   :  { %v11293_v50 = vand.u32 4294901760, %v4929_v16  ;;  %v11308_v6 = vand.u32 4294901760, %v11281_v44  ;;  %v5190_v23 = vand.u32 4294901760, %v5189_v15  ;;  %v11382_v3 = vand.u32 4294901760, %v4918_v22  ;;  %v13283_v15 = vld [vmem:[#allocation108_spill] sm:$0xff] }
 0x4e5   :  { %v5197_v63 = vand.u32 4294901760, %v5196_v1  ;;  %v11392_v8 = vand.u32 4294901760, %v11358_v31  ;;  %v11394_v20 = vand.u32 4294901760, %v4917_v7  ;;  %v11398_v25 = vsub.f32 %v4919_v0, %v11368_v33 }
 0x4e6   :  { %v11304_v34 = vsub.f32 %v4929_v16, %v11293_v50  ;;  %7506 = vmatprep.subr.mxu0 %v11293_v50  ;;  %v5182_v45 = vsub.f32 %v11281_v44, %v11308_v6  ;;  %v5203_v16 = vsub.f32 %v11315_v53, %v11350_v18  ;;  %v11412_v0 = vsub.f32 %v4918_v22, %v11382_v3 }
 0x4e7   :  { %7507 = vmatpush3.msra.mxu0 %v11293_v50  ;;  %v5211_v1 = vand.u32 4294901760, %v5210_v47  ;;  %v5224_v54 = vsub.f32 %v11358_v31, %v11392_v8  ;;  %v11430_v10 = vand.u32 4294901760, %v11398_v25 }
 0x4e8   :  { %7508 = vmatprep.subr.mxu0 %v11272_v48  ;;  %v11319_v29 = vand.u32 4294901760, %v11304_v34  ;;  %v5183_v21 = vand.u32 4294901760, %v5182_v45  ;;  %v5204_v9 = vand.u32 4294901760, %v5203_v16  ;;  %v11404_v45 = vand.u32 4294901760, %v11372_v49  ;;  %v13284_v16 = vld [vmem:[#allocation48_spill] sm:$0xff] }
 0x4e9   :  { %7509 = vmatpush3.msra.mxu0 %v11272_v48 }
 0x4ea   :  { %7510 = vmatprep.subr.mxu0 %v11270_v35  ;;  %v5175_v24 = vsub.f32 %v11304_v34, %v11319_v29  ;;  %v5231_v47 = vsub.f32 %v11372_v49, %v11404_v45 }
 0x4eb   :  { %7511 = vmatpush3.msra.mxu0 %v11270_v35 }
 0x4ec   :  { %7512 = vmatprep.subr.mxu0 %v11278_v11  ;;  %v5176_v40 = vand.u32 4294901760, %v5175_v24  ;;  %v5217_v24 = vsub.f32 %v11344_v62, %v11378_v4 }
 0x4ed   :  { %7513 = vmatpush3.msra.mxu0 %v11278_v11 }
 0x4ee   :  { %7514 = vmatprep.subr.mxu0 %v11288_v37  ;;  %7562 = vmatprep.subr.mxu1 %v5176_v40  ;;  %v5218_v22 = vand.u32 4294901760, %v5217_v24 }
 0x4ef   :  { %7515 = vmatpush3.msra.mxu0 %v11288_v37  ;;  %7563 = vmatpush3.msra.mxu1 %v5176_v40  ;;  %v13282_v40 = vld [vmem:[#allocation47_spill] sm:$0xff] }
 0x4f0   :  { %7516 = vmatprep.subr.mxu0 %v11298_v26  ;;  %7564 = vmatprep.subr.mxu1 %v5183_v21  ;;  %v4915_v13 = vmul.f32 %v13283_v15, %v13282_v40  ;;  %v4914_v15 = vmul.f32 %v13285_v59, %v13284_v16  ;;  %v11442_v59 = vand.u32 4294901760, %v11412_v0 }
 0x4f1   :  { %7517 = vmatpush3.msra.mxu0 %v11298_v26  ;;  %7565 = vmatpush3.msra.mxu1 %v5183_v21  ;;  %v11408_v21 = vand.u32 4294901760, %v4916_v19 }
 0x4f2   :  { %7518 = vmatprep.subr.mxu0 %v11312_v14  ;;  %7566 = vmatprep.subr.mxu1 %v5190_v23  ;;  %v11432_v2 = vand.u32 4294901760, %v4915_v13  ;;  %v11444_v43 = vand.u32 4294901760, %v4914_v15  ;;  %v5252_v55 = vsub.f32 %v11412_v0, %v11442_v59 }
 0x4f3   :  { %7519 = vmatpush3.msra.mxu0 %v11312_v14  ;;  %7567 = vmatpush3.msra.mxu1 %v5190_v23  ;;  %v11418_v23 = vand.u32 4294901760, %v11386_v42 }
 0x4f4   :  { %7520 = vmatprep.subr.mxu0 %v11325_v36  ;;  %7568 = vmatprep.subr.mxu1 %v5197_v63  ;;  %v11454_v58 = vsub.f32 %v4915_v13, %v11432_v2  ;;  %v11464_v28 = vsub.f32 %v4914_v15, %v11444_v43  ;;  %v5253_v15 = vand.u32 4294901760, %v5252_v55  ;;  %v13286_v55 = vld [vmem:[#allocation59_spill] sm:$0xff] }
 0x4f5   :  { %7521 = vmatpush3.msra.mxu0 %v11325_v36  ;;  %7569 = vmatpush3.msra.mxu1 %v5197_v63  ;;  %v11424_v63 = vsub.f32 %v4917_v7, %v11394_v20  ;;  %v5225_v7 = vand.u32 4294901760, %v5224_v54  ;;  %v5238_v24 = vsub.f32 %v11386_v42, %v11418_v23 }
 0x4f6   :  { %7522 = vmatprep.subr.mxu0 %v11340_v52  ;;  %7570 = vmatprep.subr.mxu1 %v5204_v9 }
 0x4f7   :  { %7523 = vmatpush3.msra.mxu0 %v11340_v52  ;;  %7571 = vmatpush3.msra.mxu1 %v5204_v9  ;;  %v11436_v9 = vsub.f32 %v4916_v19, %v11408_v21  ;;  %v5232_v19 = vand.u32 4294901760, %v5231_v47  ;;  %v11451_v54 = vand.u32 4294901760, %v11424_v63 }
 0x4f8   :  { %7524 = vmatprep.subr.mxu0 %v11354_v41  ;;  %7572 = vmatprep.subr.mxu1 %v5211_v1 }
 0x4f9   :  { %7525 = vmatpush3.msra.mxu0 %v11354_v41  ;;  %7573 = vmatpush3.msra.mxu1 %v5211_v1  ;;  %v5245_v1 = vsub.f32 %v11398_v25, %v11430_v10  ;;  %v11461_v47 = vand.u32 4294901760, %v11436_v9 }
 0x4fa   :  { %7526 = vmatprep.subr.mxu0 %v11368_v33  ;;  %7574 = vmatprep.subr.mxu1 %v5218_v22 }
 0x4fb   :  { %7527 = vmatpush3.msra.mxu0 %v11368_v33  ;;  %7575 = vmatpush3.msra.mxu1 %v5218_v22  ;;  %v5239_v22 = vand.u32 4294901760, %v5238_v24  ;;  %v5246_v13 = vand.u32 4294901760, %v5245_v1  ;;  %v11472_v24 = vand.u32 4294901760, %v11454_v58  ;;  %v11479_v1 = vand.u32 4294901760, %v11464_v28 }
 0x4fc   :  { %7528 = vmatprep.subr.mxu0 %v11382_v3  ;;  %7576 = vmatprep.subr.mxu1 %v5225_v7 }
 0x4fd   :  { %7529 = vmatpush3.msra.mxu0 %v11382_v3  ;;  %7577 = vmatpush3.msra.mxu1 %v5225_v7  ;;  %v5259_v7 = vsub.f32 %v11424_v63, %v11451_v54  ;;  %v5273_v60 = vsub.f32 %v11454_v58, %v11472_v24 }
 0x4fe   :  { %7530 = vmatprep.subr.mxu0 %v11394_v20  ;;  %7578 = vmatprep.subr.mxu1 %v5232_v19 }
 0x4ff   :  { %7531 = vmatpush3.msra.mxu0 %v11394_v20  ;;  %7579 = vmatpush3.msra.mxu1 %v5232_v19  ;;  %v5266_v19 = vsub.f32 %v11436_v9, %v11461_v47 }
 0x500   :  { %7532 = vmatprep.subr.mxu0 %v11408_v21  ;;  %7580 = vmatprep.subr.mxu1 %v5239_v22 }
 0x501   :  { %7533 = vmatpush3.msra.mxu0 %v11408_v21  ;;  %7581 = vmatpush3.msra.mxu1 %v5239_v22  ;;  %v5260_v22 = vand.u32 4294901760, %v5259_v7  ;;  %v5267_v38 = vand.u32 4294901760, %v5266_v19  ;;  %v13287_v7 = vld [vmem:[#allocation66_spill] sm:$0xff] }
 0x502   :  { %7534 = vmatprep.subr.mxu0 %v11432_v2  ;;  %7582 = vmatprep.subr.mxu1 %v5246_v13 }
 0x503   :  { %7535 = vmatpush3.msra.mxu0 %v11432_v2  ;;  %7583 = vmatpush3.msra.mxu1 %v5246_v13  ;;  %v5280_v13 = vsub.f32 %v11464_v28, %v11479_v1 }
 0x504   :  { %7536 = vmatprep.subr.mxu0 %v11444_v43  ;;  %7584 = vmatprep.subr.mxu1 %v5253_v15 }
 0x505   :  { %7537 = vmatpush3.msra.mxu0 %v11444_v43  ;;  %7585 = vmatpush3.msra.mxu1 %v5253_v15  ;;  %v5274_v15 = vand.u32 4294901760, %v5273_v60  ;;  %v5281_v19 = vand.u32 4294901760, %v5280_v13  ;;  %v13293_v60 = vld [vmem:[#allocation37_spill] sm:$0xff]  ;;  %v13298_v13 = vld [vmem:[#allocation91_spill] sm:$0xff] }
 0x506   :  { %7539 = vmatmul.mubr.f32.vlgmr.msra.gmra.mxu0 %v13286_v55  ;;  %7586 = vmatprep.subr.mxu1 %v5260_v22  ;;  %v13288_v55 = vld [vmem:[#allocation69_spill] sm:$0xff] }
 0x507   :  { %7618 = vmatprep.subr.mxu0 %v11304_v34  ;;  %7587 = vmatpush3.msra.mxu1 %v5260_v22  ;;  %v13295_v22 = vld [vmem:[#allocation39_spill] sm:$0xff] }
 0x508   :  { %7619 = vmatpush3.msra.mxu0 %v11304_v34  ;;  %7588 = vmatprep.subr.mxu1 %v5267_v38  ;;  %v13289_v34 = vld [vmem:[#allocation72_spill] sm:$0xff] }
 0x509   :  { %7620 = vmatprep.subr.mxu0 %v11281_v44  ;;  %7541 = vmatprep.mubr.f32.mxu0 %v13287_v7  ;;  %v13299_v7 = vld [vmem:[#allocation50_spill] sm:$0xff] }
 0x50a   :  { %7589 = vmatpush3.msra.mxu1 %v5267_v38  ;;  %7621 = vmatpush3.msra.mxu0 %v11281_v44  ;;  %v13290_v38 = vld [vmem:[#allocation75_spill] sm:$0xff]  ;;  %v13291_v44 = vld [vmem:[#allocation26_spill] sm:$0xff] }
 0x50b   :  { %7542 = vmatmul.mubr.f32.gmra.mxu0 %v13288_v55  ;;  %7590 = vmatprep.subr.mxu1 %v5274_v15  ;;  %v13303_v55 = vld [vmem:[#allocation62_spill] sm:$0xff] }
 0x50c   :  { %7622 = vmatprep.subr.mxu0 %v11291_v17  ;;  %7591 = vmatpush3.msra.mxu1 %v5274_v15  ;;  %v13302_v15 = vld [vmem:[#allocation99_spill] sm:$0xff] }
 0x50d   :  { %7623 = vmatpush3.msra.mxu0 %v11291_v17  ;;  %7592 = vmatprep.subr.mxu1 %v5281_v19  ;;  %v13292_v17 = vld [vmem:[#allocation80_spill] sm:$0xff] }
 0x50e   :  { %7624 = vmatprep.subr.mxu0 %v11301_v30  ;;  %7544 = vmatprep.mubr.f32.mxu0 %v13289_v34  ;;  %v13307_v34 = vld [vmem:[#allocation71_spill] sm:$0xff] }
 0x50f   :  { %7593 = vmatpush3.msra.mxu1 %v5281_v19  ;;  %7625 = vmatpush3.msra.mxu0 %v11301_v30  ;;  %v13294_v30 = vld [vmem:[#allocation83_spill] sm:$0xff]  ;;  %v13306_v19 = vld [vmem:[#allocation104_spill] sm:$0xff] }
 0x510   :  { %7545 = vmatmul.mubr.f32.gmra.mxu0 %v13290_v38  ;;  %7595 = vmatmul.mubr.f32.vlgmr.msra.gmra.mxu1 %v13291_v44  ;;  %v13310_v38 = vld [vmem:[#allocation106_spill] sm:$0xff] }
 0x511   :  { %7626 = vmatprep.subr.mxu0 %v11315_v53  ;;  %7674 = vmatprep.subr.mxu1 %v11293_v50 }
 0x512   :  { %7627 = vmatpush3.msra.mxu0 %v11315_v53  ;;  %7675 = vmatpush3.msra.mxu1 %v11293_v50  ;;  %v13296_v53 = vld [vmem:[#allocation88_spill] sm:$0xff] }
 0x513   :  { %7628 = vmatprep.subr.mxu0 %v11329_v5  ;;  %7676 = vmatprep.subr.mxu1 %v11272_v48 }
 0x514   :  { %7547 = vmatprep.mubr.f32.mxu0 %v13292_v17  ;;  %7597 = vmatprep.mubr.f32.mxu1 %v13293_v60  ;;  %v13311_v17 = vld [vmem:[#allocation79_spill] sm:$0xff] }
 0x515   :  { %7629 = vmatpush3.msra.mxu0 %v11329_v5  ;;  %7677 = vmatpush3.msra.mxu1 %v11272_v48  ;;  %v13297_v5 = vld [vmem:[#allocation46_spill] sm:$0xff] }
 0x516   :  { %7548 = vmatmul.mubr.f32.gmra.mxu0 %v13294_v30  ;;  %7598 = vmatmul.mubr.f32.gmra.mxu1 %v13295_v22  ;;  %v13314_v30 = vld [vmem:[#allocation87_spill] sm:$0xff] }
 0x517   :  { %7630 = vmatprep.subr.mxu0 %v11344_v62  ;;  %7678 = vmatprep.subr.mxu1 %v11270_v35 }
 0x518   :  { %7631 = vmatpush3.msra.mxu0 %v11344_v62  ;;  %7679 = vmatpush3.msra.mxu1 %v11270_v35  ;;  %v13300_v62 = vld [vmem:[#allocation96_spill] sm:$0xff] }
 0x519   :  { %7632 = vmatprep.subr.mxu0 %v11358_v31  ;;  %7680 = vmatprep.subr.mxu1 %v11278_v11 }
 0x51a   :  { %7550 = vmatprep.mubr.f32.mxu0 %v13296_v53  ;;  %7600 = vmatprep.mubr.f32.mxu1 %v13297_v5  ;;  %v13315_v53 = vld [vmem:[#allocation31_spill] sm:$0xff] }
 0x51b   :  { %7633 = vmatpush3.msra.mxu0 %v11358_v31  ;;  %7681 = vmatpush3.msra.mxu1 %v11278_v11  ;;  %v13301_v31 = vld [vmem:[#allocation58_spill] sm:$0xff] }
 0x51c   :  { %7551 = vmatmul.mubr.f32.gmra.mxu0 %v13298_v13  ;;  %7601 = vmatmul.mubr.f32.gmra.mxu1 %v13299_v7  ;;  %v13318_v13 = vld [vmem:[#allocation95_spill] sm:$0xff] }
 0x51d   :  { %7634 = vmatprep.subr.mxu0 %v11372_v49  ;;  %7682 = vmatprep.subr.mxu1 %v11288_v37 }
 0x51e   :  { %7635 = vmatpush3.msra.mxu0 %v11372_v49  ;;  %7683 = vmatpush3.msra.mxu1 %v11288_v37  ;;  %v13304_v49 = vld [vmem:[#allocation102_spill] sm:$0xff] }
 0x51f   :  { %7636 = vmatprep.subr.mxu0 %v11386_v42  ;;  %7684 = vmatprep.subr.mxu1 %v11298_v26 }
 0x520   :  { %7553 = vmatprep.mubr.f32.mxu0 %v13300_v62  ;;  %7603 = vmatprep.mubr.f32.mxu1 %v13301_v31  ;;  %v13319_v62 = vld [vmem:[#allocation45_spill] sm:$0xff] }
 0x521   :  { %7637 = vmatpush3.msra.mxu0 %v11386_v42  ;;  %7685 = vmatpush3.msra.mxu1 %v11298_v26  ;;  %v13305_v42 = vld [vmem:[#allocation68_spill] sm:$0xff] }
 0x522   :  { %7554 = vmatmul.mubr.f32.gmra.mxu0 %v13302_v15  ;;  %7604 = vmatmul.mubr.f32.gmra.mxu1 %v13303_v55  ;;  %v13322_v15 = vld [vmem:[#allocation57_spill] sm:$0xff] }
 0x523   :  { %7638 = vmatprep.subr.mxu0 %v11398_v25  ;;  %7686 = vmatprep.subr.mxu1 %v11312_v14 }
 0x524   :  { %7639 = vmatpush3.msra.mxu0 %v11398_v25  ;;  %7687 = vmatpush3.msra.mxu1 %v11312_v14  ;;  %v13308_v25 = vld [vmem:[#allocation105_spill] sm:$0xff] }
 0x525   :  { %7640 = vmatprep.subr.mxu0 %v11412_v0  ;;  %7688 = vmatprep.subr.mxu1 %v11325_v36 }
 0x526   :  { %7556 = vmatprep.mubr.f32.mxu0 %v13304_v49  ;;  %7606 = vmatprep.mubr.f32.mxu1 %v13305_v42  ;;  %v13323_v49 = vld [vmem:[#allocation36_spill] sm:$0xff] }
 0x527   :  { %7641 = vmatpush3.msra.mxu0 %v11412_v0  ;;  %7689 = vmatpush3.msra.mxu1 %v11325_v36  ;;  %v13309_v0 = vld [vmem:[#allocation77_spill] sm:$0xff] }
 0x528   :  { %7557 = vmatmul.mubr.f32.gmra.mxu0 %v13306_v19  ;;  %7607 = vmatmul.mubr.f32.gmra.mxu1 %v13307_v34  ;;  %v13325_v19 = vld [vmem:[#allocation53_spill] sm:$0xff] }
 0x529   :  { %7642 = vmatprep.subr.mxu0 %v11424_v63  ;;  %7690 = vmatprep.subr.mxu1 %v11340_v52 }
 0x52a   :  { %7643 = vmatpush3.msra.mxu0 %v11424_v63  ;;  %7691 = vmatpush3.msra.mxu1 %v11340_v52  ;;  %v13312_v63 = vld [vmem:[#allocation85_spill] sm:$0xff] }
 0x52b   :  { %7644 = vmatprep.subr.mxu0 %v11436_v9  ;;  %7692 = vmatprep.subr.mxu1 %v11354_v41 }
 0x52c   :  { %7559 = vmatprep.mubr.f32.mxu0 %v13308_v25  ;;  %7609 = vmatprep.mubr.f32.mxu1 %v13309_v0  ;;  %v13327_v25 = vld [vmem:[#allocation56_spill] sm:$0xff] }
 0x52d   :  { %7645 = vmatpush3.msra.mxu0 %v11436_v9  ;;  %7693 = vmatpush3.msra.mxu1 %v11354_v41  ;;  %v13313_v9 = vld [vmem:[#allocation13_spill] sm:$0xff] }
 0x52e   :  { %7560 = vmatmul.mubr.f32.gmra.mxu0 %v13310_v38  ;;  %7610 = vmatmul.mubr.f32.gmra.mxu1 %v13311_v17 }
 0x52f   :  { %7646 = vmatprep.subr.mxu0 %v11454_v58  ;;  %7694 = vmatprep.subr.mxu1 %v11368_v33 }
 0x530   :  { %7647 = vmatpush3.msra.mxu0 %v11454_v58  ;;  %7695 = vmatpush3.msra.mxu1 %v11368_v33  ;;  %v13316_v58 = vld [vmem:[#allocation93_spill] sm:$0xff] }
 0x531   :  { %7648 = vmatprep.subr.mxu0 %v11464_v28  ;;  %7696 = vmatprep.subr.mxu1 %v11382_v3 }
 0x532   :  { %7612 = vmatprep.mubr.f32.mxu1 %v13312_v63  ;;  %7649 = vmatpush3.msra.mxu0 %v11464_v28  ;;  %v13317_v28 = vld [vmem:[#allocation43_spill] sm:$0xff] }
 0x533   :  { %7650 = vmatprep.mubr.f32.mxu0 %v13313_v9  ;;  %7697 = vmatpush3.msra.mxu1 %v11382_v3 }
 0x534   :  { %7613 = vmatmul.mubr.f32.gmra.mxu1 %v13314_v30  ;;  %7651 = vmatmul.mubr.f32.vlgmr.msra.gmra.mxu0 %v13315_v53 }
 0x535   :  { %7698 = vmatprep.subr.mxu1 %v11394_v20  ;;  %7730 = vmatprep.subr.mxu0 %v11319_v29 }
 0x536   :  { %7699 = vmatpush3.msra.mxu1 %v11394_v20  ;;  %7731 = vmatpush3.msra.mxu0 %v11319_v29  ;;  %v13320_v29 = vld [vmem:[#allocation55_spill] sm:$0xff] }
 0x537   :  { %7700 = vmatprep.subr.mxu1 %v11408_v21  ;;  %7732 = vmatprep.subr.mxu0 %v11308_v6 }
 0x538   :  { %7615 = vmatprep.mubr.f32.mxu1 %v13316_v58  ;;  %7653 = vmatprep.mubr.f32.mxu0 %v13317_v28 }
 0x539   :  { %7701 = vmatpush3.msra.mxu1 %v11408_v21  ;;  %7733 = vmatpush3.msra.mxu0 %v11308_v6  ;;  %v13321_v6 = vld [vmem:[#allocation14_spill] sm:$0xff] }
 0x53a   :  { %7616 = vmatmul.mubr.f32.gmra.mxu1 %v13318_v13  ;;  %7654 = vmatmul.mubr.f32.gmra.mxu0 %v13319_v62 }
 0x53b   :  { %7702 = vmatprep.subr.mxu1 %v11432_v2  ;;  %7734 = vmatprep.subr.mxu0 %v11322_v32 }
 0x53c   :  { %7703 = vmatpush3.msra.mxu1 %v11432_v2  ;;  %7735 = vmatpush3.msra.mxu0 %v11322_v32  ;;  %v13324_v32 = vld [vmem:[#allocation65_spill] sm:$0xff] }
 0x53d   :  { %7704 = vmatprep.subr.mxu1 %v11444_v43  ;;  %7736 = vmatprep.subr.mxu0 %v11337_v57 }
 0x53e   :  { %7656 = vmatprep.mubr.f32.mxu0 %v13320_v29  ;;  %7705 = vmatpush3.msra.mxu1 %v11444_v43 }
 0x53f   :  { %7706 = vmatprep.mubr.f32.mxu1 %v13321_v6  ;;  %7737 = vmatpush3.msra.mxu0 %v11337_v57  ;;  %v13326_v57 = vld [vmem:[#allocation67_spill] sm:$0xff] }
 0x540   :  { %7657 = vmatmul.mubr.f32.gmra.mxu0 %v13322_v15  ;;  %7707 = vmatmul.mubr.f32.vlgmr.msra.gmra.mxu1 %v13323_v49 }
 0x541   :  { %7738 = vmatprep.subr.mxu0 %v11350_v18  ;;  %7786 = vmatprep.subr.mxu1 %v11293_v50 }
 0x542   :  { %7739 = vmatpush3.msra.mxu0 %v11350_v18  ;;  %7787 = vmatpush3.msra.mxu1 %v11293_v50  ;;  %v13328_v50 = vld [vmem:[#allocation74_spill] sm:$0xff]  ;;  %v13329_v18 = vld [vmem:[#allocation61_spill] sm:$0xff] }
 0x543   :  { %7740 = vmatprep.subr.mxu0 %v11364_v39  ;;  %7788 = vmatprep.subr.mxu1 %v11272_v48 }
 0x544   :  { %7659 = vmatprep.mubr.f32.mxu0 %v13324_v32  ;;  %7709 = vmatprep.mubr.f32.mxu1 %v13325_v19 }
 0x545   :  { %7741 = vmatpush3.msra.mxu0 %v11364_v39  ;;  %7789 = vmatpush3.msra.mxu1 %v11272_v48  ;;  %v13330_v48 = vld [vmem:[#allocation76_spill] sm:$0xff] }
 0x546   :  { %7660 = vmatmul.mubr.f32.gmra.mxu0 %v13326_v57  ;;  %7710 = vmatmul.mubr.f32.gmra.mxu1 %v13327_v25  ;;  %v13331_v39 = vld [vmem:[#allocation64_spill] sm:$0xff] }
 0x547   :  { %7742 = vmatprep.subr.mxu0 %v11378_v4  ;;  %7790 = vmatprep.subr.mxu1 %v11270_v35 }
 0x548   :  { %7743 = vmatpush3.msra.mxu0 %v11378_v4  ;;  %7791 = vmatpush3.msra.mxu1 %v11270_v35  ;;  %v13332_v35 = vld [vmem:[#allocation82_spill] sm:$0xff] }
 0x549   :  { %7744 = vmatprep.subr.mxu0 %v11392_v8  ;;  %7792 = vmatprep.subr.mxu1 %v11278_v11  ;;  %v13333_v4 = vld [vmem:[#allocation70_spill] sm:$0xff] }
 0x54a   :  { %7662 = vmatprep.mubr.f32.mxu0 %v13328_v50  ;;  %7712 = vmatprep.mubr.f32.mxu1 %v13329_v18 }
 0x54b   :  { %7745 = vmatpush3.msra.mxu0 %v11392_v8  ;;  %7793 = vmatpush3.msra.mxu1 %v11278_v11  ;;  %v13334_v11 = vld [vmem:[#allocation84_spill] sm:$0xff]  ;;  %v13335_v8 = vld [vmem:[#allocation73_spill] sm:$0xff] }
 0x54c   :  { %7663 = vmatmul.mubr.f32.gmra.mxu0 %v13330_v48  ;;  %7713 = vmatmul.mubr.f32.gmra.mxu1 %v13331_v39 }
 0x54d   :  { %7746 = vmatprep.subr.mxu0 %v11404_v45  ;;  %7794 = vmatprep.subr.mxu1 %v11288_v37 }
 0x54e   :  { %7747 = vmatpush3.msra.mxu0 %v11404_v45  ;;  %7795 = vmatpush3.msra.mxu1 %v11288_v37  ;;  %v13336_v37 = vld [vmem:[#allocation90_spill] sm:$0xff] }
 0x54f   :  { %7748 = vmatprep.subr.mxu0 %v11418_v23  ;;  %7796 = vmatprep.subr.mxu1 %v11298_v26  ;;  %v13337_v45 = vld [vmem:[#allocation78_spill] sm:$0xff] }
 0x550   :  { %7665 = vmatprep.mubr.f32.mxu0 %v13332_v35  ;;  %7715 = vmatprep.mubr.f32.mxu1 %v13333_v4 }
 0x551   :  { %7749 = vmatpush3.msra.mxu0 %v11418_v23  ;;  %7797 = vmatpush3.msra.mxu1 %v11298_v26  ;;  %v13338_v26 = vld [vmem:[#allocation92_spill] sm:$0xff]  ;;  %v13339_v23 = vld [vmem:[#allocation81_spill] sm:$0xff] }
 0x552   :  { %7666 = vmatmul.mubr.f32.gmra.mxu0 %v13334_v11  ;;  %7716 = vmatmul.mubr.f32.gmra.mxu1 %v13335_v8 }
 0x553   :  { %7750 = vmatprep.subr.mxu0 %v11430_v10  ;;  %7798 = vmatprep.subr.mxu1 %v11312_v14 }
 0x554   :  { %7751 = vmatpush3.msra.mxu0 %v11430_v10  ;;  %7799 = vmatpush3.msra.mxu1 %v11312_v14  ;;  %v13340_v10 = vld [vmem:[#allocation98_spill] sm:$0xff] }
 0x555   :  { %7752 = vmatprep.subr.mxu0 %v11442_v59  ;;  %7800 = vmatprep.subr.mxu1 %v11325_v36  ;;  %v13341_v14 = vld [vmem:[#allocation86_spill] sm:$0xff] }
 0x556   :  { %7668 = vmatprep.mubr.f32.mxu0 %v13336_v37  ;;  %7718 = vmatprep.mubr.f32.mxu1 %v13337_v45 }
 0x557   :  { %7753 = vmatpush3.msra.mxu0 %v11442_v59  ;;  %7801 = vmatpush3.msra.mxu1 %v11325_v36  ;;  %v13342_v36 = vld [vmem:[#allocation100_spill] sm:$0xff]  ;;  %v13343_v59 = vld [vmem:[#allocation89_spill] sm:$0xff] }
 0x558   :  { %7669 = vmatmul.mubr.f32.gmra.mxu0 %v13338_v26  ;;  %7719 = vmatmul.mubr.f32.gmra.mxu1 %v13339_v23 }
 0x559   :  { %7754 = vmatprep.subr.mxu0 %v11451_v54  ;;  %7802 = vmatprep.subr.mxu1 %v11340_v52 }
 0x55a   :  { %7755 = vmatpush3.msra.mxu0 %v11451_v54  ;;  %7803 = vmatpush3.msra.mxu1 %v11340_v52  ;;  %v13344_v52 = vld [vmem:[#allocation94_spill] sm:$0xff]  ;;  %v13346_v54 = vld [vmem:[#allocation97_spill] sm:$0xff] }
 0x55b   :  { %7756 = vmatprep.subr.mxu0 %v11461_v47  ;;  %7804 = vmatprep.subr.mxu1 %v11354_v41 }
 0x55c   :  { %7671 = vmatprep.mubr.f32.mxu0 %v13340_v10  ;;  %7721 = vmatprep.mubr.f32.mxu1 %v13341_v14 }
 0x55d   :  { %7757 = vmatpush3.msra.mxu0 %v11461_v47  ;;  %7805 = vmatpush3.msra.mxu1 %v11354_v41  ;;  %v13345_v41 = vld [vmem:[#allocation12_spill] sm:$0xff]  ;;  %v13347_v47 = vld [vmem:[#allocation101_spill] sm:$0xff] }
 0x55e   :  { %7672 = vmatmul.mubr.f32.gmra.mxu0 %v13342_v36  ;;  %7722 = vmatmul.mubr.f32.gmra.mxu1 %v13343_v59 }
 0x55f   :  { %7758 = vmatprep.subr.mxu0 %v11472_v24  ;;  %7806 = vmatprep.subr.mxu1 %v11368_v33 }
 0x560   :  { %7759 = vmatpush3.msra.mxu0 %v11472_v24  ;;  %7807 = vmatpush3.msra.mxu1 %v11368_v33  ;;  %v13348_v33 = vld [vmem:[#allocation103_spill] sm:$0xff] }
 0x561   :  { %7760 = vmatprep.subr.mxu0 %v11479_v1  ;;  %7808 = vmatprep.subr.mxu1 %v11382_v3 }
 0x562   :  { %7724 = vmatprep.mubr.f32.mxu1 %v13344_v52  ;;  %7761 = vmatpush3.msra.mxu0 %v11479_v1 }
 0x563   :  { %7762 = vmatprep.mubr.f32.mxu0 %v13345_v41  ;;  %7809 = vmatpush3.msra.mxu1 %v11382_v3 }
 0x564   :  { %7725 = vmatmul.mubr.f32.gmra.mxu1 %v13346_v54  ;;  %7763 = vmatmul.mubr.f32.vlgmr.msra.gmra.mxu0 %v13291_v44 }
 0x565   :  { %7810 = vmatprep.subr.mxu1 %v11394_v20  ;;  %7727 = vmatprep.mubr.f32.mxu1 %v13347_v47 }
 0x566   :  { %7811 = vmatpush3.msra.mxu1 %v11394_v20  ;;  %7765 = vmatprep.mubr.f32.mxu0 %v13293_v60 }
 0x567   :  { %7812 = vmatprep.subr.mxu1 %v11408_v21 }
 0x568   :  { %7813 = vmatpush3.msra.mxu1 %v11408_v21  ;;  %7766 = vmatmul.mubr.f32.gmra.mxu0 %v13295_v22 }
 0x569   :  { %7728 = vmatmul.mubr.f32.gmra.mxu1 %v13348_v33  ;;  %7814 = vmatprep.subr.mxu1 %v11432_v2 }
 0x56a   :  { %7815 = vmatpush3.msra.mxu1 %v11432_v2  ;;  %7768 = vmatprep.mubr.f32.mxu0 %v13297_v5 }
 0x56b   :  { %7816 = vmatprep.subr.mxu1 %v11444_v43  ;;  %7818 = vmatprep.mubr.f32.mxu1 %v13345_v41 }
 0x56c   :  { %7817 = vmatpush3.msra.mxu1 %v11444_v43  ;;  %7769 = vmatmul.mubr.f32.gmra.mxu0 %v13299_v7 }
 0x56d   :  { %7819 = vmatmul.mubr.f32.vlgmr.msra.gmra.mxu1 %v13291_v44  ;;  %7771 = vmatprep.mubr.f32.mxu0 %v13301_v31 }
 0x56e   :  { %7821 = vmatprep.mubr.f32.mxu1 %v13293_v60 }
 0x570   :  { %7772 = vmatmul.mubr.f32.gmra.mxu0 %v13303_v55 }
 0x571   :  { %7822 = vmatmul.mubr.f32.gmra.mxu1 %v13295_v22  ;;  %7774 = vmatprep.mubr.f32.mxu0 %v13305_v42 }
 0x572   :  { %7824 = vmatprep.mubr.f32.mxu1 %v13297_v5 }
 0x574   :  { %7775 = vmatmul.mubr.f32.gmra.mxu0 %v13307_v34 }
 0x575   :  { %7825 = vmatmul.mubr.f32.gmra.mxu1 %v13299_v7  ;;  %7777 = vmatprep.mubr.f32.mxu0 %v13309_v0 }
 0x576   :  { %7827 = vmatprep.mubr.f32.mxu1 %v13301_v31 }
 0x578   :  { %7778 = vmatmul.mubr.f32.gmra.mxu0 %v13311_v17 }
 0x579   :  { %7828 = vmatmul.mubr.f32.gmra.mxu1 %v13303_v55  ;;  %7780 = vmatprep.mubr.f32.mxu0 %v13312_v63 }
 0x57a   :  { %7830 = vmatprep.mubr.f32.mxu1 %v13305_v42 }
 0x57c   :  { %7781 = vmatmul.mubr.f32.gmra.mxu0 %v13314_v30 }
 0x57d   :  { %7831 = vmatmul.mubr.f32.gmra.mxu1 %v13307_v34  ;;  %7783 = vmatprep.mubr.f32.mxu0 %v13316_v58 }
 0x57e   :  { %7833 = vmatprep.mubr.f32.mxu1 %v13309_v0 }
 0x580   :  { %7784 = vmatmul.mubr.f32.gmra.mxu0 %v13318_v13 }
 0x581   :  { %7834 = vmatmul.mubr.f32.gmra.mxu1 %v13311_v17 }
 0x582   :  { %7836 = vmatprep.mubr.f32.mxu1 %v13312_v63 }
 0x585   :  { %7837 = vmatmul.mubr.f32.gmra.mxu1 %v13314_v30 }
 0x586   :  { %7839 = vmatprep.mubr.f32.mxu1 %v13316_v58 }
 0x589   :  { %7840 = vmatmul.mubr.f32.gmra.mxu1 %v13318_v13 }
 0x5c6   :  { %v7540_v43 = vpop.f32.mrf.mxu0 }
 0x5c8   :  { %v11709_v2 = vpop.f32.mrf.mxu0 }
 0x5cb   :  { %v11711_v3 = vpop.f32.mrf.mxu0 }
 0x5cd   :  { %v11713_v20 = vpop.f32.mrf.mxu0 }
 0x5d0   :  { %v11715_v21 = vpop.f32.mrf.mxu0  ;;  %v7596_v24 = vpop.f32.mrf.mxu1 }
 0x5d1   :  { %v5325_v61 = vadd.f32 %v7596_v24, %v7540_v43 }
 0x5d2   :  { %v11717_v1 = vpop.f32.mrf.mxu0  ;;  %v5318_v44 = vpop.f32.mrf.mxu1 }
 0x5d6   :  { %v11719_v60 = vpop.f32.mrf.mxu0  ;;  %v7599_v22 = vpop.f32.mrf.mxu1 }
 0x5d8   :  { %v11721_v5 = vpop.f32.mrf.mxu0  ;;  %v11723_v7 = vpop.f32.mrf.mxu1 }
 0x5dc   :  { %v11725_v31 = vpop.f32.mrf.mxu0  ;;  %v11727_v55 = vpop.f32.mrf.mxu1 }
 0x5de   :  { %v11729_v42 = vpop.f32.mrf.mxu0  ;;  %v11731_v34 = vpop.f32.mrf.mxu1 }
 0x5e2   :  { %v11733_v0 = vpop.f32.mrf.mxu0  ;;  %v11735_v38 = vpop.f32.mrf.mxu1 }
 0x5e4   :  { %v11737_v17 = vpop.f32.mrf.mxu0  ;;  %v11739_v63 = vpop.f32.mrf.mxu1 }
 0x5e8   :  { %v11741_v9 = vpop.f32.mrf.mxu0  ;;  %v11743_v30 = vpop.f32.mrf.mxu1 }
 0x5e9   :  { %13349 = vst [vmem:[#allocation183_spill] sm:$0xff] %v11741_v9 }
 0x5ea   :  { %v11745_v53 = vpop.f32.mrf.mxu0  ;;  %v11747_v58 = vpop.f32.mrf.mxu1 }
 0x5eb   :  { %13350 = vst [vmem:[#allocation185_spill] sm:$0xff] %v11745_v53 }
 0x5ee   :  { %v11749_v28 = vpop.f32.mrf.mxu0  ;;  %v11751_v13 = vpop.f32.mrf.mxu1 }
 0x5ef   :  { %13351 = vst [vmem:[#allocation187_spill] sm:$0xff] %v11749_v28 }
 0x5f0   :  { %v11753_v62 = vpop.f32.mrf.mxu0  ;;  %v11755_v29 = vpop.f32.mrf.mxu1 }
 0x5f1   :  { %13352 = vst [vmem:[#allocation188_spill] sm:$0xff] %v11753_v62 }
 0x5f4   :  { %v11757_v6 = vpop.f32.mrf.mxu1  ;;  %v7652_v15 = vpop.f32.mrf.mxu0 }
 0x5f5   :  { %13353 = vst [vmem:[#allocation117_spill] sm:$0xff] %v11757_v6  ;;  %v5319_v6 = vadd.f32 %v5318_v44, %v11709_v2 }
 0x5f6   :  { %v11759_v49 = vpop.f32.mrf.mxu1  ;;  %v5512_v32 = vpop.f32.mrf.mxu0 }
 0x5f7   :  { %13354 = vst [vmem:[#allocation131_spill] sm:$0xff] %v11759_v49 }
 0x5fa   :  { %v11761_v19 = vpop.f32.mrf.mxu1  ;;  %v7655_v57 = vpop.f32.mrf.mxu0 }
 0x5fb   :  { %13355 = vst [vmem:[#allocation141_spill] sm:$0xff] %v11761_v19 }
 0x5fc   :  { %v11763_v25 = vpop.f32.mrf.mxu1  ;;  %v5526_v50 = vpop.f32.mrf.mxu0 }
 0x5fd   :  { %13356 = vst [vmem:[#allocation113_spill] sm:$0xff] %v11763_v25 }
 0x600   :  { %v7658_v18 = vpop.f32.mrf.mxu0  ;;  %v7708_v48 = vpop.f32.mrf.mxu1 }
 0x602   :  { %v5540_v39 = vpop.f32.mrf.mxu0  ;;  %v5706_v35 = vpop.f32.mrf.mxu1 }
 0x606   :  { %v11765_v4 = vpop.f32.mrf.mxu0  ;;  %v7711_v11 = vpop.f32.mrf.mxu1 }
 0x608   :  { %v11767_v8 = vpop.f32.mrf.mxu0  ;;  %v5722_v37 = vpop.f32.mrf.mxu1 }
 0x60c   :  { %v11769_v45 = vpop.f32.mrf.mxu0  ;;  %v7714_v26 = vpop.f32.mrf.mxu1 }
 0x60e   :  { %v11771_v23 = vpop.f32.mrf.mxu0  ;;  %v5738_v10 = vpop.f32.mrf.mxu1 }
 0x612   :  { %v11773_v14 = vpop.f32.mrf.mxu0  ;;  %v11775_v36 = vpop.f32.mrf.mxu1 }
 0x613   :  { %13357 = vst [vmem:[#allocation116_spill] sm:$0xff] %v11773_v14 }
 0x614   :  { %v11777_v59 = vpop.f32.mrf.mxu0  ;;  %v11779_v52 = vpop.f32.mrf.mxu1 }
 0x615   :  { %13358 = vst [vmem:[#allocation118_spill] sm:$0xff] %v11777_v59 }
 0x618   :  { %v11781_v41 = vpop.f32.mrf.mxu0  ;;  %v11783_v54 = vpop.f32.mrf.mxu1 }
 0x619   :  { %13359 = vst [vmem:[#allocation122_spill] sm:$0xff] %v11781_v41 }
 0x61a   :  { %v11785_v47 = vpop.f32.mrf.mxu0  ;;  %v11787_v33 = vpop.f32.mrf.mxu1 }
 0x61b   :  { %13360 = vst [vmem:[#allocation129_spill] sm:$0xff] %v11785_v47  ;;  %13361 = vst [vmem:[#allocation30_spill] sm:$0xff] %v11787_v33  ;;  %v5520_v47 = vadd.f32 %v7652_v15, %v5325_v61  ;;  %v5349_v61 = vadd.f32 %v11727_v55, %v11715_v21 }
 0x61d   :  { %v5715_v33 = vadd.f32 %v7708_v48, %v5520_v47 }
 0x61e   :  { %v11789_v25 = vpop.f32.mrf.mxu0  ;;  %v11791_v62 = vpop.f32.mrf.mxu1 }
 0x61f   :  { %13362 = vst [vmem:[#allocation127_spill] sm:$0xff] %v11789_v25  ;;  %13363 = vst [vmem:[#allocation128_spill] sm:$0xff] %v11791_v62  ;;  %v5337_v25 = vadd.f32 %v7599_v22, %v11711_v3  ;;  %v5513_v62 = vadd.f32 %v5512_v32, %v5319_v6  ;;  %v5343_v6 = vadd.f32 %v11731_v34, %v11717_v1 }
 0x620   :  { %v11793_v19 = vpop.f32.mrf.mxu0  ;;  %v11795_v28 = vpop.f32.mrf.mxu1  ;;  %v5548_v32 = vadd.f32 %v7658_v18, %v5349_v61 }
 0x621   :  { %13364 = vst [vmem:[#allocation140_spill] sm:$0xff] %v11793_v19  ;;  %13365 = vst [vmem:[#allocation166_spill] sm:$0xff] %v11795_v28  ;;  %v5534_v43 = vadd.f32 %v7655_v57, %v5337_v25  ;;  %v5707_v24 = vadd.f32 %v5706_v35, %v5513_v62  ;;  %v5361_v57 = vadd.f32 %v11735_v38, %v11719_v60 }
 0x622   :  { %v5541_v25 = vadd.f32 %v5540_v39, %v5343_v6 }
 0x623   :  { %v5731_v15 = vadd.f32 %v7711_v11, %v5534_v43 }
 0x624   :  { %v11797_v49 = vpop.f32.mrf.mxu1  ;;  %v7764_v53 = vpop.f32.mrf.mxu0 }
 0x625   :  { %13366 = vst [vmem:[#allocation32_spill] sm:$0xff] %v11797_v49  ;;  %v5331_v49 = vadd.f32 %v11723_v7, %v11713_v20  ;;  %v11816_v20 = vld [vmem:[%s11902_s6] ss:$0 sm:$0xff]  ;;  %s7949_s6 = smov [#allocation8]  }
 0x626   :  { %v11799_v59 = vpop.f32.mrf.mxu1  ;;  %v5945_v41 = vpop.f32.mrf.mxu0  ;;  %s6292_s10 = sshll.u32 %s7949_s6, 4  ;;  %s6293_s10 = int_to_ptr.vmem [resolvable:$true] %s6292_s10 }
 0x627   :  { %13367 = vst [vmem:[#allocation154_spill] sm:$0xff] %v11799_v59  ;;  %v5952_v59 = vadd.f32 %v7764_v53, %v5715_v33  ;;  %v5527_v44 = vadd.f32 %v5526_v50, %v5331_v49  ;;  %v5747_v50 = vadd.f32 %v7714_v26, %v5548_v32  ;;  %s7914_s13 = scalar_lea.vmem %s6293_s10, 2048  ;;  %p7919_p2 = scmp.lt.s32.totalorder %s6293_s10, %s6293_s10 }
 0x628   :  { %v7767_v9 = vpop.f32.mrf.mxu0  ;;  %p7915_p1 = scmp.ne.s32.totalorder %s6293_s10, %s7914_s13  ;;  %p7920_p3 = scmp.lt.s32.totalorder %s7914_s13, %s7914_s13 }
 0x629   :  { %v11802_v46 = vpop.f32.mrf.mxu1  ;;  %v5723_v53 = vadd.f32 %v5722_v37, %v5527_v44  ;;  %v5964_v62 = vadd.f32 %v7767_v9, %v5731_v15  ;;  %v5355_v9 = vadd.f32 %v11739_v63, %v11721_v5 }
 0x62a   :  { %13368 = vst [vmem:[#allocation60_spill] sm:$0xff] %v11802_v46  ;;  %v5957_v19 = vpop.f32.mrf.mxu0  ;;  %v5946_v46 = vadd.f32 %v5945_v41, %v5707_v24  ;;  %p7921_p4 = por %p7920_p3, %p7919_p2 }
 0x62b   :  { %v11805_v14 = vpop.f32.mrf.mxu1  ;;  %v5958_v1 = vadd.f32 %v5957_v19, %v5723_v53  ;;  %v5555_v26 = vadd.f32 %v11767_v8, %v5355_v9  ;;  %v13369_v53 = vld [vmem:[#allocation116_spill] sm:$0xff] }
 0x62c   :  { %v7770_v28 = vpop.f32.mrf.mxu0  ;;  %p7922_p5 = pnand %p7921_p4, %p7915_p1 }
 0x62d   :  { %v7820_v2 = vpop.f32.mrf.mxu1  ;;  %v5976_v37 = vadd.f32 %v7770_v28, %v5747_v50 }
 0x62e   :  { %v6129_v3 = vadd.f32 %v7820_v2, %v5952_v59  ;;  %v5969_v22 = vpop.f32.mrf.mxu0 }
 0x62f   :  { %v6122_v7 = vpop.f32.mrf.mxu1 }
 0x630   :  { %v6217_v21 = vmul.f32 %v6129_v3, %v13282_v40  ;;  %v6123_v55 = vadd.f32 %v6122_v7, %v5946_v46  ;;  %v7773_v49 = vpop.f32.mrf.mxu0  ;;  %v5562_v40 = vadd.f32 %v11765_v4, %v5361_v57  ;;  %v5739_v46 = vadd.f32 %v5738_v10, %v5541_v25 }
 0x631   :  { %v7823_v48 = vpop.f32.mrf.mxu1 }
 0x632   :  { %v6240_v34 = vadd.f32 %v11816_v20, %v6217_v21  ;;  %v6216_v18 = vmul.f32 %v6123_v55, %v13284_v16  ;;  %v6141_v35 = vadd.f32 %v7823_v48, %v5964_v62  ;;  %v5981_v11 = vpop.f32.mrf.mxu0  ;;  %v5373_v16 = vadd.f32 %v11743_v30, %v11725_v31  ;;  %v13373_v48 = vld [vmem:[#allocation117_spill] sm:$0xff] }
 0x633   :  { %v6134_v59 = vpop.f32.mrf.mxu1  ;;  %v5763_v47 = vadd.f32 %v11775_v36, %v5562_v40  ;;  %v5970_v5 = vadd.f32 %v5969_v22, %v5739_v46  ;;  %v5755_v31 = vadd.f32 %v11779_v52, %v5555_v26  ;;  %v13376_v46 = vld [vmem:[#allocation29_spill] sm:$0xff]  ;;  %v13380_v26 = vld [vmem:[#allocation166_spill] sm:$0xff] }
 0x634   :  { %v6256_v41 = vmax.f32 %v6240_v34, 0.0  ;;  %v6239_v60 = vadd.f32 %v11816_v20, %v6216_v18  ;;  %v6219_v38 = vmul.f32 %v6141_v35, %v13278_v27  ;;  %v6135_v19 = vadd.f32 %v6134_v59, %v5958_v1  ;;  %v7776_v39 = vpop.f32.mrf.mxu0  ;;  %v13374_v34 = vld [vmem:[#allocation118_spill] sm:$0xff] }
 0x635   :  { %v7826_v63 = vpop.f32.mrf.mxu1  ;;  %v5367_v27 = vadd.f32 %v11747_v58, %v11729_v42  ;;  %v5576_v24 = vadd.f32 %v11769_v45, %v5373_v16  ;;  %v5988_v30 = vadd.f32 %v7773_v49, %v5763_v47  ;;  %v5982_v58 = vadd.f32 %v5981_v11, %v5755_v31  ;;  %v13371_v49 = vld [vmem:[#allocation28_spill] sm:$0xff] }
 0x636   :  { %6272 = vst [vmem:[#allocation8 + $0x8] sm:$0xff] %v6256_v41  ;;  %v6255_v4 = vmax.f32 %v6239_v60, 0.0  ;;  %v6242_v28 = vadd.f32 %v11816_v20, %v6219_v38  ;;  %v6218_v10 = vmul.f32 %v6135_v19, %v13280_v56  ;;  %v6153_v33 = vadd.f32 %v7826_v63, %v5976_v37  ;;  %v5993_v43 = vpop.f32.mrf.mxu0  ;;  %v13377_v60 = vld [vmem:[#allocation185_spill] sm:$0xff]  ;;  %v13378_v38 = vld [vmem:[#allocation131_spill] sm:$0xff] }
 0x637   :  { %v6146_v8 = vpop.f32.mrf.mxu1  ;;  %v5385_v56 = vadd.f32 %v11751_v13, %v11733_v0  ;;  %v5569_v3 = vadd.f32 %v11771_v23, %v5367_v27  ;;  %v5779_v42 = vadd.f32 %v11783_v54, %v5576_v24  ;;  %v13370_v0 = vld [vmem:[#allocation30_spill] sm:$0xff]  ;;  %v5391_v19 = vadd.f32 %v13378_v38, %v13377_v60  ;;  %v13382_v27 = vld [vmem:[#allocation187_spill] sm:$0xff]  ;;  %v13383_v24 = vld [vmem:[#allocation141_spill] sm:$0xff] }
 0x638   :  { %6271 = vst [vmem:[#allocation8] sm:$0xff] %v6255_v4  ;;  %v6258_v36 = vmax.f32 %v6242_v28, 0.0  ;;  %v6241_v61 = vadd.f32 %v11816_v20, %v6218_v10  ;;  %v6221_v2 = vmul.f32 %v6153_v33, %v13275_v51  ;;  %v6147_v44 = vadd.f32 %v6146_v8, %v5970_v5  ;;  %v7779_v15 = vpop.f32.mrf.mxu0  ;;  %v13381_v10 = vld [vmem:[#allocation23_spill] sm:$0xff] }
 0x639   :  { %v7829_v45 = vpop.f32.mrf.mxu1  ;;  %v5379_v51 = vadd.f32 %v11755_v29, %v11737_v17  ;;  %v5590_v62 = vadd.f32 %v13369_v53, %v5385_v56  ;;  %v5771_v13 = vadd.f32 %v13370_v0, %v5569_v3  ;;  %v6000_v23 = vadd.f32 %v7776_v39, %v5779_v42  ;;  %v13375_v17 = vld [vmem:[#allocation128_spill] sm:$0xff]  ;;  %v13379_v39 = vld [vmem:[#allocation122_spill] sm:$0xff] }
 0x63a   :  { %6274 = vst [vmem:[#allocation8 + $0x18] sm:$0xff] %v6258_v36  ;;  %v6257_v52 = vmax.f32 %v6241_v61, 0.0  ;;  %v6244_v22 = vadd.f32 %v11816_v20, %v6221_v2  ;;  %v6220_v6 = vmul.f32 %v6147_v44, %v13276_v12  ;;  %v6165_v32 = vadd.f32 %v7829_v45, %v5988_v30  ;;  %v6005_v7 = vpop.f32.mrf.mxu0  ;;  %v13372_v12 = vld [vmem:[#allocation183_spill] sm:$0xff]  ;;  %v13384_v30 = vld [vmem:[#allocation129_spill] sm:$0xff]  ;;  %v13385_v36 = vld [vmem:[#allocation32_spill] sm:$0xff] }
 0x63b   :  { %v6158_v21 = vpop.f32.mrf.mxu1  ;;  %v5397_v1 = vadd.f32 %v13373_v48, %v13372_v12  ;;  %v5583_v18 = vadd.f32 %v13374_v34, %v5379_v51  ;;  %v5795_v29 = vadd.f32 %v13375_v17, %v5590_v62  ;;  %v5994_v35 = vadd.f32 %v5993_v43, %v5771_v13  ;;  %v13386_v3 = vld [vmem:[#allocation24_spill] sm:$0xff]  ;;  %v13390_v53 = vld [vmem:[#allocation154_spill] sm:$0xff] }
 0x63c   :  { %6273 = vst [vmem:[#allocation8 + $0x10] sm:$0xff] %v6257_v52  ;;  %v6260_v54 = vmax.f32 %v6244_v22, 0.0  ;;  %v6243_v55 = vadd.f32 %v11816_v20, %v6220_v6  ;;  %v6223_v57 = vmul.f32 %v6165_v32, %v13371_v49  ;;  %v6159_v25 = vadd.f32 %v6158_v21, %v5982_v58  ;;  %v7782_v50 = vpop.f32.mrf.mxu0  ;;  %v13387_v52 = vld [vmem:[#allocation188_spill] sm:$0xff]  ;;  %v13388_v22 = vld [vmem:[#allocation113_spill] sm:$0xff]  ;;  %v13389_v32 = vld [vmem:[#allocation127_spill] sm:$0xff] }
 0x63d   :  { %v7832_v11 = vpop.f32.mrf.mxu1  ;;  %v5604_v16 = vadd.f32 %v13379_v39, %v5397_v1  ;;  %v5787_v47 = vadd.f32 %v13380_v26, %v5583_v18  ;;  %v6012_v5 = vadd.f32 %v7779_v15, %v5795_v29  ;;  %v5409_v31 = vadd.f32 %v13383_v24, %v13382_v27  ;;  %v13391_v21 = vld [vmem:[#allocation20_spill] sm:$0xff]  ;;  %v13396_v26 = vld [vmem:[#allocation19_spill] sm:$0xff]  ;;  %v13398_v24 = vld [vmem:[#allocation18_spill] sm:$0xff] }
 0x63e   :  { %6276 = vst [vmem:[#allocation8 + $0x28] sm:$0xff] %v6260_v54  ;;  %v6259_v9 = vmax.f32 %v6243_v55, 0.0  ;;  %v6246_v40 = vadd.f32 %v11816_v20, %v6223_v57  ;;  %v6222_v37 = vmul.f32 %v6159_v25, %v13376_v46  ;;  %v6177_v59 = vadd.f32 %v7832_v11, %v6000_v23  ;;  %v6017_v41 = vpop.f32.mrf.mxu0  ;;  %v13392_v49 = vld [vmem:[#allocation140_spill] sm:$0xff] }
 0x63f   :  { %v6170_v63 = vpop.f32.mrf.mxu1  ;;  %v5597_v8 = vadd.f32 %v13384_v30, %v5391_v19  ;;  %v5811_v61 = vadd.f32 %v13385_v36, %v5604_v16  ;;  %v6006_v2 = vadd.f32 %v6005_v7, %v5787_v47  ;;  %v5403_v6 = vadd.f32 %v13388_v22, %v13387_v52  ;;  %v13393_v25 = vld [vmem:[#allocation60_spill] sm:$0xff] }
 0x640   :  { %6275 = vst [vmem:[#allocation8 + $0x20] sm:$0xff] %v6259_v9  ;;  %v6262_v4 = vmax.f32 %v6246_v40, 0.0  ;;  %v6245_v28 = vadd.f32 %v11816_v20, %v6222_v37  ;;  %v6225_v33 = vmul.f32 %v6177_v59, %v13381_v10  ;;  %v6171_v43 = vadd.f32 %v6170_v63, %v5994_v35  ;;  %v7785_v58 = vpop.f32.mrf.mxu0  ;;  %v13395_v59 = vld [vmem:[#allocation17_spill] sm:$0xff] }
 0x641   :  { %v7835_v44 = vpop.f32.mrf.mxu1  ;;  %v5618_v51 = vadd.f32 %v13389_v32, %v5409_v31  ;;  %v5803_v62 = vadd.f32 %v13390_v53, %v5597_v8  ;;  %v6024_v0 = vadd.f32 %v7782_v50, %v5811_v61  ;;  %v5611_v57 = vadd.f32 %v13392_v49, %v5403_v6  ;;  %v13394_v50 = vld [vmem:[#allocation21_spill] sm:$0xff] }
 0x642   :  { %6278 = vst [vmem:[#allocation8 + $0x38] sm:$0xff] %v6262_v4  ;;  %v6261_v56 = vmax.f32 %v6245_v28, 0.0  ;;  %v6248_v15 = vadd.f32 %v11816_v20, %v6225_v33  ;;  %v6224_v42 = vmul.f32 %v6171_v43, %v13386_v3  ;;  %v6189_v45 = vadd.f32 %v7835_v44, %v6012_v5  ;;  %v6029_v17 = vpop.f32.mrf.mxu0  ;;  %v13397_v28 = vld [vmem:[#allocation16_spill] sm:$0xff] }
 0x643   :  { %v6182_v13 = vpop.f32.mrf.mxu1  ;;  %v5827_v12 = vadd.f32 %v13393_v25, %v5618_v51  ;;  %v6018_v48 = vadd.f32 %v6017_v41, %v5803_v62  ;;  %v5819_v11 = vadd.f32 %v11805_v14, %v5611_v57 }
 0x644   :  { %6277 = vst [vmem:[#allocation8 + $0x30] sm:$0xff] %v6261_v56  ;;  %v6264_v7 = vmax.f32 %v6248_v15, 0.0  ;;  %v6247_v23 = vadd.f32 %v11816_v20, %v6224_v42  ;;  %v6227_v54 = vmul.f32 %v6189_v45, %v13391_v21  ;;  %v6183_v55 = vadd.f32 %v6182_v13, %v6006_v2 }
 0x645   :  { %v7838_v1 = vpop.f32.mrf.mxu1  ;;  %v6036_v9 = vadd.f32 %v7785_v58, %v5827_v12  ;;  %v6030_v38 = vadd.f32 %v6029_v17, %v5819_v11 }
 0x646   :  { %6280 = vst [vmem:[#allocation8 + $0x48] sm:$0xff] %v6264_v7  ;;  %v6263_v34 = vmax.f32 %v6247_v23, 0.0  ;;  %v6250_v18 = vadd.f32 %v11816_v20, %v6227_v54  ;;  %v6226_v29 = vmul.f32 %v6183_v55, %v13394_v50  ;;  %v6201_v35 = vadd.f32 %v7838_v1, %v6024_v0 }
 0x647   :  { %v6194_v40 = vpop.f32.mrf.mxu1 }
 0x648   :  { %6279 = vst [vmem:[#allocation8 + $0x40] sm:$0xff] %v6263_v34  ;;  %v6266_v46 = vmax.f32 %v6250_v18, 0.0  ;;  %v6249_v37 = vadd.f32 %v11816_v20, %v6226_v29  ;;  %v6229_v60 = vmul.f32 %v6201_v35, %v13395_v59  ;;  %v6195_v41 = vadd.f32 %v6194_v40, %v6018_v48 }
 0x649   :  { %v7841_v19 = vpop.f32.mrf.mxu1 }
 0x64a   :  { %6282 = vst [vmem:[#allocation8 + $0x58] sm:$0xff] %v6266_v46  ;;  %v6265_v39 = vmax.f32 %v6249_v37, 0.0  ;;  %v6252_v16 = vadd.f32 %v11816_v20, %v6229_v60  ;;  %v6228_v47 = vmul.f32 %v6195_v41, %v13396_v26  ;;  %v6213_v5 = vadd.f32 %v7841_v19, %v6036_v9 }
 0x64b   :  { %v6206_v63 = vpop.f32.mrf.mxu1 }
 0x64c   :  { %6281 = vst [vmem:[#allocation8 + $0x50] sm:$0xff] %v6265_v39  ;;  %v6268_v14 = vmax.f32 %v6252_v16, 0.0  ;;  %v6251_v4 = vadd.f32 %v11816_v20, %v6228_v47  ;;  %v6231_v10 = vmul.f32 %v6213_v5, %v13397_v28  ;;  %v6207_v33 = vadd.f32 %v6206_v63, %v6030_v38 }
 0x64e   :  { %6284 = vst [vmem:[#allocation8 + $0x68] sm:$0xff] %v6268_v14  ;;  %v6267_v43 = vmax.f32 %v6251_v4, 0.0  ;;  %v6254_v27 = vadd.f32 %v11816_v20, %v6231_v10  ;;  %v6230_v31 = vmul.f32 %v6207_v33, %v13398_v24 }
 0x650   :  { %6283 = vst [vmem:[#allocation8 + $0x60] sm:$0xff] %v6267_v43  ;;  %v6270_v30 = vmax.f32 %v6254_v27, 0.0  ;;  %v6253_v8 = vadd.f32 %v11816_v20, %v6230_v31 }
 0x652   :  { %6286 = vst [vmem:[#allocation8 + $0x78] sm:$0xff] %v6270_v30  ;;  %v6269_v36 = vmax.f32 %v6253_v8, 0.0 }
 0x654   :  { %6285 = vst [vmem:[#allocation8 + $0x70] sm:$0xff] %v6269_v36 }
 0x655   :  { %7925 = shalt.err (!%p7922_p5)
}
 0x656   :  { %6298 = dma.vmem_to_hbm [thread:$0]  %s6293_s10, 2048, %s11903_s7, [#allocation4], %s7944_s11, %s7944_s11, %s7945_s12  }
 0x657   :  { %7938 = dma.done.wait [#allocation4], 2048  }
 0x658   :  { %7939 = vsyncadd [#allocation4], 4294965248 }
 0x659   :  { %6302 = vsyncpa [#allocation3], 1 }
 0x65a   :  { %6303 = vsyncpa [#allocation6], 1 }
 0x65b   :  { %6304 = vsyncpa [#allocation4], 1 }

</bundles_post_ra>
